<compile_context>
chip_gen: v6e
topology: v6e:2x2x1
jax: 0.10.0
libtpu: 0.0.40
codegen_flags: <defaults>
</compile_context>

<pallas_src>
import functools
import math

import jax
import jax.numpy as jnp
import numpy as np
from jax.experimental import pallas as pl
from jax.experimental.pallas import tpu as pltpu


# ----------------------------------------------------------------------------
# in-kernel math helpers (fp32)
# ----------------------------------------------------------------------------
def _erf_approx(x):
    # Abramowitz & Stegun 7.1.26 rational approximation, |err| <= 1.5e-7.
    a1, a2, a3, a4, a5 = (0.254829592, -0.284496736, 1.421413741,
                          -1.453152027, 1.061405429)
    p = 0.3275911
    sgn = jnp.where(x >= 0.0, 1.0, -1.0)
    ax = jnp.abs(x)
    t = pl.reciprocal(1.0 + p * ax)            # exact reciprocal on the EUP
    poly = ((((a5 * t + a4) * t + a3) * t + a2) * t + a1) * t
    return sgn * (1.0 - poly * jnp.exp(-ax * ax))


def _gelu_exact(x):
    return x * 0.5 * (1.0 + _erf_approx(x * 0.7071067811865476))


def _ln_gelu(v, gamma, beta):
    # v: (T, F, C); LayerNorm over F (axis=1), affine params pre-broadcast (F, C).
    mean = jnp.mean(v, axis=1, keepdims=True)
    var = jnp.mean((v - mean) ** 2, axis=1, keepdims=True)
    vn = (v - mean) * jax.lax.rsqrt(var + 1e-5)
    return _gelu_exact(vn * gamma + beta)


# ----------------------------------------------------------------------------
# fused ResidualCNN kernel: one grid step = one batch image
# ----------------------------------------------------------------------------
def _residual_cnn_kernel(x_ref, g1_ref, be1_ref, w1_ref, bb1_ref,
                         g2_ref, be2_ref, w2_ref, bb2_ref,
                         out_ref, ypad_ref, *, kernel_size, pad):
    K = kernel_size
    _, T, F, C = x_ref.shape                       # per-image block (1, T, F, C)

    x = x_ref[0].astype(jnp.float32)               # (T, F, C)

    # Zero the padded scratch every step (border stays zero; interior is
    # overwritten below).  Unconditional so it is correct under megacore
    # "parallel" splitting of the batch axis.
    ypad_ref[...] = jnp.zeros_like(ypad_ref)

    def conv(w_ref, bias_ref):
        # sum over K*K shifted taps; each tap is a (T*F, C) @ (C, C) matmul.
        acc = jnp.zeros((T * F, C), jnp.float32)
        for kh in range(K):                        # shift along F
            for kw in range(K):                    # shift along T
                tap = ypad_ref[kw:kw + T, kh:kh + F, :]          # (T, F, C)
                acc = acc + jnp.dot(tap.reshape(T * F, C),
                                    w_ref[kh * K + kw],          # (Cin, Cout)
                                    preferred_element_type=jnp.float32)
        return acc + bias_ref[...]                                # (T*F, C)

    # ---- block 1: LayerNorm1 -> GELU -> dropout(id) -> conv1 ---------------
    y1 = _ln_gelu(x, g1_ref[...], be1_ref[...])
    ypad_ref[pad:pad + T, pad:pad + F, :] = y1
    h1 = conv(w1_ref, bb1_ref)                                    # (T*F, C)

    # ---- block 2: LayerNorm2 -> GELU -> dropout(id) -> conv2 ---------------
    y2 = _ln_gelu(h1.reshape(T, F, C), g2_ref[...], be2_ref[...])
    ypad_ref[pad:pad + T, pad:pad + F, :] = y2                    # border still 0
    h2 = conv(w2_ref, bb2_ref)                                    # (T*F, C)

    # ---- residual add -------------------------------------------------------
    out_ref[0] = (h2 + x.reshape(T * F, C)).astype(out_ref.dtype)


# ----------------------------------------------------------------------------
# parameter preparation (done ONCE, outside jit: no per-call weight transposes)
# ----------------------------------------------------------------------------
def prepare_params(params):
    c_out, c_in, K, _ = params["w1"].shape
    assert c_out == c_in, "residual connection requires in_channels == out_channels"
    C = c_out
    F = params["gamma1"].shape[0]

    def prep_w(w):   # (Cout, Cin, Kh, Kw) -> (K*K, Cin, Cout), flat = kh*K + kw
        return jnp.transpose(w, (2, 3, 1, 0)).reshape(K * K, C, C)

    def prep_affine(a):  # (F,) -> (F, C), pre-broadcast across channels
        return jnp.broadcast_to(a.astype(jnp.float32)[:, None], (F, C))

    return dict(
        g1=prep_affine(params["gamma1"]), be1=prep_affine(params["beta1"]),
        g2=prep_affine(params["gamma2"]), be2=prep_affine(params["beta2"]),
        w1=prep_w(params["w1"]), bb1=params["b1"].reshape(1, C).astype(jnp.float32),
        w2=prep_w(params["w2"]), bb2=params["b2"].reshape(1, C).astype(jnp.float32),
    )


# ----------------------------------------------------------------------------
# forward wrapper
# ----------------------------------------------------------------------------
@functools.partial(jax.jit, static_argnames=("kernel_size",))
def residual_cnn_forward(x, kparams, kernel_size):
    B, C, F, T = x.shape
    K = kernel_size
    pad = K // 2

    # NCHW (B, C, n_feats, time) -> per-image channels-last (B, T, F, C)
    xt = jnp.transpose(x, (0, 3, 2, 1))

    kern = functools.partial(_residual_cnn_kernel, kernel_size=K, pad=pad)
    const2 = lambda b: (0, 0)
    const3 = lambda b: (0, 0, 0)

    out2d = pl.pallas_call(
        kern,
        grid=(B,),
        in_specs=[
            pl.BlockSpec((1, T, F, C), lambda b: (b, 0, 0, 0)),   # x (image)
            pl.BlockSpec((F, C), const2),                         # gamma1
            pl.BlockSpec((F, C), const2),                         # beta1
            pl.BlockSpec((K * K, C, C), const3),                  # w1
            pl.BlockSpec((1, C), const2),                         # b1
            pl.BlockSpec((F, C), const2),                         # gamma2
            pl.BlockSpec((F, C), const2),                         # beta2
            pl.BlockSpec((K * K, C, C), const3),                  # w2
            pl.BlockSpec((1, C), const2),                         # b2
        ],
        out_specs=pl.BlockSpec((1, T * F, C), lambda b: (b, 0, 0)),
        out_shape=jax.ShapeDtypeStruct((B, T * F, C), x.dtype),
        scratch_shapes=[pltpu.VMEM((T + K - 1, F + K - 1, C), jnp.float32)],
        compiler_params=pltpu.CompilerParams(
            dimension_semantics=("parallel",),        # batch split across TCs
            vmem_limit_bytes=48 * 1024 * 1024),
    )(xt, kparams["g1"], kparams["be1"], kparams["w1"], kparams["bb1"],
      kparams["g2"], kparams["be2"], kparams["w2"], kparams["bb2"])

    out = out2d.reshape(B, T, F, C)
    return jnp.transpose(out, (0, 3, 2, 1))           # back to (B, C, n_feats, T)


# ----------------------------------------------------------------------------
# pure-JAX reference (for the correctness check)
# ----------------------------------------------------------------------------
def _ref_forward(x, params):
    def cnn_layer_norm(v, gamma, beta):
        vt = jnp.swapaxes(v, 2, 3)                    # (B, C, T, F)
        mean = jnp.mean(vt, axis=-1, keepdims=True)
        var = jnp.mean((vt - mean) ** 2, axis=-1, keepdims=True)
        vt = (vt - mean) * jax.lax.rsqrt(var + 1e-5) * gamma + beta
        return jnp.swapaxes(vt, 2, 3)

    K = params["w1"].shape[-1]
    pad = K // 2

    def conv(v, w, b):
        out = jax.lax.conv_general_dilated(
            v, w, window_strides=(1, 1), padding=[(pad, pad), (pad, pad)],
            dimension_numbers=("NCHW", "OIHW", "NCHW"),
            precision=jax.lax.Precision.HIGHEST)
        return out + b[None, :, None, None]

    residual = x
    h = cnn_layer_norm(x, params["gamma1"], params["beta1"])
    h = jax.nn.gelu(h, approximate=False)
    h = conv(h, params["w1"], params["b1"])
    h = cnn_layer_norm(h, params["gamma2"], params["beta2"])
    h = jax.nn.gelu(h, approximate=False)
    h = conv(h, params["w2"], params["b2"])
    return h + residual


# ----------------------------------------------------------------------------
if __name__ == "__main__":
    B, C, n_feats, T = 2, 4, 16, 16          # x: (batch, channels, n_feats, time)
    K = 3                                     # kernel=3, stride=1, padding=1
    key = jax.random.PRNGKey(0)
    (kx, kw1, kb1, kw2, kb2,
     kg1, kbe1, kg2, kbe2) = jax.random.split(key, 9)

    x = jax.random.normal(kx, (B, C, n_feats, T), jnp.float32)

    bound = 1.0 / math.sqrt(C * K * K)        # PyTorch Conv2d default init bound
    u = lambda k, shape: jax.random.uniform(k, shape, jnp.float32, -bound, bound)
    params = dict(
        w1=u(kw1, (C, C, K, K)), b1=u(kb1, (C,)),
        w2=u(kw2, (C, C, K, K)), b2=u(kb2, (C,)),
        # nn.LayerNorm initializes to ones/zeros; perturb so the test actually
        # exercises the affine path.
        gamma1=1.0 + 0.1 * jax.random.normal(kg1, (n_feats,), jnp.float32),
        beta1=0.1 * jax.random.normal(kbe1, (n_feats,), jnp.float32),
        gamma2=1.0 + 0.1 * jax.random.normal(kg2, (n_feats,), jnp.float32),
        beta2=0.1 * jax.random.normal(kbe2, (n_feats,), jnp.float32),
    )

    kparams = prepare_params(params)
    out = residual_cnn_forward(x, kparams, K)
    out = jax.block_until_ready(out)
    assert out.shape == (B, C, n_feats, T), out.shape

    ref = jax.block_until_ready(_ref_forward(x, params))
    np.testing.assert_allclose(np.asarray(out), np.asarray(ref),
                               rtol=1e-3, atol=1e-3)
    print("KERNEL_OK")
</pallas_src>

<mosaic_0001>
module attributes {stable_mosaic.version = 11 : i64} {
  func.func @_residual_cnn_kernel(%arg0: i32, %arg1: memref<1x16x16x4xf32, #tpu.memory_space<vmem>>, %arg2: memref<16x4xf32, #tpu.memory_space<vmem>>, %arg3: memref<16x4xf32, #tpu.memory_space<vmem>>, %arg4: memref<9x4x4xf32, #tpu.memory_space<vmem>>, %arg5: memref<1x4xf32, #tpu.memory_space<vmem>>, %arg6: memref<16x4xf32, #tpu.memory_space<vmem>>, %arg7: memref<16x4xf32, #tpu.memory_space<vmem>>, %arg8: memref<9x4x4xf32, #tpu.memory_space<vmem>>, %arg9: memref<1x4xf32, #tpu.memory_space<vmem>>, %arg10: memref<1x256x4xf32, #tpu.memory_space<vmem>>, %arg11: memref<18x18x4xf32, #tpu.memory_space<vmem>>) attributes {dimension_semantics = [#tpu.dimension_semantics<parallel>], iteration_bounds = array<i64: 2>, scalar_prefetch = 0 : i64, scratch_operands = 1 : i64, tpu.core_type = #tpu.core_type<tc>, window_params = [{transform_indices = @transform_0, window_bounds = array<i64: 1, 16, 16, 4>}, {pipeline_mode = #tpu.pipeline_mode<synchronous>, transform_indices = @transform_1, window_bounds = array<i64: 16, 4>}, {pipeline_mode = #tpu.pipeline_mode<synchronous>, transform_indices = @transform_2, window_bounds = array<i64: 16, 4>}, {pipeline_mode = #tpu.pipeline_mode<synchronous>, transform_indices = @transform_3, window_bounds = array<i64: 9, 4, 4>}, {pipeline_mode = #tpu.pipeline_mode<synchronous>, transform_indices = @transform_4, window_bounds = array<i64: 1, 4>}, {pipeline_mode = #tpu.pipeline_mode<synchronous>, transform_indices = @transform_5, window_bounds = array<i64: 16, 4>}, {pipeline_mode = #tpu.pipeline_mode<synchronous>, transform_indices = @transform_6, window_bounds = array<i64: 16, 4>}, {pipeline_mode = #tpu.pipeline_mode<synchronous>, transform_indices = @transform_7, window_bounds = array<i64: 9, 4, 4>}, {pipeline_mode = #tpu.pipeline_mode<synchronous>, transform_indices = @transform_8, window_bounds = array<i64: 1, 4>}, {transform_indices = @transform_9, window_bounds = array<i64: 1, 256, 4>}]} {
    %c0 = arith.constant 0 : index
    %c0_0 = arith.constant 0 : index
    %c0_1 = arith.constant 0 : index
    %c0_2 = arith.constant 0 : index
    %0 = vector.load %arg1[%c0, %c0_0, %c0_1, %c0_2] : memref<1x16x16x4xf32, #tpu.memory_space<vmem>>, vector<1x16x16x4xf32>
    %1 = vector.shape_cast %0 : vector<1x16x16x4xf32> to vector<16x16x4xf32>
    %cst = arith.constant 0.000000e+00 : f32
    %2 = vector.broadcast %cst : f32 to vector<18x18x4xf32>
    %c0_3 = arith.constant 0 : index
    %c0_4 = arith.constant 0 : index
    %c0_5 = arith.constant 0 : index
    %3 = vector.load %arg11[%c0_3, %c0_4, %c0_5] : memref<18x18x4xf32, #tpu.memory_space<vmem>>, vector<18x18x4xf32>
    tpu.vector_store %arg11[%c0_3, %c0_4, %c0_5], %2 {strides = array<i32>} : memref<18x18x4xf32, #tpu.memory_space<vmem>>, vector<18x18x4xf32>,
    %c0_6 = arith.constant 0 : index
    %c0_7 = arith.constant 0 : index
    %4 = vector.load %arg2[%c0_6, %c0_7] : memref<16x4xf32, #tpu.memory_space<vmem>>, vector<16x4xf32>
    %c0_8 = arith.constant 0 : index
    %c0_9 = arith.constant 0 : index
    %5 = vector.load %arg3[%c0_8, %c0_9] : memref<16x4xf32, #tpu.memory_space<vmem>>, vector<16x4xf32>
    %cst_10 = arith.constant dense<0.000000e+00> : vector<16x4xf32>
    %6 = vector.multi_reduction <add>, %1, %cst_10 [1] : vector<16x16x4xf32> to vector<16x4xf32>
    %7 = vector.shape_cast %6 : vector<16x4xf32> to vector<16x1x4xf32>
    %cst_11 = arith.constant 1.600000e+01 : f32
    %8 = vector.broadcast %cst_11 : f32 to vector<16x1x4xf32>
    %9 = arith.divf %7, %8 : vector<16x1x4xf32>
    %10 = vector.broadcast %9 : vector<16x1x4xf32> to vector<16x16x4xf32>
    %11 = arith.subf %1, %10 : vector<16x16x4xf32>
    %12 = arith.mulf %11, %11 : vector<16x16x4xf32>
    %cst_12 = arith.constant dense<0.000000e+00> : vector<16x4xf32>
    %13 = vector.multi_reduction <add>, %12, %cst_12 [1] : vector<16x16x4xf32> to vector<16x4xf32>
    %14 = vector.shape_cast %13 : vector<16x4xf32> to vector<16x1x4xf32>
    %cst_13 = arith.constant 1.600000e+01 : f32
    %15 = vector.broadcast %cst_13 : f32 to vector<16x1x4xf32>
    %16 = arith.divf %14, %15 : vector<16x1x4xf32>
    %17 = vector.broadcast %9 : vector<16x1x4xf32> to vector<16x16x4xf32>
    %18 = arith.subf %1, %17 : vector<16x16x4xf32>
    %cst_14 = arith.constant 9.99999974E-6 : f32
    %19 = vector.broadcast %cst_14 : f32 to vector<16x1x4xf32>
    %20 = arith.addf %16, %19 : vector<16x1x4xf32>
    %21 = math.rsqrt %20 : vector<16x1x4xf32>
    %22 = vector.broadcast %21 : vector<16x1x4xf32> to vector<16x16x4xf32>
    %23 = arith.mulf %18, %22 : vector<16x16x4xf32>
    %24 = vector.shape_cast %4 : vector<16x4xf32> to vector<1x16x4xf32>
    %25 = vector.broadcast %24 : vector<1x16x4xf32> to vector<16x16x4xf32>
    %26 = arith.mulf %23, %25 : vector<16x16x4xf32>
    %27 = vector.shape_cast %5 : vector<16x4xf32> to vector<1x16x4xf32>
    %28 = vector.broadcast %27 : vector<1x16x4xf32> to vector<16x16x4xf32>
    %29 = arith.addf %26, %28 : vector<16x16x4xf32>
    %cst_15 = arith.constant 5.000000e-01 : f32
    %30 = vector.broadcast %cst_15 : f32 to vector<16x16x4xf32>
    %31 = arith.mulf %29, %30 : vector<16x16x4xf32>
    %cst_16 = arith.constant 0.707106769 : f32
    %32 = vector.broadcast %cst_16 : f32 to vector<16x16x4xf32>
    %33 = arith.mulf %29, %32 : vector<16x16x4xf32>
    %cst_17 = arith.constant 0.000000e+00 : f32
    %34 = vector.broadcast %cst_17 : f32 to vector<16x16x4xf32>
    %35 = arith.cmpf oge, %33, %34 : vector<16x16x4xf32>
    %cst_18 = arith.constant 1.000000e+00 : f32
    %cst_19 = arith.constant -1.000000e+00 : f32
    %36 = vector.broadcast %cst_18 : f32 to vector<16x16x4xf32>
    %37 = vector.broadcast %cst_19 : f32 to vector<16x16x4xf32>
    %38 = arith.select %35, %36, %37 : vector<16x16x4xi1>, vector<16x16x4xf32>
    %39 = math.absf %33 : vector<16x16x4xf32>
    %cst_20 = arith.constant 0.327591091 : f32
    %40 = vector.broadcast %cst_20 : f32 to vector<16x16x4xf32>
    %41 = arith.mulf %40, %39 : vector<16x16x4xf32>
    %cst_21 = arith.constant 1.000000e+00 : f32
    %42 = vector.broadcast %cst_21 : f32 to vector<16x16x4xf32>
    %43 = arith.addf %42, %41 : vector<16x16x4xf32>
    %44 = tpu.reciprocal %43 : vector<16x16x4xf32> -> vector<16x16x4xf32>
    %cst_22 = arith.constant 1.06140542 : f32
    %45 = vector.broadcast %cst_22 : f32 to vector<16x16x4xf32>
    %46 = arith.mulf %45, %44 : vector<16x16x4xf32>
    %cst_23 = arith.constant -1.45315206 : f32
    %47 = vector.broadcast %cst_23 : f32 to vector<16x16x4xf32>
    %48 = arith.addf %46, %47 : vector<16x16x4xf32>
    %49 = arith.mulf %48, %44 : vector<16x16x4xf32>
    %cst_24 = arith.constant 1.42141378 : f32
    %50 = vector.broadcast %cst_24 : f32 to vector<16x16x4xf32>
    %51 = arith.addf %49, %50 : vector<16x16x4xf32>
    %52 = arith.mulf %51, %44 : vector<16x16x4xf32>
    %cst_25 = arith.constant -0.284496725 : f32
    %53 = vector.broadcast %cst_25 : f32 to vector<16x16x4xf32>
    %54 = arith.addf %52, %53 : vector<16x16x4xf32>
    %55 = arith.mulf %54, %44 : vector<16x16x4xf32>
    %cst_26 = arith.constant 0.254829586 : f32
    %56 = vector.broadcast %cst_26 : f32 to vector<16x16x4xf32>
    %57 = arith.addf %55, %56 : vector<16x16x4xf32>
    %58 = arith.mulf %57, %44 : vector<16x16x4xf32>
    %cst_27 = arith.constant 0.000000e+00 : f32
    %59 = vector.broadcast %cst_27 : f32 to vector<16x16x4xf32>
    %60 = arith.subf %59, %39 : vector<16x16x4xf32>
    %61 = arith.mulf %60, %39 : vector<16x16x4xf32>
    %62 = math.exp %61 : vector<16x16x4xf32>
    %63 = arith.mulf %58, %62 : vector<16x16x4xf32>
    %cst_28 = arith.constant 1.000000e+00 : f32
    %64 = vector.broadcast %cst_28 : f32 to vector<16x16x4xf32>
    %65 = arith.subf %64, %63 : vector<16x16x4xf32>
    %66 = arith.mulf %38, %65 : vector<16x16x4xf32>
    %cst_29 = arith.constant 1.000000e+00 : f32
    %67 = vector.broadcast %cst_29 : f32 to vector<16x16x4xf32>
    %68 = arith.addf %67, %66 : vector<16x16x4xf32>
    %69 = arith.mulf %31, %68 : vector<16x16x4xf32>
    %c1 = arith.constant 1 : index
    %c1_30 = arith.constant 1 : index
    %c0_31 = arith.constant 0 : index
    %70 = vector.load %arg11[%c1, %c1_30, %c0_31] : memref<18x18x4xf32, #tpu.memory_space<vmem>>, vector<16x16x4xf32>
    tpu.vector_store %arg11[%c1, %c1_30, %c0_31], %69 {strides = array<i32>} : memref<18x18x4xf32, #tpu.memory_space<vmem>>, vector<16x16x4xf32>,
    %cst_32 = arith.constant 0.000000e+00 : f32
    %71 = vector.broadcast %cst_32 : f32 to vector<256x4xf32>
    %c0_33 = arith.constant 0 : index
    %c0_34 = arith.constant 0 : index
    %c0_35 = arith.constant 0 : index
    %72 = vector.load %arg11[%c0_33, %c0_34, %c0_35] : memref<18x18x4xf32, #tpu.memory_space<vmem>>, vector<16x16x4xf32>
    %73 = vector.shape_cast %72 : vector<16x16x4xf32> to vector<256x4xf32>
    %c0_36 = arith.constant 0 : index
    %c0_37 = arith.constant 0 : index
    %c0_38 = arith.constant 0 : index
    %74 = vector.load %arg4[%c0_36, %c0_37, %c0_38] : memref<9x4x4xf32, #tpu.memory_space<vmem>>, vector<1x4x4xf32>
    %75 = vector.shape_cast %74 : vector<1x4x4xf32> to vector<4x4xf32>
    %cst_39 = arith.constant dense<0.000000e+00> : vector<256x4xf32>
    %76 = tpu.matmul %73, %75, %cst_39 {dimension_numbers = #tpu.dot_dimension_numbers<[1], [0], [0], [1], [0, 0, 1, 1], [], []>} : vector<256x4xf32>, vector<4x4xf32>, vector<256x4xf32> -> vector<256x4xf32>
    %77 = arith.addf %71, %76 : vector<256x4xf32>
    %c1_40 = arith.constant 1 : index
    %c0_41 = arith.constant 0 : index
    %c0_42 = arith.constant 0 : index
    %78 = vector.load %arg11[%c1_40, %c0_41, %c0_42] : memref<18x18x4xf32, #tpu.memory_space<vmem>>, vector<16x16x4xf32>
    %79 = vector.shape_cast %78 : vector<16x16x4xf32> to vector<256x4xf32>
    %c1_43 = arith.constant 1 : index
    %c0_44 = arith.constant 0 : index
    %c0_45 = arith.constant 0 : index
    %80 = vector.load %arg4[%c1_43, %c0_44, %c0_45] : memref<9x4x4xf32, #tpu.memory_space<vmem>>, vector<1x4x4xf32>
    %81 = vector.shape_cast %80 : vector<1x4x4xf32> to vector<4x4xf32>
    %cst_46 = arith.constant dense<0.000000e+00> : vector<256x4xf32>
    %82 = tpu.matmul %79, %81, %cst_46 {dimension_numbers = #tpu.dot_dimension_numbers<[1], [0], [0], [1], [0, 0, 1, 1], [], []>} : vector<256x4xf32>, vector<4x4xf32>, vector<256x4xf32> -> vector<256x4xf32>
    %83 = arith.addf %77, %82 : vector<256x4xf32>
    %c2 = arith.constant 2 : index
    %c0_47 = arith.constant 0 : index
    %c0_48 = arith.constant 0 : index
    %84 = vector.load %arg11[%c2, %c0_47, %c0_48] : memref<18x18x4xf32, #tpu.memory_space<vmem>>, vector<16x16x4xf32>
    %85 = vector.shape_cast %84 : vector<16x16x4xf32> to vector<256x4xf32>
    %c2_49 = arith.constant 2 : index
    %c0_50 = arith.constant 0 : index
    %c0_51 = arith.constant 0 : index
    %86 = vector.load %arg4[%c2_49, %c0_50, %c0_51] : memref<9x4x4xf32, #tpu.memory_space<vmem>>, vector<1x4x4xf32>
    %87 = vector.shape_cast %86 : vector<1x4x4xf32> to vector<4x4xf32>
    %cst_52 = arith.constant dense<0.000000e+00> : vector<256x4xf32>
    %88 = tpu.matmul %85, %87, %cst_52 {dimension_numbers = #tpu.dot_dimension_numbers<[1], [0], [0], [1], [0, 0, 1, 1], [], []>} : vector<256x4xf32>, vector<4x4xf32>, vector<256x4xf32> -> vector<256x4xf32>
    %89 = arith.addf %83, %88 : vector<256x4xf32>
    %c0_53 = arith.constant 0 : index
    %c1_54 = arith.constant 1 : index
    %c0_55 = arith.constant 0 : index
    %90 = vector.load %arg11[%c0_53, %c1_54, %c0_55] : memref<18x18x4xf32, #tpu.memory_space<vmem>>, vector<16x16x4xf32>
    %91 = vector.shape_cast %90 : vector<16x16x4xf32> to vector<256x4xf32>
    %c3 = arith.constant 3 : index
    %c0_56 = arith.constant 0 : index
    %c0_57 = arith.constant 0 : index
    %92 = vector.load %arg4[%c3, %c0_56, %c0_57] : memref<9x4x4xf32, #tpu.memory_space<vmem>>, vector<1x4x4xf32>
    %93 = vector.shape_cast %92 : vector<1x4x4xf32> to vector<4x4xf32>
    %cst_58 = arith.constant dense<0.000000e+00> : vector<256x4xf32>
    %94 = tpu.matmul %91, %93, %cst_58 {dimension_numbers = #tpu.dot_dimension_numbers<[1], [0], [0], [1], [0, 0, 1, 1], [], []>} : vector<256x4xf32>, vector<4x4xf32>, vector<256x4xf32> -> vector<256x4xf32>
    %95 = arith.addf %89, %94 : vector<256x4xf32>
    %c1_59 = arith.constant 1 : index
    %c1_60 = arith.constant 1 : index
    %c0_61 = arith.constant 0 : index
    %96 = vector.load %arg11[%c1_59, %c1_60, %c0_61] : memref<18x18x4xf32, #tpu.memory_space<vmem>>, vector<16x16x4xf32>
    %97 = vector.shape_cast %96 : vector<16x16x4xf32> to vector<256x4xf32>
    %c4 = arith.constant 4 : index
    %c0_62 = arith.constant 0 : index
    %c0_63 = arith.constant 0 : index
    %98 = vector.load %arg4[%c4, %c0_62, %c0_63] : memref<9x4x4xf32, #tpu.memory_space<vmem>>, vector<1x4x4xf32>
    %99 = vector.shape_cast %98 : vector<1x4x4xf32> to vector<4x4xf32>
    %cst_64 = arith.constant dense<0.000000e+00> : vector<256x4xf32>
    %100 = tpu.matmul %97, %99, %cst_64 {dimension_numbers = #tpu.dot_dimension_numbers<[1], [0], [0], [1], [0, 0, 1, 1], [], []>} : vector<256x4xf32>, vector<4x4xf32>, vector<256x4xf32> -> vector<256x4xf32>
    %101 = arith.addf %95, %100 : vector<256x4xf32>
    %c2_65 = arith.constant 2 : index
    %c1_66 = arith.constant 1 : index
    %c0_67 = arith.constant 0 : index
    %102 = vector.load %arg11[%c2_65, %c1_66, %c0_67] : memref<18x18x4xf32, #tpu.memory_space<vmem>>, vector<16x16x4xf32>
    %103 = vector.shape_cast %102 : vector<16x16x4xf32> to vector<256x4xf32>
    %c5 = arith.constant 5 : index
    %c0_68 = arith.constant 0 : index
    %c0_69 = arith.constant 0 : index
    %104 = vector.load %arg4[%c5, %c0_68, %c0_69] : memref<9x4x4xf32, #tpu.memory_space<vmem>>, vector<1x4x4xf32>
    %105 = vector.shape_cast %104 : vector<1x4x4xf32> to vector<4x4xf32>
    %cst_70 = arith.constant dense<0.000000e+00> : vector<256x4xf32>
    %106 = tpu.matmul %103, %105, %cst_70 {dimension_numbers = #tpu.dot_dimension_numbers<[1], [0], [0], [1], [0, 0, 1, 1], [], []>} : vector<256x4xf32>, vector<4x4xf32>, vector<256x4xf32> -> vector<256x4xf32>
    %107 = arith.addf %101, %106 : vector<256x4xf32>
    %c0_71 = arith.constant 0 : index
    %c2_72 = arith.constant 2 : index
    %c0_73 = arith.constant 0 : index
    %108 = vector.load %arg11[%c0_71, %c2_72, %c0_73] : memref<18x18x4xf32, #tpu.memory_space<vmem>>, vector<16x16x4xf32>
    %109 = vector.shape_cast %108 : vector<16x16x4xf32> to vector<256x4xf32>
    %c6 = arith.constant 6 : index
    %c0_74 = arith.constant 0 : index
    %c0_75 = arith.constant 0 : index
    %110 = vector.load %arg4[%c6, %c0_74, %c0_75] : memref<9x4x4xf32, #tpu.memory_space<vmem>>, vector<1x4x4xf32>
    %111 = vector.shape_cast %110 : vector<1x4x4xf32> to vector<4x4xf32>
    %cst_76 = arith.constant dense<0.000000e+00> : vector<256x4xf32>
    %112 = tpu.matmul %109, %111, %cst_76 {dimension_numbers = #tpu.dot_dimension_numbers<[1], [0], [0], [1], [0, 0, 1, 1], [], []>} : vector<256x4xf32>, vector<4x4xf32>, vector<256x4xf32> -> vector<256x4xf32>
    %113 = arith.addf %107, %112 : vector<256x4xf32>
    %c1_77 = arith.constant 1 : index
    %c2_78 = arith.constant 2 : index
    %c0_79 = arith.constant 0 : index
    %114 = vector.load %arg11[%c1_77, %c2_78, %c0_79] : memref<18x18x4xf32, #tpu.memory_space<vmem>>, vector<16x16x4xf32>
    %115 = vector.shape_cast %114 : vector<16x16x4xf32> to vector<256x4xf32>
    %c7 = arith.constant 7 : index
    %c0_80 = arith.constant 0 : index
    %c0_81 = arith.constant 0 : index
    %116 = vector.load %arg4[%c7, %c0_80, %c0_81] : memref<9x4x4xf32, #tpu.memory_space<vmem>>, vector<1x4x4xf32>
    %117 = vector.shape_cast %116 : vector<1x4x4xf32> to vector<4x4xf32>
    %cst_82 = arith.constant dense<0.000000e+00> : vector<256x4xf32>
    %118 = tpu.matmul %115, %117, %cst_82 {dimension_numbers = #tpu.dot_dimension_numbers<[1], [0], [0], [1], [0, 0, 1, 1], [], []>} : vector<256x4xf32>, vector<4x4xf32>, vector<256x4xf32> -> vector<256x4xf32>
    %119 = arith.addf %113, %118 : vector<256x4xf32>
    %c2_83 = arith.constant 2 : index
    %c2_84 = arith.constant 2 : index
    %c0_85 = arith.constant 0 : index
    %120 = vector.load %arg11[%c2_83, %c2_84, %c0_85] : memref<18x18x4xf32, #tpu.memory_space<vmem>>, vector<16x16x4xf32>
    %121 = vector.shape_cast %120 : vector<16x16x4xf32> to vector<256x4xf32>
    %c8 = arith.constant 8 : index
    %c0_86 = arith.constant 0 : index
    %c0_87 = arith.constant 0 : index
    %122 = vector.load %arg4[%c8, %c0_86, %c0_87] : memref<9x4x4xf32, #tpu.memory_space<vmem>>, vector<1x4x4xf32>
    %123 = vector.shape_cast %122 : vector<1x4x4xf32> to vector<4x4xf32>
    %cst_88 = arith.constant dense<0.000000e+00> : vector<256x4xf32>
    %124 = tpu.matmul %121, %123, %cst_88 {dimension_numbers = #tpu.dot_dimension_numbers<[1], [0], [0], [1], [0, 0, 1, 1], [], []>} : vector<256x4xf32>, vector<4x4xf32>, vector<256x4xf32> -> vector<256x4xf32>
    %125 = arith.addf %119, %124 : vector<256x4xf32>
    %c0_89 = arith.constant 0 : index
    %c0_90 = arith.constant 0 : index
    %126 = vector.load %arg5[%c0_89, %c0_90] : memref<1x4xf32, #tpu.memory_space<vmem>>, vector<1x4xf32>
    %127 = vector.broadcast %126 : vector<1x4xf32> to vector<256x4xf32>
    %128 = arith.addf %125, %127 : vector<256x4xf32>
    %129 = vector.shape_cast %128 : vector<256x4xf32> to vector<16x16x4xf32>
    %c0_91 = arith.constant 0 : index
    %c0_92 = arith.constant 0 : index
    %130 = vector.load %arg6[%c0_91, %c0_92] : memref<16x4xf32, #tpu.memory_space<vmem>>, vector<16x4xf32>
    %c0_93 = arith.constant 0 : index
    %c0_94 = arith.constant 0 : index
    %131 = vector.load %arg7[%c0_93, %c0_94] : memref<16x4xf32, #tpu.memory_space<vmem>>, vector<16x4xf32>
    %cst_95 = arith.constant dense<0.000000e+00> : vector<16x4xf32>
    %132 = vector.multi_reduction <add>, %129, %cst_95 [1] : vector<16x16x4xf32> to vector<16x4xf32>
    %133 = vector.shape_cast %132 : vector<16x4xf32> to vector<16x1x4xf32>
    %cst_96 = arith.constant 1.600000e+01 : f32
    %134 = vector.broadcast %cst_96 : f32 to vector<16x1x4xf32>
    %135 = arith.divf %133, %134 : vector<16x1x4xf32>
    %136 = vector.broadcast %135 : vector<16x1x4xf32> to vector<16x16x4xf32>
    %137 = arith.subf %129, %136 : vector<16x16x4xf32>
    %138 = arith.mulf %137, %137 : vector<16x16x4xf32>
    %cst_97 = arith.constant dense<0.000000e+00> : vector<16x4xf32>
    %139 = vector.multi_reduction <add>, %138, %cst_97 [1] : vector<16x16x4xf32> to vector<16x4xf32>
    %140 = vector.shape_cast %139 : vector<16x4xf32> to vector<16x1x4xf32>
    %cst_98 = arith.constant 1.600000e+01 : f32
    %141 = vector.broadcast %cst_98 : f32 to vector<16x1x4xf32>
    %142 = arith.divf %140, %141 : vector<16x1x4xf32>
    %143 = vector.broadcast %135 : vector<16x1x4xf32> to vector<16x16x4xf32>
    %144 = arith.subf %129, %143 : vector<16x16x4xf32>
    %cst_99 = arith.constant 9.99999974E-6 : f32
    %145 = vector.broadcast %cst_99 : f32 to vector<16x1x4xf32>
    %146 = arith.addf %142, %145 : vector<16x1x4xf32>
    %147 = math.rsqrt %146 : vector<16x1x4xf32>
    %148 = vector.broadcast %147 : vector<16x1x4xf32> to vector<16x16x4xf32>
    %149 = arith.mulf %144, %148 : vector<16x16x4xf32>
    %150 = vector.shape_cast %130 : vector<16x4xf32> to vector<1x16x4xf32>
    %151 = vector.broadcast %150 : vector<1x16x4xf32> to vector<16x16x4xf32>
    %152 = arith.mulf %149, %151 : vector<16x16x4xf32>
    %153 = vector.shape_cast %131 : vector<16x4xf32> to vector<1x16x4xf32>
    %154 = vector.broadcast %153 : vector<1x16x4xf32> to vector<16x16x4xf32>
    %155 = arith.addf %152, %154 : vector<16x16x4xf32>
    %cst_100 = arith.constant 5.000000e-01 : f32
    %156 = vector.broadcast %cst_100 : f32 to vector<16x16x4xf32>
    %157 = arith.mulf %155, %156 : vector<16x16x4xf32>
    %cst_101 = arith.constant 0.707106769 : f32
    %158 = vector.broadcast %cst_101 : f32 to vector<16x16x4xf32>
    %159 = arith.mulf %155, %158 : vector<16x16x4xf32>
    %cst_102 = arith.constant 0.000000e+00 : f32
    %160 = vector.broadcast %cst_102 : f32 to vector<16x16x4xf32>
    %161 = arith.cmpf oge, %159, %160 : vector<16x16x4xf32>
    %cst_103 = arith.constant 1.000000e+00 : f32
    %cst_104 = arith.constant -1.000000e+00 : f32
    %162 = vector.broadcast %cst_103 : f32 to vector<16x16x4xf32>
    %163 = vector.broadcast %cst_104 : f32 to vector<16x16x4xf32>
    %164 = arith.select %161, %162, %163 : vector<16x16x4xi1>, vector<16x16x4xf32>
    %165 = math.absf %159 : vector<16x16x4xf32>
    %cst_105 = arith.constant 0.327591091 : f32
    %166 = vector.broadcast %cst_105 : f32 to vector<16x16x4xf32>
    %167 = arith.mulf %166, %165 : vector<16x16x4xf32>
    %cst_106 = arith.constant 1.000000e+00 : f32
    %168 = vector.broadcast %cst_106 : f32 to vector<16x16x4xf32>
    %169 = arith.addf %168, %167 : vector<16x16x4xf32>
    %170 = tpu.reciprocal %169 : vector<16x16x4xf32> -> vector<16x16x4xf32>
    %cst_107 = arith.constant 1.06140542 : f32
    %171 = vector.broadcast %cst_107 : f32 to vector<16x16x4xf32>
    %172 = arith.mulf %171, %170 : vector<16x16x4xf32>
    %cst_108 = arith.constant -1.45315206 : f32
    %173 = vector.broadcast %cst_108 : f32 to vector<16x16x4xf32>
    %174 = arith.addf %172, %173 : vector<16x16x4xf32>
    %175 = arith.mulf %174, %170 : vector<16x16x4xf32>
    %cst_109 = arith.constant 1.42141378 : f32
    %176 = vector.broadcast %cst_109 : f32 to vector<16x16x4xf32>
    %177 = arith.addf %175, %176 : vector<16x16x4xf32>
    %178 = arith.mulf %177, %170 : vector<16x16x4xf32>
    %cst_110 = arith.constant -0.284496725 : f32
    %179 = vector.broadcast %cst_110 : f32 to vector<16x16x4xf32>
    %180 = arith.addf %178, %179 : vector<16x16x4xf32>
    %181 = arith.mulf %180, %170 : vector<16x16x4xf32>
    %cst_111 = arith.constant 0.254829586 : f32
    %182 = vector.broadcast %cst_111 : f32 to vector<16x16x4xf32>
    %183 = arith.addf %181, %182 : vector<16x16x4xf32>
    %184 = arith.mulf %183, %170 : vector<16x16x4xf32>
    %cst_112 = arith.constant 0.000000e+00 : f32
    %185 = vector.broadcast %cst_112 : f32 to vector<16x16x4xf32>
    %186 = arith.subf %185, %165 : vector<16x16x4xf32>
    %187 = arith.mulf %186, %165 : vector<16x16x4xf32>
    %188 = math.exp %187 : vector<16x16x4xf32>
    %189 = arith.mulf %184, %188 : vector<16x16x4xf32>
    %cst_113 = arith.constant 1.000000e+00 : f32
    %190 = vector.broadcast %cst_113 : f32 to vector<16x16x4xf32>
    %191 = arith.subf %190, %189 : vector<16x16x4xf32>
    %192 = arith.mulf %164, %191 : vector<16x16x4xf32>
    %cst_114 = arith.constant 1.000000e+00 : f32
    %193 = vector.broadcast %cst_114 : f32 to vector<16x16x4xf32>
    %194 = arith.addf %193, %192 : vector<16x16x4xf32>
    %195 = arith.mulf %157, %194 : vector<16x16x4xf32>
    %c1_115 = arith.constant 1 : index
    %c1_116 = arith.constant 1 : index
    %c0_117 = arith.constant 0 : index
    %196 = vector.load %arg11[%c1_115, %c1_116, %c0_117] : memref<18x18x4xf32, #tpu.memory_space<vmem>>, vector<16x16x4xf32>
    tpu.vector_store %arg11[%c1_115, %c1_116, %c0_117], %195 {strides = array<i32>} : memref<18x18x4xf32, #tpu.memory_space<vmem>>, vector<16x16x4xf32>,
    %cst_118 = arith.constant 0.000000e+00 : f32
    %197 = vector.broadcast %cst_118 : f32 to vector<256x4xf32>
    %c0_119 = arith.constant 0 : index
    %c0_120 = arith.constant 0 : index
    %c0_121 = arith.constant 0 : index
    %198 = vector.load %arg11[%c0_119, %c0_120, %c0_121] : memref<18x18x4xf32, #tpu.memory_space<vmem>>, vector<16x16x4xf32>
    %199 = vector.shape_cast %198 : vector<16x16x4xf32> to vector<256x4xf32>
    %c0_122 = arith.constant 0 : index
    %c0_123 = arith.constant 0 : index
    %c0_124 = arith.constant 0 : index
    %200 = vector.load %arg8[%c0_122, %c0_123, %c0_124] : memref<9x4x4xf32, #tpu.memory_space<vmem>>, vector<1x4x4xf32>
    %201 = vector.shape_cast %200 : vector<1x4x4xf32> to vector<4x4xf32>
    %cst_125 = arith.constant dense<0.000000e+00> : vector<256x4xf32>
    %202 = tpu.matmul %199, %201, %cst_125 {dimension_numbers = #tpu.dot_dimension_numbers<[1], [0], [0], [1], [0, 0, 1, 1], [], []>} : vector<256x4xf32>, vector<4x4xf32>, vector<256x4xf32> -> vector<256x4xf32>
    %203 = arith.addf %197, %202 : vector<256x4xf32>
    %c1_126 = arith.constant 1 : index
    %c0_127 = arith.constant 0 : index
    %c0_128 = arith.constant 0 : index
    %204 = vector.load %arg11[%c1_126, %c0_127, %c0_128] : memref<18x18x4xf32, #tpu.memory_space<vmem>>, vector<16x16x4xf32>
    %205 = vector.shape_cast %204 : vector<16x16x4xf32> to vector<256x4xf32>
    %c1_129 = arith.constant 1 : index
    %c0_130 = arith.constant 0 : index
    %c0_131 = arith.constant 0 : index
    %206 = vector.load %arg8[%c1_129, %c0_130, %c0_131] : memref<9x4x4xf32, #tpu.memory_space<vmem>>, vector<1x4x4xf32>
    %207 = vector.shape_cast %206 : vector<1x4x4xf32> to vector<4x4xf32>
    %cst_132 = arith.constant dense<0.000000e+00> : vector<256x4xf32>
    %208 = tpu.matmul %205, %207, %cst_132 {dimension_numbers = #tpu.dot_dimension_numbers<[1], [0], [0], [1], [0, 0, 1, 1], [], []>} : vector<256x4xf32>, vector<4x4xf32>, vector<256x4xf32> -> vector<256x4xf32>
    %209 = arith.addf %203, %208 : vector<256x4xf32>
    %c2_133 = arith.constant 2 : index
    %c0_134 = arith.constant 0 : index
    %c0_135 = arith.constant 0 : index
    %210 = vector.load %arg11[%c2_133, %c0_134, %c0_135] : memref<18x18x4xf32, #tpu.memory_space<vmem>>, vector<16x16x4xf32>
    %211 = vector.shape_cast %210 : vector<16x16x4xf32> to vector<256x4xf32>
    %c2_136 = arith.constant 2 : index
    %c0_137 = arith.constant 0 : index
    %c0_138 = arith.constant 0 : index
    %212 = vector.load %arg8[%c2_136, %c0_137, %c0_138] : memref<9x4x4xf32, #tpu.memory_space<vmem>>, vector<1x4x4xf32>
    %213 = vector.shape_cast %212 : vector<1x4x4xf32> to vector<4x4xf32>
    %cst_139 = arith.constant dense<0.000000e+00> : vector<256x4xf32>
    %214 = tpu.matmul %211, %213, %cst_139 {dimension_numbers = #tpu.dot_dimension_numbers<[1], [0], [0], [1], [0, 0, 1, 1], [], []>} : vector<256x4xf32>, vector<4x4xf32>, vector<256x4xf32> -> vector<256x4xf32>
    %215 = arith.addf %209, %214 : vector<256x4xf32>
    %c0_140 = arith.constant 0 : index
    %c1_141 = arith.constant 1 : index
    %c0_142 = arith.constant 0 : index
    %216 = vector.load %arg11[%c0_140, %c1_141, %c0_142] : memref<18x18x4xf32, #tpu.memory_space<vmem>>, vector<16x16x4xf32>
    %217 = vector.shape_cast %216 : vector<16x16x4xf32> to vector<256x4xf32>
    %c3_143 = arith.constant 3 : index
    %c0_144 = arith.constant 0 : index
    %c0_145 = arith.constant 0 : index
    %218 = vector.load %arg8[%c3_143, %c0_144, %c0_145] : memref<9x4x4xf32, #tpu.memory_space<vmem>>, vector<1x4x4xf32>
    %219 = vector.shape_cast %218 : vector<1x4x4xf32> to vector<4x4xf32>
    %cst_146 = arith.constant dense<0.000000e+00> : vector<256x4xf32>
    %220 = tpu.matmul %217, %219, %cst_146 {dimension_numbers = #tpu.dot_dimension_numbers<[1], [0], [0], [1], [0, 0, 1, 1], [], []>} : vector<256x4xf32>, vector<4x4xf32>, vector<256x4xf32> -> vector<256x4xf32>
    %221 = arith.addf %215, %220 : vector<256x4xf32>
    %c1_147 = arith.constant 1 : index
    %c1_148 = arith.constant 1 : index
    %c0_149 = arith.constant 0 : index
    %222 = vector.load %arg11[%c1_147, %c1_148, %c0_149] : memref<18x18x4xf32, #tpu.memory_space<vmem>>, vector<16x16x4xf32>
    %223 = vector.shape_cast %222 : vector<16x16x4xf32> to vector<256x4xf32>
    %c4_150 = arith.constant 4 : index
    %c0_151 = arith.constant 0 : index
    %c0_152 = arith.constant 0 : index
    %224 = vector.load %arg8[%c4_150, %c0_151, %c0_152] : memref<9x4x4xf32, #tpu.memory_space<vmem>>, vector<1x4x4xf32>
    %225 = vector.shape_cast %224 : vector<1x4x4xf32> to vector<4x4xf32>
    %cst_153 = arith.constant dense<0.000000e+00> : vector<256x4xf32>
    %226 = tpu.matmul %223, %225, %cst_153 {dimension_numbers = #tpu.dot_dimension_numbers<[1], [0], [0], [1], [0, 0, 1, 1], [], []>} : vector<256x4xf32>, vector<4x4xf32>, vector<256x4xf32> -> vector<256x4xf32>
    %227 = arith.addf %221, %226 : vector<256x4xf32>
    %c2_154 = arith.constant 2 : index
    %c1_155 = arith.constant 1 : index
    %c0_156 = arith.constant 0 : index
    %228 = vector.load %arg11[%c2_154, %c1_155, %c0_156] : memref<18x18x4xf32, #tpu.memory_space<vmem>>, vector<16x16x4xf32>
    %229 = vector.shape_cast %228 : vector<16x16x4xf32> to vector<256x4xf32>
    %c5_157 = arith.constant 5 : index
    %c0_158 = arith.constant 0 : index
    %c0_159 = arith.constant 0 : index
    %230 = vector.load %arg8[%c5_157, %c0_158, %c0_159] : memref<9x4x4xf32, #tpu.memory_space<vmem>>, vector<1x4x4xf32>
    %231 = vector.shape_cast %230 : vector<1x4x4xf32> to vector<4x4xf32>
    %cst_160 = arith.constant dense<0.000000e+00> : vector<256x4xf32>
    %232 = tpu.matmul %229, %231, %cst_160 {dimension_numbers = #tpu.dot_dimension_numbers<[1], [0], [0], [1], [0, 0, 1, 1], [], []>} : vector<256x4xf32>, vector<4x4xf32>, vector<256x4xf32> -> vector<256x4xf32>
    %233 = arith.addf %227, %232 : vector<256x4xf32>
    %c0_161 = arith.constant 0 : index
    %c2_162 = arith.constant 2 : index
    %c0_163 = arith.constant 0 : index
    %234 = vector.load %arg11[%c0_161, %c2_162, %c0_163] : memref<18x18x4xf32, #tpu.memory_space<vmem>>, vector<16x16x4xf32>
    %235 = vector.shape_cast %234 : vector<16x16x4xf32> to vector<256x4xf32>
    %c6_164 = arith.constant 6 : index
    %c0_165 = arith.constant 0 : index
    %c0_166 = arith.constant 0 : index
    %236 = vector.load %arg8[%c6_164, %c0_165, %c0_166] : memref<9x4x4xf32, #tpu.memory_space<vmem>>, vector<1x4x4xf32>
    %237 = vector.shape_cast %236 : vector<1x4x4xf32> to vector<4x4xf32>
    %cst_167 = arith.constant dense<0.000000e+00> : vector<256x4xf32>
    %238 = tpu.matmul %235, %237, %cst_167 {dimension_numbers = #tpu.dot_dimension_numbers<[1], [0], [0], [1], [0, 0, 1, 1], [], []>} : vector<256x4xf32>, vector<4x4xf32>, vector<256x4xf32> -> vector<256x4xf32>
    %239 = arith.addf %233, %238 : vector<256x4xf32>
    %c1_168 = arith.constant 1 : index
    %c2_169 = arith.constant 2 : index
    %c0_170 = arith.constant 0 : index
    %240 = vector.load %arg11[%c1_168, %c2_169, %c0_170] : memref<18x18x4xf32, #tpu.memory_space<vmem>>, vector<16x16x4xf32>
    %241 = vector.shape_cast %240 : vector<16x16x4xf32> to vector<256x4xf32>
    %c7_171 = arith.constant 7 : index
    %c0_172 = arith.constant 0 : index
    %c0_173 = arith.constant 0 : index
    %242 = vector.load %arg8[%c7_171, %c0_172, %c0_173] : memref<9x4x4xf32, #tpu.memory_space<vmem>>, vector<1x4x4xf32>
    %243 = vector.shape_cast %242 : vector<1x4x4xf32> to vector<4x4xf32>
    %cst_174 = arith.constant dense<0.000000e+00> : vector<256x4xf32>
    %244 = tpu.matmul %241, %243, %cst_174 {dimension_numbers = #tpu.dot_dimension_numbers<[1], [0], [0], [1], [0, 0, 1, 1], [], []>} : vector<256x4xf32>, vector<4x4xf32>, vector<256x4xf32> -> vector<256x4xf32>
    %245 = arith.addf %239, %244 : vector<256x4xf32>
    %c2_175 = arith.constant 2 : index
    %c2_176 = arith.constant 2 : index
    %c0_177 = arith.constant 0 : index
    %246 = vector.load %arg11[%c2_175, %c2_176, %c0_177] : memref<18x18x4xf32, #tpu.memory_space<vmem>>, vector<16x16x4xf32>
    %247 = vector.shape_cast %246 : vector<16x16x4xf32> to vector<256x4xf32>
    %c8_178 = arith.constant 8 : index
    %c0_179 = arith.constant 0 : index
    %c0_180 = arith.constant 0 : index
    %248 = vector.load %arg8[%c8_178, %c0_179, %c0_180] : memref<9x4x4xf32, #tpu.memory_space<vmem>>, vector<1x4x4xf32>
    %249 = vector.shape_cast %248 : vector<1x4x4xf32> to vector<4x4xf32>
    %cst_181 = arith.constant dense<0.000000e+00> : vector<256x4xf32>
    %250 = tpu.matmul %247, %249, %cst_181 {dimension_numbers = #tpu.dot_dimension_numbers<[1], [0], [0], [1], [0, 0, 1, 1], [], []>} : vector<256x4xf32>, vector<4x4xf32>, vector<256x4xf32> -> vector<256x4xf32>
    %251 = arith.addf %245, %250 : vector<256x4xf32>
    %c0_182 = arith.constant 0 : index
    %c0_183 = arith.constant 0 : index
    %252 = vector.load %arg9[%c0_182, %c0_183] : memref<1x4xf32, #tpu.memory_space<vmem>>, vector<1x4xf32>
    %253 = vector.broadcast %252 : vector<1x4xf32> to vector<256x4xf32>
    %254 = arith.addf %251, %253 : vector<256x4xf32>
    %255 = vector.shape_cast %1 : vector<16x16x4xf32> to vector<256x4xf32>
    %256 = arith.addf %254, %255 : vector<256x4xf32>
    %c0_184 = arith.constant 0 : index
    %c0_185 = arith.constant 0 : index
    %c0_186 = arith.constant 0 : index
    %257 = vector.load %arg10[%c0_184, %c0_185, %c0_186] : memref<1x256x4xf32, #tpu.memory_space<vmem>>, vector<1x256x4xf32>
    %258 = vector.shape_cast %257 : vector<1x256x4xf32> to vector<256x4xf32>
    %259 = vector.shape_cast %256 : vector<256x4xf32> to vector<1x256x4xf32>
    tpu.vector_store %arg10[%c0_184, %c0_185, %c0_186], %259 {strides = array<i32>} : memref<1x256x4xf32, #tpu.memory_space<vmem>>, vector<1x256x4xf32>,
    return
  }
  func.func @transform_0(%arg0: i32) -> (i32, i32, i32, i32) {
    %c0_i32 = arith.constant 0 : i32
    %c0_i32_0 = arith.constant 0 : i32
    %c0_i32_1 = arith.constant 0 : i32
    %c0_i32_2 = arith.constant 0 : i32
    return %arg0, %c0_i32, %c0_i32_0, %c0_i32_1 : i32, i32, i32, i32
  }
  func.func @transform_1(%arg0: i32) -> (i32, i32) {
    %c0_i32 = arith.constant 0 : i32
    %c0_i32_0 = arith.constant 0 : i32
    %c0_i32_1 = arith.constant 0 : i32
    return %c0_i32, %c0_i32_0 : i32, i32
  }
  func.func @transform_2(%arg0: i32) -> (i32, i32) {
    %c0_i32 = arith.constant 0 : i32
    %c0_i32_0 = arith.constant 0 : i32
    %c0_i32_1 = arith.constant 0 : i32
    return %c0_i32, %c0_i32_0 : i32, i32
  }
  func.func @transform_3(%arg0: i32) -> (i32, i32, i32) {
    %c0_i32 = arith.constant 0 : i32
    %c0_i32_0 = arith.constant 0 : i32
    %c0_i32_1 = arith.constant 0 : i32
    %c0_i32_2 = arith.constant 0 : i32
    return %c0_i32, %c0_i32_0, %c0_i32_1 : i32, i32, i32
  }
  func.func @transform_4(%arg0: i32) -> (i32, i32) {
    %c0_i32 = arith.constant 0 : i32
    %c0_i32_0 = arith.constant 0 : i32
    %c0_i32_1 = arith.constant 0 : i32
    return %c0_i32, %c0_i32_0 : i32, i32
  }
  func.func @transform_5(%arg0: i32) -> (i32, i32) {
    %c0_i32 = arith.constant 0 : i32
    %c0_i32_0 = arith.constant 0 : i32
    %c0_i32_1 = arith.constant 0 : i32
    return %c0_i32, %c0_i32_0 : i32, i32
  }
  func.func @transform_6(%arg0: i32) -> (i32, i32) {
    %c0_i32 = arith.constant 0 : i32
    %c0_i32_0 = arith.constant 0 : i32
    %c0_i32_1 = arith.constant 0 : i32
    return %c0_i32, %c0_i32_0 : i32, i32
  }
  func.func @transform_7(%arg0: i32) -> (i32, i32, i32) {
    %c0_i32 = arith.constant 0 : i32
    %c0_i32_0 = arith.constant 0 : i32
    %c0_i32_1 = arith.constant 0 : i32
    %c0_i32_2 = arith.constant 0 : i32
    return %c0_i32, %c0_i32_0, %c0_i32_1 : i32, i32, i32
  }
  func.func @transform_8(%arg0: i32) -> (i32, i32) {
    %c0_i32 = arith.constant 0 : i32
    %c0_i32_0 = arith.constant 0 : i32
    %c0_i32_1 = arith.constant 0 : i32
    return %c0_i32, %c0_i32_0 : i32, i32
  }
  func.func @transform_9(%arg0: i32) -> (i32, i32, i32) {
    %c0_i32 = arith.constant 0 : i32
    %c0_i32_0 = arith.constant 0 : i32
    %c0_i32_1 = arith.constant 0 : i32
    return %arg0, %c0_i32, %c0_i32_0 : i32, i32, i32
  }
}

</mosaic_0001>

<bundles_post_ra>
// kernel: residual_cnn_forward.1
= control target key start
LH: loop header
LB: loop body
LE: loop exit
PB: predicated region body
PF: predicated region fallthrough
CT: control target
= control target key end

     0   :  { %s12854_s30 = smov 0   ;;  %s18126_s0 = inlined_call_operand.vmem [shape: f32[2,16,16,4], index: 0, kind: input, shape index: {}]   ;;  %s18127_s1 = inlined_call_operand.vmem [shape: f32[16,4], index: 1, kind: input, shape index: {}]   ;;  %s18128_s2 = inlined_call_operand.vmem [shape: f32[16,4], index: 2, kind: input, shape index: {}]   ;;  %s18129_s3 = inlined_call_operand.vmem [shape: f32[9,4,4], index: 3, kind: input, shape index: {}]   ;;  %s18130_s4 = inlined_call_operand.vmem [shape: f32[1,4], index: 4, kind: input, shape index: {}]   ;;  %s18131_s5 = inlined_call_operand.vmem [shape: f32[16,4], index: 5, kind: input, shape index: {}]   ;;  %s18132_s6 = inlined_call_operand.vmem [shape: f32[16,4], index: 6, kind: input, shape index: {}]   ;;  %s18133_s7 = inlined_call_operand.vmem [shape: f32[9,4,4], index: 7, kind: input, shape index: {}]   ;;  %s18134_s8 = inlined_call_operand.vmem [shape: f32[1,4], index: 8, kind: input, shape index: {}]   ;;  %s18135_s9 = inlined_call_operand.vmem [shape: f32[2,256,4], index: 9, kind: output, shape index: {}]  }
   0x1 LB: > { %s10272_s10 = sadd.s32 4294967295, %s12800_s30   ;;  %p10276_p0 = scmp.ge.s32.totalorder %s12800_s30, 1  ;;  %s12800_s30 = sphi %s12854_s30, %s19_s30  }
   0x2   : > { %p287_p1 = scmp.lt.s32.totalorder %s12800_s30, 3 }
   0x4   : > { %p288_p2 = pnand %p10276_p0, %p287_p1 }
   0x6   : > { %291 = sbr.rel (%p288_p2) target bundleno = 1668 (0x684), region = 56 }
   0xb   : > { %v10281_v0 = vld [vmem:[%s18129_s3 + $0x4] sm:$0xf]  ;;  %vm1966_vm0 = vcmask 1043456   ;;  %v1835_v1 = vld [vmem:[%s18129_s3] sm:$0xf]  ;;  %p323_p3 = scmp.lt.s32.totalorder %s10272_s10, 1 }
   0xc   : > { %11491 = vmatprep.subr.msk.mxu0 %vm1966_vm0, %v10281_v0  ;;  %11541 = vmatprep.subr.msk.mxu1 %vm1966_vm0, %v1835_v1  ;;  %vm365_vm1 = vcmask 31744   ;;  %vm368_vm2 = vcmask 25600   ;;  %v12802_v2 = vmov 0.0   ;;  %v10348_v3 = vld [vmem:[%s18129_s3 + $0x8] sm:$0xf] }
   0xd   : > { %11492 = vmatpush3.msk.msra.mxu0 %vm1966_vm0, %v10281_v0  ;;  %s18589_s10 = smov (!%p323_p3, %s10272_s10), 1  ;;  %370 = vst.msk [vmem:[#allocation2 + $0x18] sm:$0xff] %vm365_vm1, %v12802_v2  ;;  %371 = vst.msk [vmem:[#allocation2 + $0x20] sm:$0xff] %vm365_vm1, %v12802_v2  ;;  %11542 = vmatpush3.msk.msra.mxu1 %vm1966_vm0, %v1835_v1 }
   0xe   : > { %366 = vst.msk [vmem:[#allocation2] sm:$0xff] %vm365_vm1, %v12802_v2  ;;  %367 = vst.msk [vmem:[#allocation2 + $0x8] sm:$0xff] %vm365_vm1, %v12802_v2  ;;  %11591 = vmatprep.subr.msk.mxu0 %vm1966_vm0, %v10348_v3  ;;  %s10895_s17 = sshll.u32 %s18589_s10, 8 }
   0xf   : > { %373 = vst.msk [vmem:[#allocation2 + $0x30] sm:$0xff] %vm365_vm1, %v12802_v2  ;;  %374 = vst.msk [vmem:[#allocation2 + $0x38] sm:$0xff] %vm365_vm1, %v12802_v2  ;;  %s12938_s20 = scalar_lea.vmem %s18126_s0, %s10895_s17  ;;  %s17882_s26 = scalar_lea.vmem %s18135_s9, %s10895_s17 }
  0x10   : > { %376 = vst.msk [vmem:[#allocation2 + $0x48] sm:$0xff] %vm365_vm1, %v12802_v2  ;;  %377 = vst.msk [vmem:[#allocation2 + $0x50] sm:$0xff] %vm365_vm1, %v12802_v2  ;;  %v12941_v4 = vld [vmem:[%s12938_s20] sm:$0xff]  ;;  %v12944_v5 = vld [vmem:[%s12938_s20 + $0x8] sm:$0xff] }
  0x11   : > { %379 = vst.msk [vmem:[#allocation2 + $0x60] sm:$0xff] %vm365_vm1, %v12802_v2  ;;  %380 = vst.msk [vmem:[#allocation2 + $0x68] sm:$0xff] %vm365_vm1, %v12802_v2  ;;  %v12947_v6 = vld [vmem:[%s12938_s20 + $0x10] sm:$0xff]  ;;  %v425_v7 = vsel %vm365_vm1, %v12941_v4, 0.0  ;;  %v426_v8 = vsel %vm365_vm1, %v12944_v5, 0.0  ;;  %v12954_v9 = vld [vmem:[%s12938_s20 + $0x18] sm:$0xff] }
  0x12   : > { %382 = vst.msk [vmem:[#allocation2 + $0x78] sm:$0xff] %vm365_vm1, %v12802_v2  ;;  %383 = vst.msk [vmem:[#allocation2 + $0x80] sm:$0xff] %vm365_vm1, %v12802_v2  ;;  %v434_v10 = vsel %vm365_vm1, %v12947_v6, 0.0  ;;  %v12959_v11 = vld [vmem:[%s12938_s20 + $0x20] sm:$0xff]  ;;  %v12962_v12 = vld [vmem:[%s12938_s20 + $0x28] sm:$0xff]  ;;  %v427_v13 = vadd.f32 %v426_v8, %v425_v7  ;;  %v435_v14 = vsel %vm365_vm1, %v12954_v9, 0.0 }
  0x13   : > { %385 = vst.msk [vmem:[#allocation2 + $0x90] sm:$0xff] %vm365_vm1, %v12802_v2  ;;  %386 = vst.msk [vmem:[#allocation2 + $0x98] sm:$0xff] %vm365_vm1, %v12802_v2  ;;  %v443_v15 = vsel %vm365_vm1, %v12959_v11, 0.0  ;;  %v444_v16 = vsel %vm365_vm1, %v12962_v12, 0.0  ;;  %v12971_v17 = vld [vmem:[%s12938_s20 + $0x30] sm:$0xff]  ;;  %v12974_v18 = vld [vmem:[%s12938_s20 + $0x38] sm:$0xff]  ;;  %v436_v22 = vadd.f32 %v435_v14, %v434_v10 }
  0x14   : > { %388 = vst.msk [vmem:[#allocation2 + $0xa8] sm:$0xff] %vm365_vm1, %v12802_v2  ;;  %389 = vst.msk [vmem:[#allocation2 + $0xb0] sm:$0xff] %vm365_vm1, %v12802_v2  ;;  %v12977_v19 = vld [vmem:[%s12938_s20 + $0x40] sm:$0xff]  ;;  %v445_v23 = vadd.f32 %v444_v16, %v443_v15  ;;  %v452_v24 = vsel %vm365_vm1, %v12971_v17, 0.0  ;;  %v453_v25 = vsel %vm365_vm1, %v12974_v18, 0.0  ;;  %v12984_v26 = vld [vmem:[%s12938_s20 + $0x48] sm:$0xff] }
  0x15   : > { %391 = vst.msk [vmem:[#allocation2 + $0xc0] sm:$0xff] %vm365_vm1, %v12802_v2  ;;  %392 = vst.msk [vmem:[#allocation2 + $0xc8] sm:$0xff] %vm365_vm1, %v12802_v2  ;;  %v1803_v20 = vld [vmem:[#allocation2] sm:$0xff]  ;;  %v1804_v21 = vld [vmem:[#allocation2 + $0x8] sm:$0xff]  ;;  %v428_v27 = vrot.slane %v427_v13, 4  ;;  %v454_v28 = vadd.f32 %v453_v25, %v452_v24  ;;  %v461_v29 = vsel %vm365_vm1, %v12977_v19, 0.0 }
  0x16   : > { %394 = vst.msk [vmem:[#allocation2 + $0xd8] sm:$0xff] %vm365_vm1, %v12802_v2  ;;  %395 = vst.msk [vmem:[#allocation2 + $0xe0] sm:$0xff] %vm365_vm1, %v12802_v2  ;;  %11543 = vmatprep.mubr.msk.f32.mxu1 %vm365_vm1, %v1803_v20  ;;  %v462_v30 = vsel %vm365_vm1, %v12984_v26, 0.0  ;;  %v12992_v31 = vld [vmem:[%s12938_s20 + $0x50] sm:$0xff]  ;;  %v12995_v32 = vld [vmem:[%s12938_s20 + $0x58] sm:$0xff]  ;;  %v437_v34 = vrot.slane %v436_v22, 4 }
  0x17   : > { %397 = vst.msk [vmem:[#allocation2 + $0xf0] sm:$0xff] %vm365_vm1, %v12802_v2  ;;  %398 = vst.msk [vmem:[#allocation2 + $0xf8] sm:$0xff] %vm365_vm1, %v12802_v2  ;;  %v12998_v33 = vld [vmem:[%s12938_s20 + $0x60] sm:$0xff]  ;;  %11544 = vmatmul.mubr.msk.f32.vlgmr.msra.gmra.mxu1 %vm365_vm1, %v1804_v21  ;;  %v446_v35 = vrot.slane %v445_v23, 4  ;;  %v463_v36 = vadd.f32 %v462_v30, %v461_v29  ;;  %v470_v37 = vsel %vm365_vm1, %v12992_v31, 0.0  ;;  %v13004_v38 = vld [vmem:[%s12938_s20 + $0x68] sm:$0xff]  ;;  %v429_v40 = vadd.f32 %v428_v27, %v427_v13 }
  0x18   : > { %400 = vst.msk [vmem:[#allocation2 + $0x108] sm:$0xff] %vm365_vm1, %v12802_v2  ;;  %401 = vst.msk [vmem:[#allocation2 + $0x110] sm:$0xff] %vm365_vm1, %v12802_v2  ;;  %v13007_v39 = vld [vmem:[%s12938_s20 + $0x70] sm:$0xff]  ;;  %v455_v41 = vrot.slane %v454_v28, 4  ;;  %v471_v42 = vsel %vm365_vm1, %v12995_v32, 0.0  ;;  %v479_v43 = vsel %vm365_vm1, %v12998_v33, 0.0  ;;  %v438_v44 = vadd.f32 %v437_v34, %v436_v22 }
  0x19   : > { %403 = vst.msk [vmem:[#allocation2 + $0x120] sm:$0xff] %vm365_vm1, %v12802_v2  ;;  %404 = vst.msk [vmem:[#allocation2 + $0x128] sm:$0xff] %vm365_vm1, %v12802_v2  ;;  %v447_v45 = vadd.f32 %v446_v35, %v445_v23  ;;  %v464_v46 = vrot.slane %v463_v36, 4  ;;  %v472_v47 = vadd.f32 %v471_v42, %v470_v37  ;;  %v13014_v48 = vld [vmem:[%s12938_s20 + $0x78] sm:$0xff]  ;;  %v430_v49 = vrot.slane %v429_v40, 2 }
  0x1a   : > { %406 = vst.msk [vmem:[#allocation2 + $0x138] sm:$0xff] %vm365_vm1, %v12802_v2  ;;  %407 = vst.msk [vmem:[#allocation2 + $0x140] sm:$0xff] %vm365_vm1, %v12802_v2  ;;  %v456_v50 = vadd.f32 %v455_v41, %v454_v28  ;;  %v480_v51 = vsel %vm365_vm1, %v13004_v38, 0.0  ;;  %v488_v52 = vsel %vm365_vm1, %v13007_v39, 0.0  ;;  %v439_v53 = vrot.slane %v438_v44, 2 }
  0x1b   : > { %409 = vst.msk [vmem:[#allocation2 + $0x150] sm:$0xff] %vm365_vm1, %v12802_v2  ;;  %410 = vst.msk [vmem:[#allocation2 + $0x158] sm:$0xff] %vm365_vm1, %v12802_v2  ;;  %v448_v54 = vrot.slane %v447_v45, 2  ;;  %v465_v55 = vadd.f32 %v464_v46, %v463_v36  ;;  %v473_v56 = vrot.slane %v472_v47, 4  ;;  %v431_v57 = vadd.f32 %v430_v49, %v429_v40 }
  0x1c   : > { %412 = vst.msk [vmem:[#allocation2 + $0x168] sm:$0xff] %vm365_vm1, %v12802_v2  ;;  %413 = vst.msk [vmem:[#allocation2 + $0x170] sm:$0xff] %vm365_vm1, %v12802_v2  ;;  %v457_v58 = vrot.slane %v456_v50, 2  ;;  %v481_v59 = vadd.f32 %v480_v51, %v479_v43  ;;  %v489_v60 = vsel %vm365_vm1, %v13014_v48, 0.0  ;;  %v440_v61 = vadd.f32 %v439_v53, %v438_v44 }
  0x1d   : > { %415 = vst.msk [vmem:[#allocation2 + $0x180] sm:$0xff] %vm365_vm1, %v12802_v2  ;;  %416 = vst.msk [vmem:[#allocation2 + $0x188] sm:$0xff] %vm365_vm1, %v12802_v2  ;;  %v449_v62 = vadd.f32 %v448_v54, %v447_v45  ;;  %v466_v63 = vrot.slane %v465_v55, 2  ;;  %v474_v0 = vadd.f32 %v473_v56, %v472_v47  ;;  %v432_v1 = vrot.slane %v431_v57, 1 }
  0x1e   : > { %418 = vst.msk [vmem:[#allocation2 + $0x198] sm:$0xff] %vm365_vm1, %v12802_v2  ;;  %419 = vst.msk [vmem:[#allocation2 + $0x1a0] sm:$0xff] %vm365_vm1, %v12802_v2  ;;  %v482_v3 = vrot.slane %v481_v59, 4  ;;  %v490_v7 = vadd.f32 %v489_v60, %v488_v52  ;;  %v441_v8 = vrot.slane %v440_v61, 1 }
  0x1f   : > { %372 = vst.msk [vmem:[#allocation2 + $0x28] sm:$0x3] %vm368_vm2, %v12802_v2  ;;  %369 = vst.msk [vmem:[#allocation2 + $0x10] sm:$0x3] %vm368_vm2, %v12802_v2  ;;  %v450_v10 = vrot.slane %v449_v62, 1  ;;  %v467_v13 = vadd.f32 %v466_v63, %v465_v55  ;;  %v475_v14 = vrot.slane %v474_v0, 2  ;;  %v433_v15 = vadd.f32 %v432_v1, %v431_v57 }
  0x20   : > { %375 = vst.msk [vmem:[#allocation2 + $0x40] sm:$0x3] %vm368_vm2, %v12802_v2  ;;  %378 = vst.msk [vmem:[#allocation2 + $0x58] sm:$0x3] %vm368_vm2, %v12802_v2  ;;  %v483_v20 = vadd.f32 %v482_v3, %v481_v59  ;;  %v491_v21 = vrot.slane %v490_v7, 4  ;;  %v442_v22 = vadd.f32 %v441_v8, %v440_v61 }
  0x21   : > { %381 = vst.msk [vmem:[#allocation2 + $0x70] sm:$0x3] %vm368_vm2, %v12802_v2  ;;  %384 = vst.msk [vmem:[#allocation2 + $0x88] sm:$0x3] %vm368_vm2, %v12802_v2  ;;  %v451_v23 = vadd.f32 %v450_v10, %v449_v62  ;;  %v468_v24 = vrot.slane %v467_v13, 1  ;;  %v476_v25 = vadd.f32 %v475_v14, %v474_v0  ;;  %v570_v27 = vmul.f32 0.0625, %v433_v15 }
  0x22   : > { %387 = vst.msk [vmem:[#allocation2 + $0xa0] sm:$0x3] %vm368_vm2, %v12802_v2  ;;  %390 = vst.msk [vmem:[#allocation2 + $0xb8] sm:$0x3] %vm368_vm2, %v12802_v2  ;;  %v484_v29 = vrot.slane %v483_v20, 2  ;;  %v13022_v30 = vadd.f32 %v491_v21, %v490_v7  ;;  %v571_v34 = vmul.f32 0.0625, %v442_v22 }
  0x23   : > { %393 = vst.msk [vmem:[#allocation2 + $0xd0] sm:$0x3] %vm368_vm2, %v12802_v2  ;;  %396 = vst.msk [vmem:[#allocation2 + $0xe8] sm:$0x3] %vm368_vm2, %v12802_v2  ;;  %v572_v35 = vmul.f32 0.0625, %v451_v23  ;;  %v469_v36 = vadd.f32 %v468_v24, %v467_v13  ;;  %v477_v37 = vrot.slane %v476_v25, 1  ;;  %v13025_v40 = vsub.f32 %v12941_v4, %v570_v27 }
  0x24   : > { %399 = vst.msk [vmem:[#allocation2 + $0x100] sm:$0x3] %vm368_vm2, %v12802_v2  ;;  %402 = vst.msk [vmem:[#allocation2 + $0x118] sm:$0x3] %vm368_vm2, %v12802_v2  ;;  %v13028_v41 = vsub.f32 %v12944_v5, %v570_v27  ;;  %v485_v43 = vadd.f32 %v484_v29, %v483_v20  ;;  %v13031_v44 = vsub.f32 %v12947_v6, %v571_v34  ;;  %v493_v7 = vrot.slane %v13022_v30, 2 }
  0x25   : > { %405 = vst.msk [vmem:[#allocation2 + $0x130] sm:$0x3] %vm368_vm2, %v12802_v2  ;;  %408 = vst.msk [vmem:[#allocation2 + $0x148] sm:$0x3] %vm368_vm2, %v12802_v2  ;;  %v13034_v45 = vsub.f32 %v12954_v9, %v571_v34  ;;  %v13037_v46 = vsub.f32 %v12959_v11, %v572_v35  ;;  %v13040_v47 = vsub.f32 %v12962_v12, %v572_v35  ;;  %v574_v0 = vmul.f32 0.0625, %v469_v36 }
  0x26   : > { %411 = vst.msk [vmem:[#allocation2 + $0x160] sm:$0x3] %vm368_vm2, %v12802_v2  ;;  %414 = vst.msk [vmem:[#allocation2 + $0x178] sm:$0x3] %vm368_vm2, %v12802_v2  ;;  %v618_v4 = vmul.f32 %v13025_v40, %v13025_v40  ;;  %v619_v5 = vmul.f32 %v13028_v41, %v13028_v41  ;;  %v620_v9 = vmul.f32 %v13031_v44, %v13031_v44  ;;  %v486_v3 = vrot.slane %v485_v43, 1 }
  0x27   : > { %417 = vst.msk [vmem:[#allocation2 + $0x190] sm:$0x3] %vm368_vm2, %v12802_v2  ;;  %420 = vst.msk [vmem:[#allocation2 + $0x1a8] sm:$0x3] %vm368_vm2, %v12802_v2  ;;  %v458_v2 = vadd.f32 %v457_v58, %v456_v50  ;;  %v621_v11 = vmul.f32 %v13034_v45, %v13034_v45  ;;  %v622_v12 = vmul.f32 %v13037_v46, %v13037_v46 }
  0x28   : > { %v623_v50 = vmul.f32 %v13040_v47, %v13040_v47  ;;  %v650_v51 = vsel %vm365_vm1, %v618_v4, 0.0  ;;  %v659_v54 = vsel %vm365_vm1, %v620_v9, 0.0  ;;  %v13074_v14 = vsub.f32 %v12977_v19, %v574_v0 }
  0x29   : > { %v459_v16 = vrot.slane %v458_v2, 1  ;;  %v660_v55 = vsel %vm365_vm1, %v621_v11, 0.0  ;;  %v668_v56 = vsel %vm365_vm1, %v622_v12, 0.0  ;;  %v487_v21 = vadd.f32 %v486_v3, %v485_v43 }
  0x2a   : > { %v661_v57 = vadd.f32 %v660_v55, %v659_v54  ;;  %v669_v58 = vsel %vm365_vm1, %v623_v50, 0.0 }
  0x2b   : > { %v460_v28 = vadd.f32 %v459_v16, %v458_v2  ;;  %v670_v62 = vadd.f32 %v669_v58, %v668_v56  ;;  %v478_v2 = vadd.f32 %v477_v37, %v476_v25  ;;  %v13077_v16 = vsub.f32 %v12984_v26, %v574_v0 }
  0x2c   : > { %v662_v1 = vrot.slane %v661_v57, 4  ;;  %v626_v25 = vmul.f32 %v13074_v14, %v13074_v14 }
  0x2d   : > { %v573_v42 = vmul.f32 0.0625, %v460_v28  ;;  %v671_v10 = vrot.slane %v670_v62, 4  ;;  %v575_v20 = vmul.f32 0.0625, %v478_v2  ;;  %v627_v28 = vmul.f32 %v13077_v16, %v13077_v16 }
  0x2e   : > { %v663_v15 = vadd.f32 %v662_v1, %v661_v57  ;;  %v686_v36 = vsel %vm365_vm1, %v626_v25, 0.0 }
  0x2f   : > { %v13047_v49 = vsub.f32 %v12971_v17, %v573_v42  ;;  %v13050_v6 = vsub.f32 %v12974_v18, %v573_v42  ;;  %v651_v17 = vsel %vm365_vm1, %v619_v5, 0.0  ;;  %v672_v23 = vadd.f32 %v671_v10, %v670_v62 }
  0x30   : > { %v652_v53 = vadd.f32 %v651_v17, %v650_v51  ;;  %v664_v27 = vrot.slane %v663_v15, 2  ;;  %v13084_v29 = vsub.f32 %v12992_v31, %v575_v20  ;;  %v13087_v19 = vsub.f32 %v12995_v32, %v575_v20  ;;  %v13110_v20 = vld [vmem:[%s12938_s20 + $0x80] sm:$0xff] }
  0x31   : > { %v624_v18 = vmul.f32 %v13047_v49, %v13047_v49  ;;  %v625_v52 = vmul.f32 %v13050_v6, %v13050_v6  ;;  %v673_v34 = vrot.slane %v672_v23, 2  ;;  %v687_v42 = vsel %vm365_vm1, %v627_v28, 0.0 }
  0x32   : > { %v653_v61 = vrot.slane %v652_v53, 4  ;;  %v665_v37 = vadd.f32 %v664_v27, %v663_v15  ;;  %v628_v43 = vmul.f32 %v13084_v29, %v13084_v29  ;;  %v629_v4 = vmul.f32 %v13087_v19, %v13087_v19 }
  0x33   : > { %v677_v59 = vsel %vm365_vm1, %v624_v18, 0.0  ;;  %v678_v60 = vsel %vm365_vm1, %v625_v52, 0.0  ;;  %v674_v31 = vadd.f32 %v673_v34, %v672_v23  ;;  %v688_v11 = vadd.f32 %v687_v42, %v686_v36  ;;  %v13122_v34 = vld [vmem:[%s12938_s20 + $0x98] sm:$0xff] }
  0x34   : > { %v679_v63 = vadd.f32 %v678_v60, %v677_v59  ;;  %v654_v8 = vadd.f32 %v653_v61, %v652_v53  ;;  %v666_v32 = vrot.slane %v665_v37, 1  ;;  %v695_v12 = vsel %vm365_vm1, %v628_v43, 0.0  ;;  %18164 = vst [vmem:[#allocation7_spill] sm:$0xff] %v13122_v34 }
  0x35   : > { %v696_v50 = vsel %vm365_vm1, %v629_v4, 0.0  ;;  %v576_v51 = vmul.f32 0.0625, %v487_v21  ;;  %v675_v18 = vrot.slane %v674_v31, 1  ;;  %v689_v53 = vrot.slane %v688_v11, 4  ;;  %v13113_v21 = vld [vmem:[%s12938_s20 + $0x88] sm:$0xff] }
  0x36   : > { %v680_v13 = vrot.slane %v679_v63, 4  ;;  %v655_v22 = vrot.slane %v654_v8, 2  ;;  %v667_v54 = vadd.f32 %v666_v32, %v665_v37  ;;  %v697_v55 = vadd.f32 %v696_v50, %v695_v12  ;;  %18162 = vst [vmem:[#allocation5_spill] sm:$0xff] %v13113_v21 }
  0x37   : > { %v13098_v56 = vsub.f32 %v12998_v33, %v576_v51  ;;  %v13101_v57 = vsub.f32 %v13004_v38, %v576_v51  ;;  %v676_v59 = vadd.f32 %v675_v18, %v674_v31  ;;  %v690_v61 = vadd.f32 %v689_v53, %v688_v11  ;;  %v354_v31 = vld [vmem:[%s12938_s20 + $0xa8] sm:$0xff] }
  0x38   : > { %v681_v24 = vadd.f32 %v680_v13, %v679_v63  ;;  %v656_v26 = vadd.f32 %v655_v22, %v654_v8  ;;  %v795_v62 = vmul.f32 0.0625, %v667_v54  ;;  %v698_v63 = vrot.slane %v697_v55, 4 }
  0x39   : > { %18160 = vst [vmem:[#allocation3_spill] sm:$0xff] %v13098_v56  ;;  %18161 = vst [vmem:[#allocation4_spill] sm:$0xff] %v13101_v57  ;;  %v630_v0 = vmul.f32 %v13098_v56, %v13098_v56  ;;  %v631_v1 = vmul.f32 %v13101_v57, %v13101_v57  ;;  %v796_v33 = vmul.f32 0.0625, %v676_v59  ;;  %v691_v38 = vrot.slane %v690_v61, 2 }
  0x3a   : > { %v682_v35 = vrot.slane %v681_v24, 2  ;;  %v657_v5 = vrot.slane %v656_v26, 1  ;;  %v811_v8 = vadd.f32 1e-05, %v795_v62  ;;  %v699_v10 = vadd.f32 %v698_v63, %v697_v55 }
  0x3b   : > { %v704_v13 = vsel %vm365_vm1, %v630_v0, 0.0  ;;  %v705_v15 = vsel %vm365_vm1, %v631_v1, 0.0  ;;  %v812_v22 = vadd.f32 1e-05, %v796_v33  ;;  %v494_v28 = vadd.f32 %v493_v7, %v13022_v30 }
  0x3c   : > { %v683_v9 = vadd.f32 %v682_v35, %v681_v24  ;;  %v658_v17 = vadd.f32 %v657_v5, %v656_v26  ;;  %v692_v24 = vadd.f32 %v691_v38, %v690_v61  ;;  %v700_v25 = vrot.slane %v699_v10, 2  ;;  %v13119_v26 = vld [vmem:[%s12938_s20 + $0x90] sm:$0xff]  ;;  %v353_v5 = vld [vmem:[%s12938_s20 + $0xa0] sm:$0xff] }
  0x3d   : > { %v706_v27 = vadd.f32 %v705_v15, %v704_v13  ;;  %18163 = vst [vmem:[#allocation6_spill] sm:$0xff] %v13119_v26  ;;  %v497_v36 = vsel %vm365_vm1, %v13110_v20, 0.0  ;;  %v498_v37 = vsel %vm365_vm1, %v13113_v21, 0.0  ;;  %v495_v4 = vrot.slane %v494_v28, 1 }
  0x3e   : > { %v684_v52 = vrot.slane %v683_v9, 1  ;;  %v794_v58 = vmul.f32 0.0625, %v658_v17  ;;  %v693_v35 = vrot.slane %v692_v24, 1  ;;  %v701_v42 = vadd.f32 %v700_v25, %v699_v10 }
  0x3f   : > { %v707_v43 = vrot.slane %v706_v27, 4  ;;  %v499_v30 = vadd.f32 %v498_v37, %v497_v36  ;;  %v506_v7 = vsel %vm365_vm1, %v13119_v26, 0.0  ;;  %v507_v11 = vsel %vm365_vm1, %v13122_v34, 0.0  ;;  %v13169_v37 = vld [vmem:[%s18128_s2] sm:$0xff] }
  0x40   : > { %v685_v60 = vadd.f32 %v684_v52, %v683_v9  ;;  %v810_v2 = vadd.f32 1e-05, %v794_v58  ;;  %v694_v9 = vadd.f32 %v693_v35, %v692_v24  ;;  %v702_v32 = vrot.slane %v701_v42, 1 }
  0x41   : > { %v708_v12 = vadd.f32 %v707_v43, %v706_v27  ;;  %v496_v50 = vadd.f32 %v495_v4, %v494_v28  ;;  %v508_v51 = vadd.f32 %v507_v11, %v506_v7  ;;  %v500_v18 = vrot.slane %v499_v30, 4  ;;  %v356_v11 = vld [vmem:[%s12938_s20 + $0xb8] sm:$0xff] }
  0x42   : > { %v797_v3 = vmul.f32 0.0625, %v685_v60  ;;  %12401 = vrsqrt.f32 %v810_v2  ;;  %v798_v17 = vmul.f32 0.0625, %v694_v9  ;;  %v515_v52 = vsel %vm365_vm1, %v353_v5, 0.0 }
  0x43   : > { %12403 = vrsqrt.f32 %v811_v8  ;;  %v516_v53 = vsel %vm365_vm1, %v354_v31, 0.0  ;;  %v703_v54 = vadd.f32 %v702_v32, %v701_v42  ;;  %v709_v55 = vrot.slane %v708_v12, 2  ;;  %v13174_v42 = vld [vmem:[%s18128_s2 + $0x8] sm:$0xff] }
  0x44   : > { %v813_v23 = vadd.f32 1e-05, %v797_v3  ;;  %12405 = vrsqrt.f32 %v812_v22  ;;  %v577_v58 = vmul.f32 0.0625, %v496_v50  ;;  %v509_v59 = vrot.slane %v508_v51, 4  ;;  %v355_v3 = vld [vmem:[%s12938_s20 + $0xb0] sm:$0xff]  ;;  %v13150_v22 = vld [vmem:[%s18127_s1] sm:$0xff] }
  0x45   : > { %v501_v60 = vadd.f32 %v500_v18, %v499_v30  ;;  %v517_v61 = vadd.f32 %v516_v53, %v515_v52  ;;  %v814_v62 = vadd.f32 1e-05, %v798_v17  ;;  %v710_v63 = vadd.f32 %v709_v55, %v708_v12 }
  0x46   : > { %12407 = vrsqrt.f32 %v813_v23  ;;  %v13137_v0 = vsub.f32 %v13007_v39, %v577_v58  ;;  %v13140_v1 = vsub.f32 %v13014_v48, %v577_v58  ;;  %v799_v2 = vmul.f32 0.0625, %v703_v54  ;;  %v13155_v39 = vld [vmem:[%s18127_s1 + $0x8] sm:$0xff] }
  0x47   : > { %v502_v33 = vrot.slane %v501_v60, 2  ;;  %v13143_v38 = vadd.f32 %v509_v59, %v508_v51  ;;  %v518_v8 = vrot.slane %v517_v61, 4  ;;  %v711_v10 = vrot.slane %v710_v63, 1 }
  0x48   : > { %18165 = vst [vmem:[#allocation8_spill] sm:$0xff] %v13137_v0  ;;  %18166 = vst [vmem:[#allocation9_spill] sm:$0xff] %v13140_v1  ;;  %v632_v13 = vmul.f32 %v13137_v0, %v13137_v0  ;;  %12409 = vrsqrt.f32 %v814_v62  ;;  %v633_v48 = vmul.f32 %v13140_v1, %v13140_v1  ;;  %v13160_v23 = vsel %vm365_vm1, %v355_v3, 0.0 }
  0x49   : > { %18167 = vst [vmem:[#allocation10_spill] sm:$0xff] %v13160_v23  ;;  %v815_v28 = vadd.f32 1e-05, %v799_v2  ;;  %v13164_v35 = vadd.f32 %v502_v33, %v501_v60  ;;  %v13179_v4 = vadd.f32 %v518_v8, %v517_v61  ;;  %v712_v30 = vadd.f32 %v711_v10, %v710_v63 }
  0x4a   : > { %v713_v7 = vsel %vm365_vm1, %v632_v13, 0.0  ;;  %v13197_v55 = vsel %vm365_vm1, %v356_v11, 0.0 }
  0x4b   : > { %18168 = vst [vmem:[#allocation11_spill] sm:$0xff] %v13179_v4  ;;  %18169 = vst [vmem:[#allocation12_spill] sm:$0xff] %v13197_v55  ;;  %12411 = vrsqrt.f32 %v815_v28 }
  0x4f   : > { %v12402_v15 = vpop.eup %12401 }
  0x50   : > { %v12404_v24 = vpop.eup %12403  ;;  %v842_v25 = vmul.f32 %v12402_v15, %v13025_v40  ;;  %v843_v27 = vmul.f32 %v12402_v15, %v13028_v41 }
  0x51   : > { %v12406_v36 = vpop.eup %12405  ;;  %v844_v43 = vmul.f32 %v12404_v24, %v13031_v44  ;;  %v845_v40 = vmul.f32 %v12404_v24, %v13034_v45  ;;  %v714_v45 = vsel %vm365_vm1, %v633_v48, 0.0 }
  0x52   : > { %v874_v31 = vmul.f32 %v842_v25, %v13150_v22  ;;  %v875_v9 = vmul.f32 %v843_v27, %v13155_v39  ;;  %v846_v44 = vmul.f32 %v12406_v36, %v13037_v46  ;;  %v847_v17 = vmul.f32 %v12406_v36, %v13040_v47 }
  0x53   : > { %v12408_v5 = vpop.eup %12407  ;;  %v876_v32 = vmul.f32 %v844_v43, %v13150_v22  ;;  %v877_v12 = vmul.f32 %v845_v40, %v13155_v39  ;;  %v13199_v59 = vadd.f32 %v714_v45, %v713_v7  ;;  %v13202_v47 = vmul.f32 0.0625, %v712_v30 }
  0x54   : > { %v906_v50 = vadd.f32 %v874_v31, %v13169_v37  ;;  %v907_v51 = vadd.f32 %v875_v9, %v13174_v42  ;;  %v848_v18 = vmul.f32 %v12408_v5, %v13047_v49  ;;  %v849_v54 = vmul.f32 %v12408_v5, %v13050_v6 }
  0x55   : > { %v908_v52 = vadd.f32 %v876_v32, %v13169_v37  ;;  %v909_v53 = vadd.f32 %v877_v12, %v13174_v42  ;;  %v878_v61 = vmul.f32 %v846_v44, %v13150_v22  ;;  %v879_v2 = vmul.f32 %v847_v17, %v13155_v39  ;;  %v13214_v43 = vpop.eup %12409 }
  0x56   : > { %v970_v46 = vmul.f32 0.70710677, %v906_v50  ;;  %v971_v58 = vmul.f32 0.70710677, %v907_v51  ;;  %v880_v6 = vmul.f32 %v848_v18, %v13150_v22  ;;  %v13207_v33 = vmul.f32 0.5, %v906_v50 }
  0x57   : > { %v972_v60 = vmul.f32 0.70710677, %v908_v52  ;;  %v973_v8 = vmul.f32 0.70710677, %v909_v53  ;;  %v881_v10 = vmul.f32 %v849_v54, %v13155_v39  ;;  %v13210_v25 = vmul.f32 0.5, %v907_v51 }
  0x58   : > { %v1066_v62 = vand.u32 2147483647, %v970_v46  ;;  %v1067_v63 = vand.u32 2147483647, %v971_v58  ;;  %v13212_v27 = vmul.f32 0.5, %v908_v52  ;;  %v13216_v9 = vmul.f32 0.5, %v909_v53 }
  0x59   : > { %v1068_v3 = vand.u32 2147483647, %v972_v60  ;;  %vm1002_vm3 = vcmp.ge.f32.partialorder %v970_v46, 0.0  ;;  %vm1003_vm4 = vcmp.ge.f32.partialorder %v971_v58, 0.0  ;;  %v1069_v7 = vand.u32 2147483647, %v973_v8 }
  0x5a   : > { %v1098_v13 = vmul.f32 0.3275911, %v1066_v62  ;;  %v1482_v15 = vsub.f32 0.0, %v1066_v62  ;;  %v1099_v48 = vmul.f32 0.3275911, %v1067_v63  ;;  %v1483_v24 = vsub.f32 0.0, %v1067_v63 }
  0x5b   : > { %v1100_v28 = vmul.f32 0.3275911, %v1068_v3  ;;  %v1484_v36 = vsub.f32 0.0, %v1068_v3  ;;  %v910_v12 = vadd.f32 %v878_v61, %v13169_v37  ;;  %v1101_v45 = vmul.f32 0.3275911, %v1069_v7 }
  0x5c   : > { %v1130_v40 = vadd.f32 1.0, %v1098_v13  ;;  %v1514_v5 = vmul.f32 %v1482_v15, %v1066_v62  ;;  %v1131_v31 = vadd.f32 1.0, %v1099_v48  ;;  %v1515_v30 = vmul.f32 %v1483_v24, %v1067_v63 }
  0x5d   : > { %v1132_v11 = vadd.f32 1.0, %v1100_v28  ;;  %v1516_v32 = vmul.f32 %v1484_v36, %v1068_v3  ;;  %v1485_v50 = vsub.f32 0.0, %v1069_v7  ;;  %v18136_v51 = vmov -1.0   ;;  %v13228_v3 = vpop.eup %12411 }
  0x5e   : > { %12413 = vrcp.f32 %v1130_v40  ;;  %v1546_v44 = vmul.f32 1.442695, %v1514_v5  ;;  %v13220_v17 = vsel %vm1002_vm3, 1.0, %v18136_v51  ;;  %vm1004_vm5 = vcmp.ge.f32.partialorder %v972_v60, 0.0 }
  0x5f   : > { %12415 = vrcp.f32 %v1131_v31  ;;  %v974_v18 = vmul.f32 0.70710677, %v910_v12  ;;  %v911_v52 = vadd.f32 %v879_v2, %v13174_v42  ;;  %v13225_v53 = vsel %vm1003_vm4, 1.0, %v18136_v51 }
  0x60   : > { %vm1005_vm6 = vcmp.ge.f32.partialorder %v973_v8, 0.0  ;;  %v1133_v54 = vadd.f32 1.0, %v1101_v45  ;;  %v912_v46 = vadd.f32 %v880_v6, %v13169_v37  ;;  %v1548_v61 = vmul.f32 1.442695, %v1515_v30 }
  0x61   : > { %12417 = vrcp.f32 %v1132_v11  ;;  %v1517_v62 = vmul.f32 %v1485_v50, %v1069_v7  ;;  %v1070_v63 = vand.u32 2147483647, %v974_v18  ;;  %v13231_v60 = vsel %vm1004_vm5, 1.0, %v18136_v51 }
  0x62   : > { %12419 = vpow2.f32 %v1546_v44  ;;  %v1550_v13 = vmul.f32 1.442695, %v1516_v32  ;;  %v975_v2 = vmul.f32 0.70710677, %v911_v52  ;;  %v13234_v58 = vsel %vm1005_vm6, 1.0, %v18136_v51 }
  0x63   : > { %12421 = vrcp.f32 %v1133_v54  ;;  %v13236_v8 = vmul.f32 0.5, %v910_v12  ;;  %v1102_v15 = vmul.f32 0.3275911, %v1070_v63  ;;  %vm1006_vm7 = vcmp.ge.f32.partialorder %v974_v18, 0.0 }
  0x64   : > { %v1486_v6 = vsub.f32 0.0, %v1070_v63  ;;  %v1071_v48 = vand.u32 2147483647, %v975_v2  ;;  %v976_v24 = vmul.f32 0.70710677, %v912_v46  ;;  %12423 = vpow2.f32 %v1548_v61 }
  0x65   : > { %v1552_v28 = vmul.f32 1.442695, %v1517_v62  ;;  %v1134_v36 = vadd.f32 1.0, %v1102_v15  ;;  %v913_v40 = vadd.f32 %v881_v10, %v13174_v42  ;;  %12425 = vpow2.f32 %v1550_v13 }
  0x66   : > { %v1103_v5 = vmul.f32 0.3275911, %v1071_v48  ;;  %v1487_v31 = vsub.f32 0.0, %v1071_v48  ;;  %v1072_v30 = vand.u32 2147483647, %v976_v24  ;;  %v13240_v7 = vsel %vm1006_vm7, 1.0, %v18136_v51 }
  0x67   : > { %12427 = vrcp.f32 %v1134_v36  ;;  %v13242_v11 = vmul.f32 0.5, %v911_v52  ;;  %vm1007_vm8 = vcmp.ge.f32.partialorder %v975_v2, 0.0  ;;  %v1518_v32 = vmul.f32 %v1486_v6, %v1070_v63 }
  0x68   : > { %v1135_v12 = vadd.f32 1.0, %v1103_v5  ;;  %v1104_v44 = vmul.f32 0.3275911, %v1072_v30  ;;  %v1488_v45 = vsub.f32 0.0, %v1072_v30  ;;  %12429 = vpow2.f32 %v1552_v28 }
  0x69   : > { %v13244_v50 = vmul.f32 0.5, %v912_v46  ;;  %v13246_v18 = vmul.f32 0.70710677, %v913_v40  ;;  %v850_v10 = vmul.f32 %v13214_v43, %v13074_v14  ;;  %v13253_v61 = vsel %vm1007_vm8, 1.0, %v18136_v51 }
  0x6a   : > { %12431 = vrcp.f32 %v1135_v12  ;;  %v1519_v52 = vmul.f32 %v1487_v31, %v1071_v48  ;;  %v1136_v62 = vadd.f32 1.0, %v1104_v44  ;;  %vm1008_vm9 = vcmp.ge.f32.partialorder %v976_v24, 0.0 }
  0x6b   : > { %v13250_v54 = vpop.eup %12413  ;;  %v1073_v46 = vand.u32 2147483647, %v13246_v18  ;;  %v882_v2 = vmul.f32 %v850_v10, %v13150_v22  ;;  %v1554_v14 = vmul.f32 1.442695, %v1518_v32  ;;  %v1520_v6 = vmul.f32 %v1488_v45, %v1072_v30 }
  0x6c   : > { %v13255_v63 = vpop.eup %12415  ;;  %v1194_v13 = vmul.f32 1.0614054, %v13250_v54  ;;  %v851_v28 = vmul.f32 %v13214_v43, %v13077_v16  ;;  %12433 = vrcp.f32 %v1136_v62  ;;  %v1556_v44 = vmul.f32 1.442695, %v1519_v52 }
  0x6d   : > { %v1195_v15 = vmul.f32 1.0614054, %v13255_v63  ;;  %v1105_v48 = vmul.f32 0.3275911, %v1073_v46  ;;  %v1489_v5 = vsub.f32 0.0, %v1073_v46  ;;  %v13266_v24 = vsel %vm1008_vm9, 1.0, %v18136_v51 }
  0x6e   : > { %v1226_v36 = vadd.f32 -1.4531521, %v1194_v13  ;;  %v13263_v31 = vpop.eup %12417  ;;  %v13269_v10 = vadd.f32 %v882_v2, %v13169_v37  ;;  %v1558_v13 = vmul.f32 1.442695, %v1520_v6  ;;  %vm1009_vm10 = vcmp.ge.f32.partialorder %v13246_v18, 0.0 }
  0x6f   : > { %v1227_v12 = vadd.f32 -1.4531521, %v1195_v15  ;;  %v13271_v49 = vpop.eup %12419  ;;  %v1196_v16 = vmul.f32 1.0614054, %v13263_v31  ;;  %v1137_v43 = vadd.f32 1.0, %v1105_v48  ;;  %v1521_v32 = vmul.f32 %v1489_v5, %v1073_v46 }
  0x70   : > { %v1258_v30 = vmul.f32 %v13250_v54, %v1226_v36  ;;  %v13275_v45 = vpop.eup %12421  ;;  %v13279_v52 = vmul.f32 0.70710677, %v13269_v10  ;;  %v883_v15 = vmul.f32 %v851_v28, %v13155_v39  ;;  %v13283_v48 = vmul.f32 0.5, %v913_v40 }
  0x71   : > { %v1259_v62 = vmul.f32 %v13255_v63, %v1227_v12  ;;  %v1228_v41 = vadd.f32 -1.4531521, %v1196_v16  ;;  %v1197_v51 = vmul.f32 1.0614054, %v13275_v45  ;;  %12435 = vrcp.f32 %v1137_v43  ;;  %v12424_v36 = vpop.eup %12423 }
  0x72   : > { %v1290_v2 = vadd.f32 1.4214138, %v1258_v30  ;;  %12437 = vpow2.f32 %v1554_v14  ;;  %v1560_v46 = vmul.f32 1.442695, %v1521_v32  ;;  %v13285_v5 = vpop.eup %12425  ;;  %v1074_v16 = vand.u32 2147483647, %v13279_v52 }
  0x73   : > { %v1291_v55 = vadd.f32 1.4214138, %v1259_v62  ;;  %v1260_v12 = vmul.f32 %v13263_v31, %v1228_v41  ;;  %v1229_v23 = vadd.f32 -1.4531521, %v1197_v51  ;;  %12439 = vpow2.f32 %v1556_v44 }
  0x74   : > { %v1322_v6 = vmul.f32 %v13250_v54, %v1290_v2  ;;  %v13289_v28 = vpop.eup %12427  ;;  %12441 = vpow2.f32 %v1558_v13  ;;  %v13294_v14 = vadd.f32 %v883_v15, %v13174_v42  ;;  %v1106_v51 = vmul.f32 0.3275911, %v1074_v16 }
  0x75   : > { %v1323_v30 = vmul.f32 %v13255_v63, %v1291_v55  ;;  %v1292_v43 = vadd.f32 1.4214138, %v1260_v12  ;;  %v1261_v32 = vmul.f32 %v13275_v45, %v1229_v23  ;;  %v1198_v62 = vmul.f32 1.0614054, %v13289_v28  ;;  %v13298_v2 = vpop.eup %12429 }
  0x76   : > { %v1354_v40 = vadd.f32 -0.28449672, %v1322_v6  ;;  %12443 = vpow2.f32 %v1560_v46  ;;  %v1490_v44 = vsub.f32 0.0, %v1074_v16  ;;  %v1138_v12 = vadd.f32 1.0, %v1106_v51 }
  0x77   : > { %v1355_v41 = vadd.f32 -0.28449672, %v1323_v30  ;;  %v13300_v1 = vpop.eup %12431  ;;  %v1324_v13 = vmul.f32 %v13263_v31, %v1292_v43  ;;  %v1293_v15 = vadd.f32 1.4214138, %v1261_v32  ;;  %v1230_v0 = vadd.f32 -1.4531521, %v1198_v62 }
  0x78   : > { %v1386_v55 = vmul.f32 %v13250_v54, %v1354_v40  ;;  %v1199_v23 = vmul.f32 1.0614054, %v13300_v1  ;;  %v1522_v34 = vmul.f32 %v1490_v44, %v1074_v16  ;;  %12445 = vrcp.f32 %v1138_v12 }
  0x79   : > { %v1387_v6 = vmul.f32 %v13255_v63, %v1355_v41  ;;  %v1356_v57 = vadd.f32 -0.28449672, %v1324_v13  ;;  %v1325_v46 = vmul.f32 %v13275_v45, %v1293_v15  ;;  %v1262_v30 = vmul.f32 %v13289_v28, %v1230_v0  ;;  %v13308_v56 = vpop.eup %12433 }
  0x7a   : > { %v1418_v26 = vadd.f32 0.2548296, %v1386_v55  ;;  %v1231_v40 = vadd.f32 -1.4531521, %v1199_v23  ;;  %v1562_v43 = vmul.f32 1.442695, %v1522_v34 }
  0x7b   : > { %v1419_v4 = vadd.f32 0.2548296, %v1387_v6  ;;  %v1388_v62 = vmul.f32 %v13263_v31, %v1356_v57  ;;  %v1357_v41 = vadd.f32 -0.28449672, %v1325_v46  ;;  %v1294_v21 = vadd.f32 1.4214138, %v1262_v30 }
  0x7c   : > { %v1450_v32 = vmul.f32 %v13250_v54, %v1418_v26  ;;  %v1263_v51 = vmul.f32 %v13300_v1, %v1231_v40  ;;  %v1200_v44 = vmul.f32 1.0614054, %v13308_v56  ;;  %v13316_v0 = vmul.f32 0.70710677, %v13294_v14 }
  0x7d   : > { %v1451_v16 = vmul.f32 %v13255_v63, %v1419_v4  ;;  %v1420_v13 = vadd.f32 0.2548296, %v1388_v62  ;;  %v1389_v34 = vmul.f32 %v13275_v45, %v1357_v41  ;;  %v1326_v26 = vmul.f32 %v13289_v28, %v1294_v21 }
  0x7e   : > { %v1610_v55 = vmul.f32 %v13271_v49, %v1450_v32  ;;  %v13321_v54 = vpop.eup %12435  ;;  %v1295_v15 = vadd.f32 1.4214138, %v1263_v51  ;;  %v1232_v6 = vadd.f32 -1.4531521, %v1200_v44  ;;  %12447 = vpow2.f32 %v1562_v43 }
  0x7f   : > { %v1611_v57 = vmul.f32 %v12424_v36, %v1451_v16  ;;  %v12438_v4 = vpop.eup %12437  ;;  %v1452_v23 = vmul.f32 %v13263_v31, %v1420_v13  ;;  %v1421_v12 = vadd.f32 0.2548296, %v1389_v34  ;;  %v1358_v46 = vadd.f32 -0.28449672, %v1326_v26 }
  0x80   : > { %v1642_v63 = vsub.f32 1.0, %v1610_v55  ;;  %v12440_v30 = vpop.eup %12439  ;;  %v1327_v49 = vmul.f32 %v13300_v1, %v1295_v15  ;;  %v1264_v32 = vmul.f32 %v13308_v56, %v1232_v6  ;;  %v1201_v21 = vmul.f32 1.0614054, %v13321_v54 }
  0x81   : > { %v1643_v40 = vsub.f32 1.0, %v1611_v57  ;;  %v12442_v36 = vpop.eup %12441  ;;  %v1612_v43 = vmul.f32 %v13285_v5, %v1452_v23  ;;  %v1453_v41 = vmul.f32 %v13275_v45, %v1421_v12  ;;  %v1390_v31 = vmul.f32 %v13289_v28, %v1358_v46 }
  0x82   : > { %v1674_v62 = vmul.f32 %v1642_v63, %v13220_v17  ;;  %v1359_v51 = vadd.f32 -0.28449672, %v1327_v49  ;;  %v1296_v44 = vadd.f32 1.4214138, %v1264_v32  ;;  %v1233_v55 = vadd.f32 -1.4531521, %v1201_v21 }
  0x83   : > { %v1675_v16 = vmul.f32 %v1643_v40, %v13225_v53  ;;  %v13333_v13 = vpop.eup %12443  ;;  %v1644_v26 = vsub.f32 1.0, %v1612_v43  ;;  %v1613_v57 = vmul.f32 %v13298_v2, %v1453_v41  ;;  %v1422_v15 = vadd.f32 0.2548296, %v1390_v31 }
  0x84   : > { %v1706_v34 = vadd.f32 1.0, %v1674_v62  ;;  %v1391_v17 = vmul.f32 %v13300_v1, %v1359_v51  ;;  %v1328_v5 = vmul.f32 %v13308_v56, %v1296_v44  ;;  %v1265_v45 = vmul.f32 %v13321_v54, %v1233_v55 }
  0x85   : > { %v1707_v6 = vadd.f32 1.0, %v1675_v16  ;;  %v1676_v53 = vmul.f32 %v1644_v26, %v13231_v60  ;;  %v1645_v23 = vsub.f32 1.0, %v1613_v57  ;;  %v1454_v12 = vmul.f32 %v13289_v28, %v1422_v15  ;;  %v13343_v32 = vpop.eup %12445 }
  0x86   : > { %v1738_v63 = vmul.f32 %v1706_v34, %v13207_v33  ;;  %v1423_v40 = vadd.f32 0.2548296, %v1391_v17  ;;  %v1360_v49 = vadd.f32 -0.28449672, %v1328_v5  ;;  %v1297_v2 = vadd.f32 1.4214138, %v1265_v45 }
  0x87   : > { %v1739_v46 = vmul.f32 %v1707_v6, %v13210_v25  ;;  %v1708_v21 = vadd.f32 1.0, %v1676_v53  ;;  %v1677_v62 = vmul.f32 %v1645_v23, %v13234_v58  ;;  %v1614_v43 = vmul.f32 %v12438_v4, %v1454_v12 }
  0x88   : > { %1771 = vst.msk [vmem:[#allocation2 + $0x19] sm:$0xff] %vm365_vm1, %v1738_v63  ;;  %v1075_v33 = vand.u32 2147483647, %v13316_v0  ;;  %v1455_v60 = vmul.f32 %v13300_v1, %v1423_v40  ;;  %v1392_v28 = vmul.f32 %v13308_v56, %v1360_v49  ;;  %v1329_v25 = vmul.f32 %v13321_v54, %v1297_v2 }
  0x89   : > { %1772 = vst.msk [vmem:[#allocation2 + $0x21] sm:$0xff] %vm365_vm1, %v1739_v46  ;;  %v1202_v41 = vmul.f32 1.0614054, %v13343_v32  ;;  %v1740_v31 = vmul.f32 %v1708_v21, %v13212_v27  ;;  %v1709_v16 = vadd.f32 1.0, %v1677_v62  ;;  %v1646_v51 = vsub.f32 1.0, %v1614_v43 }
  0x8a   : > { %v1107_v44 = vmul.f32 0.3275911, %v1075_v33  ;;  %v1615_v55 = vmul.f32 %v12440_v30, %v1455_v60  ;;  %v1424_v58 = vadd.f32 0.2548296, %v1392_v28  ;;  %v1361_v4 = vadd.f32 -0.28449672, %v1329_v25 }
  0x8b   : > { %v1234_v34 = vadd.f32 -1.4531521, %v1202_v41  ;;  %v13354_v26 = vpop.eup %12447  ;;  %1773 = vst.msk [vmem:[#allocation2 + $0x31] sm:$0xff] %vm365_vm1, %v1740_v31  ;;  %v1741_v1 = vmul.f32 %v1709_v16, %v13216_v9  ;;  %v1678_v57 = vmul.f32 %v1646_v51, %v13240_v7  ;;  %v18170_v15 = vmov -1.0  }
  0x8c   : > { %v1041_v6 = vsel %vm1009_vm10, 1.0, %v18170_v15  ;;  %v1139_v27 = vadd.f32 1.0, %v1107_v44  ;;  %v1647_v17 = vsub.f32 1.0, %v1615_v55  ;;  %v1456_v5 = vmul.f32 %v13308_v56, %v1424_v58 }
  0x8d   : > { %v1393_v30 = vmul.f32 %v13321_v54, %v1361_v4  ;;  %v1266_v45 = vmul.f32 %v13343_v32, %v1234_v34  ;;  %1774 = vst.msk [vmem:[#allocation2 + $0x39] sm:$0xff] %vm365_vm1, %v1741_v1  ;;  %v1710_v63 = vadd.f32 1.0, %v1678_v57  ;;  %v1491_v53 = vsub.f32 0.0, %v1075_v33 }
  0x8e   : > { %12449 = vrcp.f32 %v1139_v27  ;;  %v852_v9 = vmul.f32 %v13228_v3, %v13084_v29  ;;  %v1679_v18 = vmul.f32 %v1647_v17, %v13253_v61  ;;  %v1616_v23 = vmul.f32 %v12442_v36, %v1456_v5 }
  0x8f   : > { %v1836_v7 = vld [vmem:[#allocation2 + $0x18] sm:$0xff]  ;;  %v1425_v12 = vadd.f32 0.2548296, %v1393_v30  ;;  %v1298_v46 = vadd.f32 1.4214138, %v1266_v45  ;;  %v1742_v40 = vmul.f32 %v1710_v63, %v13236_v8  ;;  %vm1010_vm11 = vcmp.ge.f32.partialorder %v13279_v52, 0.0 }
  0x90   : > { %11493 = vmatprep.mubr.msk.f32.mxu0 %vm365_vm1, %v1836_v7  ;;  %v1837_v56 = vld [vmem:[#allocation2 + $0x20] sm:$0xff]  ;;  %11546 = vmatprep.mubr.msk.f32.mxu1 %vm365_vm1, %v1836_v7  ;;  %v884_v49 = vmul.f32 %v852_v9, %v13150_v22  ;;  %v853_v29 = vmul.f32 %v13228_v3, %v13087_v19  ;;  %v1711_v61 = vadd.f32 1.0, %v1679_v18  ;;  %v1648_v36 = vsub.f32 1.0, %v1616_v23  ;;  %v12721_v8 = vld [vmem:[%s18129_s3 + $0x8] sm:$0xf] }
  0x91   : > { %11494 = vmatmul.mubr.msk.f32.vlgmr.msra.gmra.mxu0 %vm365_vm1, %v1837_v56  ;;  %11547 = vmatmul.mubr.msk.f32.gmra.mxu1 %vm365_vm1, %v1837_v56  ;;  %v1457_v2 = vmul.f32 %v13321_v54, %v1425_v12  ;;  %v1330_v21 = vmul.f32 %v13343_v32, %v1298_v46  ;;  %1775 = vst.msk [vmem:[#allocation2 + $0x49] sm:$0xff] %vm365_vm1, %v1742_v40  ;;  %v816_v43 = vadd.f32 1e-05, %v13202_v47  ;;  %vm1011_vm12 = vcmp.ge.f32.partialorder %v13316_v0, 0.0 }
  0x92   : > { %11592 = vmatpush3.msk.msra.mxu0 %vm1966_vm0, %v12721_v8  ;;  %v1523_v62 = vmul.f32 %v1491_v53, %v1075_v33  ;;  %v916_v19 = vadd.f32 %v884_v49, %v13169_v37  ;;  %v885_v3 = vmul.f32 %v853_v29, %v13155_v39  ;;  %v1838_v60 = vld [vmem:[#allocation2 + $0x30] sm:$0xff]  ;;  %v1743_v54 = vmul.f32 %v1711_v61, %v13242_v11 }
  0x93   : > { %v1680_v28 = vmul.f32 %v1648_v36, %v13266_v24  ;;  %v1617_v25 = vmul.f32 %v13333_v13, %v1457_v2  ;;  %v1362_v41 = vadd.f32 -0.28449672, %v1330_v21  ;;  %11496 = vmatprep.mubr.msk.f32.mxu0 %vm365_vm1, %v1838_v60  ;;  %11549 = vmatprep.mubr.msk.f32.mxu1 %vm365_vm1, %v1838_v60  ;;  %12451 = vrsqrt.f32 %v816_v43 }
  0x94   : > { %v13394_v33 = vmul.f32 0.70710677, %v916_v19  ;;  %v917_v31 = vadd.f32 %v885_v3, %v13174_v42  ;;  %v1839_v47 = vld [vmem:[#allocation2 + $0x38] sm:$0xff]  ;;  %1776 = vst.msk [vmem:[#allocation2 + $0x51] sm:$0xff] %vm365_vm1, %v1743_v54  ;;  %v716_v13 = vrot.slane %v13199_v59, 4  ;;  %v18171_v58 = vrot.slane %v13143_v38, 2 }
  0x95   : > { %v1712_v11 = vadd.f32 1.0, %v1680_v28  ;;  %v1649_v16 = vsub.f32 1.0, %v1617_v25  ;;  %v1394_v24 = vmul.f32 %v13343_v32, %v1362_v41  ;;  %11497 = vmatmul.mubr.msk.f32.gmra.mxu0 %vm365_vm1, %v1839_v47  ;;  %11550 = vmatmul.mubr.msk.f32.gmra.mxu1 %vm365_vm1, %v1839_v47  ;;  %v1564_v51 = vmul.f32 1.442695, %v1523_v62  ;;  %v18173_v3 = vld [vmem:[#allocation5_spill] sm:$0xff] }
  0x96   : > { %v1076_v44 = vand.u32 2147483647, %v13394_v33  ;;  %v13403_v55 = vmul.f32 0.70710677, %v917_v31  ;;  %v512_v4 = vadd.f32 %v18171_v58, %v13143_v38  ;;  %v946_v57 = vmul.f32 0.5, %v13269_v10 }
  0x97   : > { %v1744_v34 = vmul.f32 %v1712_v11, %v13244_v50  ;;  %v1681_v1 = vmul.f32 %v1649_v16, %v1041_v6  ;;  %v1426_v27 = vadd.f32 0.2548296, %v1394_v24  ;;  %v1042_v17 = vsel %vm1010_vm11, 1.0, %v18170_v15  ;;  %v18175_v16 = vld [vmem:[#allocation3_spill] sm:$0xff] }
  0x98   : > { %v13414_v5 = vmul.f32 0.5, %v13294_v14  ;;  %v1108_v30 = vmul.f32 0.3275911, %v1076_v44  ;;  %v1077_v45 = vand.u32 2147483647, %v13403_v55  ;;  %v1840_v63 = vld [vmem:[#allocation2 + $0x48] sm:$0xff]  ;;  %v717_v52 = vadd.f32 %v716_v13, %v13199_v59 }
  0x99   : > { %1777 = vst.msk [vmem:[#allocation2 + $0x61] sm:$0xff] %vm365_vm1, %v1744_v34  ;;  %v1713_v38 = vadd.f32 1.0, %v1681_v1  ;;  %v1458_v50 = vmul.f32 %v13343_v32, %v1426_v27  ;;  %v13422_v10 = vsel %vm1011_vm12, 1.0, %v18170_v15  ;;  %11499 = vmatprep.mubr.msk.f32.mxu0 %vm365_vm1, %v1840_v63  ;;  %11552 = vmatprep.mubr.msk.f32.mxu1 %vm365_vm1, %v1840_v63  ;;  %12453 = vpow2.f32 %v1564_v51  ;;  %v18176_v13 = vld [vmem:[#allocation4_spill] sm:$0xff] }
  0x9a   : > { %v1140_v14 = vadd.f32 1.0, %v1108_v30  ;;  %v1492_v6 = vsub.f32 0.0, %v1076_v44  ;;  %v1109_v53 = vmul.f32 0.3275911, %v1077_v45  ;;  %v718_v18 = vrot.slane %v717_v52, 2 }
  0x9b   : > { %v13427_v9 = vpop.eup %12449  ;;  %v1745_v7 = vmul.f32 %v1713_v38, %v13283_v48  ;;  %v1618_v32 = vmul.f32 %v13354_v26, %v1458_v50  ;;  %v18172_v0 = vrot.slane %v13164_v35, 1  ;;  %v1841_v59 = vld [vmem:[#allocation2 + $0x50] sm:$0xff]  ;;  %v13435_v46 = vmul.f32 0.5, %v916_v19  ;;  %v18177_v38 = vld [vmem:[#allocation6_spill] sm:$0xff] }
  0x9c   : > { %v1203_v12 = vmul.f32 1.0614054, %v13427_v9  ;;  %12455 = vrcp.f32 %v1140_v14  ;;  %v1141_v56 = vadd.f32 1.0, %v1109_v53  ;;  %11500 = vmatmul.mubr.msk.f32.gmra.mxu0 %vm365_vm1, %v1841_v59  ;;  %11553 = vmatmul.mubr.msk.f32.gmra.mxu1 %vm365_vm1, %v1841_v59  ;;  %v1493_v26 = vsub.f32 0.0, %v1077_v45 }
  0x9d   : > { %v505_v23 = vadd.f32 %v18172_v0, %v13164_v35  ;;  %1778 = vst.msk [vmem:[#allocation2 + $0x69] sm:$0xff] %vm365_vm1, %v1745_v7  ;;  %v1650_v48 = vsub.f32 1.0, %v1618_v32  ;;  %v719_v40 = vadd.f32 %v718_v18, %v717_v52  ;;  %vm1012_vm13 = vcmp.ge.f32.partialorder %v13394_v33, 0.0  ;;  %v18178_v52 = vld [vmem:[#allocation7_spill] sm:$0xff] }
  0x9e   : > { %v1235_v29 = vadd.f32 -1.4531521, %v1203_v12  ;;  %v13441_v35 = vmul.f32 0.5, %v917_v31  ;;  %v513_v61 = vrot.slane %v512_v4, 1  ;;  %v1524_v2 = vmul.f32 %v1492_v6, %v1076_v44  ;;  %v18174_v31 = vld [vmem:[#allocation11_spill] sm:$0xff] }
  0x9f   : > { %v578_v49 = vmul.f32 0.0625, %v505_v23  ;;  %v1682_v36 = vmul.f32 %v1650_v48, %v1042_v17  ;;  %12457 = vrcp.f32 %v1141_v56  ;;  %v720_v21 = vrot.slane %v719_v40, 1 }
  0xa0   : > { %v1842_v8 = vld [vmem:[#allocation2 + $0x60] sm:$0xff]  ;;  %v1267_v62 = vmul.f32 %v13427_v9, %v1235_v29  ;;  %v514_v60 = vadd.f32 %v513_v61, %v512_v4  ;;  %v12452_v54 = vpop.eup %12451  ;;  %v1525_v25 = vmul.f32 %v1493_v26, %v1077_v45  ;;  %v520_v47 = vrot.slane %v18174_v31, 2 }
  0xa1   : > { %v13445_v19 = vsub.f32 %v13110_v20, %v578_v49  ;;  %v13448_v43 = vsub.f32 %v18173_v3, %v578_v49  ;;  %11502 = vmatprep.mubr.msk.f32.mxu0 %vm365_vm1, %v1842_v8  ;;  %v1714_v28 = vadd.f32 1.0, %v1682_v36  ;;  %11555 = vmatprep.mubr.msk.f32.mxu1 %vm365_vm1, %v1842_v8  ;;  %v721_v41 = vadd.f32 %v720_v21, %v719_v40 }
  0xa2   : > { %v1299_v11 = vadd.f32 1.4214138, %v1267_v62  ;;  %v854_v24 = vmul.f32 %v12452_v54, %v18175_v16  ;;  %v855_v20 = vmul.f32 %v12452_v54, %v18176_v13  ;;  %v579_v34 = vmul.f32 0.0625, %v514_v60 }
  0xa3   : > { %v634_v51 = vmul.f32 %v13445_v19, %v13445_v19  ;;  %v1746_v44 = vmul.f32 %v1714_v28, %v946_v57  ;;  %v801_v58 = vmul.f32 0.0625, %v721_v41  ;;  %v635_v4 = vmul.f32 %v13448_v43, %v13448_v43 }
  0xa4   : > { %v1843_v1 = vld [vmem:[#allocation2 + $0x68] sm:$0xff]  ;;  %v1331_v27 = vmul.f32 %v13427_v9, %v1299_v11  ;;  %v886_v17 = vmul.f32 %v854_v24, %v13150_v22  ;;  %v887_v30 = vmul.f32 %v855_v20, %v13155_v39  ;;  %v13468_v50 = vsub.f32 %v18177_v38, %v579_v34 }
  0xa5   : > { %v722_v45 = vsel %vm365_vm1, %v634_v51, 0.0  ;;  %11503 = vmatmul.mubr.msk.f32.gmra.mxu0 %vm365_vm1, %v1843_v1  ;;  %1779 = vst.msk [vmem:[#allocation2 + $0x79] sm:$0xff] %vm365_vm1, %v1746_v44  ;;  %11556 = vmatmul.mubr.msk.f32.gmra.mxu1 %vm365_vm1, %v1843_v1  ;;  %v817_v57 = vadd.f32 1e-05, %v801_v58  ;;  %v723_v63 = vsel %vm365_vm1, %v635_v4, 0.0  ;;  %v13471_v14 = vsub.f32 %v18178_v52, %v579_v34 }
  0xa6   : > { %v1363_v6 = vadd.f32 -0.28449672, %v1331_v27  ;;  %v918_v53 = vadd.f32 %v886_v17, %v13169_v37  ;;  %v13475_v7 = vadd.f32 %v887_v30, %v13174_v42  ;;  %v724_v32 = vadd.f32 %v723_v63, %v722_v45  ;;  %v12454_v18 = vpop.eup %12453 }
  0xa7   : > { %v1566_v0 = vmul.f32 1.442695, %v1524_v2  ;;  %12459 = vrsqrt.f32 %v817_v57  ;;  %v636_v23 = vmul.f32 %v13468_v50, %v13468_v50  ;;  %v637_v59 = vmul.f32 %v13471_v14, %v13471_v14 }
  0xa8   : > { %v1395_v12 = vmul.f32 %v13427_v9, %v1363_v6  ;;  %vm1013_vm14 = vcmp.ge.f32.partialorder %v13403_v55, 0.0  ;;  %v1568_v56 = vmul.f32 1.442695, %v1525_v25  ;;  %v13483_v48 = vmul.f32 0.70710677, %v918_v53 }
  0xa9   : > { %v13485_v26 = vpop.eup %12455  ;;  %v13490_v40 = vsel %vm1012_vm13, 1.0, %v18170_v15  ;;  %v13493_v49 = vmul.f32 0.70710677, %v13475_v7  ;;  %v725_v29 = vrot.slane %v724_v32, 4  ;;  %v521_v61 = vadd.f32 %v520_v47, %v18174_v31 }
  0xaa   : > { %v1427_v36 = vadd.f32 0.2548296, %v1395_v12  ;;  %v1204_v2 = vmul.f32 1.0614054, %v13485_v26  ;;  %v731_v55 = vsel %vm365_vm1, %v636_v23, 0.0  ;;  %v732_v21 = vsel %vm365_vm1, %v637_v59, 0.0 }
  0xab   : > { %12461 = vpow2.f32 %v1566_v0  ;;  %v13500_v8 = vsel %vm1013_vm14, 1.0, %v18170_v15  ;;  %v1078_v33 = vand.u32 2147483647, %v13483_v48  ;;  %v1079_v62 = vand.u32 2147483647, %v13493_v49 }
  0xac   : > { %v13504_v3 = vpop.eup %12457  ;;  %v1844_v60 = vld [vmem:[#allocation2 + $0x78] sm:$0xff]  ;;  %v1459_v54 = vmul.f32 %v13427_v9, %v1427_v36  ;;  %v1236_v28 = vadd.f32 -1.4531521, %v1204_v2  ;;  %12463 = vpow2.f32 %v1568_v56  ;;  %v726_v25 = vadd.f32 %v725_v29, %v724_v32  ;;  %v18180_v36 = vld [vmem:[#allocation9_spill] sm:$0xff] }
  0xad   : > { %11505 = vmatprep.mubr.msk.f32.mxu0 %vm365_vm1, %v1844_v60  ;;  %11558 = vmatprep.mubr.msk.f32.mxu1 %vm365_vm1, %v1844_v60  ;;  %v1205_v41 = vmul.f32 1.0614054, %v13504_v3  ;;  %v1110_v31 = vmul.f32 0.3275911, %v1078_v33  ;;  %v733_v47 = vadd.f32 %v732_v21, %v731_v55  ;;  %v522_v11 = vrot.slane %v521_v61, 1  ;;  %v18179_v56 = vld [vmem:[#allocation8_spill] sm:$0xff] }
  0xae   : > { %v1619_v16 = vmul.f32 %v12454_v18, %v1459_v54  ;;  %v1268_v24 = vmul.f32 %v13485_v26, %v1236_v28  ;;  %v1111_v13 = vmul.f32 0.3275911, %v1079_v62  ;;  %v727_v20 = vrot.slane %v726_v25, 2 }
  0xaf   : > { %v1237_v51 = vadd.f32 -1.4531521, %v1205_v41  ;;  %v1142_v44 = vadd.f32 1.0, %v1110_v31  ;;  %v1494_v9 = vsub.f32 0.0, %v1078_v33  ;;  %v1495_v58 = vsub.f32 0.0, %v1079_v62 }
  0xb0   : > { %v1651_v4 = vsub.f32 1.0, %v1619_v16  ;;  %v1300_v34 = vadd.f32 1.4214138, %v1268_v24  ;;  %v1143_v1 = vadd.f32 1.0, %v1111_v13  ;;  %v728_v27 = vadd.f32 %v727_v20, %v726_v25  ;;  %v12722_v13 = vld [vmem:[%s12938_s20 + $0xa0] sm:$0xff] }
  0xb1   : > { %v1269_v17 = vmul.f32 %v13504_v3, %v1237_v51  ;;  %v13512_v30 = vmul.f32 0.5, %v918_v53  ;;  %vm1014_vm15 = vcmp.ge.f32.partialorder %v13483_v48, 0.0  ;;  %12465 = vrcp.f32 %v1142_v44  ;;  %v12723_v51 = vld [vmem:[%s12938_s20 + $0xa8] sm:$0xff] }
  0xb2   : > { %v1683_v45 = vmul.f32 %v1651_v4, %v13422_v10  ;;  %v1332_v57 = vmul.f32 %v13485_v26, %v1300_v34  ;;  %12467 = vrcp.f32 %v1143_v1  ;;  %v729_v63 = vrot.slane %v728_v27, 1 }
  0xb3   : > { %v1301_v38 = vadd.f32 1.4214138, %v1269_v17  ;;  %v1526_v52 = vmul.f32 %v1494_v9, %v1078_v33  ;;  %v734_v6 = vrot.slane %v733_v47, 4  ;;  %v523_v32 = vadd.f32 %v522_v11, %v521_v61 }
  0xb4   : > { %v12460_v18 = vpop.eup %12459  ;;  %v1715_v0 = vadd.f32 1.0, %v1683_v45  ;;  %v1364_v23 = vadd.f32 -0.28449672, %v1332_v57  ;;  %v1527_v59 = vmul.f32 %v1495_v58, %v1079_v62  ;;  %v730_v12 = vadd.f32 %v729_v63, %v728_v27 }
  0xb5   : > { %v1333_v53 = vmul.f32 %v13504_v3, %v1301_v38  ;;  %v856_v29 = vmul.f32 %v12460_v18, %v18179_v56  ;;  %v857_v2 = vmul.f32 %v12460_v18, %v18180_v36  ;;  %v735_v10 = vadd.f32 %v734_v6, %v733_v47 }
  0xb6   : > { %v1747_v55 = vmul.f32 %v1715_v0, %v13414_v5  ;;  %v1396_v21 = vmul.f32 %v13485_v26, %v1364_v23  ;;  %v802_v60 = vmul.f32 0.0625, %v730_v12  ;;  %v580_v33 = vmul.f32 0.0625, %v523_v32 }
  0xb7   : > { %v1365_v61 = vadd.f32 -0.28449672, %v1333_v53  ;;  %v1570_v54 = vmul.f32 1.442695, %v1526_v52  ;;  %v888_v28 = vmul.f32 %v856_v29, %v13150_v22  ;;  %v889_v62 = vmul.f32 %v857_v2, %v13155_v39 }
  0xb8   : > { %v12462_v25 = vpop.eup %12461  ;;  %1780 = vst.msk [vmem:[#allocation2 + $0x81] sm:$0xff] %vm365_vm1, %v1747_v55  ;;  %v1428_v41 = vadd.f32 0.2548296, %v1396_v21  ;;  %vm1015_vm2 = vcmp.ge.f32.partialorder %v13493_v49, 0.0  ;;  %v818_v31 = vadd.f32 1e-05, %v802_v60  ;;  %v13530_v22 = vsub.f32 %v12722_v13, %v580_v33 }
  0xb9   : > { %v736_v5 = vrot.slane %v735_v10, 2  ;;  %v12464_v47 = vpop.eup %12463  ;;  %v1397_v11 = vmul.f32 %v13504_v3, %v1365_v61  ;;  %v920_v16 = vadd.f32 %v888_v28, %v13169_v37  ;;  %v921_v24 = vadd.f32 %v889_v62, %v13174_v42 }
  0xba   : > { %v1460_v39 = vmul.f32 %v13485_v26, %v1428_v41  ;;  %v1572_v20 = vmul.f32 1.442695, %v1527_v59  ;;  %12469 = vrsqrt.f32 %v818_v31  ;;  %v13534_v44 = vsub.f32 %v12723_v51, %v580_v33 }
  0xbb   : > { %v1429_v9 = vadd.f32 0.2548296, %v1397_v11  ;;  %v13539_v58 = vsel %vm1014_vm15, 1.0, %v18170_v15  ;;  %v13542_v37 = vmul.f32 0.5, %v13475_v7  ;;  %v13544_v42 = vmul.f32 0.70710677, %v920_v16 }
  0xbc   : > { %v1620_v4 = vmul.f32 %v12462_v25, %v1460_v39  ;;  %v13549_v26 = vsel %vm1015_vm2, 1.0, %v18170_v15  ;;  %v13551_v34 = vmul.f32 0.70710677, %v921_v24  ;;  %v737_v1 = vadd.f32 %v736_v5, %v735_v10  ;;  %v18181_v5 = vld [vmem:[#allocation10_spill] sm:$0xff] }
  0xbd   : > { %v1461_v27 = vmul.f32 %v13504_v3, %v1429_v9  ;;  %12471 = vpow2.f32 %v1570_v54  ;;  %v1080_v48 = vand.u32 2147483647, %v13544_v42  ;;  %v638_v7 = vmul.f32 %v13530_v22, %v13530_v22 }
  0xbe   : > { %v13557_v17 = vpop.eup %12465  ;;  %v1652_v45 = vsub.f32 1.0, %v1620_v4  ;;  %12473 = vpow2.f32 %v1572_v20  ;;  %v1081_v57 = vand.u32 2147483647, %v13551_v34  ;;  %v639_v49 = vmul.f32 %v13534_v44, %v13534_v44 }
  0xbf   : > { %v13562_v63 = vpop.eup %12467  ;;  %v1845_v38 = vld [vmem:[#allocation2 + $0x80] sm:$0xff]  ;;  %v1621_v52 = vmul.f32 %v12464_v47, %v1461_v27  ;;  %v1206_v3 = vmul.f32 1.0614054, %v13557_v17  ;;  %v13565_v6 = vmul.f32 0.5, %v920_v16  ;;  %v1112_v32 = vmul.f32 0.3275911, %v1080_v48 }
  0xc0   : > { %11506 = vmatmul.mubr.msk.f32.gmra.mxu0 %vm365_vm1, %v1845_v38  ;;  %v1684_v18 = vmul.f32 %v1652_v45, %v13490_v40  ;;  %11559 = vmatmul.mubr.msk.f32.gmra.mxu1 %vm365_vm1, %v1845_v38  ;;  %v1207_v0 = vmul.f32 1.0614054, %v13562_v63  ;;  %v1113_v23 = vmul.f32 0.3275911, %v1081_v57  ;;  %v738_v59 = vrot.slane %v737_v1, 1  ;;  %v18182_v47 = vld [vmem:[#allocation12_spill] sm:$0xff] }
  0xc1   : > { %v1653_v12 = vsub.f32 1.0, %v1621_v52  ;;  %v1238_v53 = vadd.f32 -1.4531521, %v1206_v3  ;;  %v1144_v56 = vadd.f32 1.0, %v1112_v32  ;;  %v740_v29 = vsel %vm365_vm1, %v638_v7, 0.0  ;;  %v13603_v38 = vld [vmem:[%s12938_s20 + $0xc0] sm:$0xff] }
  0xc2   : > { %v1716_v36 = vadd.f32 1.0, %v1684_v18  ;;  %v1239_v2 = vadd.f32 -1.4531521, %v1207_v0  ;;  %v1145_v10 = vadd.f32 1.0, %v1113_v23  ;;  %v741_v55 = vsel %vm365_vm1, %v639_v49, 0.0  ;;  %v13606_v52 = vld [vmem:[%s12938_s20 + $0xc8] sm:$0xff] }
  0xc3   : > { %v1685_v21 = vmul.f32 %v1653_v12, %v13500_v8  ;;  %v1270_v40 = vmul.f32 %v13557_v17, %v1238_v53  ;;  %12475 = vrcp.f32 %v1144_v56  ;;  %v1496_v60 = vsub.f32 0.0, %v1080_v48  ;;  %v13613_v12 = vld [vmem:[%s18128_s2] sm:$0xff]  ;;  %v13619_v56 = vld [vmem:[%s18128_s2 + $0x8] sm:$0xff] }
  0xc4   : > { %v1748_v33 = vmul.f32 %v1716_v36, %v13435_v46  ;;  %v1271_v61 = vmul.f32 %v13562_v63, %v1239_v2  ;;  %12477 = vrcp.f32 %v1145_v10  ;;  %v1497_v54 = vsub.f32 0.0, %v1081_v57 }
  0xc5   : > { %v1717_v28 = vadd.f32 1.0, %v1685_v21  ;;  %v1302_v62 = vadd.f32 1.4214138, %v1270_v40  ;;  %v13577_v25 = vmul.f32 0.5, %v921_v24  ;;  %v739_v41 = vadd.f32 %v738_v59, %v737_v1  ;;  %v13627_v40 = vld [vmem:[%s12938_s20 + $0xd0] sm:$0xff] }
  0xc6   : > { %1781 = vst.msk [vmem:[#allocation2 + $0x91] sm:$0xff] %vm365_vm1, %v1748_v33  ;;  %v1303_v31 = vadd.f32 1.4214138, %v1271_v61  ;;  %vm1016_vm3 = vcmp.ge.f32.partialorder %v13544_v42, 0.0  ;;  %v742_v8 = vadd.f32 %v741_v55, %v740_v29  ;;  %v526_v11 = vadd.f32 %v18182_v47, %v18181_v5 }
  0xc7   : > { %v12470_v16 = vpop.eup %12469  ;;  %v1749_v46 = vmul.f32 %v1717_v28, %v13441_v35  ;;  %v1334_v13 = vmul.f32 %v13557_v17, %v1302_v62  ;;  %v1528_v39 = vmul.f32 %v1496_v60, %v1080_v48  ;;  %v803_v20 = vmul.f32 0.0625, %v739_v41  ;;  %v13593_v48 = vld [vmem:[%s18127_s1] sm:$0xff] }
  0xc8   : > { %v1335_v24 = vmul.f32 %v13562_v63, %v1303_v31  ;;  %v1529_v51 = vmul.f32 %v1497_v54, %v1081_v57  ;;  %v858_v9 = vmul.f32 %v12470_v16, %v13445_v19  ;;  %v859_v4 = vmul.f32 %v12470_v16, %v13448_v43  ;;  %v13599_v19 = vld [vmem:[%s18127_s1 + $0x8] sm:$0xff] }
  0xc9   : > { %1782 = vst.msk [vmem:[#allocation2 + $0x99] sm:$0xff] %vm365_vm1, %v1749_v46  ;;  %v1366_v1 = vadd.f32 -0.28449672, %v1334_v13  ;;  %v819_v27 = vadd.f32 1e-05, %v803_v20  ;;  %v743_v7 = vrot.slane %v742_v8, 4 }
  0xca   : > { %v527_v45 = vrot.slane %v526_v11, 4  ;;  %v12472_v35 = vpop.eup %12471  ;;  %v1367_v49 = vadd.f32 -0.28449672, %v1335_v24  ;;  %vm1017_vm4 = vcmp.ge.f32.partialorder %v13551_v34, 0.0  ;;  %v890_v57 = vmul.f32 %v13593_v48, %v858_v9 }
  0xcb   : > { %v891_v43 = vmul.f32 %v13599_v19, %v859_v4  ;;  %v12474_v3 = vpop.eup %12473  ;;  %v1398_v32 = vmul.f32 %v13557_v17, %v1366_v1  ;;  %v1574_v18 = vmul.f32 1.442695, %v1528_v39  ;;  %12479 = vrsqrt.f32 %v819_v27 }
  0xcc   : > { %v744_v0 = vadd.f32 %v743_v7, %v742_v8  ;;  %v1399_v23 = vmul.f32 %v13562_v63, %v1367_v49  ;;  %v1576_v59 = vmul.f32 1.442695, %v1529_v51  ;;  %v922_v53 = vadd.f32 %v13613_v12, %v890_v57 }
  0xcd   : > { %v923_v29 = vadd.f32 %v13619_v56, %v891_v43  ;;  %v1846_v36 = vld [vmem:[#allocation2 + $0x90] sm:$0xff]  ;;  %v1430_v2 = vadd.f32 0.2548296, %v1398_v32  ;;  %v528_v10 = vadd.f32 %v527_v45, %v526_v11  ;;  %v533_v55 = vsel %vm365_vm1, %v13603_v38, 0.0 }
  0xce   : > { %v534_v21 = vsel %vm365_vm1, %v13606_v52, 0.0  ;;  %11508 = vmatprep.mubr.msk.f32.mxu0 %vm365_vm1, %v1846_v36  ;;  %11561 = vmatprep.mubr.msk.f32.mxu1 %vm365_vm1, %v1846_v36  ;;  %v1431_v60 = vadd.f32 0.2548296, %v1399_v23  ;;  %v13634_v33 = vsel %vm1016_vm3, 1.0, %v18170_v15  ;;  %v13639_v61 = vsel %vm1017_vm4, 1.0, %v18170_v15 }
  0xcf   : > { %v13641_v54 = vmul.f32 0.70710677, %v922_v53  ;;  %v1462_v28 = vmul.f32 %v13557_v17, %v1430_v2  ;;  %12481 = vpow2.f32 %v1574_v18  ;;  %v13644_v62 = vmul.f32 0.70710677, %v923_v29 }
  0xd0   : > { %v745_v41 = vrot.slane %v744_v0, 2  ;;  %v13646_v31 = vpop.eup %12475  ;;  %v1847_v8 = vld [vmem:[#allocation2 + $0x98] sm:$0xff]  ;;  %v1463_v42 = vmul.f32 %v13562_v63, %v1431_v60  ;;  %12483 = vpow2.f32 %v1576_v59  ;;  %v13650_v47 = vadd.f32 %v534_v21, %v533_v55 }
  0xd1   : > { %v1082_v5 = vand.u32 2147483647, %v13641_v54  ;;  %v13652_v34 = vpop.eup %12477  ;;  %11509 = vmatmul.mubr.msk.f32.gmra.mxu0 %vm365_vm1, %v1847_v8  ;;  %v1622_v11 = vmul.f32 %v12472_v35, %v1462_v28  ;;  %11562 = vmatmul.mubr.msk.f32.gmra.mxu1 %vm365_vm1, %v1847_v8  ;;  %v1208_v17 = vmul.f32 1.0614054, %v13646_v31  ;;  %v529_v16 = vrot.slane %v528_v10, 2 }
  0xd2   : > { %v13659_v46 = vsel %vm365_vm1, %v13627_v40, 0.0  ;;  %v1623_v63 = vmul.f32 %v12474_v3, %v1463_v42  ;;  %v1209_v13 = vmul.f32 1.0614054, %v13652_v34  ;;  %v13662_v39 = vmul.f32 0.5, %v922_v53 }
  0xd3   : > { %v1114_v20 = vmul.f32 0.3275911, %v1082_v5  ;;  %v1654_v24 = vsub.f32 1.0, %v1622_v11  ;;  %v1240_v51 = vadd.f32 -1.4531521, %v1208_v17  ;;  %v746_v4 = vadd.f32 %v745_v41, %v744_v0 }
  0xd4   : > { %v1083_v9 = vand.u32 2147483647, %v13644_v62  ;;  %v1655_v1 = vsub.f32 1.0, %v1623_v63  ;;  %v1241_v27 = vadd.f32 -1.4531521, %v1209_v13  ;;  %v1498_v45 = vsub.f32 0.0, %v1082_v5 }
  0xd5   : > { %v1146_v7 = vadd.f32 1.0, %v1114_v20  ;;  %v1686_v35 = vmul.f32 %v1654_v24, %v13539_v58  ;;  %v1272_v49 = vmul.f32 %v13646_v31, %v1240_v51  ;;  %v13669_v18 = vmul.f32 0.5, %v923_v29 }
  0xd6   : > { %v1115_v57 = vmul.f32 0.3275911, %v1083_v9  ;;  %v1499_v43 = vsub.f32 0.0, %v1083_v9  ;;  %v1687_v3 = vmul.f32 %v1655_v1, %v13549_v26  ;;  %v1273_v32 = vmul.f32 %v13652_v34, %v1241_v27 }
  0xd7   : > { %12485 = vrcp.f32 %v1146_v7  ;;  %v1718_v23 = vadd.f32 1.0, %v1686_v35  ;;  %v1304_v59 = vadd.f32 1.4214138, %v1272_v49  ;;  %v530_v53 = vadd.f32 %v529_v16, %v528_v10 }
  0xd8   : > { %v1147_v0 = vadd.f32 1.0, %v1115_v57  ;;  %v12480_v36 = vpop.eup %12479  ;;  %v1719_v2 = vadd.f32 1.0, %v1687_v3  ;;  %v1305_v55 = vadd.f32 1.4214138, %v1273_v32  ;;  %v1530_v21 = vmul.f32 %v1498_v45, %v1082_v5  ;;  %v13702_v57 = vld [vmem:[%s12938_s20 + $0xd8] sm:$0xff] }
  0xd9   : > { %v747_v58 = vrot.slane %v746_v4, 1  ;;  %v1750_v60 = vmul.f32 %v1718_v23, %v13512_v30  ;;  %v1336_v28 = vmul.f32 %v13646_v31, %v1304_v59  ;;  %v1531_v26 = vmul.f32 %v1499_v43, %v1083_v9 }
  0xda   : > { %12487 = vrcp.f32 %v1147_v0  ;;  %v1751_v41 = vmul.f32 %v1719_v2, %v13542_v37  ;;  %v1337_v29 = vmul.f32 %v13652_v34, %v1305_v55  ;;  %v860_v8 = vmul.f32 %v12480_v36, %v13468_v50 }
  0xdb   : > { %v861_v42 = vmul.f32 %v12480_v36, %v13471_v14  ;;  %1783 = vst.msk [vmem:[#allocation2 + $0xa9] sm:$0xff] %vm365_vm1, %v1750_v60  ;;  %v1368_v10 = vadd.f32 -0.28449672, %v1336_v28  ;;  %v748_v11 = vadd.f32 %v747_v58, %v746_v4  ;;  %v531_v5 = vrot.slane %v530_v53, 1 }
  0xdc   : > { %v536_v17 = vrot.slane %v13650_v47, 4  ;;  %v12482_v30 = vpop.eup %12481  ;;  %1784 = vst.msk [vmem:[#allocation2 + $0xb1] sm:$0xff] %vm365_vm1, %v1751_v41  ;;  %v1369_v16 = vadd.f32 -0.28449672, %v1337_v29  ;;  %v1578_v63 = vmul.f32 1.442695, %v1530_v21  ;;  %v892_v37 = vmul.f32 %v13593_v48, %v860_v8 }
  0xdd   : > { %v893_v13 = vmul.f32 %v13599_v19, %v861_v42  ;;  %v12484_v20 = vpop.eup %12483  ;;  %v1400_v50 = vmul.f32 %v13646_v31, %v1368_v10  ;;  %vm1018_vm5 = vcmp.ge.f32.partialorder %v13641_v54, 0.0  ;;  %v804_v14 = vmul.f32 0.0625, %v748_v11  ;;  %v12728_v41 = vld [vmem:[%s12938_s20 + $0xb0] sm:$0xff]  ;;  %v12729_v8 = vld [vmem:[%s12938_s20 + $0xb8] sm:$0xff] }
  0xde   : > { %v532_v24 = vadd.f32 %v531_v5, %v530_v53  ;;  %v1401_v51 = vmul.f32 %v13652_v34, %v1369_v16  ;;  %v1580_v9 = vmul.f32 1.442695, %v1531_v26  ;;  %v13686_v4 = vadd.f32 %v13613_v12, %v892_v37 }
  0xdf   : > { %v13689_v1 = vadd.f32 %v13619_v56, %v893_v13  ;;  %v1432_v27 = vadd.f32 0.2548296, %v1400_v50  ;;  %vm1019_vm6 = vcmp.ge.f32.partialorder %v13644_v62, 0.0  ;;  %v820_v7 = vadd.f32 1e-05, %v804_v14 }
  0xe0   : > { %v13693_v45 = vadd.f32 %v536_v17, %v13650_v47  ;;  %v1433_v35 = vadd.f32 0.2548296, %v1401_v51  ;;  %v13696_v54 = vsel %vm1018_vm5, 1.0, %v18170_v15  ;;  %12489 = vpow2.f32 %v1578_v63 }
  0xe1   : > { %v13699_v49 = vmul.f32 0.70710677, %v13686_v4  ;;  %v1464_v43 = vmul.f32 %v13646_v31, %v1432_v27  ;;  %v13706_v3 = vmul.f32 0.70710677, %v13689_v1  ;;  %12491 = vrsqrt.f32 %v820_v7 }
  0xe2   : > { %v581_v62 = vmul.f32 0.0625, %v532_v24  ;;  %v1848_v32 = vld [vmem:[#allocation2 + $0xa8] sm:$0xff]  ;;  %v1465_v47 = vmul.f32 %v13652_v34, %v1433_v35  ;;  %v13710_v23 = vsel %vm1019_vm6, 1.0, %v18170_v15  ;;  %12493 = vpow2.f32 %v1580_v9  ;;  %v13741_v35 = vld [vmem:[%s12938_s20 + $0xe0] sm:$0xff] }
  0xe3   : > { %v1084_v59 = vand.u32 2147483647, %v13699_v49  ;;  %11511 = vmatprep.mubr.msk.f32.mxu0 %vm365_vm1, %v1848_v32  ;;  %v1849_v31 = vld [vmem:[#allocation2 + $0xb0] sm:$0xff]  ;;  %v1624_v53 = vmul.f32 %v12482_v30, %v1464_v43  ;;  %11564 = vmatprep.mubr.msk.f32.mxu1 %vm365_vm1, %v1848_v32  ;;  %v1085_v36 = vand.u32 2147483647, %v13706_v3  ;;  %v538_v34 = vrot.slane %v13693_v45, 2 }
  0xe4   : > { %v13713_v0 = vpop.eup %12485  ;;  %v543_v2 = vsel %vm365_vm1, %v13702_v57, 0.0  ;;  %11512 = vmatmul.mubr.msk.f32.gmra.mxu0 %vm365_vm1, %v1849_v31  ;;  %v1625_v55 = vmul.f32 %v12484_v20, %v1465_v47  ;;  %11565 = vmatmul.mubr.msk.f32.gmra.mxu1 %vm365_vm1, %v1849_v31  ;;  %v13725_v29 = vsub.f32 %v12728_v41, %v581_v62  ;;  %v13728_v42 = vsub.f32 %v12729_v8, %v581_v62  ;;  %v13748_v32 = vld [vmem:[%s12938_s20 + $0xe8] sm:$0xff] }
  0xe5   : > { %v1210_v21 = vmul.f32 1.0614054, %v13713_v0  ;;  %v1116_v58 = vmul.f32 0.3275911, %v1084_v59  ;;  %v1500_v60 = vsub.f32 0.0, %v1084_v59  ;;  %v1656_v28 = vsub.f32 1.0, %v1624_v53 }
  0xe6   : > { %v1117_v26 = vmul.f32 0.3275911, %v1085_v36  ;;  %v1657_v11 = vsub.f32 1.0, %v1625_v55  ;;  %v1501_v30 = vsub.f32 0.0, %v1085_v36  ;;  %v544_v14 = vadd.f32 %v543_v2, %v13659_v46 }
  0xe7   : > { %v13730_v10 = vpop.eup %12487  ;;  %v1242_v5 = vadd.f32 -1.4531521, %v1210_v21  ;;  %v1148_v17 = vadd.f32 1.0, %v1116_v58  ;;  %v1688_v16 = vmul.f32 %v1656_v28, %v13634_v33  ;;  %v1532_v37 = vmul.f32 %v1500_v60, %v1084_v59 }
  0xe8   : > { %v1211_v63 = vmul.f32 1.0614054, %v13730_v10  ;;  %v1149_v13 = vadd.f32 1.0, %v1117_v26  ;;  %v1689_v20 = vmul.f32 %v1657_v11, %v13639_v61  ;;  %vm1020_vm7 = vcmp.ge.f32.partialorder %v13699_v49, 0.0 }
  0xe9   : > { %v1274_v50 = vmul.f32 %v13713_v0, %v1242_v5  ;;  %12495 = vrcp.f32 %v1148_v17  ;;  %v1720_v24 = vadd.f32 1.0, %v1688_v16  ;;  %v1533_v27 = vmul.f32 %v1501_v30, %v1085_v36 }
  0xea   : > { %v1243_v51 = vadd.f32 -1.4531521, %v1211_v63  ;;  %12497 = vrcp.f32 %v1149_v13  ;;  %v1721_v9 = vadd.f32 1.0, %v1689_v20  ;;  %v640_v7 = vmul.f32 %v13725_v29, %v13725_v29 }
  0xeb   : > { %v1306_v33 = vadd.f32 1.4214138, %v1274_v50  ;;  %v1752_v61 = vmul.f32 %v1720_v24, %v13565_v6  ;;  %v1582_v62 = vmul.f32 1.442695, %v1532_v37  ;;  %v641_v46 = vmul.f32 %v13728_v42, %v13728_v42 }
  0xec   : > { %v1275_v43 = vmul.f32 %v13730_v10, %v1243_v51  ;;  %v1753_v47 = vmul.f32 %v1721_v9, %v13577_v25  ;;  %v749_v31 = vsel %vm365_vm1, %v640_v7, 0.0  ;;  %v539_v53 = vadd.f32 %v538_v34, %v13693_v45 }
  0xed   : > { %v1338_v59 = vmul.f32 %v13713_v0, %v1306_v33  ;;  %v12490_v36 = vpop.eup %12489  ;;  %1785 = vst.msk [vmem:[#allocation2 + $0xc1] sm:$0xff] %vm365_vm1, %v1752_v61  ;;  %v750_v2 = vsel %vm365_vm1, %v641_v46, 0.0  ;;  %v545_v55 = vrot.slane %v544_v14, 4  ;;  %v551_v21 = vsel %vm365_vm1, %v13741_v35, 0.0 }
  0xee   : > { %v1307_v6 = vadd.f32 1.4214138, %v1275_v43  ;;  %v12492_v58 = vpop.eup %12491  ;;  %1786 = vst.msk [vmem:[#allocation2 + $0xc9] sm:$0xff] %vm365_vm1, %v1753_v47  ;;  %v751_v60 = vadd.f32 %v750_v2, %v749_v31  ;;  %v540_v28 = vrot.slane %v539_v53, 1  ;;  %v552_v26 = vsel %vm365_vm1, %v13748_v32, 0.0 }
  0xef   : > { %v1370_v25 = vadd.f32 -0.28449672, %v1338_v59  ;;  %v12494_v45 = vpop.eup %12493  ;;  %v862_v41 = vmul.f32 %v12492_v58, %v13530_v22  ;;  %v863_v8 = vmul.f32 %v12492_v58, %v13534_v44  ;;  %v546_v11 = vadd.f32 %v545_v55, %v544_v14 }
  0xf0   : > { %v1339_v34 = vmul.f32 %v13730_v10, %v1307_v6  ;;  %v1584_v17 = vmul.f32 1.442695, %v1533_v27  ;;  %v752_v30 = vrot.slane %v751_v60, 4  ;;  %v541_v16 = vadd.f32 %v540_v28, %v539_v53 }
  0xf1   : > { %v1402_v5 = vmul.f32 %v13713_v0, %v1370_v25  ;;  %v894_v37 = vmul.f32 %v13593_v48, %v862_v41  ;;  %v895_v13 = vmul.f32 %v13599_v19, %v863_v8  ;;  %v553_v20 = vadd.f32 %v552_v26, %v551_v21 }
  0xf2   : > { %v1371_v63 = vadd.f32 -0.28449672, %v1339_v34  ;;  %v13768_v24 = vmul.f32 0.5, %v13686_v4  ;;  %v13771_v22 = vmul.f32 0.5, %v13689_v1  ;;  %v547_v44 = vrot.slane %v546_v11, 2 }
  0xf3   : > { %v1434_v50 = vadd.f32 0.2548296, %v1402_v5  ;;  %v13775_v51 = vadd.f32 %v13613_v12, %v894_v37  ;;  %v13778_v9 = vadd.f32 %v13619_v56, %v895_v13  ;;  %v753_v33 = vadd.f32 %v752_v30, %v751_v60 }
  0xf4   : > { %v1403_v14 = vmul.f32 %v13730_v10, %v1371_v63  ;;  %v1850_v27 = vld [vmem:[#allocation2 + $0xc0] sm:$0xff]  ;;  %v13784_v4 = vsel %vm1020_vm7, 1.0, %v18170_v15  ;;  %12499 = vpow2.f32 %v1582_v62  ;;  %v582_v1 = vmul.f32 0.0625, %v541_v16 }
  0xf5   : > { %v1466_v7 = vmul.f32 %v13713_v0, %v1434_v50  ;;  %11514 = vmatprep.mubr.msk.f32.mxu0 %vm365_vm1, %v1850_v27  ;;  %v1851_v43 = vld [vmem:[#allocation2 + $0xc8] sm:$0xff]  ;;  %11567 = vmatprep.mubr.msk.f32.mxu1 %vm365_vm1, %v1850_v27  ;;  %vm1021_vm8 = vcmp.ge.f32.partialorder %v13706_v3, 0.0  ;;  %12501 = vpow2.f32 %v1584_v17  ;;  %v13792_v0 = vmul.f32 0.70710677, %v13775_v51 }
  0xf6   : > { %v13786_v61 = vpop.eup %12495  ;;  %v1435_v46 = vadd.f32 0.2548296, %v1403_v14  ;;  %v554_v47 = vrot.slane %v553_v20, 4  ;;  %11515 = vmatmul.mubr.msk.f32.gmra.mxu0 %vm365_vm1, %v1851_v43  ;;  %11568 = vmatmul.mubr.msk.f32.gmra.mxu1 %vm365_vm1, %v1851_v43  ;;  %v13800_v31 = vmul.f32 0.70710677, %v13778_v9  ;;  %v548_v53 = vadd.f32 %v547_v44, %v546_v11 }
  0xf7   : > { %v13794_v49 = vpop.eup %12497  ;;  %v1626_v62 = vmul.f32 %v12490_v36, %v1466_v7  ;;  %v1212_v59 = vmul.f32 1.0614054, %v13786_v61  ;;  %v1086_v55 = vand.u32 2147483647, %v13792_v0  ;;  %v754_v21 = vrot.slane %v753_v33, 2 }
  0xf8   : > { %v1467_v6 = vmul.f32 %v13730_v10, %v1435_v46  ;;  %v1213_v2 = vmul.f32 1.0614054, %v13794_v49  ;;  %v13806_v60 = vsub.f32 %v13603_v38, %v582_v1  ;;  %v13809_v36 = vsub.f32 %v13606_v52, %v582_v1 }
  0xf9   : > { %v1658_v58 = vsub.f32 1.0, %v1626_v62  ;;  %v1244_v25 = vadd.f32 -1.4531521, %v1212_v59  ;;  %v1118_v34 = vmul.f32 0.3275911, %v1086_v55  ;;  %v1502_v41 = vsub.f32 0.0, %v1086_v55 }
  0xfa   : > { %v1627_v28 = vmul.f32 %v12494_v45, %v1467_v6  ;;  %v1245_v26 = vadd.f32 -1.4531521, %v1213_v2  ;;  %v1087_v11 = vand.u32 2147483647, %v13800_v31  ;;  %v555_v5 = vadd.f32 %v554_v47, %v553_v20  ;;  %v13831_v2 = vld [vmem:[%s12938_s20 + $0xf0] sm:$0xff] }
  0xfb   : > { %v1690_v8 = vmul.f32 %v1658_v58, %v13696_v54  ;;  %v1276_v10 = vmul.f32 %v13786_v61, %v1244_v25  ;;  %v1150_v16 = vadd.f32 1.0, %v1118_v34  ;;  %v1534_v38 = vmul.f32 %v1502_v41, %v1086_v55 }
  0xfc   : > { %v1659_v17 = vsub.f32 1.0, %v1627_v28  ;;  %v1277_v30 = vmul.f32 %v13794_v49, %v1245_v26  ;;  %v1119_v52 = vmul.f32 0.3275911, %v1087_v11  ;;  %v1503_v13 = vsub.f32 0.0, %v1087_v11  ;;  %v13836_v28 = vld [vmem:[%s12938_s20 + $0xf8] sm:$0xff] }
  0xfd   : > { %v1722_v63 = vadd.f32 1.0, %v1690_v8  ;;  %v1308_v37 = vadd.f32 1.4214138, %v1276_v10  ;;  %12503 = vrcp.f32 %v1150_v16  ;;  %v1586_v44 = vmul.f32 1.442695, %v1534_v38 }
  0xfe   : > { %v1691_v45 = vmul.f32 %v1659_v17, %v13710_v23  ;;  %v1309_v50 = vadd.f32 1.4214138, %v1277_v30  ;;  %v1151_v27 = vadd.f32 1.0, %v1119_v52  ;;  %v1535_v20 = vmul.f32 %v1503_v13, %v1087_v11 }
  0xff   : > { %v1754_v54 = vmul.f32 %v1722_v63, %v13662_v39  ;;  %v1340_v14 = vmul.f32 %v13786_v61, %v1308_v37  ;;  %12505 = vpow2.f32 %v1586_v44  ;;  %v755_v43 = vadd.f32 %v754_v21, %v753_v33 }
 0x100   : > { %v1723_v7 = vadd.f32 1.0, %v1691_v45  ;;  %v1341_v1 = vmul.f32 %v13794_v49, %v1309_v50  ;;  %v13823_v23 = vsel %vm1021_vm8, 1.0, %v18170_v15  ;;  %12507 = vrcp.f32 %v1151_v27 }
 0x101   : > { %1787 = vst.msk [vmem:[#allocation2 + $0xd9] sm:$0xff] %vm365_vm1, %v1754_v54  ;;  %v1372_v46 = vadd.f32 -0.28449672, %v1340_v14  ;;  %v642_v39 = vmul.f32 %v13806_v60, %v13806_v60  ;;  %v12500_v47 = vpop.eup %12499  ;;  %v756_v6 = vrot.slane %v755_v43, 1  ;;  %v643_v33 = vmul.f32 %v13809_v36, %v13809_v36 }
 0x102   : > { %v1755_v62 = vmul.f32 %v1723_v7, %v13669_v18  ;;  %v1373_v59 = vadd.f32 -0.28449672, %v1341_v1  ;;  %v12502_v55 = vpop.eup %12501  ;;  %v1588_v3 = vmul.f32 1.442695, %v1535_v20  ;;  %v549_v25 = vrot.slane %v548_v53, 1 }
 0x103   : > { %v1404_v21 = vmul.f32 %v13786_v61, %v1372_v46  ;;  %v758_v58 = vsel %vm365_vm1, %v642_v39, 0.0  ;;  %v757_v26 = vadd.f32 %v756_v6, %v755_v43  ;;  %v759_v34 = vsel %vm365_vm1, %v643_v33, 0.0 }
 0x104   : > { %1788 = vst.msk [vmem:[#allocation2 + $0xe1] sm:$0xff] %vm365_vm1, %v1755_v62  ;;  %v1405_v18 = vmul.f32 %v13794_v49, %v1373_v59  ;;  %v556_v41 = vrot.slane %v555_v5, 2  ;;  %v760_v10 = vadd.f32 %v759_v34, %v758_v58  ;;  %v550_v11 = vadd.f32 %v549_v25, %v548_v53 }
 0x105   : > { %v1436_v8 = vadd.f32 0.2548296, %v1404_v21  ;;  %v560_v17 = vsel %vm365_vm1, %v13831_v2, 0.0  ;;  %v805_v16 = vmul.f32 0.0625, %v757_v26  ;;  %v561_v63 = vsel %vm365_vm1, %v13836_v28, 0.0 }
 0x106   : > { %v1437_v30 = vadd.f32 0.2548296, %v1405_v18  ;;  %v557_v38 = vadd.f32 %v556_v41, %v555_v5  ;;  %v761_v52 = vrot.slane %v760_v10, 4  ;;  %v583_v13 = vmul.f32 0.0625, %v550_v11 }
 0x107   : > { %v1468_v37 = vmul.f32 %v13786_v61, %v1436_v8  ;;  %v562_v45 = vadd.f32 %v561_v63, %v560_v17  ;;  %12509 = vpow2.f32 %v1588_v3  ;;  %v821_v54 = vadd.f32 1e-05, %v805_v16 }
 0x108   : > { %v1852_v50 = vld [vmem:[#allocation2 + $0xd8] sm:$0xff]  ;;  %v1469_v44 = vmul.f32 %v13794_v49, %v1437_v30  ;;  %v558_v53 = vrot.slane %v557_v38, 1  ;;  %v762_v5 = vadd.f32 %v761_v52, %v760_v10  ;;  %v13850_v27 = vsub.f32 %v13627_v40, %v583_v13 }
 0x109   : > { %11517 = vmatprep.mubr.msk.f32.mxu0 %vm365_vm1, %v1852_v50  ;;  %v1628_v14 = vmul.f32 %v12500_v47, %v1468_v37  ;;  %11570 = vmatprep.mubr.msk.f32.mxu1 %vm365_vm1, %v1852_v50  ;;  %v563_v20 = vrot.slane %v562_v45, 4  ;;  %12511 = vrsqrt.f32 %v821_v54  ;;  %v13853_v7 = vsub.f32 %v13702_v57, %v583_v13 }
 0x10a   : > { %v1629_v61 = vmul.f32 %v12502_v55, %v1469_v44  ;;  %v559_v1 = vadd.f32 %v558_v53, %v557_v38  ;;  %v13855_v49 = vpop.eup %12503  ;;  %v763_v39 = vrot.slane %v762_v5, 2  ;;  %v644_v47 = vmul.f32 %v13850_v27, %v13850_v27 }
 0x10b   : > { %v1853_v43 = vld [vmem:[#allocation2 + $0xe0] sm:$0xff]  ;;  %v1660_v46 = vsub.f32 1.0, %v1628_v14  ;;  %v564_v62 = vadd.f32 %v563_v20, %v562_v45  ;;  %v1214_v59 = vmul.f32 1.0614054, %v13855_v49  ;;  %v645_v57 = vmul.f32 %v13853_v7, %v13853_v7 }
 0x10c   : > { %11518 = vmatmul.mubr.msk.f32.gmra.mxu0 %vm365_vm1, %v1853_v43  ;;  %v1661_v40 = vsub.f32 1.0, %v1629_v61  ;;  %11571 = vmatmul.mubr.msk.f32.gmra.mxu1 %vm365_vm1, %v1853_v43  ;;  %v584_v6 = vmul.f32 0.0625, %v559_v1  ;;  %v13864_v33 = vpop.eup %12505  ;;  %v764_v21 = vadd.f32 %v763_v39, %v762_v5  ;;  %v767_v3 = vsel %vm365_vm1, %v644_v47, 0.0 }
 0x10d   : > { %v1692_v55 = vmul.f32 %v1660_v46, %v13784_v4  ;;  %v565_v58 = vrot.slane %v564_v62, 2  ;;  %v13868_v25 = vpop.eup %12507  ;;  %v1246_v26 = vadd.f32 -1.4531521, %v1214_v59  ;;  %v768_v34 = vsel %vm365_vm1, %v645_v57, 0.0 }
 0x10e   : > { %v1693_v18 = vmul.f32 %v1661_v40, %v13823_v23  ;;  %v13873_v41 = vsub.f32 %v13741_v35, %v584_v6  ;;  %v1215_v10 = vmul.f32 1.0614054, %v13868_v25  ;;  %v765_v11 = vrot.slane %v764_v21, 1 }
 0x10f   : > { %v1724_v8 = vadd.f32 1.0, %v1692_v55  ;;  %v769_v17 = vadd.f32 %v768_v34, %v767_v3  ;;  %v1278_v30 = vmul.f32 %v13855_v49, %v1246_v26  ;;  %v13878_v16 = vsub.f32 %v13748_v32, %v584_v6 }
 0x110   : > { %v1725_v4 = vadd.f32 1.0, %v1693_v18  ;;  %v646_v23 = vmul.f32 %v13873_v41, %v13873_v41  ;;  %v1247_v63 = vadd.f32 -1.4531521, %v1215_v10  ;;  %v766_v37 = vadd.f32 %v765_v11, %v764_v21 }
 0x111   : > { %v1756_v38 = vmul.f32 %v1724_v8, %v13768_v24  ;;  %v770_v35 = vrot.slane %v769_v17, 4  ;;  %v1310_v13 = vadd.f32 1.4214138, %v1278_v30  ;;  %v647_v45 = vmul.f32 %v13878_v16, %v13878_v16 }
 0x112   : > { %v1757_v52 = vmul.f32 %v1725_v4, %v13771_v22  ;;  %v776_v50 = vsel %vm365_vm1, %v646_v23, 0.0  ;;  %v1279_v32 = vmul.f32 %v13868_v25, %v1247_v63  ;;  %v806_v44 = vmul.f32 0.0625, %v766_v37 }
 0x113   : > { %1789 = vst.msk [vmem:[#allocation2 + $0xf1] sm:$0xff] %vm365_vm1, %v1756_v38  ;;  %v771_v54 = vadd.f32 %v770_v35, %v769_v17  ;;  %v1342_v24 = vmul.f32 %v13855_v49, %v1310_v13  ;;  %v777_v53 = vsel %vm365_vm1, %v647_v45, 0.0  ;;  %v566_v14 = vadd.f32 %v565_v58, %v564_v62 }
 0x114   : > { %1790 = vst.msk [vmem:[#allocation2 + $0xf9] sm:$0xff] %vm365_vm1, %v1757_v52  ;;  %v12510_v22 = vpop.eup %12509  ;;  %v1311_v5 = vadd.f32 1.4214138, %v1279_v32  ;;  %v822_v20 = vadd.f32 1e-05, %v806_v44  ;;  %v778_v1 = vadd.f32 %v777_v53, %v776_v50  ;;  %vm1022_vm9 = vcmp.ge.f32.partialorder %v13792_v0, 0.0 }
 0x115   : > { %v772_v61 = vrot.slane %v771_v54, 2  ;;  %v1374_v43 = vadd.f32 -0.28449672, %v1342_v24  ;;  %v567_v3 = vrot.slane %v566_v14, 1  ;;  %v1054_v63 = vsel %vm1022_vm9, 1.0, %v18170_v15 }
 0x116   : > { %v12512_v46 = vpop.eup %12511  ;;  %v1343_v39 = vmul.f32 %v13868_v25, %v1311_v5  ;;  %12513 = vrsqrt.f32 %v822_v20  ;;  %v779_v40 = vrot.slane %v778_v1, 4  ;;  %vm1023_vm10 = vcmp.ge.f32.partialorder %v13800_v31, 0.0  ;;  %v10382_v20 = vld [vmem:[%s18129_s3 + $0xc] sm:$0xf] }
 0x117   : > { %v773_v47 = vadd.f32 %v772_v61, %v771_v54  ;;  %v1406_v59 = vmul.f32 %v13855_v49, %v1374_v43  ;;  %v864_v57 = vmul.f32 %v12512_v46, %v13725_v29  ;;  %v865_v6 = vmul.f32 %v12512_v46, %v13728_v42  ;;  %11641 = vmatprep.subr.msk.mxu1 %vm1966_vm0, %v10382_v20 }
 0x118   : > { %v1375_v55 = vadd.f32 -0.28449672, %v1343_v39  ;;  %v780_v21 = vadd.f32 %v779_v40, %v778_v1  ;;  %v568_v38 = vadd.f32 %v567_v3, %v566_v14  ;;  %v1055_v14 = vsel %vm1023_vm10, 1.0, %v18170_v15  ;;  %11642 = vmatpush3.msk.msra.mxu1 %vm1966_vm0, %v10382_v20 }
 0x119   : > { %v774_v62 = vrot.slane %v773_v47, 1  ;;  %v1438_v18 = vadd.f32 0.2548296, %v1406_v59  ;;  %v896_v26 = vmul.f32 %v13593_v48, %v864_v57  ;;  %v897_v34 = vmul.f32 %v13599_v19, %v865_v6 }
 0x11a   : > { %v1854_v58 = vld [vmem:[#allocation2 + $0xf0] sm:$0xff]  ;;  %v1407_v29 = vmul.f32 %v13868_v25, %v1375_v55  ;;  %v781_v10 = vrot.slane %v780_v21, 2  ;;  %v585_v24 = vmul.f32 0.0625, %v568_v38 }
 0x11b   : > { %11520 = vmatprep.mubr.msk.f32.mxu0 %vm365_vm1, %v1854_v58  ;;  %v1855_v8 = vld [vmem:[#allocation2 + $0xf8] sm:$0xff]  ;;  %11573 = vmatprep.mubr.msk.f32.mxu1 %vm365_vm1, %v1854_v58  ;;  %v775_v42 = vadd.f32 %v774_v62, %v773_v47  ;;  %v1470_v11 = vmul.f32 %v13855_v49, %v1438_v18  ;;  %v13906_v17 = vadd.f32 %v13613_v12, %v896_v26 }
 0x11c   : > { %11521 = vmatmul.mubr.msk.f32.gmra.mxu0 %vm365_vm1, %v1855_v8  ;;  %11574 = vmatmul.mubr.msk.f32.gmra.mxu1 %vm365_vm1, %v1855_v8  ;;  %v13909_v4 = vadd.f32 %v13619_v56, %v897_v34  ;;  %v1439_v30 = vadd.f32 0.2548296, %v1407_v29  ;;  %v782_v23 = vadd.f32 %v781_v10, %v780_v21  ;;  %v13937_v59 = vsub.f32 %v13831_v2, %v585_v24 }
 0x11d   : > { %v807_v0 = vmul.f32 0.0625, %v775_v42  ;;  %v1630_v37 = vmul.f32 %v13864_v33, %v1470_v11  ;;  %v13914_v35 = vmul.f32 0.70710677, %v13906_v17  ;;  %v958_v33 = vmul.f32 0.5, %v13775_v51  ;;  %v13933_v51 = vld [vmem:[%s18129_s3 + $0x10] sm:$0xf] }
 0x11e   : > { %v1471_v49 = vmul.f32 %v13868_v25, %v1439_v30  ;;  %v13919_v52 = vmul.f32 0.70710677, %v13909_v4  ;;  %v783_v32 = vrot.slane %v782_v23, 1  ;;  %11691 = vmatprep.subr.msk.mxu0 %vm1966_vm0, %v13933_v51  ;;  %v13944_v6 = vsub.f32 %v13836_v28, %v585_v24 }
 0x11f   : > { %v823_v13 = vadd.f32 1e-05, %v807_v0  ;;  %v1662_v45 = vsub.f32 1.0, %v1630_v37  ;;  %v1088_v50 = vand.u32 2147483647, %v13914_v35  ;;  %v648_v28 = vmul.f32 %v13937_v59, %v13937_v59 }
 0x120   : > { %v1631_v44 = vmul.f32 %v12510_v22, %v1471_v49  ;;  %v1089_v54 = vand.u32 2147483647, %v13919_v52  ;;  %v959_v22 = vmul.f32 0.5, %v13778_v9  ;;  %v784_v46 = vadd.f32 %v783_v32, %v782_v23 }
 0x121   : > { %v1694_v53 = vmul.f32 %v1662_v45, %v1054_v63  ;;  %v1120_v31 = vmul.f32 0.3275911, %v1088_v50  ;;  %12515 = vrsqrt.f32 %v823_v13  ;;  %v1504_v3 = vsub.f32 0.0, %v1088_v50 }
 0x122   : > { %v1663_v5 = vsub.f32 1.0, %v1631_v44  ;;  %v1121_v25 = vmul.f32 0.3275911, %v1089_v54  ;;  %v808_v2 = vmul.f32 0.0625, %v784_v46  ;;  %v649_v26 = vmul.f32 %v13944_v6, %v13944_v6 }
 0x123   : > { %v12514_v61 = vpop.eup %12513  ;;  %v1726_v1 = vadd.f32 1.0, %v1694_v53  ;;  %v1152_v43 = vadd.f32 1.0, %v1120_v31  ;;  %v1505_v34 = vsub.f32 0.0, %v1089_v54  ;;  %v1536_v10 = vmul.f32 %v1504_v3, %v1088_v50 }
 0x124   : > { %v1695_v39 = vmul.f32 %v1663_v5, %v1055_v14  ;;  %v1153_v47 = vadd.f32 1.0, %v1121_v25  ;;  %v866_v40 = vmul.f32 %v12514_v61, %v13806_v60  ;;  %v867_v57 = vmul.f32 %v12514_v61, %v13809_v36 }
 0x125   : > { %v1758_v9 = vmul.f32 %v1726_v1, %v958_v33  ;;  %12517 = vrcp.f32 %v1152_v43  ;;  %v824_v36 = vadd.f32 1e-05, %v808_v2  ;;  %v785_v30 = vsel %vm365_vm1, %v648_v28, 0.0 }
 0x126   : > { %v1727_v55 = vadd.f32 1.0, %v1695_v39  ;;  %12519 = vrcp.f32 %v1153_v47  ;;  %v898_v62 = vmul.f32 %v13593_v48, %v866_v40  ;;  %v899_v60 = vmul.f32 %v13599_v19, %v867_v57 }
 0x127   : > { %1791 = vst.msk [vmem:[#allocation2 + $0x109] sm:$0xff] %vm365_vm1, %v1758_v9  ;;  %12521 = vrsqrt.f32 %v824_v36  ;;  %v786_v0 = vsel %vm365_vm1, %v649_v26, 0.0  ;;  %v1537_v38 = vmul.f32 %v1505_v34, %v1089_v54  ;;  %v1590_v24 = vmul.f32 1.442695, %v1536_v10 }
 0x128   : > { %v1759_v21 = vmul.f32 %v1727_v55, %v959_v22  ;;  %v13950_v58 = vadd.f32 %v13613_v12, %v898_v62  ;;  %v13953_v18 = vadd.f32 %v13619_v56, %v899_v60  ;;  %v787_v32 = vadd.f32 %v786_v0, %v785_v30 }
 0x129   : > { %v1592_v54 = vmul.f32 1.442695, %v1537_v38  ;;  %vm1024_vm11 = vcmp.ge.f32.partialorder %v13914_v35, 0.0  ;;  %vm1025_vm12 = vcmp.ge.f32.partialorder %v13919_v52, 0.0  ;;  %v961_v52 = vmul.f32 0.5, %v13909_v4 }
 0x12a   : > { %1792 = vst.msk [vmem:[#allocation2 + $0x111] sm:$0xff] %vm365_vm1, %v1759_v21  ;;  %v13961_v8 = vmul.f32 0.70710677, %v13950_v58  ;;  %v13964_v29 = vmul.f32 0.70710677, %v13953_v18  ;;  %v788_v61 = vrot.slane %v787_v32, 4 }
 0x12b   : > { %v14001_v21 = vmul.f32 0.5, %v13906_v17 }
 0x12c   : > { %v1090_v42 = vand.u32 2147483647, %v13961_v8  ;;  %v1091_v11 = vand.u32 2147483647, %v13964_v29  ;;  %v789_v55 = vadd.f32 %v788_v61, %v787_v32  ;;  %vm1026_vm13 = vcmp.ge.f32.partialorder %v13961_v8, 0.0 }
 0x12d   : > { %vm1027_vm14 = vcmp.ge.f32.partialorder %v13964_v29, 0.0 }
 0x12e   : > { %v1856_v23 = vld [vmem:[#allocation2 + $0x108] sm:$0xff]  ;;  %v1122_v63 = vmul.f32 0.3275911, %v1090_v42  ;;  %v12516_v37 = vpop.eup %12515  ;;  %v1123_v49 = vmul.f32 0.3275911, %v1091_v11  ;;  %v1506_v22 = vsub.f32 0.0, %v1090_v42 }
 0x12f   : > { %11523 = vmatprep.mubr.msk.f32.mxu0 %vm365_vm1, %v1856_v23  ;;  %11576 = vmatprep.mubr.msk.f32.mxu1 %vm365_vm1, %v1856_v23  ;;  %v868_v45 = vmul.f32 %v12516_v37, %v13850_v27  ;;  %v869_v50 = vmul.f32 %v12516_v37, %v13853_v7  ;;  %v790_v23 = vrot.slane %v789_v55, 2 }
 0x130   : > { %v1154_v13 = vadd.f32 1.0, %v1122_v63  ;;  %v1155_v33 = vadd.f32 1.0, %v1123_v49  ;;  %v1538_v60 = vmul.f32 %v1506_v22, %v1090_v42 }
 0x131   : > { %v1857_v44 = vld [vmem:[#allocation2 + $0x110] sm:$0xff]  ;;  %v900_v14 = vmul.f32 %v13593_v48, %v868_v45  ;;  %v901_v31 = vmul.f32 %v13599_v19, %v869_v50  ;;  %v1507_v19 = vsub.f32 0.0, %v1091_v11 }
 0x132   : > { %v13974_v53 = vpop.eup %12517  ;;  %11524 = vmatmul.mubr.msk.f32.gmra.mxu0 %vm365_vm1, %v1857_v44  ;;  %11577 = vmatmul.mubr.msk.f32.gmra.mxu1 %vm365_vm1, %v1857_v44  ;;  %12523 = vrcp.f32 %v1154_v13  ;;  %v1594_v63 = vmul.f32 1.442695, %v1538_v60  ;;  %v14012_v13 = vld [vmem:[%s18127_s1 + $0x8] sm:$0xff] }
 0x133   : > { %v13980_v5 = vpop.eup %12519  ;;  %v1216_v27 = vmul.f32 1.0614054, %v13974_v53  ;;  %12525 = vrcp.f32 %v1155_v33  ;;  %v13985_v25 = vadd.f32 %v13613_v12, %v900_v14  ;;  %v13988_v20 = vadd.f32 %v13619_v56, %v901_v31 }
 0x134   : > { %v1217_v7 = vmul.f32 1.0614054, %v13980_v5  ;;  %12527 = vpow2.f32 %v1590_v24  ;;  %v12522_v40 = vpop.eup %12521  ;;  %v1539_v36 = vmul.f32 %v1507_v19, %v1091_v11  ;;  %v791_v31 = vadd.f32 %v790_v23, %v789_v55 }
 0x135   : > { %v1248_v1 = vadd.f32 -1.4531521, %v1216_v27  ;;  %12529 = vpow2.f32 %v1592_v54  ;;  %v13991_v46 = vmul.f32 0.70710677, %v13985_v25  ;;  %v13995_v47 = vmul.f32 0.70710677, %v13988_v20 }
 0x136   : > { %v1249_v43 = vadd.f32 -1.4531521, %v1217_v7  ;;  %v870_v10 = vmul.f32 %v12522_v40, %v13873_v41  ;;  %v871_v42 = vmul.f32 %v12522_v40, %v13878_v16  ;;  %v1596_v49 = vmul.f32 1.442695, %v1539_v36 }
 0x137   : > { %v1280_v39 = vmul.f32 %v13974_v53, %v1248_v1  ;;  %v1092_v57 = vand.u32 2147483647, %v13991_v46  ;;  %v1093_v2 = vand.u32 2147483647, %v13995_v47  ;;  %vm1028_vm15 = vcmp.ge.f32.partialorder %v13991_v46, 0.0 }
 0x138   : > { %v1281_v9 = vmul.f32 %v13980_v5, %v1249_v43  ;;  %v902_v37 = vmul.f32 %v13593_v48, %v870_v10  ;;  %v903_v41 = vmul.f32 %v14012_v13, %v871_v42  ;;  %vm1029_vm2 = vcmp.ge.f32.partialorder %v13995_v47, 0.0 }
 0x139   : > { %v1312_v62 = vadd.f32 1.4214138, %v1280_v39  ;;  %v1124_v28 = vmul.f32 0.3275911, %v1092_v57  ;;  %v1125_v34 = vmul.f32 0.3275911, %v1093_v2 }
 0x13a   : > { %v1313_v3 = vadd.f32 1.4214138, %v1281_v9  ;;  %v14020_v50 = vadd.f32 %v13613_v12, %v902_v37  ;;  %v1508_v24 = vsub.f32 0.0, %v1092_v57  ;;  %v14027_v33 = vadd.f32 %v13619_v56, %v903_v41 }
 0x13b   : > { %v1344_v26 = vmul.f32 %v13974_v53, %v1312_v62  ;;  %v1156_v0 = vadd.f32 1.0, %v1124_v28  ;;  %v1157_v17 = vadd.f32 1.0, %v1125_v34  ;;  %v1509_v19 = vsub.f32 0.0, %v1093_v2 }
 0x13c   : > { %v1345_v30 = vmul.f32 %v13980_v5, %v1313_v3  ;;  %v14031_v12 = vmul.f32 0.70710677, %v14020_v50  ;;  %v14035_v56 = vmul.f32 0.70710677, %v14027_v33  ;;  %v1540_v9 = vmul.f32 %v1508_v24, %v1092_v57 }
 0x13d   : > { %v1376_v38 = vadd.f32 -0.28449672, %v1344_v26  ;;  %12531 = vrcp.f32 %v1156_v0  ;;  %v1056_v62 = vsel %vm1024_vm11, 1.0, %v18170_v15  ;;  %v1541_v57 = vmul.f32 %v1509_v19, %v1093_v2 }
 0x13e   : > { %v1377_v11 = vadd.f32 -0.28449672, %v1345_v30  ;;  %12533 = vrcp.f32 %v1157_v17  ;;  %v1094_v55 = vand.u32 2147483647, %v14031_v12  ;;  %v1095_v30 = vand.u32 2147483647, %v14035_v56 }
 0x13f   : > { %v14015_v45 = vpop.eup %12523  ;;  %v1408_v16 = vmul.f32 %v13974_v53, %v1376_v38  ;;  %12535 = vpow2.f32 %v1594_v63  ;;  %v1598_v42 = vmul.f32 1.442695, %v1540_v9  ;;  %vm1030_vm3 = vcmp.ge.f32.partialorder %v14031_v12, 0.0 }
 0x140   : > { %v14022_v48 = vpop.eup %12525  ;;  %v1409_v32 = vmul.f32 %v13980_v5, %v1377_v11  ;;  %v1218_v44 = vmul.f32 1.0614054, %v14015_v45  ;;  %12537 = vpow2.f32 %v1596_v49  ;;  %v1126_v26 = vmul.f32 0.3275911, %v1094_v55 }
 0x141   : > { %v1440_v54 = vadd.f32 0.2548296, %v1408_v16  ;;  %v1219_v14 = vmul.f32 1.0614054, %v14022_v48  ;;  %v12528_v27 = vpop.eup %12527  ;;  %v1127_v17 = vmul.f32 0.3275911, %v1095_v30 }
 0x142   : > { %v1441_v7 = vadd.f32 0.2548296, %v1409_v32  ;;  %v1250_v61 = vadd.f32 -1.4531521, %v1218_v44  ;;  %v12530_v1 = vpop.eup %12529  ;;  %v1158_v23 = vadd.f32 1.0, %v1126_v26  ;;  %v1510_v19 = vsub.f32 0.0, %v1094_v55 }
 0x143   : > { %v1472_v22 = vmul.f32 %v13974_v53, %v1440_v54  ;;  %v1251_v43 = vadd.f32 -1.4531521, %v1219_v14  ;;  %v1057_v53 = vsel %vm1025_vm12, 1.0, %v18170_v15  ;;  %v1600_v32 = vmul.f32 1.442695, %v1541_v57 }
 0x144   : > { %v1473_v39 = vmul.f32 %v13980_v5, %v1441_v7  ;;  %v1282_v40 = vmul.f32 %v14015_v45, %v1250_v61  ;;  %v792_v5 = vrot.slane %v791_v31, 1  ;;  %12539 = vrcp.f32 %v1158_v23 }
 0x145   : > { %v1632_v60 = vmul.f32 %v12528_v27, %v1472_v22  ;;  %v1283_v3 = vmul.f32 %v14022_v48, %v1251_v43  ;;  %v1159_v44 = vadd.f32 1.0, %v1127_v17  ;;  %12541 = vpow2.f32 %v1598_v42 }
 0x146   : > { %v1633_v36 = vmul.f32 %v12530_v1, %v1473_v39  ;;  %v1314_v28 = vadd.f32 1.4214138, %v1282_v40  ;;  %v793_v49 = vadd.f32 %v792_v5, %v791_v31  ;;  %vm1031_vm4 = vcmp.ge.f32.partialorder %v14035_v56, 0.0 }
 0x147   : > { %v1664_v34 = vsub.f32 1.0, %v1632_v60  ;;  %v1315_v10 = vadd.f32 1.4214138, %v1283_v3  ;;  %12543 = vrcp.f32 %v1159_v44 }
 0x148   : > { %v1665_v0 = vsub.f32 1.0, %v1633_v36  ;;  %v1346_v35 = vmul.f32 %v14015_v45, %v1314_v28  ;;  %12545 = vpow2.f32 %v1600_v32  ;;  %v1511_v36 = vsub.f32 0.0, %v1095_v30 }
 0x149   : > { %v1696_v38 = vmul.f32 %v1664_v34, %v1056_v62  ;;  %v1347_v63 = vmul.f32 %v14022_v48, %v1315_v10  ;;  %v809_v62 = vmul.f32 0.0625, %v793_v49  ;;  %v1542_v34 = vmul.f32 %v1510_v19, %v1094_v55 }
 0x14a   : > { %v1697_v37 = vmul.f32 %v1665_v0, %v1057_v53  ;;  %v1378_v11 = vadd.f32 -0.28449672, %v1346_v35  ;;  %v14051_v41 = vpop.eup %12531  ;;  %v1058_v10 = vsel %vm1026_vm13, 1.0, %v18170_v15  ;;  %v1543_v42 = vmul.f32 %v1511_v36, %v1095_v30 }
 0x14b   : > { %v1728_v2 = vadd.f32 1.0, %v1696_v38  ;;  %v1379_v16 = vadd.f32 -0.28449672, %v1347_v63  ;;  %v14053_v24 = vpop.eup %12533  ;;  %v1220_v4 = vmul.f32 1.0614054, %v14051_v41  ;;  %v962_v38 = vmul.f32 0.5, %v13950_v58 }
 0x14c   : > { %v1729_v54 = vadd.f32 1.0, %v1697_v37  ;;  %v1410_v14 = vmul.f32 %v14015_v45, %v1378_v11  ;;  %v1221_v31 = vmul.f32 1.0614054, %v14053_v24  ;;  %v12536_v61 = vpop.eup %12535  ;;  %v825_v28 = vadd.f32 1e-05, %v809_v62 }
 0x14d   : > { %v1760_v27 = vmul.f32 %v1728_v2, %v14001_v21  ;;  %v1411_v7 = vmul.f32 %v14022_v48, %v1379_v16  ;;  %v1252_v43 = vadd.f32 -1.4531521, %v1220_v4  ;;  %v12538_v39 = vpop.eup %12537  ;;  %v1602_v63 = vmul.f32 1.442695, %v1542_v34 }
 0x14e   : > { %v1761_v1 = vmul.f32 %v1729_v54, %v961_v52  ;;  %v1442_v22 = vadd.f32 0.2548296, %v1410_v14  ;;  %v1253_v9 = vadd.f32 -1.4531521, %v1221_v31  ;;  %12547 = vrsqrt.f32 %v825_v28 }
 0x14f   : > { %1793 = vst.msk [vmem:[#allocation2 + $0x121] sm:$0xff] %vm365_vm1, %v1760_v27  ;;  %v1443_v40 = vadd.f32 0.2548296, %v1411_v7  ;;  %v1284_v60 = vmul.f32 %v14051_v41, %v1252_v43  ;;  %v963_v11 = vmul.f32 0.5, %v13953_v18  ;;  %v1604_v14 = vmul.f32 1.442695, %v1543_v42 }
 0x150   : > { %1794 = vst.msk [vmem:[#allocation2 + $0x129] sm:$0xff] %vm365_vm1, %v1761_v1  ;;  %v1474_v21 = vmul.f32 %v14015_v45, %v1442_v22  ;;  %v1285_v3 = vmul.f32 %v14053_v24, %v1253_v9  ;;  %v1059_v45 = vsel %vm1027_vm14, 1.0, %v18170_v15  ;;  %12549 = vpow2.f32 %v1602_v63 }
 0x151   : > { %v1475_v53 = vmul.f32 %v14022_v48, %v1443_v40  ;;  %v1316_v5 = vadd.f32 1.4214138, %v1284_v60  ;;  %v14075_v17 = vpop.eup %12539  ;;  %12551 = vpow2.f32 %v1604_v14 }
 0x152   : > { %v1634_v26 = vmul.f32 %v12536_v61, %v1474_v21  ;;  %v1317_v0 = vadd.f32 1.4214138, %v1285_v3  ;;  %v1222_v16 = vmul.f32 1.0614054, %v14075_v17  ;;  %v12542_v32 = vpop.eup %12541  ;;  %v1060_v21 = vsel %vm1028_vm15, 1.0, %v18170_v15 }
 0x153   : > { %v1635_v57 = vmul.f32 %v12538_v39, %v1475_v53  ;;  %v1348_v29 = vmul.f32 %v14051_v41, %v1316_v5  ;;  %v964_v5 = vmul.f32 0.5, %v13985_v25 }
 0x154   : > { %v1666_v8 = vsub.f32 1.0, %v1634_v26  ;;  %v1349_v48 = vmul.f32 %v14053_v24, %v1317_v0  ;;  %v14091_v4 = vpop.eup %12543  ;;  %v1254_v7 = vadd.f32 -1.4531521, %v1222_v16  ;;  %v14112_v0 = vld [vmem:[%s18129_s3 + $0x14] sm:$0xf] }
 0x155   : > { %v1667_v35 = vsub.f32 1.0, %v1635_v57  ;;  %v1380_v55 = vadd.f32 -0.28449672, %v1348_v29  ;;  %v1223_v1 = vmul.f32 1.0614054, %v14091_v4  ;;  %v12546_v22 = vpop.eup %12545  ;;  %11741 = vmatprep.subr.msk.mxu1 %vm1966_vm0, %v14112_v0 }
 0x156   : > { %v14072_v23 = vld [vmem:[#allocation2 + $0x120] sm:$0xff]  ;;  %v1698_v52 = vmul.f32 %v1666_v8, %v1058_v10  ;;  %v1381_v49 = vadd.f32 -0.28449672, %v1349_v48  ;;  %v1286_v19 = vmul.f32 %v14075_v17, %v1254_v7  ;;  %v965_v10 = vmul.f32 0.5, %v13988_v20 }
 0x157   : > { %11526 = vmatprep.mubr.msk.f32.mxu0 %vm365_vm1, %v14072_v23  ;;  %v14079_v37 = vld [vmem:[#allocation2 + $0x128] sm:$0xff]  ;;  %11579 = vmatprep.mubr.msk.f32.mxu1 %vm365_vm1, %v14072_v23  ;;  %v1699_v30 = vmul.f32 %v1667_v35, %v1059_v45  ;;  %v1412_v2 = vmul.f32 %v14051_v41, %v1380_v55  ;;  %v1255_v40 = vadd.f32 -1.4531521, %v1223_v1 }
 0x158   : > { %11527 = vmatmul.mubr.msk.f32.gmra.mxu0 %vm365_vm1, %v14079_v37  ;;  %v1730_v58 = vadd.f32 1.0, %v1698_v52  ;;  %11580 = vmatmul.mubr.msk.f32.gmra.mxu1 %vm365_vm1, %v14079_v37  ;;  %v1413_v54 = vmul.f32 %v14053_v24, %v1381_v49  ;;  %v1318_v62 = vadd.f32 1.4214138, %v1286_v19  ;;  %v12733_v55 = vld [vmem:[%s18128_s2 + $0x8] sm:$0xff]  ;;  %v966_v19 = vmul.f32 0.5, %v14020_v50 }
 0x159   : > { %v1731_v44 = vadd.f32 1.0, %v1699_v30  ;;  %v1444_v27 = vadd.f32 0.2548296, %v1412_v2  ;;  %v1287_v53 = vmul.f32 %v14091_v4, %v1255_v40  ;;  %v1063_v40 = vsel %vm1031_vm4, 1.0, %v18170_v15 }
 0x15a   : > { %v1762_v18 = vmul.f32 %v1730_v58, %v962_v38  ;;  %v1445_v61 = vadd.f32 0.2548296, %v1413_v54  ;;  %v1350_v36 = vmul.f32 %v14075_v17, %v1318_v62  ;;  %v12732_v38 = vld [vmem:[%s18128_s2] sm:$0xff]  ;;  %v967_v50 = vmul.f32 0.5, %v14027_v33 }
 0x15b   : > { %v1763_v31 = vmul.f32 %v1731_v44, %v963_v11  ;;  %v1476_v43 = vmul.f32 %v14051_v41, %v1444_v27  ;;  %v12548_v46 = vpop.eup %12547  ;;  %v1061_v41 = vsel %vm1029_vm2, 1.0, %v18170_v15  ;;  %v1319_v26 = vadd.f32 1.4214138, %v1287_v53 }
 0x15c   : > { %1795 = vst.msk [vmem:[#allocation2 + $0x139] sm:$0xff] %vm365_vm1, %v1762_v18  ;;  %v1477_v39 = vmul.f32 %v14053_v24, %v1445_v61  ;;  %v872_v47 = vmul.f32 %v12548_v46, %v13937_v59  ;;  %v873_v24 = vmul.f32 %v12548_v46, %v13944_v6  ;;  %v1382_v57 = vadd.f32 -0.28449672, %v1350_v36  ;;  %v12731_v59 = vld [vmem:[%s18127_s1] sm:$0xff] }
 0x15d   : > { %1796 = vst.msk [vmem:[#allocation2 + $0x141] sm:$0xff] %vm365_vm1, %v1763_v31  ;;  %v1636_v9 = vmul.f32 %v12542_v32, %v1476_v43  ;;  %v1351_v29 = vmul.f32 %v14091_v4, %v1319_v26  ;;  %v12550_v49 = vpop.eup %12549  ;;  %v1062_v31 = vsel %vm1030_vm3, 1.0, %v18170_v15 }
 0x15e   : > { %v1637_v60 = vmul.f32 %v12546_v22, %v1477_v39  ;;  %v904_v6 = vmul.f32 %v12731_v59, %v872_v47  ;;  %v905_v25 = vmul.f32 %v14012_v13, %v873_v24  ;;  %v1414_v48 = vmul.f32 %v14075_v17, %v1382_v57  ;;  %v12552_v18 = vpop.eup %12551  ;;  %v2910_v57 = vld [vmem:[#allocation2 + $0x1] sm:$0xff] }
 0x15f   : > { %v1668_v3 = vsub.f32 1.0, %v1636_v9  ;;  %v1383_v13 = vadd.f32 -0.28449672, %v1351_v29 }
 0x160   : > { %v1669_v28 = vsub.f32 1.0, %v1637_v60  ;;  %v14137_v52 = vadd.f32 %v12732_v38, %v904_v6  ;;  %v14142_v63 = vadd.f32 %v12733_v55, %v905_v25  ;;  %v1446_v30 = vadd.f32 0.2548296, %v1414_v48  ;;  %v2911_v25 = vld [vmem:[#allocation2 + $0x9] sm:$0xff]  ;;  %v14190_v48 = vld [vmem:[#allocation2 + $0x19] sm:$0xff]  ;;  %v14195_v55 = vld [vmem:[#allocation2 + $0x21] sm:$0xff] }
 0x161   : > { %v1700_v34 = vmul.f32 %v1668_v3, %v1060_v21  ;;  %v1415_v2 = vmul.f32 %v14091_v4, %v1383_v13 }
 0x162   : > { %v1701_v45 = vmul.f32 %v1669_v28, %v1061_v41  ;;  %v14146_v16 = vmul.f32 0.70710677, %v14137_v52  ;;  %v1478_v32 = vmul.f32 %v14075_v17, %v1446_v30  ;;  %v14152_v44 = vmul.f32 0.70710677, %v14142_v63  ;;  %v14199_v30 = vld [vmem:[#allocation2 + $0x31] sm:$0xff] }
 0x163   : > { %v14114_v8 = vld [vmem:[#allocation2 + $0x138] sm:$0xff]  ;;  %v1732_v35 = vadd.f32 1.0, %v1700_v34  ;;  %v1447_v54 = vadd.f32 0.2548296, %v1415_v2 }
 0x164   : > { %11529 = vmatprep.mubr.msk.f32.mxu0 %vm365_vm1, %v14114_v8  ;;  %v14125_v20 = vld [vmem:[#allocation2 + $0x140] sm:$0xff]  ;;  %11582 = vmatprep.mubr.msk.f32.mxu1 %vm365_vm1, %v14114_v8  ;;  %v1733_v42 = vadd.f32 1.0, %v1701_v45  ;;  %v1096_v14 = vand.u32 2147483647, %v14146_v16  ;;  %v1638_v27 = vmul.f32 %v12550_v49, %v1478_v32  ;;  %v1097_v7 = vand.u32 2147483647, %v14152_v44 }
 0x165   : > { %11530 = vmatmul.mubr.msk.f32.gmra.mxu0 %vm365_vm1, %v14125_v20  ;;  %11583 = vmatmul.mubr.msk.f32.gmra.mxu1 %vm365_vm1, %v14125_v20  ;;  %v1764_v11 = vmul.f32 %v1732_v35, %v964_v5  ;;  %v1479_v12 = vmul.f32 %v14091_v4, %v1447_v54  ;;  %v14205_v32 = vld [vmem:[#allocation2 + $0x39] sm:$0xff]  ;;  %vm1032_vm5 = vcmp.ge.f32.partialorder %v14146_v16, 0.0  ;;  %vm1033_vm6 = vcmp.ge.f32.partialorder %v14152_v44, 0.0 }
 0x166   : > { %v1765_v58 = vmul.f32 %v1733_v42, %v965_v10  ;;  %v1128_v61 = vmul.f32 0.3275911, %v1096_v14  ;;  %v1670_v17 = vsub.f32 1.0, %v1638_v27  ;;  %v1129_v1 = vmul.f32 0.3275911, %v1097_v7 }
 0x167   : > { %1797 = vst.msk [vmem:[#allocation2 + $0x151] sm:$0xff] %vm365_vm1, %v1764_v11  ;;  %v1639_v22 = vmul.f32 %v12552_v18, %v1479_v12  ;;  %v1512_v3 = vsub.f32 0.0, %v1096_v14  ;;  %v1513_v41 = vsub.f32 0.0, %v1097_v7  ;;  %v1065_v16 = vsel %vm1033_vm6, 1.0, %v18170_v15 }
 0x168   : > { %1798 = vst.msk [vmem:[#allocation2 + $0x159] sm:$0xff] %vm365_vm1, %v1765_v58  ;;  %v1160_v43 = vadd.f32 1.0, %v1128_v61  ;;  %v1702_v39 = vmul.f32 %v1670_v17, %v1062_v31  ;;  %v1161_v9 = vadd.f32 1.0, %v1129_v1  ;;  %v14213_v31 = vld [vmem:[#allocation2 + $0x51] sm:$0xff]  ;;  %v14216_v17 = vld [vmem:[#allocation2 + $0x61] sm:$0xff]  ;;  %v968_v44 = vmul.f32 0.5, %v14137_v52 }
 0x169   : > { %v1671_v21 = vsub.f32 1.0, %v1639_v22  ;;  %v1544_v28 = vmul.f32 %v1512_v3, %v1096_v14  ;;  %v1545_v26 = vmul.f32 %v1513_v41, %v1097_v7  ;;  %v14207_v14 = vld [vmem:[#allocation2 + $0x49] sm:$0xff]  ;;  %v14237_v3 = vld [vmem:[#allocation2 + $0x91] sm:$0xff] }
 0x16a   : > { %12553 = vrcp.f32 %v1160_v43  ;;  %v1734_v4 = vadd.f32 1.0, %v1702_v39  ;;  %v1064_v43 = vsel %vm1032_vm5, 1.0, %v18170_v15  ;;  %v14224_v39 = vld [vmem:[#allocation2 + $0x69] sm:$0xff] }
 0x16b   : > { %12555 = vrcp.f32 %v1161_v9  ;;  %v1703_v60 = vmul.f32 %v1671_v21, %v1063_v40  ;;  %v1606_v24 = vmul.f32 1.442695, %v1544_v28  ;;  %v1608_v33 = vmul.f32 1.442695, %v1545_v26  ;;  %v14227_v9 = vld [vmem:[#allocation2 + $0x79] sm:$0xff]  ;;  %v14253_v26 = vld [vmem:[#allocation2 + $0xb1] sm:$0xff] }
 0x16c   : > { %v1766_v53 = vmul.f32 %v1734_v4, %v966_v19  ;;  %v14243_v28 = vld [vmem:[#allocation2 + $0x99] sm:$0xff] }
 0x16d   : > { %v1735_v46 = vadd.f32 1.0, %v1703_v60  ;;  %12557 = vpow2.f32 %v1606_v24  ;;  %v14255_v24 = vld [vmem:[#allocation2 + $0xc1] sm:$0xff] }
 0x16e   : > { %v14162_v62 = vld [vmem:[#allocation2 + $0x150] sm:$0xff]  ;;  %1799 = vst.msk [vmem:[#allocation2 + $0x169] sm:$0xff] %vm365_vm1, %v1766_v53  ;;  %12559 = vpow2.f32 %v1608_v33  ;;  %v14235_v53 = vld [vmem:[#allocation2 + $0x81] sm:$0xff] }
 0x16f   : > { %11532 = vmatprep.mubr.msk.f32.mxu0 %vm365_vm1, %v14162_v62  ;;  %v14166_v56 = vld [vmem:[#allocation2 + $0x158] sm:$0xff]  ;;  %11585 = vmatprep.mubr.msk.f32.mxu1 %vm365_vm1, %v14162_v62  ;;  %v1767_v36 = vmul.f32 %v1735_v46, %v967_v50  ;;  %v969_v50 = vmul.f32 0.5, %v14142_v63  ;;  %v14246_v63 = vld [vmem:[#allocation2 + $0xa9] sm:$0xff] }
 0x170   : > { %11533 = vmatmul.mubr.msk.f32.gmra.mxu0 %vm365_vm1, %v14166_v56  ;;  %11586 = vmatmul.mubr.msk.f32.gmra.mxu1 %vm365_vm1, %v14166_v56  ;;  %v2520_v33 = vld [vmem:[#allocation2 + $0x30] sm:$0xff] }
 0x171   : > { %1800 = vst.msk [vmem:[#allocation2 + $0x171] sm:$0xff] %vm365_vm1, %v1767_v36 }
 0x175   : > { %v14177_v47 = vld [vmem:[#allocation2 + $0x168] sm:$0xff] }
 0x176   : > { %11535 = vmatprep.mubr.msk.f32.mxu0 %vm365_vm1, %v14177_v47  ;;  %11588 = vmatprep.mubr.msk.f32.mxu1 %vm365_vm1, %v14177_v47 }
 0x177   : > { %v12554_v5 = vpop.eup %12553 }
 0x178   : > { %v12556_v34 = vpop.eup %12555  ;;  %v1224_v10 = vmul.f32 1.0614054, %v12554_v5  ;;  %v14183_v45 = vld [vmem:[#allocation2 + $0x170] sm:$0xff] }
 0x179   : > { %v1225_v29 = vmul.f32 1.0614054, %v12556_v34  ;;  %11536 = vmatmul.mubr.msk.f32.gmra.mxu0 %vm365_vm1, %v14183_v45  ;;  %11589 = vmatmul.mubr.msk.f32.gmra.mxu1 %vm365_vm1, %v14183_v45 }
 0x17a   : > { %v1256_v59 = vadd.f32 -1.4531521, %v1224_v10  ;;  %11643 = vmatprep.mubr.msk.f32.mxu1 %vm365_vm1, %v2910_v57  ;;  %v14269_v57 = vld [vmem:[#allocation2 + $0xd9] sm:$0xff] }
 0x17b   : > { %v1257_v6 = vadd.f32 -1.4531521, %v1225_v29  ;;  %v14276_v29 = vld [vmem:[%s18129_s3 + $0x1c] sm:$0xf] }
 0x17c   : > { %v1288_v35 = vmul.f32 %v12554_v5, %v1256_v59  ;;  %v2521_v59 = vld [vmem:[#allocation2 + $0x38] sm:$0xff] }
 0x17d   : > { %v1289_v42 = vmul.f32 %v12556_v34, %v1257_v6  ;;  %11644 = vmatmul.mubr.msk.f32.vlgmr.msra.gmra.mxu1 %vm365_vm1, %v2911_v25  ;;  %v11495_v6 = vpop.f32.mrf.mxu0  ;;  %v11545_v25 = vpop.f32.mrf.mxu1 }
 0x17e   : > { %v1320_v13 = vadd.f32 1.4214138, %v1288_v35  ;;  %11646 = vmatprep.mubr.msk.f32.mxu1 %vm365_vm1, %v14190_v48  ;;  %11742 = vmatpush3.msk.msra.mxu1 %vm1966_vm0, %v14112_v0  ;;  %v12558_v0 = vpop.eup %12557  ;;  %v2522_v35 = vld [vmem:[#allocation2 + $0x48] sm:$0xff] }
 0x17f   : > { %v1321_v38 = vadd.f32 1.4214138, %v1289_v42  ;;  %v12560_v12 = vpop.eup %12559  ;;  %11841 = vmatprep.subr.msk.mxu1 %vm1966_vm0, %v14276_v29  ;;  %v14285_v42 = vadd.f32 %v11545_v25, %v11495_v6 }
 0x180   : > { %v1352_v11 = vmul.f32 %v12554_v5, %v1320_v13  ;;  %v14287_v13 = vld [vmem:[#allocation2 + $0xe1] sm:$0xff] }
 0x181   : > { %v1353_v49 = vmul.f32 %v12556_v34, %v1321_v38  ;;  %11647 = vmatmul.mubr.msk.f32.gmra.mxu1 %vm365_vm1, %v14195_v55  ;;  %v14292_v38 = vld [vmem:[%s18129_s3 + $0x18] sm:$0xf] }
 0x182   : > { %v1384_v58 = vadd.f32 -0.28449672, %v1352_v11  ;;  %11649 = vmatprep.mubr.msk.f32.mxu1 %vm365_vm1, %v14199_v30  ;;  %v14295_v11 = vld [vmem:[#allocation2 + $0xf1] sm:$0xff] }
 0x183   : > { %v1385_v2 = vadd.f32 -0.28449672, %v1353_v49  ;;  %v2523_v49 = vld [vmem:[#allocation2 + $0x50] sm:$0xff] }
 0x184   : > { %v1416_v54 = vmul.f32 %v12554_v5, %v1384_v58  ;;  %v14300_v58 = vpop.f32.mrf.mxu0 }
 0x185   : > { %v1417_v18 = vmul.f32 %v12556_v34, %v1385_v2  ;;  %11650 = vmatmul.mubr.msk.f32.gmra.mxu1 %vm365_vm1, %v14205_v32  ;;  %v14302_v2 = vpop.f32.mrf.mxu1 }
 0x186   : > { %v1448_v27 = vadd.f32 0.2548296, %v1416_v54  ;;  %11652 = vmatprep.mubr.msk.f32.mxu1 %vm365_vm1, %v14207_v14  ;;  %v2524_v54 = vld [vmem:[#allocation2 + $0x60] sm:$0xff] }
 0x187   : > { %v1449_v7 = vadd.f32 0.2548296, %v1417_v18  ;;  %v14310_v18 = vld [vmem:[#allocation2 + $0xf9] sm:$0xff] }
 0x188   : > { %v1480_v61 = vmul.f32 %v12554_v5, %v1448_v27  ;;  %v11548_v27 = vpop.f32.mrf.mxu1 }
 0x189   : > { %v1481_v1 = vmul.f32 %v12556_v34, %v1449_v7  ;;  %11653 = vmatmul.mubr.msk.f32.gmra.mxu1 %vm365_vm1, %v14213_v31  ;;  %v14263_v34 = vld [vmem:[#allocation2 + $0xc9] sm:$0xff] }
 0x18a   : > { %v1640_v22 = vmul.f32 %v12558_v0, %v1480_v61  ;;  %11655 = vmatprep.mubr.msk.f32.mxu1 %vm365_vm1, %v14216_v17  ;;  %v14313_v0 = vld [vmem:[#allocation2 + $0x109] sm:$0xff] }
 0x18b   : > { %v1641_v19 = vmul.f32 %v12560_v12, %v1481_v1  ;;  %v2525_v12 = vld [vmem:[#allocation2 + $0x68] sm:$0xff]  ;;  %v14320_v1 = vpop.f32.mrf.mxu1 }
 0x18c   : > { %v1672_v40 = vsub.f32 1.0, %v1640_v22  ;;  %18184 = vst [vmem:[#allocation11_spill] sm:$0xff] %v14320_v1  ;;  %v2526_v22 = vld [vmem:[#allocation2 + $0x78] sm:$0xff] }
 0x18d   : > { %v1673_v21 = vsub.f32 1.0, %v1641_v19  ;;  %11656 = vmatmul.mubr.msk.f32.gmra.mxu1 %vm365_vm1, %v14224_v39 }
 0x18e   : > { %v1704_v4 = vmul.f32 %v1672_v40, %v1064_v43  ;;  %11658 = vmatprep.mubr.msk.f32.mxu1 %vm365_vm1, %v14227_v9  ;;  %v14326_v43 = vld [vmem:[#allocation2 + $0x111] sm:$0xff]  ;;  %v11551_v40 = vpop.f32.mrf.mxu1 }
 0x18f   : > { %v1705_v60 = vmul.f32 %v1673_v21, %v1065_v16  ;;  %v14329_v16 = vld [vmem:[#allocation2 + $0x121] sm:$0xff] }
 0x190   : > { %v1736_v46 = vadd.f32 1.0, %v1704_v4 }
 0x191   : > { %v1737_v41 = vadd.f32 1.0, %v1705_v60  ;;  %11659 = vmatmul.mubr.msk.f32.gmra.mxu1 %vm365_vm1, %v14235_v53  ;;  %v2528_v60 = vld [vmem:[#allocation2 + $0x90] sm:$0xff] }
 0x192   : > { %v1768_v36 = vmul.f32 %v1736_v46, %v968_v44  ;;  %11661 = vmatprep.mubr.msk.f32.mxu1 %vm365_vm1, %v14237_v3  ;;  %v2527_v44 = vld [vmem:[#allocation2 + $0x80] sm:$0xff]  ;;  %v14342_v46 = vld [vmem:[#allocation2 + $0x129] sm:$0xff] }
 0x193   : > { %v1769_v52 = vmul.f32 %v1737_v41, %v969_v50  ;;  %v14336_v50 = vpop.f32.mrf.mxu1 }
 0x194   : > { %1801 = vst.msk [vmem:[#allocation2 + $0x181] sm:$0xff] %vm365_vm1, %v1768_v36  ;;  %18186 = vst [vmem:[#allocation4_spill] sm:$0xff] %v14336_v50 }
 0x195   : > { %1802 = vst.msk [vmem:[#allocation2 + $0x189] sm:$0xff] %vm365_vm1, %v1769_v52  ;;  %11662 = vmatmul.mubr.msk.f32.gmra.mxu1 %vm365_vm1, %v14243_v28  ;;  %v11554_v36 = vpop.f32.mrf.mxu1  ;;  %v14345_v52 = vld [vmem:[#allocation2 + $0x139] sm:$0xff] }
 0x196   : > { %11664 = vmatprep.mubr.msk.f32.mxu1 %vm365_vm1, %v14246_v63 }
 0x197   : > { %v14352_v25 = vpop.f32.mrf.mxu1 }
 0x198   : > { %18188 = vst [vmem:[#allocation7_spill] sm:$0xff] %v14352_v25 }
 0x199   : > { %11665 = vmatmul.mubr.msk.f32.gmra.mxu1 %vm365_vm1, %v14253_v26 }
 0x19a   : > { %11667 = vmatprep.mubr.msk.f32.mxu1 %vm365_vm1, %v14255_v24 }
 0x19b   : > { %v14259_v5 = vld [vmem:[#allocation2 + $0x180] sm:$0xff] }
 0x19c   : > { %11538 = vmatprep.mubr.msk.f32.mxu0 %vm365_vm1, %v14259_v5  ;;  %v14267_v10 = vld [vmem:[#allocation2 + $0x188] sm:$0xff] }
 0x19d   : > { %11539 = vmatmul.mubr.msk.f32.gmra.mxu0 %vm365_vm1, %v14267_v10  ;;  %11668 = vmatmul.mubr.msk.f32.gmra.mxu1 %vm365_vm1, %v14263_v34 }
 0x19e   : > { %11593 = vmatprep.mubr.msk.f32.mxu0 %vm365_vm1, %v2520_v33  ;;  %11670 = vmatprep.mubr.msk.f32.mxu1 %vm365_vm1, %v14269_v57 }
 0x1a1   : > { %11594 = vmatmul.mubr.msk.f32.vlgmr.msra.gmra.mxu0 %vm365_vm1, %v2521_v59  ;;  %11671 = vmatmul.mubr.msk.f32.gmra.mxu1 %vm365_vm1, %v14287_v13  ;;  %v2529_v59 = vld [vmem:[#allocation2 + $0x98] sm:$0xff] }
 0x1a2   : > { %11692 = vmatpush3.msk.msra.mxu0 %vm1966_vm0, %v13933_v51  ;;  %11596 = vmatprep.mubr.msk.f32.mxu0 %vm365_vm1, %v2522_v35  ;;  %v11498_v51 = vpop.f32.mrf.mxu0  ;;  %v2530_v35 = vld [vmem:[#allocation2 + $0xa8] sm:$0xff] }
 0x1a3   : > { %11791 = vmatprep.subr.msk.mxu0 %vm1966_vm0, %v14292_v38  ;;  %11673 = vmatprep.mubr.msk.f32.mxu1 %vm365_vm1, %v14295_v11  ;;  %v14315_v7 = vadd.f32 %v11548_v27, %v11498_v51  ;;  %v11557_v51 = vpop.f32.mrf.mxu1  ;;  %v14361_v27 = vld [vmem:[#allocation2 + $0x151] sm:$0xff] }
 0x1a4   : > { %v14318_v61 = vpop.f32.mrf.mxu0 }
 0x1a5   : > { %11597 = vmatmul.mubr.msk.f32.gmra.mxu0 %vm365_vm1, %v2523_v49  ;;  %18183 = vst [vmem:[#allocation5_spill] sm:$0xff] %v14318_v61  ;;  %11674 = vmatmul.mubr.msk.f32.gmra.mxu1 %vm365_vm1, %v14310_v18  ;;  %v14358_v49 = vld [vmem:[#allocation2 + $0x141] sm:$0xff] }
 0x1a6   : > { %11599 = vmatprep.mubr.msk.f32.mxu0 %vm365_vm1, %v2524_v54  ;;  %11676 = vmatprep.mubr.msk.f32.mxu1 %vm365_vm1, %v14313_v0  ;;  %v11501_v19 = vpop.f32.mrf.mxu0 }
 0x1a7   : > { %v14331_v21 = vadd.f32 %v11551_v40, %v11501_v19  ;;  %v14368_v40 = vpop.f32.mrf.mxu1 }
 0x1a8   : > { %v14334_v4 = vpop.f32.mrf.mxu0  ;;  %18190 = vst [vmem:[#allocation9_spill] sm:$0xff] %v14368_v40  ;;  %v2534_v40 = vld [vmem:[#allocation2 + $0xd8] sm:$0xff] }
 0x1a9   : > { %11600 = vmatmul.mubr.msk.f32.gmra.mxu0 %vm365_vm1, %v2525_v12  ;;  %18185 = vst [vmem:[#allocation3_spill] sm:$0xff] %v14334_v4  ;;  %11677 = vmatmul.mubr.msk.f32.gmra.mxu1 %vm365_vm1, %v14326_v43 }
 0x1aa   : > { %11602 = vmatprep.mubr.msk.f32.mxu0 %vm365_vm1, %v2526_v22  ;;  %11679 = vmatprep.mubr.msk.f32.mxu1 %vm365_vm1, %v14329_v16  ;;  %v11504_v41 = vpop.f32.mrf.mxu0  ;;  %v2531_v22 = vld [vmem:[#allocation2 + $0xb0] sm:$0xff] }
 0x1ab   : > { %v14347_v33 = vadd.f32 %v11554_v36, %v11504_v41  ;;  %v11560_v36 = vpop.f32.mrf.mxu1 }
 0x1ac   : > { %v14350_v6 = vpop.f32.mrf.mxu0 }
 0x1ad   : > { %11603 = vmatmul.mubr.msk.f32.gmra.mxu0 %vm365_vm1, %v2527_v44  ;;  %18187 = vst [vmem:[#allocation6_spill] sm:$0xff] %v14350_v6  ;;  %11680 = vmatmul.mubr.msk.f32.gmra.mxu1 %vm365_vm1, %v14342_v46  ;;  %v2532_v44 = vld [vmem:[#allocation2 + $0xc0] sm:$0xff]  ;;  %v14384_v15 = vpop.f32.mrf.mxu1 }
 0x1ae   : > { %11605 = vmatprep.mubr.msk.f32.mxu0 %vm365_vm1, %v2528_v60  ;;  %11682 = vmatprep.mubr.msk.f32.mxu1 %vm365_vm1, %v14345_v52  ;;  %v11507_v54 = vpop.f32.mrf.mxu0  ;;  %v14374_v60 = vld [vmem:[#allocation2 + $0x159] sm:$0xff]  ;;  %18192 = vst [vmem:[#allocation12_spill] sm:$0xff] %v14384_v15 }
 0x1af   : > { %v14363_v12 = vadd.f32 %v11557_v51, %v11507_v54  ;;  %v2533_v54 = vld [vmem:[#allocation2 + $0xc8] sm:$0xff]  ;;  %v11563_v25 = vpop.f32.mrf.mxu1 }
 0x1b0   : > { %v14366_v19 = vpop.f32.mrf.mxu0 }
 0x1b1   : > { %11606 = vmatmul.mubr.msk.f32.gmra.mxu0 %vm365_vm1, %v2529_v59  ;;  %18189 = vst [vmem:[#allocation8_spill] sm:$0xff] %v14366_v19  ;;  %11683 = vmatmul.mubr.msk.f32.gmra.mxu1 %vm365_vm1, %v14358_v49  ;;  %v14377_v59 = vld [vmem:[#allocation2 + $0x169] sm:$0xff]  ;;  %v14390_v19 = vld [vmem:[#allocation2 + $0x171] sm:$0xff]  ;;  %v14398_v15 = vpop.f32.mrf.mxu1 }
 0x1b2   : > { %11608 = vmatprep.mubr.msk.f32.mxu0 %vm365_vm1, %v2530_v35  ;;  %11685 = vmatprep.mubr.msk.f32.mxu1 %vm365_vm1, %v14361_v27  ;;  %v11510_v41 = vpop.f32.mrf.mxu0  ;;  %18194 = vst [vmem:[#allocation14_spill] sm:$0xff] %v14398_v15 }
 0x1b3   : > { %v14379_v35 = vadd.f32 %v11560_v36, %v11510_v41  ;;  %v11566_v50 = vpop.f32.mrf.mxu1 }
 0x1b4   : > { %v14382_v51 = vpop.f32.mrf.mxu0 }
 0x1b5   : > { %11609 = vmatmul.mubr.msk.f32.gmra.mxu0 %vm365_vm1, %v2531_v22  ;;  %18191 = vst [vmem:[#allocation10_spill] sm:$0xff] %v14382_v51  ;;  %11686 = vmatmul.mubr.msk.f32.gmra.mxu1 %vm365_vm1, %v14374_v60  ;;  %v2536_v51 = vld [vmem:[#allocation2 + $0xf0] sm:$0xff] }
 0x1b6   : > { %11611 = vmatprep.mubr.msk.f32.mxu0 %vm365_vm1, %v2532_v44  ;;  %11688 = vmatprep.mubr.msk.f32.mxu1 %vm365_vm1, %v14377_v59  ;;  %v11513_v22 = vpop.f32.mrf.mxu0  ;;  %v2535_v44 = vld [vmem:[#allocation2 + $0xe0] sm:$0xff] }
 0x1b7   : > { %v14393_v41 = vadd.f32 %v11563_v25, %v11513_v22  ;;  %v14414_v22 = vpop.f32.mrf.mxu1 }
 0x1b8   : > { %v14396_v36 = vpop.f32.mrf.mxu0  ;;  %18195 = vst [vmem:[#allocation15_spill] sm:$0xff] %v14414_v22 }
 0x1b9   : > { %11612 = vmatmul.mubr.msk.f32.gmra.mxu0 %vm365_vm1, %v2533_v54  ;;  %18193 = vst [vmem:[#allocation13_spill] sm:$0xff] %v14396_v36  ;;  %11689 = vmatmul.mubr.msk.f32.gmra.mxu1 %vm365_vm1, %v14390_v19  ;;  %v2538_v54 = vld [vmem:[#allocation2 + $0x108] sm:$0xff] }
 0x1ba   : > { %11614 = vmatprep.mubr.msk.f32.mxu0 %vm365_vm1, %v2534_v40  ;;  %11743 = vmatprep.mubr.msk.f32.mxu1 %vm365_vm1, %v14199_v30  ;;  %v11516_v6 = vpop.f32.mrf.mxu0  ;;  %v2537_v40 = vld [vmem:[#allocation2 + $0xf8] sm:$0xff] }
 0x1bb   : > { %v14405_v25 = vadd.f32 %v11566_v50, %v11516_v6  ;;  %v2539_v50 = vld [vmem:[#allocation2 + $0x110] sm:$0xff] }
 0x1bc   : > { %v14418_v6 = vpop.f32.mrf.mxu0 }
 0x1bd   : > { %11615 = vmatmul.mubr.msk.f32.gmra.mxu0 %vm365_vm1, %v2535_v44  ;;  %11744 = vmatmul.mubr.msk.f32.vlgmr.msra.gmra.mxu1 %vm365_vm1, %v14205_v32  ;;  %18196 = vst [vmem:[#allocation16_spill] sm:$0xff] %v14418_v6 }
 0x1be   : > { %11617 = vmatprep.mubr.msk.f32.mxu0 %vm365_vm1, %v2536_v51  ;;  %11746 = vmatprep.mubr.msk.f32.mxu1 %vm365_vm1, %v14207_v14  ;;  %v11569_v51 = vpop.f32.mrf.mxu1 }
 0x1bf   : > { %11842 = vmatpush3.msk.msra.mxu1 %vm1966_vm0, %v14276_v29 }
 0x1c1   : > { %11618 = vmatmul.mubr.msk.f32.gmra.mxu0 %vm365_vm1, %v2537_v40  ;;  %11747 = vmatmul.mubr.msk.f32.gmra.mxu1 %vm365_vm1, %v14213_v31  ;;  %v14654_v40 = vld [vmem:[#allocation2 + $0xda] sm:$0xff] }
 0x1c2   : > { %11620 = vmatprep.mubr.msk.f32.mxu0 %vm365_vm1, %v2538_v54  ;;  %11749 = vmatprep.mubr.msk.f32.mxu1 %vm365_vm1, %v14216_v17  ;;  %v4080_v54 = vld [vmem:[#allocation2 + $0x2] sm:$0xff] }
 0x1c5   : > { %11621 = vmatmul.mubr.msk.f32.gmra.mxu0 %vm365_vm1, %v2539_v50  ;;  %11750 = vmatmul.mubr.msk.f32.gmra.mxu1 %vm365_vm1, %v14224_v39 }
 0x1c6   : > { %11623 = vmatprep.mubr.msk.f32.mxu0 %vm365_vm1, %v14072_v23  ;;  %11752 = vmatprep.mubr.msk.f32.mxu1 %vm365_vm1, %v14227_v9  ;;  %v14449_v23 = vpop.f32.mrf.mxu1 }
 0x1c7   : > { %18197 = vst [vmem:[#allocation17_spill] sm:$0xff] %v14449_v23 }
 0x1c9   : > { %11624 = vmatmul.mubr.msk.f32.gmra.mxu0 %vm365_vm1, %v14079_v37  ;;  %11753 = vmatmul.mubr.msk.f32.gmra.mxu1 %vm365_vm1, %v14235_v53 }
 0x1ca   : > { %11626 = vmatprep.mubr.msk.f32.mxu0 %vm365_vm1, %v14114_v8  ;;  %11755 = vmatprep.mubr.msk.f32.mxu1 %vm365_vm1, %v14237_v3 }
 0x1cc   : > { %v11519_v29 = vpop.f32.mrf.mxu0  ;;  %v11572_v8 = vpop.f32.mrf.mxu1 }
 0x1cd   : > { %v14429_v44 = vadd.f32 %v11569_v51, %v11519_v29  ;;  %11627 = vmatmul.mubr.msk.f32.gmra.mxu0 %vm365_vm1, %v14125_v20  ;;  %11756 = vmatmul.mubr.msk.f32.gmra.mxu1 %vm365_vm1, %v14243_v28  ;;  %v4081_v51 = vld [vmem:[#allocation2 + $0xa] sm:$0xff] }
 0x1ce   : > { %11629 = vmatprep.mubr.msk.f32.mxu0 %vm365_vm1, %v14162_v62  ;;  %11758 = vmatprep.mubr.msk.f32.mxu1 %vm365_vm1, %v14246_v63  ;;  %v14455_v37 = vpop.f32.mrf.mxu0  ;;  %v2550_v62 = vld [vmem:[#allocation2 + $0x198] sm:$0xff] }
 0x1cf   : > { %18198 = vst [vmem:[#allocation18_spill] sm:$0xff] %v14455_v37 }
 0x1d1   : > { %11630 = vmatmul.mubr.msk.f32.gmra.mxu0 %vm365_vm1, %v14166_v56  ;;  %11759 = vmatmul.mubr.msk.f32.gmra.mxu1 %vm365_vm1, %v14253_v26 }
 0x1d2   : > { %11632 = vmatprep.mubr.msk.f32.mxu0 %vm365_vm1, %v14177_v47  ;;  %11761 = vmatprep.mubr.msk.f32.mxu1 %vm365_vm1, %v14255_v24  ;;  %v2551_v47 = vld [vmem:[#allocation2 + $0x1a0] sm:$0xff] }
 0x1d5   : > { %11633 = vmatmul.mubr.msk.f32.gmra.mxu0 %vm365_vm1, %v14183_v45  ;;  %11762 = vmatmul.mubr.msk.f32.gmra.mxu1 %vm365_vm1, %v14263_v34  ;;  %v14488_v45 = vld [vmem:[%s18129_s3 + $0x20] sm:$0xf] }
 0x1d6   : > { %11635 = vmatprep.mubr.msk.f32.mxu0 %vm365_vm1, %v14259_v5  ;;  %11764 = vmatprep.mubr.msk.f32.mxu1 %vm365_vm1, %v14269_v57  ;;  %v14588_v5 = vld [vmem:[#allocation2 + $0x62] sm:$0xff] }
 0x1d9   : > { %11636 = vmatmul.mubr.msk.f32.gmra.mxu0 %vm365_vm1, %v14267_v10  ;;  %11765 = vmatmul.mubr.msk.f32.gmra.mxu1 %vm365_vm1, %v14287_v13  ;;  %v14600_v10 = vld [vmem:[#allocation2 + $0x7a] sm:$0xff] }
 0x1da   : > { %11638 = vmatprep.mubr.msk.f32.mxu0 %vm365_vm1, %v2550_v62  ;;  %11767 = vmatprep.mubr.msk.f32.mxu1 %vm365_vm1, %v14295_v11  ;;  %v14680_v62 = vld [vmem:[#allocation2 + $0x10a] sm:$0xff] }
 0x1dc   : > { %v11522_v20 = vpop.f32.mrf.mxu0 }
 0x1dd   : > { %v14467_v56 = vadd.f32 %v11572_v8, %v11522_v20  ;;  %11639 = vmatmul.mubr.msk.f32.gmra.mxu0 %vm365_vm1, %v2551_v47  ;;  %11768 = vmatmul.mubr.msk.f32.gmra.mxu1 %vm365_vm1, %v14310_v18  ;;  %v14677_v8 = vld [vmem:[#allocation2 + $0xfa] sm:$0xff] }
 0x1de   : > { %11693 = vmatprep.mubr.msk.f32.mxu0 %vm365_vm1, %v14190_v48  ;;  %11770 = vmatprep.mubr.msk.f32.mxu1 %vm365_vm1, %v14313_v0  ;;  %v14508_v48 = vpop.f32.mrf.mxu1 }
 0x1df   : > { %18199 = vst [vmem:[#allocation19_spill] sm:$0xff] %v14508_v48 }
 0x1e1   : > { %11694 = vmatmul.mubr.msk.f32.vlgmr.msra.gmra.mxu0 %vm365_vm1, %v14195_v55  ;;  %11771 = vmatmul.mubr.msk.f32.gmra.mxu1 %vm365_vm1, %v14326_v43  ;;  %v14514_v55 = vpop.f32.mrf.mxu0 }
 0x1e2   : > { %11792 = vmatpush3.msk.msra.mxu0 %vm1966_vm0, %v14292_v38  ;;  %11696 = vmatprep.mubr.msk.f32.mxu0 %vm365_vm1, %v14199_v30  ;;  %18200 = vst [vmem:[#allocation20_spill] sm:$0xff] %v14514_v55  ;;  %v11575_v30 = vpop.f32.mrf.mxu1 }
 0x1e3   : > { %11891 = vmatprep.subr.msk.mxu0 %vm1966_vm0, %v14488_v45  ;;  %11773 = vmatprep.mubr.msk.f32.mxu1 %vm365_vm1, %v14329_v16 }
 0x1e4   : > { %v14614_v38 = vpop.f32.mrf.mxu1 }
 0x1e5   : > { %11697 = vmatmul.mubr.msk.f32.gmra.mxu0 %vm365_vm1, %v14205_v32  ;;  %11774 = vmatmul.mubr.msk.f32.gmra.mxu1 %vm365_vm1, %v14342_v46  ;;  %18201 = vst [vmem:[#allocation21_spill] sm:$0xff] %v14614_v38 }
 0x1e6   : > { %11699 = vmatprep.mubr.msk.f32.mxu0 %vm365_vm1, %v14207_v14  ;;  %11776 = vmatprep.mubr.msk.f32.mxu1 %vm365_vm1, %v14345_v52 }
 0x1e9   : > { %11700 = vmatmul.mubr.msk.f32.gmra.mxu0 %vm365_vm1, %v14213_v31  ;;  %11777 = vmatmul.mubr.msk.f32.gmra.mxu1 %vm365_vm1, %v14358_v49  ;;  %v14534_v31 = vld [vmem:[#allocation2 + $0x181] sm:$0xff] }
 0x1ea   : > { %11702 = vmatprep.mubr.msk.f32.mxu0 %vm365_vm1, %v14216_v17  ;;  %11779 = vmatprep.mubr.msk.f32.mxu1 %vm365_vm1, %v14361_v27  ;;  %v14542_v17 = vld [vmem:[#allocation2 + $0x189] sm:$0xff] }
 0x1ed   : > { %11703 = vmatmul.mubr.msk.f32.gmra.mxu0 %vm365_vm1, %v14224_v39  ;;  %11780 = vmatmul.mubr.msk.f32.gmra.mxu1 %vm365_vm1, %v14374_v60  ;;  %v3720_v39 = vld [vmem:[#allocation2 + $0x199] sm:$0xff] }
 0x1ee   : > { %11705 = vmatprep.mubr.msk.f32.mxu0 %vm365_vm1, %v14227_v9  ;;  %11782 = vmatprep.mubr.msk.f32.mxu1 %vm365_vm1, %v14377_v59  ;;  %v3721_v9 = vld [vmem:[#allocation2 + $0x1a1] sm:$0xff] }
 0x1f1   : > { %11706 = vmatmul.mubr.msk.f32.gmra.mxu0 %vm365_vm1, %v14235_v53  ;;  %11783 = vmatmul.mubr.msk.f32.gmra.mxu1 %vm365_vm1, %v14390_v19  ;;  %v14553_v53 = vld [vmem:[#allocation2 + $0x1a] sm:$0xff] }
 0x1f2   : > { %v11525_v32 = vpop.f32.mrf.mxu0  ;;  %11708 = vmatprep.mubr.msk.f32.mxu0 %vm365_vm1, %v14237_v3  ;;  %11785 = vmatprep.mubr.msk.f32.mxu1 %vm365_vm1, %v14534_v31  ;;  %v14560_v3 = vld [vmem:[#allocation2 + $0x22] sm:$0xff] }
 0x1f3   : > { %v14526_v14 = vadd.f32 %v11575_v30, %v11525_v32  ;;  %v14692_v30 = vld [vmem:[#allocation2 + $0x112] sm:$0xff]  ;;  %v14696_v32 = vld [vmem:[#allocation2 + $0x122] sm:$0xff] }
 0x1f5   : > { %11709 = vmatmul.mubr.msk.f32.gmra.mxu0 %vm365_vm1, %v14243_v28  ;;  %11786 = vmatmul.mubr.msk.f32.gmra.mxu1 %vm365_vm1, %v14542_v17  ;;  %v14564_v28 = vld [vmem:[#allocation2 + $0x32] sm:$0xff] }
 0x1f6   : > { %11711 = vmatprep.mubr.msk.f32.mxu0 %vm365_vm1, %v14246_v63  ;;  %11788 = vmatprep.mubr.msk.f32.mxu1 %vm365_vm1, %v3720_v39  ;;  %v14572_v63 = vld [vmem:[#allocation2 + $0x3a] sm:$0xff] }
 0x1f7   : > { %v14712_v39 = vld [vmem:[#allocation2 + $0x13a] sm:$0xff] }
 0x1f9   : > { %11712 = vmatmul.mubr.msk.f32.gmra.mxu0 %vm365_vm1, %v14253_v26  ;;  %11789 = vmatmul.mubr.msk.f32.gmra.mxu1 %vm365_vm1, %v3721_v9  ;;  %v14576_v26 = vld [vmem:[#allocation2 + $0x4a] sm:$0xff] }
 0x1fa   : > { %11714 = vmatprep.mubr.msk.f32.mxu0 %vm365_vm1, %v14255_v24  ;;  %11843 = vmatprep.mubr.msk.f32.mxu1 %vm365_vm1, %v14553_v53  ;;  %v14584_v24 = vld [vmem:[#allocation2 + $0x52] sm:$0xff] }
 0x1fd   : > { %11715 = vmatmul.mubr.msk.f32.gmra.mxu0 %vm365_vm1, %v14263_v34  ;;  %11844 = vmatmul.mubr.msk.f32.vlgmr.msra.gmra.mxu1 %vm365_vm1, %v14560_v3  ;;  %v14596_v34 = vld [vmem:[#allocation2 + $0x6a] sm:$0xff] }
 0x1fe   : > { %11717 = vmatprep.mubr.msk.f32.mxu0 %vm365_vm1, %v14269_v57  ;;  %11846 = vmatprep.mubr.msk.f32.mxu1 %vm365_vm1, %v14564_v28  ;;  %v14608_v57 = vld [vmem:[#allocation2 + $0x82] sm:$0xff] }
 0x201   : > { %11718 = vmatmul.mubr.msk.f32.gmra.mxu0 %vm365_vm1, %v14287_v13  ;;  %11847 = vmatmul.mubr.msk.f32.gmra.mxu1 %vm365_vm1, %v14572_v63  ;;  %v14612_v13 = vld [vmem:[#allocation2 + $0x92] sm:$0xff] }
 0x202   : > { %11720 = vmatprep.mubr.msk.f32.mxu0 %vm365_vm1, %v14295_v11  ;;  %11849 = vmatprep.mubr.msk.f32.mxu1 %vm365_vm1, %v14576_v26  ;;  %v14620_v11 = vpop.f32.mrf.mxu0 }
 0x203   : > { %18202 = vst [vmem:[#allocation22_spill] sm:$0xff] %v14620_v11 }
 0x205   : > { %11721 = vmatmul.mubr.msk.f32.gmra.mxu0 %vm365_vm1, %v14310_v18  ;;  %11850 = vmatmul.mubr.msk.f32.gmra.mxu1 %vm365_vm1, %v14584_v24  ;;  %v14624_v18 = vld [vmem:[#allocation2 + $0x9a] sm:$0xff] }
 0x206   : > { %11723 = vmatprep.mubr.msk.f32.mxu0 %vm365_vm1, %v14313_v0  ;;  %11852 = vmatprep.mubr.msk.f32.mxu1 %vm365_vm1, %v14588_v5  ;;  %v14628_v0 = vld [vmem:[#allocation2 + $0xaa] sm:$0xff] }
 0x209   : > { %11724 = vmatmul.mubr.msk.f32.gmra.mxu0 %vm365_vm1, %v14326_v43  ;;  %11853 = vmatmul.mubr.msk.f32.gmra.mxu1 %vm365_vm1, %v14596_v34  ;;  %v11578_v43 = vpop.f32.mrf.mxu1 }
 0x20a   : > { %11726 = vmatprep.mubr.msk.f32.mxu0 %vm365_vm1, %v14329_v16  ;;  %11855 = vmatprep.mubr.msk.f32.mxu1 %vm365_vm1, %v14600_v10 }
 0x20d   : > { %11727 = vmatmul.mubr.msk.f32.gmra.mxu0 %vm365_vm1, %v14342_v46  ;;  %11856 = vmatmul.mubr.msk.f32.gmra.mxu1 %vm365_vm1, %v14608_v57  ;;  %v14636_v46 = vld [vmem:[#allocation2 + $0xb2] sm:$0xff] }
 0x20e   : > { %11729 = vmatprep.mubr.msk.f32.mxu0 %vm365_vm1, %v14345_v52  ;;  %11858 = vmatprep.mubr.msk.f32.mxu1 %vm365_vm1, %v14612_v13 }
 0x211   : > { %11730 = vmatmul.mubr.msk.f32.gmra.mxu0 %vm365_vm1, %v14358_v49  ;;  %11859 = vmatmul.mubr.msk.f32.gmra.mxu1 %vm365_vm1, %v14624_v18  ;;  %v14642_v49 = vld [vmem:[#allocation2 + $0xc2] sm:$0xff] }
 0x212   : > { %11732 = vmatprep.mubr.msk.f32.mxu0 %vm365_vm1, %v14361_v27  ;;  %11861 = vmatprep.mubr.msk.f32.mxu1 %vm365_vm1, %v14628_v0  ;;  %v14650_v27 = vld [vmem:[#allocation2 + $0xca] sm:$0xff] }
 0x215   : > { %11733 = vmatmul.mubr.msk.f32.gmra.mxu0 %vm365_vm1, %v14374_v60  ;;  %11862 = vmatmul.mubr.msk.f32.gmra.mxu1 %vm365_vm1, %v14636_v46  ;;  %v14658_v60 = vpop.f32.mrf.mxu1 }
 0x216   : > { %11735 = vmatprep.mubr.msk.f32.mxu0 %vm365_vm1, %v14377_v59  ;;  %11864 = vmatprep.mubr.msk.f32.mxu1 %vm365_vm1, %v14642_v49  ;;  %18203 = vst [vmem:[#allocation23_spill] sm:$0xff] %v14658_v60  ;;  %v14664_v59 = vld [vmem:[#allocation2 + $0xe2] sm:$0xff] }
 0x218   : > { %v11528_v16 = vpop.f32.mrf.mxu0  ;;  %v11581_v29 = vpop.f32.mrf.mxu1 }
 0x219   : > { %v14638_v52 = vadd.f32 %v11578_v43, %v11528_v16  ;;  %11736 = vmatmul.mubr.msk.f32.gmra.mxu0 %vm365_vm1, %v14390_v19  ;;  %11865 = vmatmul.mubr.msk.f32.gmra.mxu1 %vm365_vm1, %v14650_v27  ;;  %v14670_v19 = vld [vmem:[#allocation2 + $0xf2] sm:$0xff] }
 0x21a   : > { %11738 = vmatprep.mubr.msk.f32.mxu0 %vm365_vm1, %v14534_v31  ;;  %11867 = vmatprep.mubr.msk.f32.mxu1 %vm365_vm1, %v14654_v40  ;;  %v14666_v50 = vpop.f32.mrf.mxu0  ;;  %v14706_v31 = vld [vmem:[#allocation2 + $0x12a] sm:$0xff]  ;;  %v14726_v16 = vld [vmem:[#allocation2 + $0x152] sm:$0xff] }
 0x21b   : > { %18204 = vst [vmem:[#allocation24_spill] sm:$0xff] %v14666_v50 }
 0x21d   : > { %11739 = vmatmul.mubr.msk.f32.gmra.mxu0 %vm365_vm1, %v14542_v17  ;;  %11868 = vmatmul.mubr.msk.f32.gmra.mxu1 %vm365_vm1, %v14664_v59 }
 0x21e   : > { %11793 = vmatprep.mubr.msk.f32.mxu0 %vm365_vm1, %v4080_v54  ;;  %11870 = vmatprep.mubr.msk.f32.mxu1 %vm365_vm1, %v14670_v19 }
 0x221   : > { %11794 = vmatmul.mubr.msk.f32.vlgmr.msra.gmra.mxu0 %vm365_vm1, %v4081_v51  ;;  %11871 = vmatmul.mubr.msk.f32.gmra.mxu1 %vm365_vm1, %v14677_v8  ;;  %v14736_v51 = vld [vmem:[#allocation2 + $0x15a] sm:$0xff] }
 0x222   : > { %11892 = vmatpush3.msk.msra.mxu0 %vm1966_vm0, %v14488_v45  ;;  %11796 = vmatprep.mubr.msk.f32.mxu0 %vm365_vm1, %v14553_v53  ;;  %v14700_v45 = vpop.f32.mrf.mxu1  ;;  %v14720_v53 = vld [vmem:[#allocation2 + $0x142] sm:$0xff] }
 0x223   : > { %11873 = vmatprep.mubr.msk.f32.mxu1 %vm365_vm1, %v14680_v62  ;;  %18205 = vst [vmem:[#allocation25_spill] sm:$0xff] %v14700_v45 }
 0x225   : > { %v11531_v20 = vpop.f32.mrf.mxu0  ;;  %11797 = vmatmul.mubr.msk.f32.gmra.mxu0 %vm365_vm1, %v14560_v3  ;;  %11874 = vmatmul.mubr.msk.f32.gmra.mxu1 %vm365_vm1, %v14692_v30  ;;  %v11584_v9 = vpop.f32.mrf.mxu1 }
 0x226   : > { %v14682_v47 = vadd.f32 %v11581_v29, %v11531_v20  ;;  %11799 = vmatprep.mubr.msk.f32.mxu0 %vm365_vm1, %v14564_v28  ;;  %11876 = vmatprep.mubr.msk.f32.mxu1 %vm365_vm1, %v14696_v32  ;;  %v14740_v29 = vld [vmem:[#allocation2 + $0x16a] sm:$0xff] }
 0x227   : > { %v14708_v17 = vpop.f32.mrf.mxu0  ;;  %v14730_v54 = vpop.f32.mrf.mxu1 }
 0x228   : > { %18206 = vst [vmem:[#allocation26_spill] sm:$0xff] %v14708_v17  ;;  %18207 = vst [vmem:[#allocation27_spill] sm:$0xff] %v14730_v54  ;;  %v14764_v17 = vld [vmem:[#allocation2 + $0x18a] sm:$0xff] }
 0x229   : > { %11800 = vmatmul.mubr.msk.f32.gmra.mxu0 %vm365_vm1, %v14572_v63  ;;  %11877 = vmatmul.mubr.msk.f32.gmra.mxu1 %vm365_vm1, %v14706_v31 }
 0x22a   : > { %11802 = vmatprep.mubr.msk.f32.mxu0 %vm365_vm1, %v14576_v26  ;;  %11879 = vmatprep.mubr.msk.f32.mxu1 %vm365_vm1, %v14712_v39 }
 0x22d   : > { %11803 = vmatmul.mubr.msk.f32.gmra.mxu0 %vm365_vm1, %v14584_v24  ;;  %11880 = vmatmul.mubr.msk.f32.gmra.mxu1 %vm365_vm1, %v14720_v53 }
 0x22e   : > { %11805 = vmatprep.mubr.msk.f32.mxu0 %vm365_vm1, %v14588_v5  ;;  %11882 = vmatprep.mubr.msk.f32.mxu1 %vm365_vm1, %v14726_v16 }
 0x230   : > { %v11534_v3 = vpop.f32.mrf.mxu0  ;;  %v11587_v20 = vpop.f32.mrf.mxu1 }
 0x231   : > { %v14724_v43 = vadd.f32 %v11584_v9, %v11534_v3  ;;  %11806 = vmatmul.mubr.msk.f32.gmra.mxu0 %vm365_vm1, %v14596_v34  ;;  %11883 = vmatmul.mubr.msk.f32.gmra.mxu1 %vm365_vm1, %v14736_v51  ;;  %v14748_v9 = vld [vmem:[#allocation2 + $0x172] sm:$0xff]  ;;  %v14752_v3 = vld [vmem:[#allocation2 + $0x182] sm:$0xff] }
 0x232   : > { %11808 = vmatprep.mubr.msk.f32.mxu0 %vm365_vm1, %v14600_v10  ;;  %11885 = vmatprep.mubr.msk.f32.mxu1 %vm365_vm1, %v14740_v29  ;;  %v14756_v54 = vpop.f32.mrf.mxu0  ;;  %v14758_v45 = vpop.f32.mrf.mxu1 }
 0x233   : > { %18208 = vst [vmem:[#allocation28_spill] sm:$0xff] %v14756_v54  ;;  %18209 = vst [vmem:[#allocation29_spill] sm:$0xff] %v14758_v45 }
 0x235   : > { %11809 = vmatmul.mubr.msk.f32.gmra.mxu0 %vm365_vm1, %v14608_v57  ;;  %11886 = vmatmul.mubr.msk.f32.gmra.mxu1 %vm365_vm1, %v14748_v9 }
 0x236   : > { %11811 = vmatprep.mubr.msk.f32.mxu0 %vm365_vm1, %v14612_v13  ;;  %11888 = vmatprep.mubr.msk.f32.mxu1 %vm365_vm1, %v14752_v3 }
 0x239   : > { %11812 = vmatmul.mubr.msk.f32.gmra.mxu0 %vm365_vm1, %v14624_v18  ;;  %v11537_v60 = vpop.f32.mrf.mxu0  ;;  %v11590_v50 = vpop.f32.mrf.mxu1  ;;  %11889 = vmatmul.mubr.msk.f32.gmra.mxu1 %vm365_vm1, %v14764_v17 }
 0x23a   : > { %11814 = vmatprep.mubr.msk.f32.mxu0 %vm365_vm1, %v14628_v0  ;;  %v14770_v38 = vadd.f32 %v11587_v20, %v11537_v60 }
 0x23b   : > { %v14774_v45 = vpop.f32.mrf.mxu1 }
 0x23c   : > { %18210 = vst [vmem:[#allocation30_spill] sm:$0xff] %v14774_v45 }
 0x23d   : > { %11815 = vmatmul.mubr.msk.f32.gmra.mxu0 %vm365_vm1, %v14636_v46  ;;  %v11645_v54 = vpop.f32.mrf.mxu1 }
 0x23e   : > { %11817 = vmatprep.mubr.msk.f32.mxu0 %vm365_vm1, %v14642_v49 }
 0x23f   : > { %v14780_v11 = vpop.f32.mrf.mxu1 }
 0x240   : > { %18211 = vst [vmem:[#allocation31_spill] sm:$0xff] %v14780_v11 }
 0x241   : > { %11818 = vmatmul.mubr.msk.f32.gmra.mxu0 %vm365_vm1, %v14650_v27  ;;  %v11648_v60 = vpop.f32.mrf.mxu1 }
 0x242   : > { %11820 = vmatprep.mubr.msk.f32.mxu0 %vm365_vm1, %v14654_v40 }
 0x243   : > { %v14786_v20 = vpop.f32.mrf.mxu1 }
 0x244   : > { %18212 = vst [vmem:[#allocation32_spill] sm:$0xff] %v14786_v20 }
 0x245   : > { %11821 = vmatmul.mubr.msk.f32.gmra.mxu0 %vm365_vm1, %v14664_v59  ;;  %v11651_v45 = vpop.f32.mrf.mxu1 }
 0x246   : > { %11823 = vmatprep.mubr.msk.f32.mxu0 %vm365_vm1, %v14670_v19 }
 0x247   : > { %v14792_v48 = vpop.f32.mrf.mxu1 }
 0x248   : > { %18213 = vst [vmem:[#allocation33_spill] sm:$0xff] %v14792_v48 }
 0x249   : > { %11824 = vmatmul.mubr.msk.f32.gmra.mxu0 %vm365_vm1, %v14677_v8  ;;  %v11654_v11 = vpop.f32.mrf.mxu1 }
 0x24a   : > { %11826 = vmatprep.mubr.msk.f32.mxu0 %vm365_vm1, %v14680_v62 }
 0x24b   : > { %v14798_v55 = vpop.f32.mrf.mxu1 }
 0x24c   : > { %18214 = vst [vmem:[#allocation34_spill] sm:$0xff] %v14798_v55 }
 0x24d   : > { %11827 = vmatmul.mubr.msk.f32.gmra.mxu0 %vm365_vm1, %v14692_v30  ;;  %v11657_v20 = vpop.f32.mrf.mxu1 }
 0x24e   : > { %11829 = vmatprep.mubr.msk.f32.mxu0 %vm365_vm1, %v14696_v32 }
 0x24f   : > { %v14804_v23 = vpop.f32.mrf.mxu1 }
 0x250   : > { %18215 = vst [vmem:[#allocation35_spill] sm:$0xff] %v14804_v23  ;;  %v14824_v23 = vpop.f32.mrf.mxu0 }
 0x251   : > { %11830 = vmatmul.mubr.msk.f32.gmra.mxu0 %vm365_vm1, %v14706_v31  ;;  %v14810_v48 = vpop.f32.mrf.mxu1  ;;  %18218 = vst [vmem:[#allocation38_spill] sm:$0xff] %v14824_v23 }
 0x252   : > { %11832 = vmatprep.mubr.msk.f32.mxu0 %vm365_vm1, %v14712_v39 }
 0x253   : > { %v14812_v37 = vpop.f32.mrf.mxu1 }
 0x254   : > { %18216 = vst [vmem:[#allocation36_spill] sm:$0xff] %v14812_v37 }
 0x255   : > { %11833 = vmatmul.mubr.msk.f32.gmra.mxu0 %vm365_vm1, %v14720_v53  ;;  %v14818_v55 = vpop.f32.mrf.mxu1 }
 0x256   : > { %11835 = vmatprep.mubr.msk.f32.mxu0 %vm365_vm1, %v14726_v16 }
 0x257   : > { %v14820_v22 = vpop.f32.mrf.mxu1 }
 0x258   : > { %18217 = vst [vmem:[#allocation37_spill] sm:$0xff] %v14820_v22 }
 0x259   : > { %11836 = vmatmul.mubr.msk.f32.gmra.mxu0 %vm365_vm1, %v14736_v51  ;;  %v14828_v6 = vpop.f32.mrf.mxu1 }
 0x25a   : > { %11838 = vmatprep.mubr.msk.f32.mxu0 %vm365_vm1, %v14740_v29 }
 0x25b   : > { %v14830_v37 = vpop.f32.mrf.mxu1 }
 0x25c   : > { %18219 = vst [vmem:[#allocation39_spill] sm:$0xff] %v14830_v37 }
 0x25d   : > { %v11540_v15 = vpop.f32.mrf.mxu0  ;;  %11839 = vmatmul.mubr.msk.f32.gmra.mxu0 %vm365_vm1, %v14748_v9  ;;  %v14838_v22 = vpop.f32.mrf.mxu1 }
 0x25e   : > { %v14834_v36 = vadd.f32 %v11590_v50, %v11540_v15  ;;  %11893 = vmatprep.mubr.msk.f32.mxu0 %vm365_vm1, %v14564_v28 }
 0x25f   : > { %v14840_v4 = vpop.f32.mrf.mxu0  ;;  %v14842_v23 = vpop.f32.mrf.mxu1 }
 0x260   : > { %18220 = vst [vmem:[#allocation40_spill] sm:$0xff] %v14840_v4  ;;  %18221 = vst [vmem:[#allocation41_spill] sm:$0xff] %v14842_v23 }
 0x261   : > { %v11595_v1 = vpop.f32.mrf.mxu0  ;;  %11894 = vmatmul.mubr.msk.f32.vlgmr.msra.gmra.mxu0 %vm365_vm1, %v14572_v63  ;;  %v14851_v50 = vpop.f32.mrf.mxu1 }
 0x262   : > { %v2879_v37 = vadd.f32 %v11595_v1, %v14285_v42  ;;  %11896 = vmatprep.mubr.msk.f32.mxu0 %vm365_vm1, %v14576_v26 }
 0x263   : > { %v14849_v15 = vpop.f32.mrf.mxu0  ;;  %v14857_v23 = vpop.f32.mrf.mxu1 }
 0x264   : > { %v14853_v28 = vadd.f32 %v11645_v54, %v2879_v37 }
 0x265   : > { %v11598_v61 = vpop.f32.mrf.mxu0  ;;  %11897 = vmatmul.mubr.msk.f32.gmra.mxu0 %vm365_vm1, %v14584_v24  ;;  %v14864_v1 = vpop.f32.mrf.mxu1 }
 0x266   : > { %v2881_v4 = vadd.f32 %v11598_v61, %v14315_v7  ;;  %11899 = vmatprep.mubr.msk.f32.mxu0 %vm365_vm1, %v14588_v5 }
 0x267   : > { %v14862_v42 = vpop.f32.mrf.mxu0  ;;  %v14870_v37 = vpop.f32.mrf.mxu1 }
 0x268   : > { %v14866_v63 = vadd.f32 %v11648_v60, %v2881_v4 }
 0x269   : > { %v11601_v26 = vpop.f32.mrf.mxu0  ;;  %11900 = vmatmul.mubr.msk.f32.gmra.mxu0 %vm365_vm1, %v14596_v34  ;;  %v14877_v61 = vpop.f32.mrf.mxu1 }
 0x26a   : > { %v2883_v24 = vadd.f32 %v11601_v26, %v14331_v21  ;;  %11902 = vmatprep.mubr.msk.f32.mxu0 %vm365_vm1, %v14600_v10 }
 0x26b   : > { %v14875_v7 = vpop.f32.mrf.mxu0  ;;  %v14883_v4 = vpop.f32.mrf.mxu1 }
 0x26c   : > { %v14879_v5 = vadd.f32 %v11651_v45, %v2883_v24 }
 0x26d   : > { %v11604_v54 = vpop.f32.mrf.mxu0  ;;  %11903 = vmatmul.mubr.msk.f32.gmra.mxu0 %vm365_vm1, %v14608_v57  ;;  %v14890_v10 = vpop.f32.mrf.mxu1 }
 0x26e   : > { %v2885_v34 = vadd.f32 %v11604_v54, %v14347_v33  ;;  %11905 = vmatprep.mubr.msk.f32.mxu0 %vm365_vm1, %v14612_v13 }
 0x26f   : > { %v14888_v21 = vpop.f32.mrf.mxu0  ;;  %v14896_v45 = vpop.f32.mrf.mxu1 }
 0x270   : > { %v14892_v60 = vadd.f32 %v11654_v11, %v2885_v34 }
 0x271   : > { %v11607_v26 = vpop.f32.mrf.mxu0  ;;  %11906 = vmatmul.mubr.msk.f32.gmra.mxu0 %vm365_vm1, %v14624_v18  ;;  %v14903_v13 = vpop.f32.mrf.mxu1 }
 0x272   : > { %v2887_v57 = vadd.f32 %v11607_v26, %v14363_v12  ;;  %11908 = vmatprep.mubr.msk.f32.mxu0 %vm365_vm1, %v14628_v0 }
 0x273   : > { %v14901_v33 = vpop.f32.mrf.mxu0  ;;  %v14909_v11 = vpop.f32.mrf.mxu1 }
 0x274   : > { %v14905_v24 = vadd.f32 %v11657_v20, %v2887_v57 }
 0x275   : > { %v11610_v54 = vpop.f32.mrf.mxu0  ;;  %11909 = vmatmul.mubr.msk.f32.gmra.mxu0 %vm365_vm1, %v14636_v46  ;;  %v14916_v0 = vpop.f32.mrf.mxu1 }
 0x276   : > { %v2889_v18 = vadd.f32 %v11610_v54, %v14379_v35  ;;  %11911 = vmatprep.mubr.msk.f32.mxu0 %vm365_vm1, %v14642_v49 }
 0x277   : > { %v14914_v12 = vpop.f32.mrf.mxu0  ;;  %v14923_v26 = vpop.f32.mrf.mxu1 }
 0x278   : > { %v14919_v34 = vadd.f32 %v14810_v48, %v2889_v18 }
 0x279   : > { %v11613_v20 = vpop.f32.mrf.mxu0  ;;  %11912 = vmatmul.mubr.msk.f32.gmra.mxu0 %vm365_vm1, %v14650_v27  ;;  %v14930_v49 = vpop.f32.mrf.mxu1 }
 0x27a   : > { %v2891_v46 = vadd.f32 %v11613_v20, %v14393_v41  ;;  %11914 = vmatprep.mubr.msk.f32.mxu0 %vm365_vm1, %v14654_v40 }
 0x27b   : > { %v14928_v35 = vpop.f32.mrf.mxu0  ;;  %v14937_v54 = vpop.f32.mrf.mxu1 }
 0x27c   : > { %v14933_v57 = vadd.f32 %v14818_v55, %v2891_v46  ;;  %18222 = vst [vmem:[#allocation42_spill] sm:$0xff] %v14937_v54 }
 0x27d   : > { %v11616_v48 = vpop.f32.mrf.mxu0  ;;  %11915 = vmatmul.mubr.msk.f32.gmra.mxu0 %vm365_vm1, %v14664_v59  ;;  %v14944_v40 = vpop.f32.mrf.mxu1 }
 0x27e   : > { %v2893_v27 = vadd.f32 %v11616_v48, %v14405_v25  ;;  %11917 = vmatprep.mubr.msk.f32.mxu0 %vm365_vm1, %v14670_v19 }
 0x27f   : > { %v14942_v41 = vpop.f32.mrf.mxu0  ;;  %v14951_v20 = vpop.f32.mrf.mxu1 }
 0x280   : > { %v14947_v18 = vadd.f32 %v14828_v6, %v2893_v27  ;;  %18223 = vst [vmem:[#allocation43_spill] sm:$0xff] %v14951_v20 }
 0x281   : > { %v11619_v55 = vpop.f32.mrf.mxu0  ;;  %11918 = vmatmul.mubr.msk.f32.gmra.mxu0 %vm365_vm1, %v14677_v8  ;;  %v14958_v19 = vpop.f32.mrf.mxu1 }
 0x282   : > { %v2895_v59 = vadd.f32 %v11619_v55, %v14429_v44  ;;  %11920 = vmatprep.mubr.msk.f32.mxu0 %vm365_vm1, %v14680_v62  ;;  %18224 = vst [vmem:[#allocation44_spill] sm:$0xff] %v14958_v19 }
 0x283   : > { %v14956_v25 = vpop.f32.mrf.mxu0  ;;  %v14965_v48 = vpop.f32.mrf.mxu1 }
 0x284   : > { %v14961_v46 = vadd.f32 %v14838_v22, %v2895_v59  ;;  %18225 = vst [vmem:[#allocation45_spill] sm:$0xff] %v14965_v48 }
 0x285   : > { %v11622_v6 = vpop.f32.mrf.mxu0  ;;  %11921 = vmatmul.mubr.msk.f32.gmra.mxu0 %vm365_vm1, %v14692_v30  ;;  %v11751_v62 = vpop.f32.mrf.mxu1 }
 0x286   : > { %v2897_v8 = vadd.f32 %v11622_v6, %v14467_v56  ;;  %11923 = vmatprep.mubr.msk.f32.mxu0 %vm365_vm1, %v14696_v32 }
 0x287   : > { %v14970_v44 = vpop.f32.mrf.mxu0  ;;  %v14977_v22 = vpop.f32.mrf.mxu1 }
 0x288   : > { %v14973_v27 = vadd.f32 %v14851_v50, %v2897_v8  ;;  %18226 = vst [vmem:[#allocation46_spill] sm:$0xff] %v14977_v22 }
 0x289   : > { %v11625_v55 = vpop.f32.mrf.mxu0  ;;  %11924 = vmatmul.mubr.msk.f32.gmra.mxu0 %vm365_vm1, %v14706_v31  ;;  %v11754_v32 = vpop.f32.mrf.mxu1 }
 0x28a   : > { %v2899_v30 = vadd.f32 %v11625_v55, %v14526_v14  ;;  %11926 = vmatprep.mubr.msk.f32.mxu0 %vm365_vm1, %v14712_v39 }
 0x28b   : > { %v14982_v56 = vpop.f32.mrf.mxu0  ;;  %v14989_v50 = vpop.f32.mrf.mxu1 }
 0x28c   : > { %v14985_v59 = vadd.f32 %v14864_v1, %v2899_v30  ;;  %18227 = vst [vmem:[#allocation47_spill] sm:$0xff] %v14989_v50 }
 0x28d   : > { %v11628_v6 = vpop.f32.mrf.mxu0  ;;  %11927 = vmatmul.mubr.msk.f32.gmra.mxu0 %vm365_vm1, %v14720_v53  ;;  %v11757_v39 = vpop.f32.mrf.mxu1 }
 0x28e   : > { %v2901_v31 = vadd.f32 %v11628_v6, %v14638_v52  ;;  %11929 = vmatprep.mubr.msk.f32.mxu0 %vm365_vm1, %v14726_v16 }
 0x28f   : > { %v14994_v14 = vpop.f32.mrf.mxu0  ;;  %v15001_v1 = vpop.f32.mrf.mxu1 }
 0x290   : > { %v14997_v8 = vadd.f32 %v14877_v61, %v2901_v31  ;;  %18228 = vst [vmem:[#allocation48_spill] sm:$0xff] %v15001_v1 }
 0x291   : > { %v11631_v55 = vpop.f32.mrf.mxu0  ;;  %11930 = vmatmul.mubr.msk.f32.gmra.mxu0 %vm365_vm1, %v14736_v51  ;;  %v11760_v16 = vpop.f32.mrf.mxu1 }
 0x292   : > { %v2903_v53 = vadd.f32 %v11631_v55, %v14682_v47  ;;  %11932 = vmatprep.mubr.msk.f32.mxu0 %vm365_vm1, %v14740_v29  ;;  %v4890_v29 = vld [vmem:[#allocation2 + $0x19a] sm:$0xff] }
 0x293   : > { %v15006_v52 = vpop.f32.mrf.mxu0  ;;  %v15013_v61 = vpop.f32.mrf.mxu1 }
 0x294   : > { %v15009_v30 = vadd.f32 %v14890_v10, %v2903_v53  ;;  %18229 = vst [vmem:[#allocation49_spill] sm:$0xff] %v15013_v61 }
 0x295   : > { %v11634_v6 = vpop.f32.mrf.mxu0  ;;  %11933 = vmatmul.mubr.msk.f32.gmra.mxu0 %vm365_vm1, %v14748_v9  ;;  %v11763_v31 = vpop.f32.mrf.mxu1 }
 0x296   : > { %v2905_v51 = vadd.f32 %v11634_v6, %v14724_v43  ;;  %11935 = vmatprep.mubr.msk.f32.mxu0 %vm365_vm1, %v14752_v3  ;;  %v4891_v43 = vld [vmem:[#allocation2 + $0x1a2] sm:$0xff] }
 0x297   : > { %v15018_v47 = vpop.f32.mrf.mxu0  ;;  %v15025_v53 = vpop.f32.mrf.mxu1 }
 0x298   : > { %v15021_v55 = vadd.f32 %v14903_v13, %v2905_v51  ;;  %18230 = vst [vmem:[#allocation50_spill] sm:$0xff] %v15025_v53 }
 0x299   : > { %v11637_v10 = vpop.f32.mrf.mxu0  ;;  %11936 = vmatmul.mubr.msk.f32.gmra.mxu0 %vm365_vm1, %v14764_v17  ;;  %v11766_v13 = vpop.f32.mrf.mxu1 }
 0x29a   : > { %v2907_v9 = vadd.f32 %v11637_v10, %v14770_v38  ;;  %11938 = vmatprep.mubr.msk.f32.mxu0 %vm365_vm1, %v4890_v29 }
 0x29b   : > { %v15029_v6 = vpop.f32.mrf.mxu0  ;;  %v15041_v10 = vpop.f32.mrf.mxu1 }
 0x29c   : > { %v15032_v3 = vadd.f32 %v14916_v0, %v2907_v9  ;;  %18231 = vst [vmem:[#allocation51_spill] sm:$0xff] %v15041_v10 }
 0x29d   : > { %v11640_v61 = vpop.f32.mrf.mxu0  ;;  %11939 = vmatmul.mubr.msk.f32.gmra.mxu0 %vm365_vm1, %v4891_v43  ;;  %v11769_v9 = vpop.f32.mrf.mxu1 }
 0x29e   : > { %v2909_v51 = vadd.f32 %v11640_v61, %v14834_v36 }
 0x29f   : > { %v15036_v1 = vpop.f32.mrf.mxu0  ;;  %v15053_v61 = vpop.f32.mrf.mxu1 }
 0x2a0   : > { %v15039_v17 = vadd.f32 %v14930_v49, %v2909_v51  ;;  %18233 = vst [vmem:[#allocation53_spill] sm:$0xff] %v15053_v61 }
 0x2a1   : > { %v11695_v38 = vpop.f32.mrf.mxu0 }
 0x2a2   : > { %v15044_v29 = vadd.f32 %v11695_v38, %v14853_v28  ;;  %v11772_v38 = vpop.f32.mrf.mxu1 }
 0x2a3   : > { %v15046_v53 = vpop.f32.mrf.mxu0 }
 0x2a5   : > { %v11698_v0 = vpop.f32.mrf.mxu0 }
 0x2a6   : > { %v15049_v43 = vadd.f32 %v11698_v0, %v14866_v63  ;;  %v15065_v0 = vpop.f32.mrf.mxu1 }
 0x2a7   : > { %v15051_v50 = vpop.f32.mrf.mxu0  ;;  %18234 = vst [vmem:[#allocation54_spill] sm:$0xff] %v15065_v0 }
 0x2a8   : > { %18232 = vst [vmem:[#allocation52_spill] sm:$0xff] %v15049_v43 }
 0x2a9   : > { %v11701_v36 = vpop.f32.mrf.mxu0 }
 0x2aa   : > { %v3663_v49 = vadd.f32 %v11701_v36, %v14879_v5 }
 0x2ab   : > { %v15056_v51 = vpop.f32.mrf.mxu0 }
 0x2ac   : > { %v15058_v10 = vadd.f32 %v11751_v62, %v3663_v49  ;;  %v11775_v62 = vpop.f32.mrf.mxu1 }
 0x2ad   : > { %v11704_v28 = vpop.f32.mrf.mxu0 }
 0x2ae   : > { %v3665_v22 = vadd.f32 %v11704_v28, %v14892_v60 }
 0x2af   : > { %v15061_v48 = vpop.f32.mrf.mxu0 }
 0x2b0   : > { %v15063_v19 = vadd.f32 %v11754_v32, %v3665_v22  ;;  %v15077_v22 = vpop.f32.mrf.mxu1 }
 0x2b1   : > { %v11707_v63 = vpop.f32.mrf.mxu0  ;;  %18235 = vst [vmem:[#allocation55_spill] sm:$0xff] %v15077_v22 }
 0x2b2   : > { %v3667_v43 = vadd.f32 %v11707_v63, %v14905_v24 }
 0x2b3   : > { %v15068_v61 = vpop.f32.mrf.mxu0 }
 0x2b4   : > { %v15070_v5 = vadd.f32 %v11757_v39, %v3667_v43  ;;  %v11778_v39 = vpop.f32.mrf.mxu1 }
 0x2b5   : > { %v11710_v36 = vpop.f32.mrf.mxu0 }
 0x2b6   : > { %v3669_v49 = vadd.f32 %v11710_v36, %v14919_v34 }
 0x2b7   : > { %v15073_v54 = vpop.f32.mrf.mxu0 }
 0x2b8   : > { %v15075_v60 = vadd.f32 %v11760_v16, %v3669_v49  ;;  %v15089_v16 = vpop.f32.mrf.mxu1 }
 0x2b9   : > { %v11713_v28 = vpop.f32.mrf.mxu0  ;;  %18237 = vst [vmem:[#allocation57_spill] sm:$0xff] %v15089_v16 }
 0x2ba   : > { %v3671_v32 = vadd.f32 %v11713_v28, %v14933_v57 }
 0x2bb   : > { %v15080_v0 = vpop.f32.mrf.mxu0 }
 0x2bc   : > { %18236 = vst [vmem:[#allocation56_spill] sm:$0xff] %v15080_v0  ;;  %v15082_v24 = vadd.f32 %v11763_v31, %v3671_v32  ;;  %v11781_v31 = vpop.f32.mrf.mxu1 }
 0x2bd   : > { %v11716_v63 = vpop.f32.mrf.mxu0 }
 0x2be   : > { %v3673_v43 = vadd.f32 %v11716_v63, %v14947_v18 }
 0x2bf   : > { %v15085_v20 = vpop.f32.mrf.mxu0 }
 0x2c0   : > { %v15087_v34 = vadd.f32 %v11766_v13, %v3673_v43  ;;  %v15101_v13 = vpop.f32.mrf.mxu1 }
 0x2c1   : > { %v11719_v36 = vpop.f32.mrf.mxu0  ;;  %18240 = vst [vmem:[#allocation60_spill] sm:$0xff] %v15101_v13 }
 0x2c2   : > { %v3675_v49 = vadd.f32 %v11719_v36, %v14961_v46 }
 0x2c3   : > { %v15092_v22 = vpop.f32.mrf.mxu0 }
 0x2c4   : > { %18238 = vst [vmem:[#allocation58_spill] sm:$0xff] %v15092_v22  ;;  %v15094_v57 = vadd.f32 %v11769_v9, %v3675_v49  ;;  %v11784_v9 = vpop.f32.mrf.mxu1 }
 0x2c5   : > { %v11722_v28 = vpop.f32.mrf.mxu0 }
 0x2c6   : > { %v3677_v32 = vadd.f32 %v11722_v28, %v14973_v27 }
 0x2c7   : > { %v15097_v0 = vpop.f32.mrf.mxu0 }
 0x2c8   : > { %18239 = vst [vmem:[#allocation59_spill] sm:$0xff] %v15097_v0  ;;  %v15099_v18 = vadd.f32 %v11772_v38, %v3677_v32  ;;  %v15113_v38 = vpop.f32.mrf.mxu1 }
 0x2c9   : > { %v11725_v63 = vpop.f32.mrf.mxu0  ;;  %18243 = vst [vmem:[#allocation63_spill] sm:$0xff] %v15113_v38 }
 0x2ca   : > { %v3679_v43 = vadd.f32 %v11725_v63, %v14985_v59 }
 0x2cb   : > { %v15104_v16 = vpop.f32.mrf.mxu0 }
 0x2cc   : > { %18241 = vst [vmem:[#allocation61_spill] sm:$0xff] %v15104_v16  ;;  %v15106_v46 = vadd.f32 %v11775_v62, %v3679_v43  ;;  %v11787_v62 = vpop.f32.mrf.mxu1 }
 0x2cd   : > { %v11728_v36 = vpop.f32.mrf.mxu0 }
 0x2ce   : > { %v3681_v49 = vadd.f32 %v11728_v36, %v14997_v8 }
 0x2cf   : > { %v15109_v22 = vpop.f32.mrf.mxu0 }
 0x2d0   : > { %18242 = vst [vmem:[#allocation62_spill] sm:$0xff] %v15109_v22  ;;  %v15111_v27 = vadd.f32 %v11778_v39, %v3681_v49  ;;  %v15125_v39 = vpop.f32.mrf.mxu1 }
 0x2d1   : > { %v11731_v28 = vpop.f32.mrf.mxu0  ;;  %18246 = vst [vmem:[#allocation66_spill] sm:$0xff] %v15125_v39 }
 0x2d2   : > { %v3683_v32 = vadd.f32 %v11731_v28, %v15009_v30 }
 0x2d3   : > { %v15116_v13 = vpop.f32.mrf.mxu0 }
 0x2d4   : > { %18244 = vst [vmem:[#allocation64_spill] sm:$0xff] %v15116_v13  ;;  %v15118_v59 = vadd.f32 %v11781_v31, %v3683_v32  ;;  %v11790_v31 = vpop.f32.mrf.mxu1 }
 0x2d5   : > { %v11734_v63 = vpop.f32.mrf.mxu0 }
 0x2d6   : > { %v3685_v43 = vadd.f32 %v11734_v63, %v15021_v55 }
 0x2d7   : > { %v15121_v16 = vpop.f32.mrf.mxu0 }
 0x2d8   : > { %18245 = vst [vmem:[#allocation65_spill] sm:$0xff] %v15121_v16  ;;  %v15123_v8 = vadd.f32 %v11784_v9, %v3685_v43  ;;  %v15139_v9 = vpop.f32.mrf.mxu1 }
 0x2d9   : > { %v11737_v36 = vpop.f32.mrf.mxu0  ;;  %18249 = vst [vmem:[#allocation69_spill] sm:$0xff] %v15139_v9 }
 0x2da   : > { %v3687_v49 = vadd.f32 %v11737_v36, %v15032_v3  ;;  %v15145_v3 = vpop.f32.mrf.mxu1 }
 0x2db   : > { %v15128_v38 = vpop.f32.mrf.mxu0  ;;  %18251 = vst [vmem:[#allocation71_spill] sm:$0xff] %v15145_v3  ;;  %v18305_v3 = vld [vmem:[#allocation26_spill] sm:$0xff] }
 0x2dc   : > { %18247 = vst [vmem:[#allocation67_spill] sm:$0xff] %v15128_v38  ;;  %v15130_v30 = vadd.f32 %v11787_v62, %v3687_v49 }
 0x2dd   : > { %v11740_v28 = vpop.f32.mrf.mxu0 }
 0x2de   : > { %v3689_v32 = vadd.f32 %v11740_v28, %v15039_v17  ;;  %v15152_v17 = vpop.f32.mrf.mxu1 }
 0x2df   : > { %v15133_v13 = vpop.f32.mrf.mxu0  ;;  %18254 = vst [vmem:[#allocation74_spill] sm:$0xff] %v15152_v17  ;;  %v18293_v17 = vld [vmem:[#allocation16_spill] sm:$0xff] }
 0x2e0   : > { %18248 = vst [vmem:[#allocation68_spill] sm:$0xff] %v15133_v13  ;;  %v15135_v55 = vadd.f32 %v11790_v31, %v3689_v32  ;;  %v15159_v9 = vpop.f32.mrf.mxu1 }
 0x2e1   : > { %v15137_v63 = vpop.f32.mrf.mxu0  ;;  %18257 = vst [vmem:[#allocation77_spill] sm:$0xff] %v15159_v9 }
 0x2e3   : > { %v15141_v43 = vpop.f32.mrf.mxu0 }
 0x2e5   : > { %v15143_v39 = vpop.f32.mrf.mxu0 }
 0x2e6   : > { %18250 = vst [vmem:[#allocation70_spill] sm:$0xff] %v15143_v39 }
 0x2e7   : > { %v15147_v62 = vpop.f32.mrf.mxu0 }
 0x2e8   : > { %18252 = vst [vmem:[#allocation72_spill] sm:$0xff] %v15147_v62  ;;  %v15166_v62 = vpop.f32.mrf.mxu1 }
 0x2e9   : > { %v11801_v36 = vpop.f32.mrf.mxu0  ;;  %18260 = vst [vmem:[#allocation80_spill] sm:$0xff] %v15166_v62 }
 0x2ea   : > { %v15150_v49 = vadd.f32 %v11801_v36, %v15058_v10 }
 0x2eb   : > { %v15154_v28 = vpop.f32.mrf.mxu0 }
 0x2ec   : > { %18253 = vst [vmem:[#allocation73_spill] sm:$0xff] %v15150_v49  ;;  %18255 = vst [vmem:[#allocation75_spill] sm:$0xff] %v15154_v28  ;;  %v15173_v28 = vpop.f32.mrf.mxu1 }
 0x2ed   : > { %v11804_v31 = vpop.f32.mrf.mxu0  ;;  %18263 = vst [vmem:[#allocation83_spill] sm:$0xff] %v15173_v28  ;;  %v18290_v28 = vld [vmem:[#allocation12_spill] sm:$0xff] }
 0x2ee   : > { %v15157_v32 = vadd.f32 %v11804_v31, %v15063_v19 }
 0x2ef   : > { %v15161_v13 = vpop.f32.mrf.mxu0 }
 0x2f0   : > { %18256 = vst [vmem:[#allocation76_spill] sm:$0xff] %v15157_v32  ;;  %18258 = vst [vmem:[#allocation78_spill] sm:$0xff] %v15161_v13  ;;  %v15180_v13 = vpop.f32.mrf.mxu1 }
 0x2f1   : > { %v11807_v38 = vpop.f32.mrf.mxu0  ;;  %18266 = vst [vmem:[#allocation86_spill] sm:$0xff] %v15180_v13 }
 0x2f2   : > { %v15164_v16 = vadd.f32 %v11807_v38, %v15070_v5 }
 0x2f3   : > { %v15168_v10 = vpop.f32.mrf.mxu0 }
 0x2f4   : > { %18259 = vst [vmem:[#allocation79_spill] sm:$0xff] %v15164_v16  ;;  %18261 = vst [vmem:[#allocation81_spill] sm:$0xff] %v15168_v10  ;;  %v15187_v10 = vpop.f32.mrf.mxu1 }
 0x2f5   : > { %v11810_v36 = vpop.f32.mrf.mxu0  ;;  %18269 = vst [vmem:[#allocation89_spill] sm:$0xff] %v15187_v10  ;;  %v18284_v10 = vld [vmem:[#allocation6_spill] sm:$0xff] }
 0x2f6   : > { %v15171_v49 = vadd.f32 %v11810_v36, %v15075_v60 }
 0x2f7   : > { %v15175_v19 = vpop.f32.mrf.mxu0 }
 0x2f8   : > { %18262 = vst [vmem:[#allocation82_spill] sm:$0xff] %v15171_v49  ;;  %18264 = vst [vmem:[#allocation84_spill] sm:$0xff] %v15175_v19  ;;  %v15194_v19 = vpop.f32.mrf.mxu1 }
 0x2f9   : > { %v11813_v31 = vpop.f32.mrf.mxu0  ;;  %18272 = vst [vmem:[#allocation92_spill] sm:$0xff] %v15194_v19  ;;  %v18281_v19 = vld [vmem:[#allocation11_spill] sm:$0xff] }
 0x2fa   : > { %v15178_v32 = vadd.f32 %v11813_v31, %v15082_v24 }
 0x2fb   : > { %v15182_v5 = vpop.f32.mrf.mxu0 }
 0x2fc   : > { %18265 = vst [vmem:[#allocation85_spill] sm:$0xff] %v15178_v32  ;;  %18267 = vst [vmem:[#allocation87_spill] sm:$0xff] %v15182_v5  ;;  %v15201_v5 = vpop.f32.mrf.mxu1 }
 0x2fd   : > { %v11816_v38 = vpop.f32.mrf.mxu0  ;;  %18275 = vst [vmem:[#allocation95_spill] sm:$0xff] %v15201_v5 }
 0x2fe   : > { %v15185_v16 = vadd.f32 %v11816_v38, %v15087_v34 }
 0x2ff   : > { %v15189_v60 = vpop.f32.mrf.mxu0 }
 0x300   : > { %18268 = vst [vmem:[#allocation88_spill] sm:$0xff] %v15185_v16  ;;  %18270 = vst [vmem:[#allocation90_spill] sm:$0xff] %v15189_v60  ;;  %v15208_v60 = vpop.f32.mrf.mxu1 }
 0x301   : > { %v11819_v36 = vpop.f32.mrf.mxu0  ;;  %18278 = vst [vmem:[#allocation98_spill] sm:$0xff] %v15208_v60 }
 0x302   : > { %v15192_v49 = vadd.f32 %v11819_v36, %v15094_v57  ;;  %v2361_v36 = vadd.f32 %v14302_v2, %v14300_v58  ;;  %v18291_v58 = vld [vmem:[#allocation13_spill] sm:$0xff]  ;;  %v18292_v2 = vld [vmem:[#allocation14_spill] sm:$0xff]  ;;  %v15231_v22 = vpop.f32.mrf.mxu1 }
 0x303   : > { %v15196_v24 = vpop.f32.mrf.mxu0  ;;  %v2421_v9 = vadd.f32 %v18292_v2, %v18291_v58  ;;  %18295 = vst [vmem:[#allocation11_spill] sm:$0xff] %v15231_v22  ;;  %v18304_v58 = vld [vmem:[#allocation23_spill] sm:$0xff] }
 0x304   : > { %18271 = vst [vmem:[#allocation91_spill] sm:$0xff] %v15192_v49  ;;  %18273 = vst [vmem:[#allocation93_spill] sm:$0xff] %v15196_v24  ;;  %v18280_v24 = vld [vmem:[#allocation5_spill] sm:$0xff] }
 0x305   : > { %v11822_v31 = vpop.f32.mrf.mxu0 }
 0x306   : > { %v15199_v32 = vadd.f32 %v11822_v31, %v15099_v18  ;;  %v2371_v18 = vadd.f32 %v18281_v19, %v18280_v24  ;;  %v18282_v31 = vld [vmem:[#allocation3_spill] sm:$0xff] }
 0x307   : > { %v15203_v34 = vpop.f32.mrf.mxu0  ;;  %v18294_v19 = vld [vmem:[#allocation15_spill] sm:$0xff] }
 0x308   : > { %18274 = vst [vmem:[#allocation94_spill] sm:$0xff] %v15199_v32  ;;  %18276 = vst [vmem:[#allocation96_spill] sm:$0xff] %v15203_v34  ;;  %v18283_v32 = vld [vmem:[#allocation4_spill] sm:$0xff]  ;;  %v18285_v34 = vld [vmem:[#allocation7_spill] sm:$0xff]  ;;  %v2431_v24 = vadd.f32 %v18294_v19, %v18293_v17  ;;  %v2880_v22 = vadd.f32 %v14862_v42, %v2371_v18  ;;  %v2890_v42 = vadd.f32 %v14928_v35, %v2421_v9 }
 0x309   : > { %v11825_v38 = vpop.f32.mrf.mxu0  ;;  %v2381_v5 = vadd.f32 %v18283_v32, %v18282_v31  ;;  %v2391_v13 = vadd.f32 %v18285_v34, %v18284_v10  ;;  %v18297_v10 = vld [vmem:[#allocation18_spill] sm:$0xff]  ;;  %v18298_v34 = vld [vmem:[#allocation17_spill] sm:$0xff]  ;;  %v18300_v31 = vld [vmem:[#allocation19_spill] sm:$0xff] }
 0x30a   : > { %v15206_v16 = vadd.f32 %v11825_v38, %v15106_v46  ;;  %v18287_v38 = vld [vmem:[#allocation8_spill] sm:$0xff]  ;;  %v18306_v17 = vld [vmem:[#allocation25_spill] sm:$0xff] }
 0x30b   : > { %v15210_v57 = vpop.f32.mrf.mxu0  ;;  %v2481_v19 = vadd.f32 %v18306_v17, %v18305_v3  ;;  %v18314_v18 = vld [vmem:[#allocation32_spill] sm:$0xff]  ;;  %v18315_v17 = vld [vmem:[#allocation33_spill] sm:$0xff] }
 0x30c   : > { %18277 = vst [vmem:[#allocation97_spill] sm:$0xff] %v15206_v16  ;;  %18279 = vst [vmem:[#allocation99_spill] sm:$0xff] %v15210_v57  ;;  %v18288_v16 = vld [vmem:[#allocation9_spill] sm:$0xff]  ;;  %v18289_v57 = vld [vmem:[#allocation10_spill] sm:$0xff] }
 0x30d   : > { %v11828_v49 = vpop.f32.mrf.mxu0  ;;  %v2401_v60 = vadd.f32 %v18288_v16, %v18287_v38  ;;  %v2411_v62 = vadd.f32 %v18290_v28, %v18289_v57  ;;  %v18301_v16 = vld [vmem:[#allocation22_spill] sm:$0xff]  ;;  %v18302_v38 = vld [vmem:[#allocation21_spill] sm:$0xff]  ;;  %v2878_v28 = vadd.f32 %v14849_v15, %v2361_v36  ;;  %v18303_v57 = vld [vmem:[#allocation24_spill] sm:$0xff] }
 0x30e   : > { %v15221_v46 = vadd.f32 %v11828_v49, %v15111_v27  ;;  %v2441_v27 = vadd.f32 %v18298_v34, %v18297_v10  ;;  %v18299_v49 = vld [vmem:[#allocation20_spill] sm:$0xff]  ;;  %v2461_v39 = vadd.f32 %v18302_v38, %v18301_v16  ;;  %v2471_v2 = vadd.f32 %v18304_v58, %v18303_v57  ;;  %v18308_v36 = vld [vmem:[#allocation27_spill] sm:$0xff]  ;;  %v18309_v38 = vld [vmem:[#allocation38_spill] sm:$0xff] }
 0x30f   : > { %v15233_v32 = vpop.f32.mrf.mxu0  ;;  %v2884_v10 = vadd.f32 %v14888_v21, %v2391_v13  ;;  %v2886_v34 = vadd.f32 %v14901_v33, %v2401_v60  ;;  %v18307_v15 = vld [vmem:[#allocation28_spill] sm:$0xff]  ;;  %v18310_v57 = vld [vmem:[#allocation29_spill] sm:$0xff]  ;;  %v18312_v13 = vld [vmem:[#allocation30_spill] sm:$0xff]  ;;  %v3270_v58 = vadd.f32 %v18314_v18, %v2880_v22 }
 0x310   : > { %18286 = vst [vmem:[#allocation5_spill] sm:$0xff] %v15221_v46  ;;  %18296 = vst [vmem:[#allocation3_spill] sm:$0xff] %v15233_v32  ;;  %v2451_v46 = vadd.f32 %v18300_v31, %v18299_v49  ;;  %v2882_v32 = vadd.f32 %v14875_v7, %v2381_v5  ;;  %v2888_v49 = vadd.f32 %v14914_v12, %v2411_v62  ;;  %v15260_v5 = vpop.f32.mrf.mxu1  ;;  %v18311_v33 = vld [vmem:[#allocation40_spill] sm:$0xff]  ;;  %v18313_v62 = vld [vmem:[#allocation31_spill] sm:$0xff] }
 0x311   : > { %v11831_v0 = vpop.f32.mrf.mxu0  ;;  %v2491_v16 = vadd.f32 %v18308_v36, %v18307_v15  ;;  %v2501_v3 = vadd.f32 %v18310_v57, %v18309_v38  ;;  %v2892_v7 = vadd.f32 %v14942_v41, %v2431_v24  ;;  %v2511_v12 = vadd.f32 %v18312_v13, %v18311_v33  ;;  %v18316_v24 = vld [vmem:[#allocation34_spill] sm:$0xff]  ;;  %v18317_v38 = vld [vmem:[#allocation35_spill] sm:$0xff]  ;;  %v18318_v33 = vld [vmem:[#allocation36_spill] sm:$0xff] }
 0x312   : > { %v15252_v31 = vadd.f32 %v11831_v0, %v15118_v59  ;;  %v3268_v0 = vadd.f32 %v18313_v62, %v2878_v28  ;;  %v2894_v59 = vadd.f32 %v14956_v25, %v2441_v27  ;;  %v2896_v60 = vadd.f32 %v14970_v44, %v2451_v46  ;;  %v18319_v25 = vld [vmem:[#allocation37_spill] sm:$0xff]  ;;  %v18320_v46 = vld [vmem:[#allocation39_spill] sm:$0xff]  ;;  %v18324_v62 = vld [vmem:[#allocation42_spill] sm:$0xff] }
 0x313   : > { %v15262_v21 = vpop.f32.mrf.mxu0  ;;  %v3272_v15 = vadd.f32 %v18315_v17, %v2882_v32  ;;  %v2898_v35 = vadd.f32 %v14982_v56, %v2461_v39  ;;  %v2900_v41 = vadd.f32 %v14994_v14, %v2471_v2  ;;  %v3274_v36 = vadd.f32 %v18316_v24, %v2884_v10  ;;  %v15283_v39 = vpop.f32.mrf.mxu1  ;;  %v18321_v27 = vld [vmem:[#allocation41_spill] sm:$0xff] }
 0x314   : > { %v3276_v57 = vadd.f32 %v18317_v38, %v2886_v34  ;;  %v3278_v13 = vadd.f32 %v18318_v33, %v2888_v49  ;;  %v3280_v44 = vadd.f32 %v18319_v25, %v2890_v42  ;;  %v3282_v22 = vadd.f32 %v18320_v46, %v2892_v7  ;;  %v18332_v24 = vld [vmem:[#allocation49_spill] sm:$0xff]  ;;  %v18333_v38 = vld [vmem:[#allocation58_spill] sm:$0xff]  ;;  %v18334_v33 = vld [vmem:[#allocation59_spill] sm:$0xff] }
 0x315   : > { %v11834_v9 = vpop.f32.mrf.mxu0  ;;  %v2902_v32 = vadd.f32 %v15006_v52, %v2481_v19  ;;  %v2904_v56 = vadd.f32 %v15018_v47, %v2491_v16  ;;  %v3284_v2 = vadd.f32 %v18321_v27, %v2894_v59  ;;  %v3286_v10 = vadd.f32 %v14857_v23, %v2896_v60 }
 0x316   : > { %v15277_v28 = vadd.f32 %v11834_v9, %v15123_v8  ;;  %v2906_v34 = vadd.f32 %v15029_v6, %v2501_v3  ;;  %v3658_v8 = vadd.f32 %v15046_v53, %v3268_v0  ;;  %v3288_v49 = vadd.f32 %v14870_v37, %v2898_v35  ;;  %v18325_v0 = vld [vmem:[#allocation52_spill] sm:$0xff] }
 0x317   : > { %v15285_v14 = vpop.f32.mrf.mxu0  ;;  %v3290_v42 = vadd.f32 %v14883_v4, %v2900_v41  ;;  %v2908_v52 = vadd.f32 %v15036_v1, %v2511_v12  ;;  %v3660_v47 = vadd.f32 %v15051_v50, %v3270_v58  ;;  %v4049_v16 = vadd.f32 %v14944_v40, %v15044_v29  ;;  %v15306_v50 = vpop.f32.mrf.mxu1  ;;  %v18322_v29 = vld [vmem:[#allocation43_spill] sm:$0xff]  ;;  %v18328_v58 = vld [vmem:[#allocation46_spill] sm:$0xff] }
 0x318   : > { %v3662_v7 = vadd.f32 %v15056_v51, %v3272_v15  ;;  %v3664_v23 = vadd.f32 %v15061_v48, %v3274_v36  ;;  %v3292_v53 = vadd.f32 %v14896_v45, %v2902_v32  ;;  %v3294_v37 = vadd.f32 %v14909_v11, %v2904_v56  ;;  %v18323_v48 = vld [vmem:[#allocation56_spill] sm:$0xff]  ;;  %v18329_v15 = vld [vmem:[#allocation47_spill] sm:$0xff] }
 0x319   : > { %v11837_v19 = vpop.f32.mrf.mxu0  ;;  %v3666_v4 = vadd.f32 %v15068_v61, %v3276_v57  ;;  %v3668_v1 = vadd.f32 %v15073_v54, %v3278_v13  ;;  %v3296_v40 = vadd.f32 %v14923_v26, %v2906_v34  ;;  %v4048_v51 = vadd.f32 %v18322_v29, %v3658_v8  ;;  %v18326_v11 = vld [vmem:[#allocation44_spill] sm:$0xff]  ;;  %v18327_v61 = vld [vmem:[#allocation45_spill] sm:$0xff]  ;;  %v15329_v25 = vpop.f32.mrf.mxu1  ;;  %v18340_v34 = vld [vmem:[#allocation51_spill] sm:$0xff] }
 0x31a   : > { %v15300_v6 = vadd.f32 %v11837_v19, %v15130_v30  ;;  %v3670_v12 = vadd.f32 %v18323_v48, %v3280_v44  ;;  %v4439_v30 = vadd.f32 %v15137_v63, %v4049_v16  ;;  %v3298_v45 = vadd.f32 %v18324_v62, %v2908_v52  ;;  %v18331_v63 = vld [vmem:[#allocation48_spill] sm:$0xff]  ;;  %v18336_v44 = vld [vmem:[#allocation50_spill] sm:$0xff]  ;;  %v18343_v16 = vld [vmem:[#allocation65_spill] sm:$0xff] }
 0x31b   : > { %v15308_v3 = vpop.f32.mrf.mxu0  ;;  %v4051_v59 = vadd.f32 %v18326_v11, %v18325_v0  ;;  %v4050_v60 = vadd.f32 %v18327_v61, %v3660_v47  ;;  %v3672_v54 = vadd.f32 %v15085_v20, %v3282_v22  ;;  %v4052_v17 = vadd.f32 %v18328_v58, %v3662_v7  ;;  %v18337_v22 = vld [vmem:[#allocation61_spill] sm:$0xff]  ;;  %v18341_v52 = vld [vmem:[#allocation62_spill] sm:$0xff]  ;;  %v18342_v19 = vld [vmem:[#allocation64_spill] sm:$0xff]  ;;  %v4739_v61 = vpop.f32.mrf.mxu1 }
 0x31c   : > { %v4054_v26 = vadd.f32 %v18329_v15, %v3664_v23  ;;  %v4438_v35 = vadd.f32 %v15141_v43, %v4048_v51  ;;  %v4056_v9 = vadd.f32 %v18331_v63, %v3666_v4  ;;  %v4058_v36 = vadd.f32 %v18332_v24, %v3668_v1  ;;  %v18338_v43 = vld [vmem:[#allocation71_spill] sm:$0xff]  ;;  %v15344_v23 = vld [vmem:[%s18130_s4] ss:$0 sm:$0xff]  ;;  %v18345_v1 = vld [vmem:[#allocation74_spill] sm:$0xff] }
 0x31d   : > { %v11840_v18 = vpop.f32.mrf.mxu0  ;;  %v3674_v57 = vadd.f32 %v18333_v38, %v3284_v2  ;;  %v3676_v13 = vadd.f32 %v18334_v33, %v3286_v10  ;;  %v4060_v46 = vadd.f32 %v18336_v44, %v3670_v12  ;;  %v3678_v32 = vadd.f32 %v18337_v22, %v3288_v49  ;;  %v18344_v4 = vld [vmem:[#allocation67_spill] sm:$0xff]  ;;  %v18346_v51 = vld [vmem:[#allocation72_spill] sm:$0xff]  ;;  %v18353_v63 = vld [vmem:[#allocation57_spill] sm:$0xff] }
 0x31e   : > { %v15323_v41 = vadd.f32 %v11840_v18, %v15135_v55  ;;  %v4829_v56 = vadd.f32 %v18338_v43, %v4439_v30  ;;  %v18339_v55 = vld [vmem:[#allocation70_spill] sm:$0xff]  ;;  %v4062_v8 = vadd.f32 %v18340_v34, %v3672_v54  ;;  %v3680_v47 = vadd.f32 %v18341_v52, %v3290_v42  ;;  %v18347_v30 = vld [vmem:[#allocation53_spill] sm:$0xff]  ;;  %v18350_v11 = vld [vmem:[#allocation75_spill] sm:$0xff] }
 0x31f   : > { %v15331_v20 = vpop.f32.mrf.mxu0  ;;  %v4441_v27 = vadd.f32 %v18339_v55, %v4051_v59  ;;  %v3682_v2 = vadd.f32 %v18342_v19, %v3292_v53  ;;  %v3684_v10 = vadd.f32 %v18343_v16, %v3294_v37  ;;  %v3686_v49 = vadd.f32 %v18344_v4, %v3296_v40  ;;  %v18348_v42 = vld [vmem:[#allocation54_spill] sm:$0xff]  ;;  %v18349_v53 = vld [vmem:[#allocation68_spill] sm:$0xff]  ;;  %v18351_v18 = vld [vmem:[#allocation55_spill] sm:$0xff]  ;;  %v11869_v4 = vpop.f32.mrf.mxu1 }
 0x320   : > { %18330 = vst [vmem:[#allocation4_spill] sm:$0xff] %v15323_v41  ;;  %18335 = vst [vmem:[#allocation6_spill] sm:$0xff] %v15331_v20  ;;  %v4828_v29 = vadd.f32 %v18345_v1, %v4438_v35  ;;  %v4440_v48 = vadd.f32 %v18346_v51, %v4050_v60  ;;  %v4064_v62 = vadd.f32 %v18347_v30, %v3674_v57  ;;  %v18352_v40 = vld [vmem:[#allocation77_spill] sm:$0xff]  ;;  %v18354_v38 = vld [vmem:[#allocation60_spill] sm:$0xff] }
 0x321   : > { %v11895_v7 = vpop.f32.mrf.mxu0  ;;  %v15351_v0 = vadd.f32 %v18348_v42, %v3676_v13  ;;  %v3688_v37 = vadd.f32 %v18349_v53, %v3298_v45  ;;  %v4442_v59 = vadd.f32 %v18350_v11, %v4052_v17  ;;  %v15356_v58 = vadd.f32 %v18351_v18, %v3678_v32  ;;  %v18355_v45 = vld [vmem:[#allocation63_spill] sm:$0xff]  ;;  %v18356_v17 = vld [vmem:[#allocation78_spill] sm:$0xff]  ;;  %v18358_v43 = vld [vmem:[#allocation80_spill] sm:$0xff] }
 0x322   : > { %v5219_v12 = vadd.f32 %v11895_v7, %v4829_v56  ;;  %v4831_v15 = vadd.f32 %v18352_v40, %v4441_v27  ;;  %v15363_v24 = vadd.f32 %v18353_v63, %v3680_v47  ;;  %v15366_v57 = vadd.f32 %v18354_v38, %v3682_v2  ;;  %v18357_v22 = vld [vmem:[#allocation66_spill] sm:$0xff]  ;;  %v18359_v34 = vld [vmem:[#allocation69_spill] sm:$0xff]  ;;  %v18362_v19 = vld [vmem:[#allocation83_spill] sm:$0xff] }
 0x323   : > { %v5059_v54 = vpop.f32.mrf.mxu0  ;;  %v15369_v33 = vadd.f32 %v18355_v45, %v3684_v10  ;;  %v4444_v13 = vadd.f32 %v18356_v17, %v4054_v26  ;;  %v15373_v32 = vadd.f32 %v18357_v22, %v3686_v49  ;;  %v4830_v56 = vadd.f32 %v18358_v43, %v4440_v48  ;;  %v18361_v47 = vld [vmem:[#allocation73_spill] sm:$0xff]  ;;  %v18363_v16 = vld [vmem:[#allocation86_spill] sm:$0xff]  ;;  %v18367_v53 = vld [vmem:[#allocation92_spill] sm:$0xff] }
 0x324   : > { %v15360_v35 = vadd.f32 %v15344_v23, %v5219_v12  ;;  %v5218_v60 = vadd.f32 %v5059_v54, %v4828_v29  ;;  %v15380_v52 = vadd.f32 %v18359_v34, %v3688_v37  ;;  %v4833_v2 = vadd.f32 %v18362_v19, %v18361_v47  ;;  %v18364_v7 = vld [vmem:[#allocation81_spill] sm:$0xff]  ;;  %v18365_v12 = vld [vmem:[#allocation76_spill] sm:$0xff]  ;;  %v18369_v18 = vld [vmem:[#allocation79_spill] sm:$0xff]  ;;  %v4749_v34 = vpop.f32.mrf.mxu1 }
 0x325   : > { %v11898_v44 = vpop.f32.mrf.mxu0  ;;  %v4832_v10 = vadd.f32 %v18363_v16, %v4442_v59  ;;  %v4446_v26 = vadd.f32 %v18364_v7, %v4056_v9  ;;  %v18366_v30 = vld [vmem:[#allocation89_spill] sm:$0xff]  ;;  %v4834_v37 = vadd.f32 %v18367_v53, %v4444_v13  ;;  %v18368_v11 = vld [vmem:[#allocation84_spill] sm:$0xff]  ;;  %v18370_v40 = vld [vmem:[#allocation95_spill] sm:$0xff] }
 0x326   : > { %v15377_v55 = vadd.f32 %v15344_v23, %v5218_v60  ;;  %v5221_v27 = vadd.f32 %v11898_v44, %v4831_v15  ;;  %18360 = vst [vmem:[#allocation7_spill] sm:$0xff] %v15380_v52  ;;  %v5294_v49 = vsel %vm365_vm1, %v15360_v35, 0.0  ;;  %v4835_v42 = vadd.f32 %v18366_v30, %v18365_v12  ;;  %v18371_v60 = vld [vmem:[#allocation87_spill] sm:$0xff]  ;;  %v18372_v17 = vld [vmem:[#allocation98_spill] sm:$0xff]  ;;  %v18377_v12 = vld [vmem:[#allocation93_spill] sm:$0xff] }
 0x327   : > { %v5069_v1 = vpop.f32.mrf.mxu0  ;;  %v4448_v59 = vadd.f32 %v18368_v11, %v4058_v36  ;;  %v4837_v15 = vadd.f32 %v18370_v40, %v18369_v18  ;;  %v4450_v63 = vadd.f32 %v18371_v60, %v4060_v46  ;;  %v4836_v44 = vadd.f32 %v18372_v17, %v4446_v26  ;;  %v18373_v22 = vld [vmem:[#allocation82_spill] sm:$0xff]  ;;  %v18374_v43 = vld [vmem:[#allocation11_spill] sm:$0xff]  ;;  %v18376_v26 = vld [vmem:[#allocation85_spill] sm:$0xff] }
 0x328   : > { %v5293_v29 = vsel %vm365_vm1, %v15377_v55, 0.0  ;;  %v15391_v51 = vadd.f32 %v15344_v23, %v5221_v27  ;;  %v5220_v48 = vadd.f32 %v5069_v1, %v4830_v56  ;;  %v4839_v56 = vadd.f32 %v18374_v43, %v18373_v22  ;;  %v18375_v27 = vld [vmem:[#allocation90_spill] sm:$0xff]  ;;  %v18379_v60 = vld [vmem:[#allocation91_spill] sm:$0xff]  ;;  %v18380_v43 = vld [vmem:[#allocation96_spill] sm:$0xff] }
 0x329   : > { %v5295_v9 = vadd.f32 %v5294_v49, %v5293_v29  ;;  %v11901_v54 = vpop.f32.mrf.mxu0  ;;  %v4452_v13 = vadd.f32 %v18375_v27, %v4062_v8  ;;  %v4838_v7 = vadd.f32 %v15260_v5, %v4448_v59  ;;  %v15417_v1 = vadd.f32 %v15283_v39, %v18376_v26  ;;  %v11872_v39 = vpop.f32.mrf.mxu1 }
 0x32a   : > { %v15401_v38 = vadd.f32 %v15344_v23, %v5220_v48  ;;  %v5223_v45 = vadd.f32 %v11901_v54, %v4833_v2  ;;  %v5303_v19 = vsel %vm365_vm1, %v15391_v51, 0.0  ;;  %v15420_v48 = vadd.f32 %v15306_v50, %v4450_v63  ;;  %v18378_v54 = vld [vmem:[#allocation88_spill] sm:$0xff] }
 0x32b   : > { %v5296_v36 = vrot.slane %v5295_v9, 4  ;;  %v5079_v47 = vpop.f32.mrf.mxu0  ;;  %v4454_v30 = vadd.f32 %v18377_v12, %v4064_v62  ;;  %v15430_v5 = vadd.f32 %v4739_v61, %v4452_v13  ;;  %v15440_v63 = vadd.f32 %v11869_v4, %v18379_v60 }
 0x32c   : > { %v5302_v46 = vsel %vm365_vm1, %v15401_v38, 0.0  ;;  %v15412_v16 = vadd.f32 %v15344_v23, %v5223_v45  ;;  %v5222_v2 = vadd.f32 %v5079_v47, %v4832_v10  ;;  %v15428_v10 = vadd.f32 %v15329_v25, %v18378_v54  ;;  %v18381_v47 = vld [vmem:[#allocation94_spill] sm:$0xff] }
 0x32d   : > { %v5297_v8 = vadd.f32 %v5296_v36, %v5295_v9  ;;  %v5304_v49 = vadd.f32 %v5303_v19, %v5302_v46  ;;  %v11904_v29 = vpop.f32.mrf.mxu0  ;;  %v15442_v22 = vadd.f32 %v4749_v34, %v4454_v30  ;;  %v4456_v27 = vadd.f32 %v18380_v43, %v15351_v0 }
 0x32e   : > { %v15424_v53 = vadd.f32 %v15344_v23, %v5222_v2  ;;  %v5225_v11 = vadd.f32 %v11904_v29, %v4835_v42  ;;  %v5312_v50 = vsel %vm365_vm1, %v15412_v16, 0.0  ;;  %v15450_v19 = vadd.f32 %v11872_v39, %v18381_v47  ;;  %v18382_v39 = vld [vmem:[#allocation99_spill] sm:$0xff] }
 0x32f   : > { %v5298_v59 = vrot.slane %v5297_v8, 2  ;;  %v5305_v9 = vrot.slane %v5304_v49, 4  ;;  %v5089_v18 = vpop.f32.mrf.mxu0 }
 0x330   : > { %v5311_v62 = vsel %vm365_vm1, %v15424_v53, 0.0  ;;  %v15437_v40 = vadd.f32 %v15344_v23, %v5225_v11  ;;  %v5224_v42 = vadd.f32 %v5089_v18, %v4834_v37  ;;  %v4759_v37 = vpop.f32.mrf.mxu1 }
 0x331   : > { %v5299_v25 = vadd.f32 %v5298_v59, %v5297_v8  ;;  %v5306_v61 = vadd.f32 %v5305_v9, %v5304_v49  ;;  %v5313_v45 = vadd.f32 %v5312_v50, %v5311_v62  ;;  %v11907_v17 = vpop.f32.mrf.mxu0  ;;  %v15459_v54 = vadd.f32 %v4759_v37, %v4456_v27 }
 0x332   : > { %v15447_v13 = vadd.f32 %v15344_v23, %v5224_v42  ;;  %v5227_v36 = vadd.f32 %v11907_v17, %v4837_v15  ;;  %v5321_v8 = vsel %vm365_vm1, %v15437_v40, 0.0  ;;  %v15463_v59 = vadd.f32 %v18382_v39, %v15356_v58 }
 0x333   : > { %v5300_v46 = vrot.slane %v5299_v25, 1  ;;  %v5307_v4 = vrot.slane %v5306_v61, 2  ;;  %v5314_v2 = vrot.slane %v5313_v45, 4  ;;  %v5099_v26 = vpop.f32.mrf.mxu0 }
 0x334   : > { %v5320_v34 = vsel %vm365_vm1, %v15447_v13, 0.0  ;;  %v15457_v0 = vadd.f32 %v15344_v23, %v5227_v36  ;;  %v5226_v49 = vadd.f32 %v5099_v26, %v4836_v44 }
 0x335   : > { %v5301_v29 = vadd.f32 %v5300_v46, %v5299_v25  ;;  %v5308_v15 = vadd.f32 %v5307_v4, %v5306_v61  ;;  %v5315_v12 = vadd.f32 %v5314_v2, %v5313_v45  ;;  %v5322_v30 = vadd.f32 %v5321_v8, %v5320_v34  ;;  %v11910_v11 = vpop.f32.mrf.mxu0 }
 0x336   : > { %v15466_v9 = vadd.f32 %v15344_v23, %v5226_v49  ;;  %v5229_v18 = vadd.f32 %v11910_v11, %v4839_v56  ;;  %v5330_v25 = vsel %vm365_vm1, %v15457_v0, 0.0 }
 0x337   : > { %v5437_v50 = vmul.f32 0.0625, %v5301_v29  ;;  %v5309_v62 = vrot.slane %v5308_v15, 1  ;;  %v5316_v42 = vrot.slane %v5315_v12, 2  ;;  %v5323_v60 = vrot.slane %v5322_v30, 4  ;;  %v5109_v44 = vpop.f32.mrf.mxu0 }
 0x338   : > { %v5329_v61 = vsel %vm365_vm1, %v15466_v9, 0.0  ;;  %v15473_v45 = vadd.f32 %v15344_v23, %v5229_v18  ;;  %v5228_v58 = vadd.f32 %v5109_v44, %v4838_v7 }
 0x339   : > { %v15476_v17 = vsub.f32 %v15377_v55, %v5437_v50  ;;  %v15479_v56 = vsub.f32 %v15360_v35, %v5437_v50  ;;  %v5310_v43 = vadd.f32 %v5309_v62, %v5308_v15  ;;  %v5317_v27 = vadd.f32 %v5316_v42, %v5315_v12  ;;  %v11913_v36 = vpop.f32.mrf.mxu0 }
 0x33a   : > { %v5324_v47 = vadd.f32 %v5323_v60, %v5322_v30  ;;  %v5331_v37 = vadd.f32 %v5330_v25, %v5329_v61  ;;  %v5339_v46 = vsel %vm365_vm1, %v15473_v45, 0.0  ;;  %v15484_v4 = vadd.f32 %v15344_v23, %v5228_v58 }
 0x33b   : > { %v5485_v7 = vmul.f32 %v15476_v17, %v15476_v17  ;;  %v5486_v55 = vmul.f32 %v15479_v56, %v15479_v56  ;;  %v5438_v2 = vmul.f32 0.0625, %v5310_v43  ;;  %v5318_v35 = vrot.slane %v5317_v27, 1 }
 0x33c   : > { %v5325_v26 = vrot.slane %v5324_v47, 2  ;;  %v5332_v8 = vrot.slane %v5331_v37, 4  ;;  %v5338_v34 = vsel %vm365_vm1, %v15484_v4, 0.0  ;;  %v5231_v49 = vadd.f32 %v11913_v36, %v15417_v1 }
 0x33d   : > { %v5517_v29 = vsel %vm365_vm1, %v5485_v7, 0.0  ;;  %v5518_v15 = vsel %vm365_vm1, %v5486_v55, 0.0  ;;  %v15496_v12 = vsub.f32 %v15401_v38, %v5438_v2  ;;  %v15499_v30 = vsub.f32 %v15391_v51, %v5438_v2  ;;  %v5119_v51 = vpop.f32.mrf.mxu0 }
 0x33e   : > { %v5519_v11 = vadd.f32 %v5518_v15, %v5517_v29  ;;  %v5319_v39 = vadd.f32 %v5318_v35, %v5317_v27  ;;  %v5326_v18 = vadd.f32 %v5325_v26, %v5324_v47  ;;  %v5333_v50 = vadd.f32 %v5332_v8, %v5331_v37 }
 0x33f   : > { %v5487_v62 = vmul.f32 %v15496_v12, %v15496_v12  ;;  %v5488_v1 = vmul.f32 %v15499_v30, %v15499_v30  ;;  %v5340_v42 = vadd.f32 %v5339_v46, %v5338_v34  ;;  %v15506_v60 = vadd.f32 %v15344_v23, %v5231_v49 }
 0x340   : > { %v5520_v44 = vrot.slane %v5519_v11, 4  ;;  %v5439_v38 = vmul.f32 0.0625, %v5319_v39  ;;  %v5327_v25 = vrot.slane %v5326_v18, 1  ;;  %v5334_v61 = vrot.slane %v5333_v50, 2 }
 0x341   : > { %v5526_v58 = vsel %vm365_vm1, %v5487_v62, 0.0  ;;  %v5527_v43 = vsel %vm365_vm1, %v5488_v1, 0.0  ;;  %v5341_v27 = vrot.slane %v5340_v42, 4  ;;  %v5348_v36 = vsel %vm365_vm1, %v15506_v60, 0.0 }
 0x342   : > { %v5521_v47 = vadd.f32 %v5520_v44, %v5519_v11  ;;  %v5528_v37 = vadd.f32 %v5527_v43, %v5526_v58  ;;  %v15513_v46 = vsub.f32 %v15424_v53, %v5439_v38  ;;  %v15516_v7 = vsub.f32 %v15412_v16, %v5439_v38  ;;  %v11875_v58 = vpop.f32.mrf.mxu1 }
 0x343   : > { %v5328_v55 = vadd.f32 %v5327_v25, %v5326_v18  ;;  %v5335_v2 = vadd.f32 %v5334_v61, %v5333_v50  ;;  %v5342_v35 = vadd.f32 %v5341_v27, %v5340_v42  ;;  %v5230_v26 = vadd.f32 %v5119_v51, %v15420_v48 }
 0x344   : > { %v5522_v8 = vrot.slane %v5521_v47, 2  ;;  %v5529_v34 = vrot.slane %v5528_v37, 4  ;;  %v5489_v49 = vmul.f32 %v15513_v46, %v15513_v46  ;;  %v5490_v29 = vmul.f32 %v15516_v7, %v15516_v7 }
 0x345   : > { %v5440_v15 = vmul.f32 0.0625, %v5328_v55  ;;  %v5336_v11 = vrot.slane %v5335_v2, 1  ;;  %v5343_v53 = vrot.slane %v5342_v35, 2  ;;  %v15524_v39 = vadd.f32 %v15344_v23, %v5230_v26 }
 0x346   : > { %v5523_v16 = vadd.f32 %v5522_v8, %v5521_v47  ;;  %v5530_v18 = vadd.f32 %v5529_v34, %v5528_v37  ;;  %v5535_v50 = vsel %vm365_vm1, %v5489_v49, 0.0  ;;  %v5536_v48 = vsel %vm365_vm1, %v5490_v29, 0.0 }
 0x347   : > { %v5537_v62 = vadd.f32 %v5536_v48, %v5535_v50  ;;  %v15529_v1 = vsub.f32 %v15447_v13, %v5440_v15  ;;  %v15532_v42 = vsub.f32 %v15437_v40, %v5440_v15  ;;  %v5337_v44 = vadd.f32 %v5336_v11, %v5335_v2  ;;  %v4769_v50 = vpop.f32.mrf.mxu1 }
 0x348   : > { %v5524_v38 = vrot.slane %v5523_v16, 1  ;;  %v5531_v25 = vrot.slane %v5530_v18, 2  ;;  %v5344_v61 = vadd.f32 %v5343_v53, %v5342_v35  ;;  %v5347_v51 = vsel %vm365_vm1, %v15524_v39, 0.0  ;;  %v11916_v53 = vpop.f32.mrf.mxu0 }
 0x349   : > { %v5538_v43 = vrot.slane %v5537_v62, 4  ;;  %v5491_v27 = vmul.f32 %v15529_v1, %v15529_v1  ;;  %v5492_v47 = vmul.f32 %v15532_v42, %v15532_v42  ;;  %v5441_v13 = vmul.f32 0.0625, %v5337_v44 }
 0x34a   : > { %v5525_v37 = vadd.f32 %v5524_v38, %v5523_v16  ;;  %v5532_v55 = vadd.f32 %v5531_v25, %v5530_v18  ;;  %v5345_v40 = vrot.slane %v5344_v61, 1  ;;  %v5349_v26 = vadd.f32 %v5348_v36, %v5347_v51 }
 0x34b   : > { %v5539_v2 = vadd.f32 %v5538_v43, %v5537_v62  ;;  %v5544_v8 = vsel %vm365_vm1, %v5491_v27, 0.0  ;;  %v5545_v35 = vsel %vm365_vm1, %v5492_v47, 0.0  ;;  %v15543_v34 = vsub.f32 %v15466_v9, %v5441_v13 }
 0x34c   : > { %v5661_v49 = vmul.f32 0.0625, %v5525_v37  ;;  %v5533_v29 = vrot.slane %v5532_v55, 1  ;;  %v5546_v15 = vadd.f32 %v5545_v35, %v5544_v8  ;;  %v15546_v11 = vsub.f32 %v15457_v0, %v5441_v13  ;;  %v5129_v37 = vpop.f32.mrf.mxu0  ;;  %v11878_v8 = vpop.f32.mrf.mxu1 }
 0x34d   : > { %v5540_v16 = vrot.slane %v5539_v2, 2  ;;  %v5493_v36 = vmul.f32 %v15543_v34, %v15543_v34  ;;  %v5346_v18 = vadd.f32 %v5345_v40, %v5344_v61  ;;  %v5350_v48 = vrot.slane %v5349_v26, 4 }
 0x34e   : > { %v5677_v62 = vadd.f32 1e-05, %v5661_v49  ;;  %v5534_v44 = vadd.f32 %v5533_v29, %v5532_v55  ;;  %v5547_v38 = vrot.slane %v5546_v15, 4  ;;  %v5494_v9 = vmul.f32 %v15546_v11, %v15546_v11 }
 0x34f   : > { %v5541_v25 = vadd.f32 %v5540_v16, %v5539_v2  ;;  %v5553_v51 = vsel %vm365_vm1, %v5493_v36, 0.0  ;;  %v5442_v43 = vmul.f32 0.0625, %v5346_v18  ;;  %v5351_v0 = vadd.f32 %v5350_v48, %v5349_v26  ;;  %v18383_v48 = vld [vmem:[#allocation3_spill] sm:$0xff] }
 0x350   : > { %12561 = vrsqrt.f32 %v5677_v62  ;;  %v5662_v27 = vmul.f32 0.0625, %v5534_v44  ;;  %v5548_v47 = vadd.f32 %v5547_v38, %v5546_v15  ;;  %v5554_v13 = vsel %vm365_vm1, %v5494_v9, 0.0  ;;  %v11919_v44 = vpop.f32.mrf.mxu0  ;;  %v4779_v38 = vpop.f32.mrf.mxu1 }
 0x351   : > { %v5542_v61 = vrot.slane %v5541_v25, 1  ;;  %v5555_v40 = vadd.f32 %v5554_v13, %v5553_v51  ;;  %v15555_v55 = vsub.f32 %v15484_v4, %v5442_v43  ;;  %v15558_v35 = vsub.f32 %v15473_v45, %v5442_v43 }
 0x352   : > { %v5678_v2 = vadd.f32 1e-05, %v5662_v27  ;;  %v5549_v49 = vrot.slane %v5548_v47, 2  ;;  %v5352_v29 = vrot.slane %v5351_v0, 2  ;;  %v5233_v26 = vadd.f32 %v11916_v53, %v15428_v10 }
 0x353   : > { %v5543_v16 = vadd.f32 %v5542_v61, %v5541_v25  ;;  %v5556_v36 = vrot.slane %v5555_v40, 4  ;;  %v5495_v15 = vmul.f32 %v15555_v55, %v15555_v55  ;;  %v5496_v18 = vmul.f32 %v15558_v35, %v15558_v35  ;;  %v18384_v25 = vld [vmem:[#allocation97_spill] sm:$0xff] }
 0x354   : > { %v4460_v4 = vadd.f32 %v18383_v48, %v15363_v24  ;;  %12563 = vrsqrt.f32 %v5678_v2  ;;  %v5550_v62 = vadd.f32 %v5549_v49, %v5548_v47  ;;  %v5353_v45 = vadd.f32 %v5352_v29, %v5351_v0 }
 0x355   : > { %v5663_v9 = vmul.f32 0.0625, %v5543_v16  ;;  %v5557_v51 = vadd.f32 %v5556_v36, %v5555_v40  ;;  %v5562_v10 = vsel %vm365_vm1, %v5495_v15, 0.0  ;;  %v5563_v53 = vsel %vm365_vm1, %v5496_v18, 0.0  ;;  %v18387_v40 = vld [vmem:[#allocation5_spill] sm:$0xff]  ;;  %v11881_v15 = vpop.f32.mrf.mxu1 }
 0x356   : > { %v15570_v43 = vadd.f32 %v11875_v58, %v18384_v25  ;;  %v5551_v27 = vrot.slane %v5550_v62, 1  ;;  %v5564_v13 = vadd.f32 %v5563_v53, %v5562_v10  ;;  %v5354_v61 = vrot.slane %v5353_v45, 1  ;;  %v5139_v58 = vpop.f32.mrf.mxu0 }
 0x357   : > { %v15573_v41 = vadd.f32 %v4769_v50, %v15463_v59  ;;  %v5558_v24 = vrot.slane %v5557_v51, 2  ;;  %v15576_v0 = vadd.f32 %v15344_v23, %v5233_v26  ;;  %v5232_v47 = vadd.f32 %v5129_v37, %v15430_v5  ;;  %v4789_v25 = vpop.f32.mrf.mxu1 }
 0x358   : > { %18385 = vst [vmem:[#allocation8_spill] sm:$0xff] %v15570_v43  ;;  %v15580_v2 = vadd.f32 %v11878_v8, %v18387_v40  ;;  %v5552_v49 = vadd.f32 %v5551_v27, %v5550_v62  ;;  %v5565_v29 = vrot.slane %v5564_v13, 4  ;;  %v5355_v16 = vadd.f32 %v5354_v61, %v5353_v45  ;;  %v15627_v61 = vld [vmem:[%s18132_s6 + $0x8] sm:$0xff] }
 0x359   : > { %18386 = vst [vmem:[#allocation9_spill] sm:$0xff] %v15573_v41  ;;  %v15582_v36 = vadd.f32 %v4779_v38, %v4460_v4  ;;  %v5679_v18 = vadd.f32 1e-05, %v5663_v9  ;;  %v5559_v48 = vadd.f32 %v5558_v24, %v5557_v51  ;;  %v15585_v59 = vadd.f32 %v15344_v23, %v5232_v47 }
 0x35a   : > { %18388 = vst [vmem:[#allocation10_spill] sm:$0xff] %v15580_v2  ;;  %v5664_v50 = vmul.f32 0.0625, %v5552_v49  ;;  %v5566_v26 = vadd.f32 %v5565_v29, %v5564_v13  ;;  %v5443_v10 = vmul.f32 0.0625, %v5355_v16  ;;  %v5235_v5 = vadd.f32 %v11919_v44, %v15440_v63 }
 0x35b   : > { %18389 = vst [vmem:[#allocation12_spill] sm:$0xff] %v15582_v36  ;;  %v5560_v37 = vrot.slane %v5559_v48, 1  ;;  %v5357_v8 = vsel %vm365_vm1, %v15576_v0, 0.0  ;;  %v5356_v62 = vsel %vm365_vm1, %v15585_v59, 0.0  ;;  %v5234_v4 = vadd.f32 %v5139_v58, %v15442_v22  ;;  %v15607_v22 = vld [vmem:[%s18131_s5] sm:$0xff]  ;;  %v11884_v58 = vpop.f32.mrf.mxu1 }
 0x35c   : > { %v5680_v45 = vadd.f32 1e-05, %v5664_v50  ;;  %v5567_v38 = vrot.slane %v5566_v26, 2  ;;  %v15594_v9 = vsub.f32 %v15524_v39, %v5443_v10  ;;  %v15597_v51 = vsub.f32 %v15506_v60, %v5443_v10  ;;  %v15612_v39 = vld [vmem:[%s18131_s5 + $0x8] sm:$0xff] }
 0x35d   : > { %v12562_v53 = vpop.eup %12561  ;;  %v4462_v63 = vadd.f32 %v15262_v21, %v15366_v57  ;;  %v15602_v44 = vadd.f32 %v11881_v15, %v15252_v31  ;;  %v5561_v60 = vadd.f32 %v5560_v37, %v5559_v48  ;;  %v5358_v27 = vadd.f32 %v5357_v8, %v5356_v62  ;;  %v15622_v57 = vld [vmem:[%s18132_s6] sm:$0xff] }
 0x35e   : > { %18390 = vst [vmem:[#allocation13_spill] sm:$0xff] %v15594_v9  ;;  %18391 = vst [vmem:[#allocation14_spill] sm:$0xff] %v15597_v51  ;;  %v5709_v13 = vmul.f32 %v12562_v53, %v15476_v17  ;;  %v5710_v21 = vmul.f32 %v12562_v53, %v15479_v56  ;;  %12565 = vrsqrt.f32 %v5679_v18  ;;  %v15617_v31 = vadd.f32 %v15344_v23, %v5235_v5 }
 0x35f   : > { %18392 = vst [vmem:[#allocation16_spill] sm:$0xff] %v15602_v44  ;;  %v5665_v24 = vmul.f32 0.0625, %v5561_v60  ;;  %v5568_v47 = vadd.f32 %v5567_v38, %v5566_v26  ;;  %v5497_v17 = vmul.f32 %v15594_v9, %v15594_v9  ;;  %v5498_v56 = vmul.f32 %v15597_v51, %v15597_v51 }
 0x360   : > { %18393 = vst [vmem:[#allocation15_spill] sm:$0xff] %v15617_v31  ;;  %v5741_v40 = vmul.f32 %v5709_v13, %v15607_v22  ;;  %v5742_v49 = vmul.f32 %v5710_v21, %v15612_v39  ;;  %12567 = vrsqrt.f32 %v5680_v45  ;;  %v15636_v29 = vadd.f32 %v15344_v23, %v5234_v4 }
 0x361   : > { %v12564_v16 = vpop.eup %12563  ;;  %v5681_v15 = vadd.f32 1e-05, %v5665_v24  ;;  %v5571_v18 = vsel %vm365_vm1, %v5497_v17, 0.0  ;;  %v5572_v48 = vsel %vm365_vm1, %v5498_v56, 0.0  ;;  %v5359_v50 = vrot.slane %v5358_v27, 4 }
 0x362   : > { %18394 = vst [vmem:[#allocation18_spill] sm:$0xff] %v15636_v29  ;;  %v5773_v26 = vadd.f32 %v5741_v40, %v15622_v57  ;;  %v5774_v10 = vadd.f32 %v5742_v49, %v15627_v61  ;;  %v5711_v5 = vmul.f32 %v12564_v16, %v15496_v12  ;;  %v5712_v37 = vmul.f32 %v12564_v16, %v15499_v30  ;;  %v11922_v12 = vpop.f32.mrf.mxu0 }
 0x363   : > { %v15644_v8 = vadd.f32 %v4789_v25, %v4462_v63  ;;  %12569 = vrsqrt.f32 %v5681_v15  ;;  %v5569_v23 = vrot.slane %v5568_v47, 1  ;;  %v15646_v62 = vadd.f32 %v5572_v48, %v5571_v18 }
 0x364   : > { %v15650_v4 = vadd.f32 %v15285_v14, %v15369_v33  ;;  %v15653_v45 = vadd.f32 %v11884_v58, %v15277_v28  ;;  %v15655_v38 = vmul.f32 0.70710677, %v5773_v26  ;;  %v15657_v53 = vmul.f32 0.70710677, %v5774_v10 }
 0x365   : > { %18395 = vst [vmem:[#allocation17_spill] sm:$0xff] %v15644_v8  ;;  %v5743_v30 = vmul.f32 %v5711_v5, %v15607_v22  ;;  %v5744_v63 = vmul.f32 %v5712_v37, %v15612_v39  ;;  %v15661_v25 = vadd.f32 %v5359_v50, %v5358_v27  ;;  %v5365_v60 = vsel %vm365_vm1, %v15636_v29, 0.0 }
 0x366   : > { %18396 = vst [vmem:[#allocation20_spill] sm:$0xff] %v15653_v45  ;;  %v15667_v14 = vadd.f32 %v15308_v3, %v15373_v32  ;;  %v5933_v28 = vand.u32 2147483647, %v15655_v38  ;;  %v5934_v33 = vand.u32 2147483647, %v15657_v53  ;;  %v5366_v13 = vsel %vm365_vm1, %v15617_v31, 0.0 }
 0x367   : > { %v5775_v21 = vadd.f32 %v5743_v30, %v15622_v57  ;;  %v5776_v24 = vadd.f32 %v5744_v63, %v15627_v61  ;;  %v5570_v27 = vadd.f32 %v5569_v23, %v5568_v47  ;;  %v15676_v17 = vadd.f32 %v11922_v12, %v15450_v19 }
 0x368   : > { %18397 = vst [vmem:[#allocation19_spill] sm:$0xff] %v15667_v14  ;;  %v5965_v56 = vmul.f32 0.3275911, %v5933_v28  ;;  %v5966_v40 = vmul.f32 0.3275911, %v5934_v33  ;;  %v6349_v49 = vsub.f32 0.0, %v5933_v28  ;;  %v15678_v3 = vadd.f32 %v5366_v13, %v5365_v60 }
 0x369   : > { %18398 = vst [vmem:[#allocation22_spill] sm:$0xff] %v15676_v17  ;;  %v6350_v32 = vsub.f32 0.0, %v5934_v33  ;;  %v5839_v16 = vmul.f32 0.70710677, %v5775_v21  ;;  %v5840_v58 = vmul.f32 0.70710677, %v5776_v24 }
 0x36a   : > { %v15681_v18 = vmul.f32 0.5, %v5773_v26  ;;  %v15683_v48 = vmul.f32 0.5, %v5774_v10  ;;  %v5997_v50 = vadd.f32 1.0, %v5965_v56  ;;  %v5998_v5 = vadd.f32 1.0, %v5966_v40 }
 0x36b   : > { %v12566_v47 = vpop.eup %12565  ;;  %v5935_v37 = vand.u32 2147483647, %v5839_v16  ;;  %v5936_v19 = vand.u32 2147483647, %v5840_v58  ;;  %v15685_v23 = vmul.f32 0.0625, %v5570_v27  ;;  %vm5869_vm7 = vcmp.ge.f32.partialorder %v15655_v38, 0.0 }
 0x36c   : > { %vm5870_vm8 = vcmp.ge.f32.partialorder %v15657_v53, 0.0  ;;  %12571 = vrcp.f32 %v5997_v50  ;;  %v6381_v30 = vmul.f32 %v6349_v49, %v5933_v28  ;;  %v6382_v26 = vmul.f32 %v6350_v32, %v5934_v33 }
 0x36d   : > { %v12568_v63 = vpop.eup %12567  ;;  %12573 = vrcp.f32 %v5998_v5  ;;  %v5967_v10 = vmul.f32 0.3275911, %v5935_v37  ;;  %v5968_v60 = vmul.f32 0.3275911, %v5936_v19  ;;  %vm5871_vm9 = vcmp.ge.f32.partialorder %v5839_v16, 0.0 }
 0x36e   : > { %v6351_v13 = vsub.f32 0.0, %v5935_v37  ;;  %v6352_v56 = vsub.f32 0.0, %v5936_v19  ;;  %v5713_v40 = vmul.f32 %v12566_v47, %v15513_v46  ;;  %vm5872_vm10 = vcmp.ge.f32.partialorder %v5840_v58, 0.0 }
 0x36f   : > { %v5999_v27 = vadd.f32 1.0, %v5967_v10  ;;  %v6000_v15 = vadd.f32 1.0, %v5968_v60  ;;  %v5714_v12 = vmul.f32 %v12566_v47, %v15516_v7  ;;  %v6413_v8 = vmul.f32 1.442695, %v6381_v30 }
 0x370   : > { %v12570_v45 = vpop.eup %12569  ;;  %v6383_v44 = vmul.f32 %v6351_v13, %v5935_v37  ;;  %v5745_v28 = vmul.f32 %v5713_v40, %v15607_v22  ;;  %v5715_v49 = vmul.f32 %v12568_v63, %v15529_v1  ;;  %v5716_v32 = vmul.f32 %v12568_v63, %v15532_v42 }
 0x371   : > { %12575 = vrcp.f32 %v5999_v27  ;;  %v5746_v33 = vmul.f32 %v5714_v12, %v15612_v39  ;;  %v5717_v50 = vmul.f32 %v12570_v45, %v15543_v34  ;;  %v6415_v46 = vmul.f32 1.442695, %v6382_v26 }
 0x372   : > { %12577 = vrcp.f32 %v6000_v15  ;;  %v6384_v5 = vmul.f32 %v6352_v56, %v5936_v19  ;;  %v5777_v10 = vadd.f32 %v5745_v28, %v15622_v57  ;;  %v5747_v47 = vmul.f32 %v5715_v49, %v15607_v22 }
 0x373   : > { %v5778_v7 = vadd.f32 %v5746_v33, %v15627_v61  ;;  %v5748_v37 = vmul.f32 %v5716_v32, %v15612_v39  ;;  %v5718_v1 = vmul.f32 %v12570_v45, %v15546_v11  ;;  %v18399_v30 = vmov -1.0  }
 0x374   : > { %v15705_v12 = vsel %vm5869_vm7, 1.0, %v18399_v30  ;;  %v15710_v42 = vsel %vm5870_vm8, 1.0, %v18399_v30  ;;  %v6417_v34 = vmul.f32 1.442695, %v6383_v44  ;;  %v5841_v15 = vmul.f32 0.70710677, %v5777_v10 }
 0x375   : > { %v15712_v19 = vmul.f32 0.5, %v5775_v21  ;;  %v15714_v63 = vmul.f32 0.5, %v5776_v24  ;;  %v15718_v26 = vsel %vm5871_vm9, 1.0, %v18399_v30  ;;  %v5842_v11 = vmul.f32 0.70710677, %v5778_v7 }
 0x376   : > { %12579 = vpow2.f32 %v6413_v8  ;;  %v15722_v45 = vsel %vm5872_vm10, 1.0, %v18399_v30  ;;  %v5937_v38 = vand.u32 2147483647, %v5841_v15  ;;  %v5779_v53 = vadd.f32 %v5747_v47, %v15622_v57 }
 0x377   : > { %12581 = vpow2.f32 %v6415_v46  ;;  %v6419_v44 = vmul.f32 1.442695, %v6384_v5  ;;  %v5938_v60 = vand.u32 2147483647, %v5842_v11  ;;  %v15726_v21 = vadd.f32 %v5748_v37, %v15627_v61 }
 0x378   : > { %12583 = vpow2.f32 %v6417_v34  ;;  %v15728_v24 = vmul.f32 0.5, %v5777_v10  ;;  %v5969_v16 = vmul.f32 0.3275911, %v5937_v38  ;;  %v6353_v13 = vsub.f32 0.0, %v5937_v38 }
 0x379   : > { %v15730_v56 = vpop.eup %12571  ;;  %vm5873_vm11 = vcmp.ge.f32.partialorder %v5841_v15, 0.0  ;;  %vm5874_vm12 = vcmp.ge.f32.partialorder %v5842_v11, 0.0  ;;  %v5970_v8 = vmul.f32 0.3275911, %v5938_v60  ;;  %v6354_v58 = vsub.f32 0.0, %v5938_v60 }
 0x37a   : > { %v15732_v40 = vpop.eup %12573  ;;  %v6061_v27 = vmul.f32 1.0614054, %v15730_v56  ;;  %v6001_v28 = vadd.f32 1.0, %v5969_v16  ;;  %v6385_v49 = vmul.f32 %v6353_v13, %v5937_v38  ;;  %v15735_v33 = vmul.f32 0.70710677, %v5779_v53 }
 0x37b   : > { %v6062_v32 = vmul.f32 1.0614054, %v15732_v40  ;;  %v6002_v46 = vadd.f32 1.0, %v5970_v8  ;;  %v6386_v5 = vmul.f32 %v6354_v58, %v5938_v60  ;;  %v15739_v10 = vmul.f32 0.70710677, %v15726_v21 }
 0x37c   : > { %v6093_v47 = vadd.f32 -1.4531521, %v6061_v27  ;;  %v15741_v37 = vmul.f32 0.5, %v5778_v7  ;;  %12585 = vrcp.f32 %v6001_v28  ;;  %v5749_v34 = vmul.f32 %v5717_v50, %v15607_v22 }
 0x37d   : > { %v6094_v36 = vadd.f32 -1.4531521, %v6062_v32  ;;  %v15746_v16 = vsel %vm5873_vm11, 1.0, %v18399_v30  ;;  %12587 = vrcp.f32 %v6002_v46  ;;  %v15748_v38 = vmul.f32 0.5, %v5779_v53 }
 0x37e   : > { %v15750_v13 = vpop.eup %12575  ;;  %v6125_v60 = vmul.f32 %v15730_v56, %v6093_v47  ;;  %v15755_v8 = vsel %vm5874_vm12, 1.0, %v18399_v30  ;;  %v6421_v7 = vmul.f32 1.442695, %v6385_v49  ;;  %v5939_v58 = vand.u32 2147483647, %v15735_v33 }
 0x37f   : > { %v15758_v50 = vpop.eup %12577  ;;  %v6126_v15 = vmul.f32 %v15732_v40, %v6094_v36  ;;  %v6063_v27 = vmul.f32 1.0614054, %v15750_v13  ;;  %v6423_v28 = vmul.f32 1.442695, %v6386_v5  ;;  %v5940_v53 = vand.u32 2147483647, %v15739_v10 }
 0x380   : > { %v6157_v32 = vadd.f32 1.4214138, %v6125_v60  ;;  %v6064_v46 = vmul.f32 1.0614054, %v15758_v50  ;;  %12589 = vpow2.f32 %v6419_v44  ;;  %v5971_v47 = vmul.f32 0.3275911, %v5939_v58 }
 0x381   : > { %v6158_v11 = vadd.f32 1.4214138, %v6126_v15  ;;  %v6095_v2 = vadd.f32 -1.4531521, %v6063_v27  ;;  %v5972_v41 = vmul.f32 0.3275911, %v5940_v53  ;;  %v5750_v49 = vmul.f32 %v5718_v1, %v15612_v39 }
 0x382   : > { %v6189_v31 = vmul.f32 %v15730_v56, %v6157_v32  ;;  %v6096_v43 = vadd.f32 -1.4531521, %v6064_v46  ;;  %v6003_v29 = vadd.f32 1.0, %v5971_v47  ;;  %v6355_v36 = vsub.f32 0.0, %v5939_v58 }
 0x383   : > { %v12580_v51 = vpop.eup %12579  ;;  %v6190_v5 = vmul.f32 %v15732_v40, %v6158_v11  ;;  %v6127_v9 = vmul.f32 %v15750_v13, %v6095_v2  ;;  %v6004_v60 = vadd.f32 1.0, %v5972_v41  ;;  %v6356_v17 = vsub.f32 0.0, %v5940_v53 }
 0x384   : > { %v12582_v20 = vpop.eup %12581  ;;  %v6221_v44 = vadd.f32 -0.28449672, %v6189_v31  ;;  %v6128_v15 = vmul.f32 %v15758_v50, %v6096_v43  ;;  %12591 = vrcp.f32 %v6003_v29  ;;  %v6387_v27 = vmul.f32 %v6355_v36, %v5939_v58 }
 0x385   : > { %v12584_v52 = vpop.eup %12583  ;;  %v6222_v1 = vadd.f32 -0.28449672, %v6190_v5  ;;  %v6159_v14 = vadd.f32 1.4214138, %v6127_v9  ;;  %12593 = vrcp.f32 %v6004_v60  ;;  %v6388_v32 = vmul.f32 %v6356_v17, %v5940_v53 }
 0x386   : > { %v6253_v46 = vmul.f32 %v15730_v56, %v6221_v44  ;;  %v6160_v47 = vadd.f32 1.4214138, %v6128_v15  ;;  %v15771_v11 = vmul.f32 0.5, %v15726_v21  ;;  %v15774_v41 = vadd.f32 %v5749_v34, %v15622_v57 }
 0x387   : > { %v6254_v2 = vmul.f32 %v15732_v40, %v6222_v1  ;;  %v6191_v43 = vmul.f32 %v15750_v13, %v6159_v14  ;;  %12595 = vpow2.f32 %v6421_v7  ;;  %v15779_v31 = vadd.f32 %v5750_v49, %v15627_v61 }
 0x388   : > { %v6285_v9 = vadd.f32 0.2548296, %v6253_v46  ;;  %v6192_v29 = vmul.f32 %v15758_v50, %v6160_v47  ;;  %12597 = vpow2.f32 %v6423_v28  ;;  %v6425_v17 = vmul.f32 1.442695, %v6387_v27 }
 0x389   : > { %v15782_v58 = vpop.eup %12585  ;;  %v6286_v21 = vadd.f32 0.2548296, %v6254_v2  ;;  %v6223_v53 = vadd.f32 -0.28449672, %v6191_v43  ;;  %v6427_v36 = vmul.f32 1.442695, %v6388_v32 }
 0x38a   : > { %v18400_v34 = vrot.slane %v15646_v62, 4  ;;  %v15789_v14 = vpop.eup %12587  ;;  %v6317_v7 = vmul.f32 %v15730_v56, %v6285_v9  ;;  %v6224_v49 = vadd.f32 -0.28449672, %v6192_v29  ;;  %v6065_v60 = vmul.f32 1.0614054, %v15782_v58 }
 0x38b   : > { %v15794_v28 = vmul.f32 0.70710677, %v15774_v41  ;;  %v6318_v44 = vmul.f32 %v15732_v40, %v6286_v21  ;;  %v6255_v15 = vmul.f32 %v15750_v13, %v6223_v53  ;;  %v6066_v27 = vmul.f32 1.0614054, %v15789_v14 }
 0x38c   : > { %v15787_v5 = vadd.f32 %v18400_v34, %v15646_v62  ;;  %v15800_v1 = vmul.f32 0.70710677, %v15779_v31  ;;  %v6477_v62 = vmul.f32 %v12580_v51, %v6317_v7  ;;  %v6256_v32 = vmul.f32 %v15758_v50, %v6224_v49 }
 0x38d   : > { %v6097_v46 = vadd.f32 -1.4531521, %v6065_v60  ;;  %12599 = vpow2.f32 %v6425_v17  ;;  %v12590_v56 = vpop.eup %12589  ;;  %v6478_v47 = vmul.f32 %v12582_v20, %v6318_v44  ;;  %v6287_v2 = vadd.f32 0.2548296, %v6255_v15 }
 0x38e   : > { %v6098_v43 = vadd.f32 -1.4531521, %v6066_v27  ;;  %12601 = vpow2.f32 %v6427_v36  ;;  %v6509_v9 = vsub.f32 1.0, %v6477_v62  ;;  %v6288_v29 = vadd.f32 0.2548296, %v6256_v32 }
 0x38f   : > { %v6129_v40 = vmul.f32 %v15782_v58, %v6097_v46  ;;  %v15805_v21 = vand.u32 2147483647, %v15794_v28  ;;  %v6510_v53 = vsub.f32 1.0, %v6478_v47  ;;  %v6319_v34 = vmul.f32 %v15750_v13, %v6287_v2 }
 0x390   : > { %v6130_v51 = vmul.f32 %v15789_v14, %v6098_v43  ;;  %v15810_v7 = vand.u32 2147483647, %v15800_v1  ;;  %v6541_v20 = vmul.f32 %v6509_v9, %v15705_v12  ;;  %v6320_v17 = vmul.f32 %v15758_v50, %v6288_v29 }
 0x391   : > { %v6161_v36 = vadd.f32 1.4214138, %v6129_v40  ;;  %v5973_v49 = vmul.f32 0.3275911, %v15805_v21  ;;  %v15815_v60 = vpop.eup %12591  ;;  %v6542_v44 = vmul.f32 %v6510_v53, %v15710_v42  ;;  %v6479_v15 = vmul.f32 %v12584_v52, %v6319_v34 }
 0x392   : > { %v6162_v27 = vadd.f32 1.4214138, %v6130_v51  ;;  %v5974_v13 = vmul.f32 0.3275911, %v15810_v7  ;;  %v15819_v62 = vpop.eup %12593  ;;  %v6573_v32 = vadd.f32 1.0, %v6541_v20  ;;  %v6480_v46 = vmul.f32 %v12590_v56, %v6320_v17 }
 0x393   : > { %v6193_v47 = vmul.f32 %v15782_v58, %v6161_v36  ;;  %v6067_v12 = vmul.f32 1.0614054, %v15815_v60  ;;  %v6574_v50 = vadd.f32 1.0, %v6542_v44  ;;  %v6511_v2 = vsub.f32 1.0, %v6479_v15 }
 0x394   : > { %v6194_v43 = vmul.f32 %v15789_v14, %v6162_v27  ;;  %v6068_v9 = vmul.f32 1.0614054, %v15819_v62  ;;  %v12596_v29 = vpop.eup %12595  ;;  %v6605_v52 = vmul.f32 %v6573_v32, %v15681_v18  ;;  %v6512_v42 = vsub.f32 1.0, %v6480_v46 }
 0x395   : > { %v6225_v40 = vadd.f32 -0.28449672, %v6193_v47  ;;  %v6099_v53 = vadd.f32 -1.4531521, %v6067_v12  ;;  %v12598_v34 = vpop.eup %12597  ;;  %v6606_v51 = vmul.f32 %v6574_v50, %v15683_v48  ;;  %v6543_v56 = vmul.f32 %v6511_v2, %v15718_v26 }
 0x396   : > { %v6226_v20 = vadd.f32 -0.28449672, %v6194_v43  ;;  %vm5875_vm13 = vcmp.ge.f32.partialorder %v15735_v33, 0.0  ;;  %v6100_v17 = vadd.f32 -1.4531521, %v6068_v9  ;;  %6637 = vst.msk [vmem:[#allocation2 + $0x19] sm:$0xff] %vm365_vm1, %v6605_v52  ;;  %v6544_v36 = vmul.f32 %v6512_v42, %v15722_v45 }
 0x397   : > { %v6257_v44 = vmul.f32 %v15782_v58, %v6225_v40  ;;  %v6131_v18 = vmul.f32 %v15815_v60, %v6099_v53  ;;  %v6005_v15 = vadd.f32 1.0, %v5973_v49  ;;  %6638 = vst.msk [vmem:[#allocation2 + $0x21] sm:$0xff] %vm365_vm1, %v6606_v51  ;;  %v6575_v27 = vadd.f32 1.0, %v6543_v56 }
 0x398   : > { %v6258_v48 = vmul.f32 %v15789_v14, %v6226_v20  ;;  %v6132_v26 = vmul.f32 %v15819_v62, %v6100_v17  ;;  %v6006_v32 = vadd.f32 1.0, %v5974_v13  ;;  %v6576_v46 = vadd.f32 1.0, %v6544_v36 }
 0x399   : > { %v6289_v47 = vadd.f32 0.2548296, %v6257_v44  ;;  %v6163_v12 = vadd.f32 1.4214138, %v6131_v18  ;;  %12603 = vrcp.f32 %v6005_v15  ;;  %v6607_v45 = vmul.f32 %v6575_v27, %v15712_v19 }
 0x39a   : > { %v12600_v50 = vpop.eup %12599  ;;  %v6290_v2 = vadd.f32 0.2548296, %v6258_v48  ;;  %v6164_v43 = vadd.f32 1.4214138, %v6132_v26  ;;  %12605 = vrcp.f32 %v6006_v32  ;;  %v6608_v49 = vmul.f32 %v6576_v46, %v15714_v63 }
 0x39b   : > { %v12602_v9 = vpop.eup %12601  ;;  %v6321_v52 = vmul.f32 %v15782_v58, %v6289_v47  ;;  %v6195_v42 = vmul.f32 %v15815_v60, %v6163_v12  ;;  %v6357_v40 = vsub.f32 0.0, %v15805_v21  ;;  %6639 = vst.msk [vmem:[#allocation2 + $0x31] sm:$0xff] %vm365_vm1, %v6607_v45  ;;  %v6358_v19 = vsub.f32 0.0, %v15810_v7 }
 0x39c   : > { %v6322_v13 = vmul.f32 %v15789_v14, %v6290_v2  ;;  %v6196_v53 = vmul.f32 %v15819_v62, %v6164_v43  ;;  %v5682_v51 = vadd.f32 1e-05, %v15685_v23  ;;  %6640 = vst.msk [vmem:[#allocation2 + $0x39] sm:$0xff] %vm365_vm1, %v6608_v49  ;;  %v5576_v20 = vrot.slane %v15787_v5, 2 }
 0x39d   : > { %v6481_v56 = vmul.f32 %v12596_v29, %v6321_v52  ;;  %v6227_v63 = vadd.f32 -0.28449672, %v6195_v42  ;;  %v6389_v58 = vmul.f32 %v6357_v40, %v15805_v21  ;;  %v6390_v44 = vmul.f32 %v6358_v19, %v15810_v7 }
 0x39e   : > { %v6482_v17 = vmul.f32 %v12598_v34, %v6322_v13  ;;  %v6228_v36 = vadd.f32 -0.28449672, %v6196_v53  ;;  %12607 = vrsqrt.f32 %v5682_v51  ;;  %vm5876_vm14 = vcmp.ge.f32.partialorder %v15739_v10, 0.0  ;;  %v4799_v53 = vpop.f32.mrf.mxu1 }
 0x39f   : > { %v6513_v14 = vsub.f32 1.0, %v6481_v56  ;;  %v6259_v18 = vmul.f32 %v15815_v60, %v6227_v63  ;;  %v5577_v23 = vadd.f32 %v5576_v20, %v15787_v5  ;;  %v6429_v27 = vmul.f32 1.442695, %v6389_v58 }
 0x3a0   : > { %v6514_v15 = vsub.f32 1.0, %v6482_v17  ;;  %v6260_v29 = vmul.f32 %v15819_v62, %v6228_v36  ;;  %v18401_v21 = vrot.slane %v15661_v25, 2  ;;  %v5907_v7 = vsel %vm5875_vm13, 1.0, %v18399_v30 }
 0x3a1   : > { %v6545_v34 = vmul.f32 %v6513_v14, %v15746_v16  ;;  %v6291_v26 = vadd.f32 0.2548296, %v6259_v18  ;;  %v5578_v32 = vrot.slane %v5577_v23, 1  ;;  %v6431_v5 = vmul.f32 1.442695, %v6390_v44  ;;  %v11887_v14 = vpop.f32.mrf.mxu1 }
 0x3a2   : > { %v5362_v48 = vadd.f32 %v18401_v21, %v15661_v25  ;;  %v6546_v46 = vmul.f32 %v6514_v15, %v15755_v8  ;;  %v6292_v47 = vadd.f32 0.2548296, %v6260_v29  ;;  %v5368_v49 = vrot.slane %v15678_v3, 4 }
 0x3a3   : > { %v6577_v45 = vadd.f32 1.0, %v6545_v34  ;;  %v6323_v2 = vmul.f32 %v15815_v60, %v6291_v26  ;;  %v5579_v43 = vadd.f32 %v5578_v32, %v5577_v23  ;;  %12609 = vpow2.f32 %v6429_v27 }
 0x3a4   : > { %v5363_v12 = vrot.slane %v5362_v48, 1  ;;  %v6578_v25 = vadd.f32 1.0, %v6546_v46  ;;  %v6324_v16 = vmul.f32 %v15819_v62, %v6292_v47  ;;  %v5369_v8 = vadd.f32 %v5368_v49, %v15678_v3 }
 0x3a5   : > { %v6609_v33 = vmul.f32 %v6577_v45, %v15728_v24  ;;  %v6483_v42 = vmul.f32 %v12600_v50, %v6323_v2  ;;  %v5667_v40 = vmul.f32 0.0625, %v5579_v43  ;;  %12611 = vpow2.f32 %v6431_v5 }
 0x3a6   : > { %v5364_v52 = vadd.f32 %v5363_v12, %v5362_v48  ;;  %v15867_v13 = vpop.eup %12603  ;;  %v6610_v19 = vmul.f32 %v6578_v25, %v15741_v37  ;;  %v6484_v60 = vmul.f32 %v12602_v9, %v6324_v16  ;;  %v5370_v50 = vrot.slane %v5369_v8, 2  ;;  %v5149_v9 = vpop.f32.mrf.mxu0 }
 0x3a7   : > { %v15870_v56 = vpop.eup %12605  ;;  %6641 = vst.msk [vmem:[#allocation2 + $0x49] sm:$0xff] %vm365_vm1, %v6609_v33  ;;  %v6515_v62 = vsub.f32 1.0, %v6483_v42  ;;  %v6069_v63 = vmul.f32 1.0614054, %v15867_v13  ;;  %v5683_v24 = vadd.f32 1e-05, %v5667_v40  ;;  %v5236_v10 = vadd.f32 %v5149_v9, %v15459_v54  ;;  %v4809_v12 = vpop.f32.mrf.mxu1 }
 0x3a8   : > { %v5444_v51 = vmul.f32 0.0625, %v5364_v52  ;;  %6642 = vst.msk [vmem:[#allocation2 + $0x51] sm:$0xff] %vm365_vm1, %v6610_v19  ;;  %v6516_v3 = vsub.f32 1.0, %v6484_v60  ;;  %v6070_v58 = vmul.f32 1.0614054, %v15870_v56  ;;  %v5908_v17 = vsel %vm5876_vm14, 1.0, %v18399_v30 }
 0x3a9   : > { %v6547_v36 = vmul.f32 %v6515_v62, %v5907_v7  ;;  %v6101_v44 = vadd.f32 -1.4531521, %v6069_v63  ;;  %12613 = vrsqrt.f32 %v5683_v24  ;;  %v5371_v21 = vadd.f32 %v5370_v50, %v5369_v8  ;;  %v18402_v33 = vld [vmem:[#allocation19_spill] sm:$0xff]  ;;  %v18404_v8 = vld [vmem:[#allocation6_spill] sm:$0xff] }
 0x3aa   : > { %v15877_v20 = vsub.f32 %v15585_v59, %v5444_v51  ;;  %v15880_v37 = vsub.f32 %v15576_v0, %v5444_v51  ;;  %v6548_v18 = vmul.f32 %v6516_v3, %v5908_v17  ;;  %v6102_v23 = vadd.f32 -1.4531521, %v6070_v58  ;;  %v18403_v40 = vld [vmem:[#allocation7_spill] sm:$0xff]  ;;  %v18405_v60 = vld [vmem:[#allocation22_spill] sm:$0xff] }
 0x3ab   : > { %v12608_v29 = vpop.eup %12607  ;;  %v6579_v0 = vadd.f32 1.0, %v6547_v36  ;;  %v6133_v27 = vmul.f32 %v15867_v13, %v6101_v44  ;;  %v15901_v49 = vadd.f32 %v4799_v53, %v15650_v4  ;;  %v15906_v25 = vadd.f32 %v11887_v14, %v15300_v6  ;;  %v15924_v6 = vld [vmem:[%s18130_s4] ss:$0 sm:$0xff] }
 0x3ac   : > { %v5499_v15 = vmul.f32 %v15877_v20, %v15877_v20  ;;  %v5500_v59 = vmul.f32 %v15880_v37, %v15880_v37  ;;  %v6580_v48 = vadd.f32 1.0, %v6548_v18  ;;  %v6134_v34 = vmul.f32 %v15870_v56, %v6102_v23 }
 0x3ad   : > { %v5719_v7 = vmul.f32 %v12608_v29, %v15555_v55  ;;  %v5720_v26 = vmul.f32 %v12608_v29, %v15558_v35  ;;  %v6611_v32 = vmul.f32 %v6579_v0, %v15748_v38  ;;  %v6165_v46 = vadd.f32 1.4214138, %v6133_v27 }
 0x3ae   : > { %v5580_v47 = vsel %vm365_vm1, %v5499_v15, 0.0  ;;  %v5581_v5 = vsel %vm365_vm1, %v5500_v59, 0.0  ;;  %v6612_v45 = vmul.f32 %v6580_v48, %v15771_v11  ;;  %v6166_v2 = vadd.f32 1.4214138, %v6134_v34 }
 0x3af   : > { %v5751_v54 = vmul.f32 %v5719_v7, %v15607_v22  ;;  %v5752_v43 = vmul.f32 %v5720_v26, %v15612_v39  ;;  %6643 = vst.msk [vmem:[#allocation2 + $0x61] sm:$0xff] %vm365_vm1, %v6611_v32  ;;  %v6197_v55 = vmul.f32 %v15867_v13, %v6165_v46  ;;  %v5582_v35 = vadd.f32 %v5581_v5, %v5580_v47  ;;  %v18407_v26 = vld [vmem:[#allocation14_spill] sm:$0xff] }
 0x3b0   : > { %v5372_v38 = vrot.slane %v5371_v21, 1  ;;  %6644 = vst.msk [vmem:[#allocation2 + $0x69] sm:$0xff] %vm365_vm1, %v6612_v45  ;;  %v6198_v11 = vmul.f32 %v15870_v56, %v6166_v2  ;;  %v12610_v4 = vpop.eup %12609  ;;  %v15915_v42 = vadd.f32 %v4809_v12, %v18402_v33  ;;  %v15919_v53 = vadd.f32 %v18404_v8, %v18403_v40  ;;  %v11925_v2 = vpop.f32.mrf.mxu0  ;;  %v18409_v33 = vld [vmem:[#allocation8_spill] sm:$0xff] }
 0x3b1   : > { %v5783_v16 = vadd.f32 %v5751_v54, %v15622_v57  ;;  %v15912_v52 = vadd.f32 %v5752_v43, %v15627_v61  ;;  %v6229_v19 = vadd.f32 -0.28449672, %v6197_v55  ;;  %v15928_v51 = vadd.f32 %v15924_v6, %v18405_v60 }
 0x3b2   : > { %vm5877_vm15 = vcmp.ge.f32.partialorder %v15794_v28, 0.0  ;;  %v6230_v62 = vadd.f32 -0.28449672, %v6198_v11  ;;  %v15934_v24 = vadd.f32 %v15924_v6, %v5236_v10  ;;  %v12612_v50 = vpop.eup %12611  ;;  %vm5878_vm2 = vcmp.ge.f32.partialorder %v15800_v1, 0.0  ;;  %v18406_v10 = vld [vmem:[#allocation13_spill] sm:$0xff] }
 0x3b3   : > { %v15931_v63 = vmul.f32 0.70710677, %v5783_v16  ;;  %v6261_v3 = vmul.f32 %v15867_v13, %v6229_v19  ;;  %v15939_v58 = vmul.f32 0.70710677, %v15912_v52  ;;  %v5373_v9 = vadd.f32 %v5372_v38, %v5371_v21  ;;  %v18408_v38 = vld [vmem:[#allocation18_spill] sm:$0xff] }
 0x3b4   : > { %v5813_v17 = vmul.f32 0.5, %v15774_v41  ;;  %v6262_v36 = vmul.f32 %v15870_v56, %v6230_v62  ;;  %v5583_v44 = vrot.slane %v5582_v35, 4  ;;  %v5814_v14 = vmul.f32 0.5, %v15779_v31 }
 0x3b5   : > { %v5943_v28 = vand.u32 2147483647, %v15931_v63  ;;  %v5909_v18 = vsel %vm5877_vm15, 1.0, %v18399_v30  ;;  %v6293_v23 = vadd.f32 0.2548296, %v6261_v3  ;;  %v5910_v59 = vsel %vm5878_vm2, 1.0, %v18399_v30 }
 0x3b6   : > { %v5944_v1 = vand.u32 2147483647, %v15939_v58  ;;  %v12614_v15 = vpop.eup %12613  ;;  %v6294_v29 = vadd.f32 0.2548296, %v6262_v36  ;;  %v5374_v41 = vsel %vm365_vm1, %v15934_v24, 0.0  ;;  %v5445_v34 = vmul.f32 0.0625, %v5373_v9 }
 0x3b7   : > { %v5975_v0 = vmul.f32 0.3275911, %v5943_v28  ;;  %v6325_v27 = vmul.f32 %v15867_v13, %v6293_v23  ;;  %v5721_v48 = vmul.f32 %v12614_v15, %v18406_v10  ;;  %v5722_v32 = vmul.f32 %v12614_v15, %v18407_v26  ;;  %v18410_v3 = vld [vmem:[#allocation15_spill] sm:$0xff]  ;;  %v5159_v26 = vpop.f32.mrf.mxu0 }
 0x3b8   : > { %v5976_v21 = vmul.f32 0.3275911, %v5944_v1  ;;  %v6326_v31 = vmul.f32 %v15870_v56, %v6294_v29  ;;  %v5584_v46 = vadd.f32 %v5583_v44, %v5582_v35  ;;  %v5375_v45 = vsel %vm365_vm1, %v15928_v51, 0.0 }
 0x3b9   : > { %v6007_v7 = vadd.f32 1.0, %v5975_v0  ;;  %v6485_v47 = vmul.f32 %v12610_v4, %v6325_v27  ;;  %v5753_v12 = vmul.f32 %v5721_v48, %v15607_v22  ;;  %v5754_v13 = vmul.f32 %v5722_v32, %v15612_v39 }
 0x3ba   : > { %v6008_v5 = vadd.f32 1.0, %v5976_v21  ;;  %v6486_v54 = vmul.f32 %v12612_v50, %v6326_v31  ;;  %v5376_v43 = vadd.f32 %v5375_v45, %v5374_v41  ;;  %v15962_v35 = vsub.f32 %v18408_v38, %v5445_v34 }
 0x3bb   : > { %12615 = vrcp.f32 %v6007_v7  ;;  %v6517_v55 = vsub.f32 1.0, %v6485_v47  ;;  %v15959_v56 = vadd.f32 %v5753_v12, %v15622_v57  ;;  %v15965_v22 = vadd.f32 %v5754_v13, %v15627_v61  ;;  %v18411_v13 = vld [vmem:[#allocation9_spill] sm:$0xff] }
 0x3bc   : > { %12617 = vrcp.f32 %v6008_v5  ;;  %v6518_v11 = vsub.f32 1.0, %v6486_v54  ;;  %v5585_v4 = vrot.slane %v5584_v46, 2  ;;  %v5239_v40 = vadd.f32 %v11925_v2, %v18409_v33 }
 0x3bd   : > { %v6549_v8 = vmul.f32 %v6517_v55, %v5909_v18  ;;  %v15968_v19 = vmul.f32 0.5, %v5783_v16  ;;  %v6359_v39 = vsub.f32 0.0, %v5943_v28  ;;  %v15971_v60 = vmul.f32 0.70710677, %v15959_v56 }
 0x3be   : > { %v6550_v62 = vmul.f32 %v6518_v11, %v5910_v59  ;;  %v15974_v57 = vmul.f32 0.70710677, %v15965_v22  ;;  %v5586_v50 = vadd.f32 %v5585_v4, %v5584_v46  ;;  %v15977_v9 = vsub.f32 %v18410_v3, %v5445_v34 }
 0x3bf   : > { %v6581_v61 = vadd.f32 1.0, %v6549_v8  ;;  %v6360_v36 = vsub.f32 0.0, %v5944_v1  ;;  %v5945_v44 = vand.u32 2147483647, %v15971_v60  ;;  %v5501_v16 = vmul.f32 %v15962_v35, %v15962_v35 }
 0x3c0   : > { %v6582_v18 = vadd.f32 1.0, %v6550_v62  ;;  %v15983_v23 = vmul.f32 0.5, %v15912_v52  ;;  %vm5879_vm3 = vcmp.ge.f32.partialorder %v15931_v63, 0.0  ;;  %v5946_v15 = vand.u32 2147483647, %v15974_v57 }
 0x3c1   : > { %v6613_v59 = vmul.f32 %v6581_v61, %v5813_v17  ;;  %vm5880_vm4 = vcmp.ge.f32.partialorder %v15939_v58, 0.0  ;;  %v6391_v29 = vmul.f32 %v6359_v39, %v5943_v28  ;;  %v5977_v0 = vmul.f32 0.3275911, %v5945_v44 }
 0x3c2   : > { %v6614_v41 = vmul.f32 %v6582_v18, %v5814_v14  ;;  %v5978_v27 = vmul.f32 0.3275911, %v5946_v15  ;;  %v6361_v21 = vsub.f32 0.0, %v5945_v44  ;;  %v5587_v10 = vrot.slane %v5586_v50, 1 }
 0x3c3   : > { %6645 = vst.msk [vmem:[#allocation2 + $0x79] sm:$0xff] %vm365_vm1, %v6613_v59  ;;  %v6392_v48 = vmul.f32 %v6360_v36, %v5944_v1  ;;  %v6009_v34 = vadd.f32 1.0, %v5977_v0  ;;  %v5502_v52 = vmul.f32 %v15977_v9, %v15977_v9  ;;  %v5589_v31 = vsel %vm365_vm1, %v5501_v16, 0.0 }
 0x3c4   : > { %6646 = vst.msk [vmem:[#allocation2 + $0x81] sm:$0xff] %vm365_vm1, %v6614_v41  ;;  %v15996_v17 = vsel %vm5879_vm3, 1.0, %v18399_v30  ;;  %v6010_v28 = vadd.f32 1.0, %v5978_v27  ;;  %v5588_v14 = vadd.f32 %v5587_v10, %v5586_v50  ;;  %v5377_v7 = vrot.slane %v5376_v43, 4  ;;  %v11928_v50 = vpop.f32.mrf.mxu0 }
 0x3c5   : > { %v6433_v32 = vmul.f32 1.442695, %v6391_v29  ;;  %12619 = vrcp.f32 %v6009_v34  ;;  %v6362_v1 = vsub.f32 0.0, %v5946_v15  ;;  %v5590_v46 = vsel %vm365_vm1, %v5502_v52, 0.0  ;;  %v18412_v52 = vld [vmem:[#allocation10_spill] sm:$0xff] }
 0x3c6   : > { %12621 = vrcp.f32 %v6010_v28  ;;  %v6393_v47 = vmul.f32 %v6361_v21, %v5945_v44  ;;  %v5668_v5 = vmul.f32 0.0625, %v5588_v14  ;;  %v5591_v12 = vadd.f32 %v5590_v46, %v5589_v31  ;;  %v5169_v21 = vpop.f32.mrf.mxu0  ;;  %v18413_v46 = vld [vmem:[#allocation12_spill] sm:$0xff] }
 0x3c7   : > { %v6435_v2 = vmul.f32 1.442695, %v6392_v48  ;;  %v5378_v54 = vadd.f32 %v5377_v7, %v5376_v43  ;;  %v16002_v63 = vadd.f32 %v15924_v6, %v5239_v40  ;;  %v5238_v55 = vadd.f32 %v5159_v26, %v18411_v13 }
 0x3c8   : > { %v15999_v45 = vpop.eup %12615  ;;  %v16010_v11 = vsel %vm5880_vm4, 1.0, %v18399_v30  ;;  %v5684_v33 = vadd.f32 1e-05, %v5668_v5  ;;  %v5592_v8 = vrot.slane %v5591_v12, 4  ;;  %v6394_v62 = vmul.f32 %v6362_v1, %v5946_v15 }
 0x3c9   : > { %v16005_v38 = vpop.eup %12617  ;;  %v6071_v4 = vmul.f32 1.0614054, %v15999_v45  ;;  %v5379_v43 = vrot.slane %v5378_v54, 2  ;;  %v16015_v40 = vadd.f32 %v15924_v6, %v5238_v55  ;;  %v6437_v61 = vmul.f32 1.442695, %v6393_v47 }
 0x3ca   : > { %v6072_v39 = vmul.f32 1.0614054, %v16005_v38  ;;  %12623 = vrsqrt.f32 %v5684_v33  ;;  %v5593_v36 = vadd.f32 %v5592_v8, %v5591_v12  ;;  %v5384_v16 = vsel %vm365_vm1, %v16002_v63, 0.0 }
 0x3cb   : > { %v6103_v3 = vadd.f32 -1.4531521, %v6071_v4  ;;  %v5380_v58 = vadd.f32 %v5379_v43, %v5378_v54  ;;  %v5383_v18 = vsel %vm365_vm1, %v16015_v40, 0.0  ;;  %12625 = vpow2.f32 %v6433_v32 }
 0x3cc   : > { %v6104_v44 = vadd.f32 -1.4531521, %v6072_v39  ;;  %v5594_v15 = vrot.slane %v5593_v36, 2  ;;  %v5385_v29 = vadd.f32 %v5384_v16, %v5383_v18  ;;  %12627 = vpow2.f32 %v6435_v2 }
 0x3cd   : > { %v6135_v59 = vmul.f32 %v15999_v45, %v6103_v3  ;;  %v6439_v41 = vmul.f32 1.442695, %v6394_v62  ;;  %v5381_v27 = vrot.slane %v5380_v58, 1  ;;  %v5241_v31 = vadd.f32 %v11928_v50, %v18412_v52 }
 0x3ce   : > { %v6136_v0 = vmul.f32 %v16005_v38, %v6104_v44  ;;  %v5595_v48 = vadd.f32 %v5594_v15, %v5593_v36  ;;  %v5386_v34 = vrot.slane %v5385_v29, 4  ;;  %v16025_v14 = vmul.f32 0.5, %v15959_v56 }
 0x3cf   : > { %v6167_v10 = vadd.f32 1.4214138, %v6135_v59  ;;  %12629 = vpow2.f32 %v6437_v61  ;;  %v5382_v7 = vadd.f32 %v5381_v27, %v5380_v58  ;;  %v5240_v47 = vadd.f32 %v5169_v21, %v18413_v46 }
 0x3d0   : > { %v6168_v28 = vadd.f32 1.4214138, %v6136_v0  ;;  %v5596_v32 = vrot.slane %v5595_v48, 1  ;;  %v5387_v1 = vadd.f32 %v5386_v34, %v5385_v29  ;;  %v16031_v12 = vmul.f32 0.5, %v15965_v22 }
 0x3d1   : > { %v6199_v26 = vmul.f32 %v15999_v45, %v6167_v10  ;;  %12631 = vpow2.f32 %v6439_v41  ;;  %v5446_v2 = vmul.f32 0.0625, %v5382_v7  ;;  %v16036_v4 = vadd.f32 %v15924_v6, %v5241_v31 }
 0x3d2   : > { %v6200_v5 = vmul.f32 %v16005_v38, %v6168_v28  ;;  %v16033_v54 = vpop.eup %12619  ;;  %v5597_v56 = vadd.f32 %v5596_v32, %v5595_v48  ;;  %v5388_v55 = vrot.slane %v5387_v1, 2  ;;  %v16050_v61 = vadd.f32 %v15924_v6, %v5240_v47 }
 0x3d3   : > { %v6231_v13 = vadd.f32 -0.28449672, %v6199_v26  ;;  %v16038_v33 = vpop.eup %12621  ;;  %v6073_v39 = vmul.f32 1.0614054, %v16033_v54  ;;  %v16042_v62 = vsub.f32 %v15934_v24, %v5446_v2  ;;  %v16045_v22 = vsub.f32 %v15928_v51, %v5446_v2 }
 0x3d4   : > { %v6232_v8 = vadd.f32 -0.28449672, %v6200_v5  ;;  %v6074_v50 = vmul.f32 1.0614054, %v16038_v33  ;;  %v5669_v3 = vmul.f32 0.0625, %v5597_v56  ;;  %v5389_v59 = vadd.f32 %v5388_v55, %v5387_v1 }
 0x3d5   : > { %v6263_v43 = vmul.f32 %v15999_v45, %v6231_v13  ;;  %v6105_v44 = vadd.f32 -1.4531521, %v6073_v39  ;;  %v5503_v58 = vmul.f32 %v16042_v62, %v16042_v62  ;;  %v5504_v24 = vmul.f32 %v16045_v22, %v16045_v22  ;;  %v11931_v13 = vpop.f32.mrf.mxu0  ;;  %v16083_v39 = vld [vmem:[%s18132_s6] sm:$0xff] }
 0x3d6   : > { %v6264_v36 = vmul.f32 %v16005_v38, %v6232_v8  ;;  %v6106_v51 = vadd.f32 -1.4531521, %v6074_v50  ;;  %v5685_v18 = vadd.f32 1e-05, %v5669_v3  ;;  %vm5881_vm5 = vcmp.ge.f32.partialorder %v15971_v60, 0.0  ;;  %v16091_v50 = vld [vmem:[%s18132_s6 + $0x8] sm:$0xff] }
 0x3d7   : > { %v6295_v16 = vadd.f32 0.2548296, %v6263_v43  ;;  %v12624_v15 = vpop.eup %12623  ;;  %v6137_v0 = vmul.f32 %v16033_v54, %v6105_v44  ;;  %v5598_v41 = vsel %vm365_vm1, %v5503_v58, 0.0  ;;  %v5599_v27 = vsel %vm365_vm1, %v5504_v24, 0.0 }
 0x3d8   : > { %v6296_v29 = vadd.f32 0.2548296, %v6264_v36  ;;  %v6138_v10 = vmul.f32 %v16038_v33, %v6106_v51  ;;  %v5723_v48 = vmul.f32 %v12624_v15, %v15877_v20  ;;  %v5724_v34 = vmul.f32 %v12624_v15, %v15880_v37  ;;  %v12626_v52 = vpop.eup %12625  ;;  %v16075_v37 = vld [vmem:[%s18131_s5 + $0x8] sm:$0xff] }
 0x3d9   : > { %v6327_v21 = vmul.f32 %v15999_v45, %v6295_v16  ;;  %v6169_v28 = vadd.f32 1.4214138, %v6137_v0  ;;  %12633 = vrsqrt.f32 %v5685_v18  ;;  %v5600_v7 = vadd.f32 %v5599_v27, %v5598_v41  ;;  %v12628_v26 = vpop.eup %12627  ;;  %v16069_v45 = vld [vmem:[%s18131_s5] sm:$0xff] }
 0x3da   : > { %v6328_v31 = vmul.f32 %v16005_v38, %v6296_v29  ;;  %v6170_v1 = vadd.f32 1.4214138, %v6138_v10  ;;  %v5755_v20 = vmul.f32 %v16069_v45, %v5723_v48  ;;  %v5756_v38 = vmul.f32 %v16075_v37, %v5724_v34 }
 0x3db   : > { %v6487_v32 = vmul.f32 %v12626_v52, %v6327_v21  ;;  %v6201_v47 = vmul.f32 %v16033_v54, %v6169_v28  ;;  %v5601_v5 = vrot.slane %v5600_v7, 4  ;;  %v5390_v2 = vrot.slane %v5389_v59, 1 }
 0x3dc   : > { %v6488_v46 = vmul.f32 %v12628_v26, %v6328_v31  ;;  %v12630_v56 = vpop.eup %12629  ;;  %v6202_v8 = vmul.f32 %v16038_v33, %v6170_v1  ;;  %v16086_v43 = vadd.f32 %v16083_v39, %v5755_v20  ;;  %v16094_v3 = vadd.f32 %v16091_v50, %v5756_v38  ;;  %v18415_v1 = vld [vmem:[#allocation17_spill] sm:$0xff] }
 0x3dd   : > { %v6519_v55 = vsub.f32 1.0, %v6487_v32  ;;  %v6233_v44 = vadd.f32 -0.28449672, %v6201_v47  ;;  %v5602_v58 = vadd.f32 %v5601_v5, %v5600_v7  ;;  %v5391_v24 = vadd.f32 %v5390_v2, %v5389_v59  ;;  %v5179_v59 = vpop.f32.mrf.mxu0 }
 0x3de   : > { %v6520_v36 = vsub.f32 1.0, %v6488_v46  ;;  %v12632_v16 = vpop.eup %12631  ;;  %vm5882_vm6 = vcmp.ge.f32.partialorder %v15974_v57, 0.0  ;;  %v6234_v18 = vadd.f32 -0.28449672, %v6202_v8  ;;  %v5392_v15 = vsel %vm365_vm1, %v16050_v61, 0.0 }
 0x3df   : > { %v6551_v51 = vmul.f32 %v6519_v55, %v15996_v17  ;;  %v6265_v0 = vmul.f32 %v16033_v54, %v6233_v44  ;;  %v16103_v41 = vmul.f32 0.70710677, %v16086_v43  ;;  %v16106_v27 = vmul.f32 0.70710677, %v16094_v3 }
 0x3e0   : > { %v6552_v29 = vmul.f32 %v6520_v36, %v16010_v11  ;;  %v6266_v17 = vmul.f32 %v16038_v33, %v6234_v18  ;;  %v5603_v10 = vrot.slane %v5602_v58, 2  ;;  %v5393_v48 = vsel %vm365_vm1, %v16036_v4, 0.0  ;;  %v18414_v11 = vld [vmem:[#allocation16_spill] sm:$0xff] }
 0x3e1   : > { %v6583_v21 = vadd.f32 1.0, %v6551_v51  ;;  %v6297_v52 = vadd.f32 0.2548296, %v6265_v0  ;;  %v5447_v31 = vmul.f32 0.0625, %v5391_v24  ;;  %v5243_v28 = vadd.f32 %v11931_v13, %v18414_v11 }
 0x3e2   : > { %v6584_v34 = vadd.f32 1.0, %v6552_v29  ;;  %v6298_v26 = vadd.f32 0.2548296, %v6266_v17  ;;  %v5394_v32 = vadd.f32 %v5393_v48, %v5392_v15  ;;  %v5242_v20 = vadd.f32 %v5179_v59, %v18415_v1 }
 0x3e3   : > { %v6615_v7 = vmul.f32 %v6583_v21, %v15968_v19  ;;  %v6329_v46 = vmul.f32 %v16033_v54, %v6297_v52  ;;  %v5947_v47 = vand.u32 2147483647, %v16103_v41  ;;  %v5948_v5 = vand.u32 2147483647, %v16106_v27 }
 0x3e4   : > { %v6616_v38 = vmul.f32 %v6584_v34, %v15983_v23  ;;  %v5913_v2 = vsel %vm5881_vm5, 1.0, %v18399_v30  ;;  %v5914_v19 = vsel %vm5882_vm6, 1.0, %v18399_v30  ;;  %v6330_v13 = vmul.f32 %v16038_v33, %v6298_v26 }
 0x3e5   : > { %6647 = vst.msk [vmem:[#allocation2 + $0x91] sm:$0xff] %vm365_vm1, %v6615_v7  ;;  %v5604_v55 = vadd.f32 %v5603_v10, %v5602_v58  ;;  %v6489_v23 = vmul.f32 %v12630_v56, %v6329_v46  ;;  %v5979_v54 = vmul.f32 0.3275911, %v5947_v47  ;;  %v5980_v8 = vmul.f32 0.3275911, %v5948_v5  ;;  %v11890_v58 = vpop.f32.mrf.mxu1  ;;  %v18416_v46 = vld [vmem:[#allocation4_spill] sm:$0xff] }
 0x3e6   : > { %6648 = vst.msk [vmem:[#allocation2 + $0x99] sm:$0xff] %vm365_vm1, %v6616_v38  ;;  %v16128_v36 = vsub.f32 %v16015_v40, %v5447_v31  ;;  %v12634_v44 = vpop.eup %12633  ;;  %v6490_v24 = vmul.f32 %v12632_v16, %v6330_v13  ;;  %v5395_v60 = vrot.slane %v5394_v32, 4  ;;  %v16131_v18 = vadd.f32 %v15924_v6, %v5243_v28 }
 0x3e7   : > { %v5605_v51 = vrot.slane %v5604_v55, 1  ;;  %v6521_v57 = vsub.f32 1.0, %v6489_v23  ;;  %v6011_v15 = vadd.f32 1.0, %v5979_v54  ;;  %v6012_v29 = vadd.f32 1.0, %v5980_v8 }
 0x3e8   : > { %v16134_v33 = vadd.f32 %v15924_v6, %v5242_v20  ;;  %v6522_v56 = vsub.f32 1.0, %v6490_v24  ;;  %v5725_v0 = vmul.f32 %v12634_v44, %v15962_v35  ;;  %v5726_v40 = vmul.f32 %v12634_v44, %v15977_v9  ;;  %v4819_v9 = vpop.f32.mrf.mxu1 }
 0x3e9   : > { %v16139_v59 = vsub.f32 %v16002_v63, %v5447_v31  ;;  %v6553_v16 = vmul.f32 %v6521_v57, %v5913_v2  ;;  %12635 = vrcp.f32 %v6011_v15  ;;  %v5606_v21 = vadd.f32 %v5605_v51, %v5604_v55 }
 0x3ea   : > { %v5505_v17 = vmul.f32 %v16128_v36, %v16128_v36  ;;  %v6554_v10 = vmul.f32 %v6522_v56, %v5914_v19  ;;  %12637 = vrcp.f32 %v6012_v29  ;;  %v5757_v48 = vmul.f32 %v16069_v45, %v5725_v0 }
 0x3eb   : > { %v5396_v34 = vadd.f32 %v5395_v60, %v5394_v32  ;;  %v6585_v52 = vadd.f32 1.0, %v6553_v16  ;;  %v6363_v11 = vsub.f32 0.0, %v5947_v47  ;;  %v5758_v35 = vmul.f32 %v16075_v37, %v5726_v40 }
 0x3ec   : > { %v5670_v28 = vmul.f32 0.0625, %v5606_v21  ;;  %v6586_v7 = vadd.f32 1.0, %v6554_v10  ;;  %v6364_v63 = vsub.f32 0.0, %v5948_v5  ;;  %v5789_v31 = vadd.f32 %v16083_v39, %v5757_v48 }
 0x3ed   : > { %v5506_v26 = vmul.f32 %v16139_v59, %v16139_v59  ;;  %v6617_v1 = vmul.f32 %v6585_v52, %v16025_v14  ;;  %v16150_v20 = vadd.f32 %v16091_v50, %v5758_v35  ;;  %v5607_v32 = vsel %vm365_vm1, %v5505_v17, 0.0 }
 0x3ee   : > { %v5686_v38 = vadd.f32 1e-05, %v5670_v28  ;;  %v16154_v2 = vadd.f32 %v11890_v58, %v18416_v46  ;;  %v6618_v19 = vmul.f32 %v6586_v7, %v16031_v12  ;;  %v16157_v13 = vmul.f32 0.70710677, %v5789_v31  ;;  %v10587_v58 = vld [vmem:[%s18133_s7 + $0x4] sm:$0xf] }
 0x3ef   : > { %v5608_v55 = vsel %vm365_vm1, %v5506_v26, 0.0  ;;  %v16161_v23 = vadd.f32 %v4819_v9, %v15919_v53  ;;  %6649 = vst.msk [vmem:[#allocation2 + $0xa9] sm:$0xff] %vm365_vm1, %v6617_v1  ;;  %v16165_v14 = vmul.f32 0.70710677, %v16150_v20  ;;  %v6395_v8 = vmul.f32 %v6363_v11, %v5947_v47  ;;  %11941 = vmatprep.subr.msk.mxu1 %vm1966_vm0, %v10587_v58 }
 0x3f0   : > { %12639 = vrsqrt.f32 %v5686_v38  ;;  %v5609_v54 = vadd.f32 %v5608_v55, %v5607_v32  ;;  %6650 = vst.msk [vmem:[#allocation2 + $0xb1] sm:$0xff] %vm365_vm1, %v6618_v19  ;;  %v5949_v44 = vand.u32 2147483647, %v16157_v13  ;;  %v5397_v12 = vrot.slane %v5396_v34, 2  ;;  %11942 = vmatpush3.msk.msra.mxu1 %vm1966_vm0, %v10587_v58 }
 0x3f1   : > { %v5401_v24 = vsel %vm365_vm1, %v16134_v33, 0.0  ;;  %v6396_v51 = vmul.f32 %v6364_v63, %v5948_v5  ;;  %v5950_v53 = vand.u32 2147483647, %v16165_v14  ;;  %v5402_v57 = vsel %vm365_vm1, %v16131_v18, 0.0 }
 0x3f2   : > { %v5610_v60 = vrot.slane %v5609_v54, 4  ;;  %v16175_v15 = vmul.f32 0.5, %v16086_v43  ;;  %vm5883_vm7 = vcmp.ge.f32.partialorder %v16103_v41, 0.0  ;;  %v5981_v29 = vmul.f32 0.3275911, %v5949_v44 }
 0x3f3   : > { %v5398_v47 = vadd.f32 %v5397_v12, %v5396_v34  ;;  %vm5884_vm8 = vcmp.ge.f32.partialorder %v16106_v27, 0.0  ;;  %v5982_v5 = vmul.f32 0.3275911, %v5950_v53  ;;  %v5403_v0 = vadd.f32 %v5402_v57, %v5401_v24 }
 0x3f4   : > { %v5611_v56 = vadd.f32 %v5610_v60, %v5609_v54  ;;  %v16184_v40 = vmul.f32 0.5, %v16094_v3  ;;  %v6441_v43 = vmul.f32 1.442695, %v6395_v8  ;;  %v6013_v16 = vadd.f32 1.0, %v5981_v29 }
 0x3f5   : > { %v5399_v21 = vrot.slane %v5398_v47, 1  ;;  %v16188_v41 = vsel %vm5883_vm7, 1.0, %v18399_v30  ;;  %v6443_v17 = vmul.f32 1.442695, %v6396_v51  ;;  %v6014_v10 = vadd.f32 1.0, %v5982_v5  ;;  %v11934_v5 = vpop.f32.mrf.mxu0 }
 0x3f6   : > { %v5612_v48 = vrot.slane %v5611_v56, 2  ;;  %v16190_v27 = vpop.eup %12635  ;;  %v16193_v34 = vsel %vm5884_vm8, 1.0, %v18399_v30  ;;  %12641 = vrcp.f32 %v6013_v16  ;;  %v5404_v3 = vrot.slane %v5403_v0, 4 }
 0x3f7   : > { %v5400_v52 = vadd.f32 %v5399_v21, %v5398_v47  ;;  %v16195_v11 = vpop.eup %12637  ;;  %v6075_v35 = vmul.f32 1.0614054, %v16190_v27  ;;  %12643 = vrcp.f32 %v6014_v10  ;;  %v6365_v28 = vsub.f32 0.0, %v5949_v44 }
 0x3f8   : > { %v5613_v9 = vadd.f32 %v5612_v48, %v5611_v56  ;;  %v6076_v7 = vmul.f32 1.0614054, %v16195_v11  ;;  %12645 = vpow2.f32 %v6441_v43  ;;  %v6366_v63 = vsub.f32 0.0, %v5950_v53 }
 0x3f9   : > { %v5448_v26 = vmul.f32 0.0625, %v5400_v52  ;;  %v6107_v1 = vadd.f32 -1.4531521, %v6075_v35  ;;  %12647 = vpow2.f32 %v6443_v17  ;;  %v16199_v38 = vmul.f32 0.5, %v5789_v31  ;;  %v6701_v52 = vld [vmem:[%s18133_s7] sm:$0xf] }
 0x3fa   : > { %v5614_v32 = vrot.slane %v5613_v9, 1  ;;  %v6108_v46 = vadd.f32 -1.4531521, %v6076_v7  ;;  %v5405_v54 = vadd.f32 %v5404_v3, %v5403_v0  ;;  %vm5885_vm9 = vcmp.ge.f32.partialorder %v16157_v13, 0.0  ;;  %11991 = vmatprep.subr.msk.mxu0 %vm1966_vm0, %v6701_v52 }
 0x3fb   : > { %v16202_v19 = vsub.f32 %v16050_v61, %v5448_v26  ;;  %v16205_v55 = vsub.f32 %v16036_v4, %v5448_v26  ;;  %v6139_v8 = vmul.f32 %v16190_v27, %v6107_v1  ;;  %v6397_v12 = vmul.f32 %v6365_v28, %v5949_v44  ;;  %11992 = vmatpush3.msk.msra.mxu0 %vm1966_vm0, %v6701_v52 }
 0x3fc   : > { %v5615_v24 = vadd.f32 %v5614_v32, %v5613_v9  ;;  %v6140_v60 = vmul.f32 %v16195_v11, %v6108_v46  ;;  %v6398_v31 = vmul.f32 %v6366_v63, %v5950_v53  ;;  %v5406_v43 = vrot.slane %v5405_v54, 2  ;;  %v6669_v9 = vld [vmem:[#allocation2] sm:$0xff]  ;;  %v6670_v32 = vld [vmem:[#allocation2 + $0x8] sm:$0xff] }
 0x3fd   : > { %v12640_v51 = vpop.eup %12639  ;;  %v5507_v57 = vmul.f32 %v16202_v19, %v16202_v19  ;;  %v5508_v61 = vmul.f32 %v16205_v55, %v16205_v55  ;;  %v6171_v29 = vadd.f32 1.4214138, %v6139_v8  ;;  %vm5886_vm10 = vcmp.ge.f32.partialorder %v16165_v14, 0.0  ;;  %11993 = vmatprep.mubr.msk.f32.mxu0 %vm365_vm1, %v6669_v9 }
 0x3fe   : > { %v5727_v4 = vmul.f32 %v12640_v51, %v16042_v62  ;;  %v5728_v47 = vmul.f32 %v12640_v51, %v16045_v22  ;;  %v5671_v58 = vmul.f32 0.0625, %v5615_v24  ;;  %v6172_v56 = vadd.f32 1.4214138, %v6140_v60  ;;  %v18417_v22 = vld [vmem:[#allocation20_spill] sm:$0xff]  ;;  %11994 = vmatmul.mubr.msk.f32.vlgmr.msra.gmra.mxu0 %vm365_vm1, %v6670_v32 }
 0x3ff   : > { %v5616_v44 = vsel %vm365_vm1, %v5507_v57, 0.0  ;;  %v5617_v0 = vsel %vm365_vm1, %v5508_v61, 0.0  ;;  %v6203_v53 = vmul.f32 %v16190_v27, %v6171_v29  ;;  %v5245_v48 = vadd.f32 %v11934_v5, %v18417_v22  ;;  %v6702_v5 = vld [vmem:[#allocation2 + $0x18] sm:$0xff] }
 0x400   : > { %v5759_v16 = vmul.f32 %v16069_v45, %v5727_v4  ;;  %v5760_v21 = vmul.f32 %v16075_v37, %v5728_v47  ;;  %v5687_v17 = vadd.f32 1e-05, %v5671_v58  ;;  %v6204_v10 = vmul.f32 %v16195_v11, %v6172_v56  ;;  %v5189_v58 = vpop.f32.mrf.mxu0  ;;  %11943 = vmatprep.mubr.msk.f32.mxu1 %vm365_vm1, %v6702_v5  ;;  %11996 = vmatprep.mubr.msk.f32.mxu0 %vm365_vm1, %v6702_v5 }
 0x401   : > { %v5618_v62 = vadd.f32 %v5617_v0, %v5616_v44  ;;  %v6235_v3 = vadd.f32 -0.28449672, %v6203_v53  ;;  %v16235_v63 = vmul.f32 0.5, %v16150_v20  ;;  %v6445_v26 = vmul.f32 1.442695, %v6397_v12 }
 0x402   : > { %v16228_v35 = vadd.f32 %v16083_v39, %v5759_v16  ;;  %v16231_v28 = vadd.f32 %v16091_v50, %v5760_v21  ;;  %12649 = vrsqrt.f32 %v5687_v17  ;;  %v6236_v7 = vadd.f32 -0.28449672, %v6204_v10  ;;  %v6703_v21 = vld [vmem:[#allocation2 + $0x20] sm:$0xff] }
 0x403   : > { %v5407_v1 = vadd.f32 %v5406_v43, %v5405_v54  ;;  %v16239_v46 = vpop.eup %12641  ;;  %v6267_v8 = vmul.f32 %v16190_v27, %v6235_v3  ;;  %v16245_v24 = vsel %vm5885_vm9, 1.0, %v18399_v30  ;;  %v6447_v51 = vmul.f32 1.442695, %v6398_v31  ;;  %11944 = vmatmul.mubr.msk.f32.vlgmr.msra.gmra.mxu1 %vm365_vm1, %v6703_v21  ;;  %11997 = vmatmul.mubr.msk.f32.gmra.mxu0 %vm365_vm1, %v6703_v21 }
 0x404   : > { %v16248_v20 = vmul.f32 0.70710677, %v16228_v35  ;;  %v16251_v54 = vpop.eup %12643  ;;  %v6268_v12 = vmul.f32 %v16195_v11, %v6236_v7  ;;  %v16257_v60 = vsel %vm5886_vm10, 1.0, %v18399_v30  ;;  %v6077_v57 = vmul.f32 1.0614054, %v16239_v46  ;;  %v6704_v7 = vld [vmem:[#allocation2 + $0x30] sm:$0xff] }
 0x405   : > { %v16261_v13 = vmul.f32 0.70710677, %v16231_v28  ;;  %v12646_v31 = vpop.eup %12645  ;;  %v6299_v61 = vadd.f32 0.2548296, %v6267_v8  ;;  %v6078_v29 = vmul.f32 1.0614054, %v16251_v54  ;;  %v16265_v47 = vadd.f32 %v15924_v6, %v5245_v48  ;;  %11946 = vmatprep.mubr.msk.f32.mxu1 %vm365_vm1, %v6704_v7  ;;  %11999 = vmatprep.mubr.msk.f32.mxu0 %vm365_vm1, %v6704_v7 }
 0x406   : > { %v5619_v4 = vrot.slane %v5618_v62, 4  ;;  %v12648_v56 = vpop.eup %12647  ;;  %v6300_v44 = vadd.f32 0.2548296, %v6268_v12  ;;  %v6109_v14 = vadd.f32 -1.4531521, %v6077_v57  ;;  %12651 = vpow2.f32 %v6445_v26  ;;  %v6705_v26 = vld [vmem:[#allocation2 + $0x38] sm:$0xff] }
 0x407   : > { %v5408_v0 = vrot.slane %v5407_v1, 1  ;;  %v6331_v43 = vmul.f32 %v16190_v27, %v6299_v61  ;;  %v6110_v53 = vadd.f32 -1.4531521, %v6078_v29  ;;  %12653 = vpow2.f32 %v6447_v51  ;;  %11947 = vmatmul.mubr.msk.f32.gmra.mxu1 %vm365_vm1, %v6705_v26  ;;  %12000 = vmatmul.mubr.msk.f32.gmra.mxu0 %vm365_vm1, %v6705_v26 }
 0x408   : > { %v5951_v16 = vand.u32 2147483647, %v16248_v20  ;;  %v6332_v17 = vmul.f32 %v16195_v11, %v6300_v44  ;;  %v6141_v10 = vmul.f32 %v16239_v46, %v6109_v14  ;;  %v5952_v22 = vand.u32 2147483647, %v16261_v13  ;;  %v6707_v44 = vld [vmem:[#allocation2 + $0x50] sm:$0xff] }
 0x409   : > { %v5244_v48 = vadd.f32 %v5189_v58, %v15901_v49  ;;  %v6491_v52 = vmul.f32 %v12646_v31, %v6331_v43  ;;  %v6142_v27 = vmul.f32 %v16251_v54, %v6110_v53  ;;  %v5620_v9 = vadd.f32 %v5619_v4, %v5618_v62 }
 0x40a   : > { %v5983_v3 = vmul.f32 0.3275911, %v5951_v16  ;;  %v6492_v32 = vmul.f32 %v12648_v56, %v6332_v17  ;;  %v6173_v8 = vadd.f32 1.4214138, %v6141_v10  ;;  %v5984_v11 = vmul.f32 0.3275911, %v5952_v22 }
 0x40b   : > { %v5409_v51 = vadd.f32 %v5408_v0, %v5407_v1  ;;  %v6523_v49 = vsub.f32 1.0, %v6491_v52  ;;  %v6174_v12 = vadd.f32 1.4214138, %v6142_v27  ;;  %v6367_v61 = vsub.f32 0.0, %v5951_v16  ;;  %v6706_v56 = vld [vmem:[#allocation2 + $0x48] sm:$0xff] }
 0x40c   : > { %v6015_v57 = vadd.f32 1.0, %v5983_v3  ;;  %v6524_v29 = vsub.f32 1.0, %v6492_v32  ;;  %v6205_v31 = vmul.f32 %v16239_v46, %v6173_v8  ;;  %v6016_v58 = vadd.f32 1.0, %v5984_v11  ;;  %11949 = vmatprep.mubr.msk.f32.mxu1 %vm365_vm1, %v6706_v56  ;;  %12002 = vmatprep.mubr.msk.f32.mxu0 %vm365_vm1, %v6706_v56  ;;  %v6709_v11 = vld [vmem:[#allocation2 + $0x68] sm:$0xff] }
 0x40d   : > { %v6368_v5 = vsub.f32 0.0, %v5952_v22  ;;  %v6555_v62 = vmul.f32 %v6523_v49, %v16188_v41  ;;  %v6206_v1 = vmul.f32 %v16251_v54, %v6174_v12  ;;  %v5621_v4 = vrot.slane %v5620_v9, 2  ;;  %11950 = vmatmul.mubr.msk.f32.gmra.mxu1 %vm365_vm1, %v6707_v44  ;;  %12003 = vmatmul.mubr.msk.f32.gmra.mxu0 %vm365_vm1, %v6707_v44 }
 0x40e   : > { %12655 = vrcp.f32 %v6015_v57  ;;  %v6556_v0 = vmul.f32 %v6524_v29, %v16193_v34  ;;  %v6237_v43 = vadd.f32 -0.28449672, %v6205_v31  ;;  %v5449_v53 = vmul.f32 0.0625, %v5409_v51  ;;  %v11937_v57 = vpop.f32.mrf.mxu0 }
 0x40f   : > { %v12650_v14 = vpop.eup %12649  ;;  %12657 = vrcp.f32 %v6016_v58  ;;  %v6587_v21 = vadd.f32 1.0, %v6555_v62  ;;  %v6238_v17 = vadd.f32 -0.28449672, %v6206_v1  ;;  %v6399_v10 = vmul.f32 %v6367_v61, %v5951_v16  ;;  %v6708_v16 = vld [vmem:[#allocation2 + $0x60] sm:$0xff]  ;;  %v6710_v1 = vld [vmem:[#allocation2 + $0x78] sm:$0xff] }
 0x410   : > { %v5729_v41 = vmul.f32 %v12650_v14, %v16128_v36  ;;  %v6588_v52 = vadd.f32 1.0, %v6556_v0  ;;  %v6269_v27 = vmul.f32 %v16239_v46, %v6237_v43  ;;  %v6400_v3 = vmul.f32 %v6368_v5, %v5952_v22  ;;  %11952 = vmatprep.mubr.msk.f32.mxu1 %vm365_vm1, %v6708_v16  ;;  %12005 = vmatprep.mubr.msk.f32.mxu0 %vm365_vm1, %v6708_v16 }
 0x411   : > { %v5730_v7 = vmul.f32 %v12650_v14, %v16139_v59  ;;  %v6619_v34 = vmul.f32 %v6587_v21, %v16175_v15  ;;  %v6270_v26 = vmul.f32 %v16251_v54, %v6238_v17  ;;  %v5622_v8 = vadd.f32 %v5621_v4, %v5620_v9  ;;  %11953 = vmatmul.mubr.msk.f32.gmra.mxu1 %vm365_vm1, %v6709_v11 }
 0x412   : > { %v5761_v32 = vmul.f32 %v16069_v45, %v5729_v41  ;;  %v6620_v36 = vmul.f32 %v6588_v52, %v16184_v40  ;;  %v6301_v51 = vadd.f32 0.2548296, %v6269_v27  ;;  %v16299_v59 = vadd.f32 %v15924_v6, %v5244_v48  ;;  %12006 = vmatmul.mubr.msk.f32.gmra.mxu0 %vm365_vm1, %v6709_v11  ;;  %11955 = vmatprep.mubr.msk.f32.mxu1 %vm365_vm1, %v6710_v1  ;;  %v6712_v27 = vld [vmem:[#allocation2 + $0x90] sm:$0xff] }
 0x413   : > { %v5762_v22 = vmul.f32 %v16075_v37, %v5730_v7  ;;  %v12652_v15 = vpop.eup %12651  ;;  %6651 = vst.msk [vmem:[#allocation2 + $0xc1] sm:$0xff] %vm365_vm1, %v6619_v34  ;;  %v6302_v49 = vadd.f32 0.2548296, %v6270_v26  ;;  %v5623_v12 = vrot.slane %v5622_v8, 1  ;;  %v16308_v40 = vsub.f32 %v16134_v33, %v5449_v53  ;;  %12008 = vmatprep.mubr.msk.f32.mxu0 %vm365_vm1, %v6710_v1 }
 0x414   : > { %v16305_v9 = vadd.f32 %v16083_v39, %v5761_v32  ;;  %v12654_v61 = vpop.eup %12653  ;;  %6652 = vst.msk [vmem:[#allocation2 + $0xc9] sm:$0xff] %vm365_vm1, %v6620_v36  ;;  %v6333_v6 = vmul.f32 %v16239_v46, %v6301_v51  ;;  %v6449_v48 = vmul.f32 1.442695, %v6399_v10  ;;  %v5411_v31 = vsel %vm365_vm1, %v16265_v47, 0.0  ;;  %v6711_v46 = vld [vmem:[#allocation2 + $0x80] sm:$0xff]  ;;  %v6713_v32 = vld [vmem:[#allocation2 + $0x98] sm:$0xff] }
 0x415   : > { %v16313_v29 = vadd.f32 %v16091_v50, %v5762_v22  ;;  %v6334_v58 = vmul.f32 %v16251_v54, %v6302_v49  ;;  %v6451_v5 = vmul.f32 1.442695, %v6400_v3  ;;  %v5624_v62 = vadd.f32 %v5623_v12, %v5622_v8  ;;  %11956 = vmatmul.mubr.msk.f32.gmra.mxu1 %vm365_vm1, %v6711_v46 }
 0x416   : > { %v16320_v33 = vmul.f32 0.70710677, %v16305_v9  ;;  %v6493_v4 = vmul.f32 %v12652_v15, %v6333_v6  ;;  %v16327_v44 = vsub.f32 %v16131_v18, %v5449_v53  ;;  %v16330_v14 = vadd.f32 %v11937_v57, %v15906_v25  ;;  %v5199_v53 = vpop.f32.mrf.mxu0  ;;  %12009 = vmatmul.mubr.msk.f32.gmra.mxu0 %vm365_vm1, %v6711_v46  ;;  %11958 = vmatprep.mubr.msk.f32.mxu1 %vm365_vm1, %v6712_v27 }
 0x417   : > { %v16324_v56 = vmul.f32 0.70710677, %v16313_v29  ;;  %v6494_v54 = vmul.f32 %v12654_v61, %v6334_v58  ;;  %v5509_v43 = vmul.f32 %v16308_v40, %v16308_v40  ;;  %v5410_v21 = vsel %vm365_vm1, %v16299_v59, 0.0  ;;  %12011 = vmatprep.mubr.msk.f32.mxu0 %vm365_vm1, %v6712_v27  ;;  %v6715_v58 = vld [vmem:[#allocation2 + $0xb0] sm:$0xff] }
 0x418   : > { %v5953_v0 = vand.u32 2147483647, %v16320_v33  ;;  %v6525_v17 = vsub.f32 1.0, %v6493_v4  ;;  %v16340_v18 = vmul.f32 0.5, %v16228_v35  ;;  %12659 = vpow2.f32 %v6449_v48  ;;  %v11940_v12 = vpop.f32.mrf.mxu0 }
 0x419   : > { %v16343_v25 = vand.u32 2147483647, %v16324_v56  ;;  %v6526_v10 = vsub.f32 1.0, %v6494_v54  ;;  %12661 = vpow2.f32 %v6451_v5  ;;  %v5672_v52 = vmul.f32 0.0625, %v5624_v62  ;;  %11959 = vmatmul.mubr.msk.f32.gmra.mxu1 %vm365_vm1, %v6713_v32 }
 0x41a   : > { %v5985_v41 = vmul.f32 0.3275911, %v5953_v0  ;;  %v6557_v7 = vmul.f32 %v6525_v17, %v16245_v24  ;;  %v5510_v34 = vmul.f32 %v16327_v44, %v16327_v44  ;;  %v5412_v26 = vadd.f32 %v5411_v31, %v5410_v21  ;;  %12012 = vmatmul.mubr.msk.f32.gmra.mxu0 %vm365_vm1, %v6713_v32  ;;  %v5209_v21 = vpop.f32.mrf.mxu0  ;;  %v12739_v17 = vld [vmem:[%s18130_s4] ss:$0 sm:$0xff] }
 0x41b   : > { %v16347_v3 = vpop.eup %12655  ;;  %v5986_v35 = vmul.f32 0.3275911, %v16343_v25  ;;  %v6558_v16 = vmul.f32 %v6526_v10, %v16257_v60  ;;  %v5625_v24 = vsel %vm365_vm1, %v5509_v43, 0.0  ;;  %v6369_v49 = vsub.f32 0.0, %v5953_v0  ;;  %v6714_v60 = vld [vmem:[#allocation2 + $0xa8] sm:$0xff] }
 0x41c   : > { %v16355_v8 = vpop.eup %12657  ;;  %v6079_v11 = vmul.f32 1.0614054, %v16347_v3  ;;  %v6017_v36 = vadd.f32 1.0, %v5985_v41  ;;  %v6589_v51 = vadd.f32 1.0, %v6557_v7  ;;  %v5688_v6 = vadd.f32 1e-05, %v5672_v52  ;;  %11961 = vmatprep.mubr.msk.f32.mxu1 %vm365_vm1, %v6714_v60  ;;  %12014 = vmatprep.mubr.msk.f32.mxu0 %vm365_vm1, %v6714_v60 }
 0x41d   : > { %v6080_v22 = vmul.f32 1.0614054, %v16355_v8  ;;  %v6018_v15 = vadd.f32 1.0, %v5986_v35  ;;  %v6590_v57 = vadd.f32 1.0, %v6558_v16  ;;  %vm5887_vm11 = vcmp.ge.f32.partialorder %v16248_v20, 0.0  ;;  %11962 = vmatmul.mubr.msk.f32.gmra.mxu1 %vm365_vm1, %v6715_v58  ;;  %v6717_v52 = vld [vmem:[#allocation2 + $0xc8] sm:$0xff] }
 0x41e   : > { %v6111_v61 = vadd.f32 -1.4531521, %v6079_v11  ;;  %12663 = vrcp.f32 %v6017_v36  ;;  %v6621_v48 = vmul.f32 %v6589_v51, %v16199_v38  ;;  %v6370_v1 = vsub.f32 0.0, %v16343_v25  ;;  %12015 = vmatmul.mubr.msk.f32.gmra.mxu0 %vm365_vm1, %v6715_v58 }
 0x41f   : > { %v6112_v31 = vadd.f32 -1.4531521, %v6080_v22  ;;  %12665 = vrcp.f32 %v6018_v15  ;;  %v6622_v5 = vmul.f32 %v6590_v57, %v16235_v63  ;;  %v5626_v46 = vsel %vm365_vm1, %v5510_v34, 0.0 }
 0x420   : > { %v6143_v62 = vmul.f32 %v16347_v3, %v6111_v61  ;;  %6653 = vst.msk [vmem:[#allocation2 + $0xd9] sm:$0xff] %vm365_vm1, %v6621_v48  ;;  %vm5888_vm12 = vcmp.ge.f32.partialorder %v16261_v13, 0.0  ;;  %v6401_v4 = vmul.f32 %v6369_v49, %v5953_v0  ;;  %v5627_v54 = vadd.f32 %v5626_v46, %v5625_v24  ;;  %v6716_v0 = vld [vmem:[#allocation2 + $0xc0] sm:$0xff] }
 0x421   : > { %v6144_v38 = vmul.f32 %v16355_v8, %v6112_v31  ;;  %v5413_v43 = vrot.slane %v5412_v26, 4  ;;  %6654 = vst.msk [vmem:[#allocation2 + $0xe1] sm:$0xff] %vm365_vm1, %v6622_v5  ;;  %12667 = vrsqrt.f32 %v5688_v6  ;;  %v16380_v10 = vadd.f32 %v12739_v17, %v16330_v14  ;;  %11964 = vmatprep.mubr.msk.f32.mxu1 %vm365_vm1, %v6716_v0  ;;  %12017 = vmatprep.mubr.msk.f32.mxu0 %vm365_vm1, %v6716_v0 }
 0x422   : > { %v6175_v63 = vadd.f32 1.4214138, %v6143_v62  ;;  %v5246_v41 = vadd.f32 %v5199_v53, %v15915_v42  ;;  %v5628_v7 = vrot.slane %v5627_v54, 4  ;;  %v5249_v34 = vadd.f32 %v11940_v12, %v16154_v2  ;;  %11965 = vmatmul.mubr.msk.f32.gmra.mxu1 %vm365_vm1, %v6717_v52  ;;  %12018 = vmatmul.mubr.msk.f32.gmra.mxu0 %vm365_vm1, %v6717_v52 }
 0x423   : > { %v6176_v27 = vadd.f32 1.4214138, %v6144_v38  ;;  %v5414_v35 = vadd.f32 %v5413_v43, %v5412_v26  ;;  %v6402_v14 = vmul.f32 %v6370_v1, %v16343_v25  ;;  %v5248_v42 = vadd.f32 %v5209_v21, %v16161_v23 }
 0x424   : > { %v6207_v32 = vmul.f32 %v16347_v3, %v6175_v63  ;;  %v16389_v16 = vadd.f32 %v12739_v17, %v5246_v41  ;;  %v5629_v11 = vadd.f32 %v5628_v7, %v5627_v54  ;;  %v16393_v24 = vadd.f32 %v12739_v17, %v5249_v34 }
 0x425   : > { %v6208_v53 = vmul.f32 %v16355_v8, %v6176_v27  ;;  %v5415_v36 = vrot.slane %v5414_v35, 2  ;;  %v12660_v2 = vpop.eup %12659  ;;  %v5420_v51 = vsel %vm365_vm1, %v16380_v10, 0.0  ;;  %v16400_v22 = vadd.f32 %v12739_v17, %v5248_v42 }
 0x426   : > { %v6239_v26 = vadd.f32 -0.28449672, %v6207_v32  ;;  %v5419_v25 = vsel %vm365_vm1, %v16389_v16, 0.0  ;;  %v12662_v23 = vpop.eup %12661  ;;  %v5630_v49 = vrot.slane %v5629_v11, 2  ;;  %v6453_v6 = vmul.f32 1.442695, %v6401_v4 }
 0x427   : > { %v6240_v15 = vadd.f32 -0.28449672, %v6208_v53  ;;  %v5416_v12 = vadd.f32 %v5415_v36, %v5414_v35  ;;  %v5421_v57 = vadd.f32 %v5420_v51, %v5419_v25  ;;  %v5429_v60 = vsel %vm365_vm1, %v16393_v24, 0.0  ;;  %v6718_v31 = vld [vmem:[#allocation2 + $0xd8] sm:$0xff] }
 0x428   : > { %v6271_v61 = vmul.f32 %v16347_v3, %v6239_v26  ;;  %v5428_v48 = vsel %vm365_vm1, %v16400_v22, 0.0  ;;  %v5631_v5 = vadd.f32 %v5630_v49, %v5629_v11  ;;  %11967 = vmatprep.mubr.msk.f32.mxu1 %vm365_vm1, %v6718_v31  ;;  %12020 = vmatprep.mubr.msk.f32.mxu0 %vm365_vm1, %v6718_v31  ;;  %v6719_v46 = vld [vmem:[#allocation2 + $0xe0] sm:$0xff]  ;;  %v5919_v38 = vsel %vm5887_vm11, 1.0, %v18399_v30 }
 0x429   : > { %v6272_v58 = vmul.f32 %v16355_v8, %v6240_v15  ;;  %v5417_v62 = vrot.slane %v5416_v12, 1  ;;  %v5422_v1 = vrot.slane %v5421_v57, 4  ;;  %v6455_v54 = vmul.f32 1.442695, %v6402_v14  ;;  %11968 = vmatmul.mubr.msk.f32.gmra.mxu1 %vm365_vm1, %v6719_v46  ;;  %12021 = vmatmul.mubr.msk.f32.gmra.mxu0 %vm365_vm1, %v6719_v46 }
 0x42a   : > { %v6303_v4 = vadd.f32 0.2548296, %v6271_v61  ;;  %v16414_v43 = vadd.f32 %v5429_v60, %v5428_v48  ;;  %v5632_v17 = vrot.slane %v5631_v5, 1  ;;  %v5920_v20 = vsel %vm5888_vm12, 1.0, %v18399_v30 }
 0x42b   : > { %v16418_v21 = vpop.eup %12663  ;;  %v6304_v63 = vadd.f32 0.2548296, %v6272_v58  ;;  %v5418_v41 = vadd.f32 %v5417_v62, %v5416_v12  ;;  %v5423_v0 = vadd.f32 %v5422_v1, %v5421_v57  ;;  %12669 = vpow2.f32 %v6453_v6 }
 0x42c   : > { %v16420_v52 = vpop.eup %12665  ;;  %v6335_v27 = vmul.f32 %v16347_v3, %v6303_v4  ;;  %v6081_v7 = vmul.f32 1.0614054, %v16418_v21  ;;  %v5633_v32 = vadd.f32 %v5632_v17, %v5631_v5  ;;  %12671 = vpow2.f32 %v6455_v54 }
 0x42d   : > { %v6336_v35 = vmul.f32 %v16355_v8, %v6304_v63  ;;  %v6082_v34 = vmul.f32 1.0614054, %v16420_v52  ;;  %v5450_v14 = vmul.f32 0.0625, %v5418_v41  ;;  %v5424_v11 = vrot.slane %v5423_v0, 2 }
 0x42e   : > { %v6495_v42 = vmul.f32 %v12660_v2, %v6335_v27  ;;  %v6113_v53 = vadd.f32 -1.4531521, %v6081_v7  ;;  %v12668_v36 = vpop.eup %12667  ;;  %v5673_v13 = vmul.f32 0.0625, %v5633_v32  ;;  %v5824_v62 = vmul.f32 0.5, %v16231_v28 }
 0x42f   : > { %v6496_v26 = vmul.f32 %v12662_v23, %v6336_v35  ;;  %v6114_v51 = vadd.f32 -1.4531521, %v6082_v34  ;;  %v16430_v25 = vsub.f32 %v16299_v59, %v5450_v14  ;;  %v5731_v8 = vmul.f32 %v12668_v36, %v16202_v19 }
 0x430   : > { %v6527_v3 = vsub.f32 1.0, %v6495_v42  ;;  %v6145_v15 = vmul.f32 %v16418_v21, %v6113_v53  ;;  %v5732_v49 = vmul.f32 %v12668_v36, %v16205_v55  ;;  %v5689_v57 = vadd.f32 1e-05, %v5673_v13 }
 0x431   : > { %v6528_v12 = vsub.f32 1.0, %v6496_v26  ;;  %v6146_v2 = vmul.f32 %v16420_v52, %v6114_v51  ;;  %v16437_v61 = vsub.f32 %v16265_v47, %v5450_v14  ;;  %v5763_v60 = vmul.f32 %v16069_v45, %v5731_v8  ;;  %v10654_v51 = vld [vmem:[%s18133_s7 + $0x8] sm:$0xf] }
 0x432   : > { %v6559_v23 = vmul.f32 %v6527_v3, %v5919_v38  ;;  %v6177_v6 = vadd.f32 1.4214138, %v6145_v15  ;;  %v5764_v59 = vmul.f32 %v16075_v37, %v5732_v49  ;;  %12673 = vrsqrt.f32 %v5689_v57  ;;  %12041 = vmatprep.subr.msk.mxu1 %vm1966_vm0, %v10654_v51 }
 0x433   : > { %v6560_v48 = vmul.f32 %v6528_v12, %v5920_v20  ;;  %v6178_v31 = vadd.f32 1.4214138, %v6146_v2  ;;  %v5511_v19 = vmul.f32 %v16430_v25, %v16430_v25  ;;  %v16445_v5 = vadd.f32 %v16083_v39, %v5763_v60  ;;  %12042 = vmatpush3.msk.msra.mxu1 %vm1966_vm0, %v10654_v51 }
 0x434   : > { %v6591_v55 = vadd.f32 1.0, %v6559_v23  ;;  %v6209_v58 = vmul.f32 %v16418_v21, %v6177_v6  ;;  %v16448_v47 = vadd.f32 %v16091_v50, %v5764_v59  ;;  %v5512_v1 = vmul.f32 %v16437_v61, %v16437_v61 }
 0x435   : > { %v6592_v45 = vadd.f32 1.0, %v6560_v48  ;;  %v6210_v37 = vmul.f32 %v16420_v52, %v6178_v31  ;;  %v5431_v4 = vrot.slane %v16414_v43, 4  ;;  %v16457_v39 = vmul.f32 0.70710677, %v16445_v5 }
 0x436   : > { %v6623_v46 = vmul.f32 %v6591_v55, %v16340_v18  ;;  %v6241_v38 = vadd.f32 -0.28449672, %v6209_v58  ;;  %v16460_v50 = vmul.f32 0.70710677, %v16448_v47  ;;  %v5634_v17 = vsel %vm365_vm1, %v5511_v19, 0.0 }
 0x437   : > { %v6624_v54 = vmul.f32 %v6592_v45, %v5824_v62  ;;  %v6242_v63 = vadd.f32 -0.28449672, %v6210_v37  ;;  %v5635_v41 = vsel %vm365_vm1, %v5512_v1, 0.0  ;;  %v5425_v18 = vadd.f32 %v5424_v11, %v5423_v0 }
 0x438   : > { %6655 = vst.msk [vmem:[#allocation2 + $0xf1] sm:$0xff] %vm365_vm1, %v6623_v46  ;;  %v6273_v28 = vmul.f32 %v16418_v21, %v6241_v38  ;;  %v12670_v20 = vpop.eup %12669  ;;  %v16469_v7 = vand.u32 2147483647, %v16457_v39  ;;  %v16472_v35 = vmul.f32 0.5, %v16305_v9  ;;  %vm5889_vm13 = vcmp.ge.f32.partialorder %v16320_v33, 0.0  ;;  %v16515_v46 = vld [vmem:[%s18131_s5] sm:$0xff] }
 0x439   : > { %6656 = vst.msk [vmem:[#allocation2 + $0xf9] sm:$0xff] %vm365_vm1, %v6624_v54  ;;  %v6274_v27 = vmul.f32 %v16420_v52, %v6242_v63  ;;  %v16476_v32 = vand.u32 2147483647, %v16460_v50  ;;  %v12672_v14 = vpop.eup %12671  ;;  %vm5890_vm14 = vcmp.ge.f32.partialorder %v16324_v56, 0.0  ;;  %v5636_v53 = vadd.f32 %v5635_v41, %v5634_v17 }
 0x43a   : > { %v6305_v34 = vadd.f32 0.2548296, %v6273_v28  ;;  %v5987_v42 = vmul.f32 0.3275911, %v16469_v7  ;;  %v5426_v26 = vrot.slane %v5425_v18, 1  ;;  %v5432_v9 = vadd.f32 %v5431_v4, %v16414_v43 }
 0x43b   : > { %v6306_v0 = vadd.f32 0.2548296, %v6274_v27  ;;  %v5988_v36 = vmul.f32 0.3275911, %v16476_v32  ;;  %v5826_v13 = vmul.f32 0.5, %v16313_v29  ;;  %v5637_v8 = vrot.slane %v5636_v53, 4 }
 0x43c   : > { %v6337_v11 = vmul.f32 %v16418_v21, %v6305_v34  ;;  %v6019_v15 = vadd.f32 1.0, %v5987_v42  ;;  %v10688_v21 = vld [vmem:[%s18133_s7 + $0xc] sm:$0xf]  ;;  %v5921_v43 = vsel %vm5889_vm13, 1.0, %v18399_v30  ;;  %v5427_v2 = vadd.f32 %v5426_v26, %v5425_v18 }
 0x43d   : > { %v6338_v3 = vmul.f32 %v16420_v52, %v6306_v0  ;;  %v6020_v12 = vadd.f32 1.0, %v5988_v36  ;;  %12091 = vmatprep.subr.msk.mxu0 %vm1966_vm0, %v10688_v21  ;;  %v5922_v29 = vsel %vm5890_vm14, 1.0, %v18399_v30  ;;  %v5638_v57 = vadd.f32 %v5637_v8, %v5636_v53 }
 0x43e   : > { %v6497_v49 = vmul.f32 %v12670_v20, %v6337_v11  ;;  %12675 = vrcp.f32 %v6019_v15  ;;  %12092 = vmatpush3.msk.msra.mxu0 %vm1966_vm0, %v10688_v21  ;;  %v5451_v60 = vmul.f32 0.0625, %v5427_v2  ;;  %v5433_v59 = vrot.slane %v5432_v9, 2  ;;  %v16547_v20 = vld [vmem:[%s18132_s6 + $0x8] sm:$0xff] }
 0x43f   : > { %v6498_v52 = vmul.f32 %v12672_v14, %v6338_v3  ;;  %v6720_v23 = vld [vmem:[#allocation2 + $0xf0] sm:$0xff]  ;;  %v12674_v6 = vpop.eup %12673  ;;  %12677 = vrcp.f32 %v6020_v12  ;;  %v6371_v56 = vsub.f32 0.0, %v16469_v7  ;;  %v6372_v62 = vsub.f32 0.0, %v16476_v32 }
 0x440   : > { %v6529_v33 = vsub.f32 1.0, %v6497_v49  ;;  %11970 = vmatprep.mubr.msk.f32.mxu1 %vm365_vm1, %v6720_v23  ;;  %12023 = vmatprep.mubr.msk.f32.mxu0 %vm365_vm1, %v6720_v23  ;;  %v6721_v48 = vld [vmem:[#allocation2 + $0xf8] sm:$0xff]  ;;  %v5733_v19 = vmul.f32 %v12674_v6, %v16308_v40  ;;  %v5734_v55 = vmul.f32 %v12674_v6, %v16327_v44  ;;  %v5639_v45 = vrot.slane %v5638_v57, 2  ;;  %v16521_v44 = vld [vmem:[%s18131_s5 + $0x8] sm:$0xff] }
 0x441   : > { %v6530_v31 = vsub.f32 1.0, %v6498_v52  ;;  %11971 = vmatmul.mubr.msk.f32.gmra.mxu1 %vm365_vm1, %v6721_v48  ;;  %12024 = vmatmul.mubr.msk.f32.gmra.mxu0 %vm365_vm1, %v6721_v48  ;;  %v16510_v37 = vsub.f32 %v16389_v16, %v5451_v60  ;;  %v16525_v4 = vsub.f32 %v16380_v10, %v5451_v60  ;;  %v16530_v16 = vld [vmem:[%s18133_s7 + $0x10] sm:$0xf]  ;;  %v5434_v17 = vadd.f32 %v5433_v59, %v5432_v9  ;;  %v16539_v10 = vld [vmem:[%s18132_s6] sm:$0xff] }
 0x442   : > { %v6561_v58 = vmul.f32 %v6529_v33, %v5921_v43  ;;  %v5765_v40 = vmul.f32 %v16515_v46, %v5733_v19  ;;  %v5766_v38 = vmul.f32 %v16521_v44, %v5734_v55  ;;  %v5640_v63 = vadd.f32 %v5639_v45, %v5638_v57  ;;  %12141 = vmatprep.subr.msk.mxu1 %vm1966_vm0, %v16530_v16 }
 0x443   : > { %v6562_v1 = vmul.f32 %v6530_v31, %v5922_v29  ;;  %v5513_v28 = vmul.f32 %v16510_v37, %v16510_v37  ;;  %v5514_v34 = vmul.f32 %v16525_v4, %v16525_v4  ;;  %v5435_v53 = vrot.slane %v5434_v17, 1 }
 0x444   : > { %v6593_v54 = vadd.f32 1.0, %v6561_v58  ;;  %v16542_v18 = vadd.f32 %v16539_v10, %v5765_v40  ;;  %v16550_v27 = vadd.f32 %v16547_v20, %v5766_v38  ;;  %v5641_v0 = vrot.slane %v5640_v63, 1 }
 0x445   : > { %v6594_v41 = vadd.f32 1.0, %v6562_v1  ;;  %v5643_v42 = vsel %vm365_vm1, %v5513_v28, 0.0  ;;  %v5644_v51 = vsel %vm365_vm1, %v5514_v34, 0.0  ;;  %v5436_v3 = vadd.f32 %v5435_v53, %v5434_v17 }
 0x446   : > { %v6625_v14 = vmul.f32 %v6593_v54, %v16472_v35  ;;  %v16557_v36 = vmul.f32 0.70710677, %v16542_v18  ;;  %v16561_v26 = vmul.f32 0.70710677, %v16550_v27  ;;  %v5642_v9 = vadd.f32 %v5641_v0, %v5640_v63 }
 0x447   : > { %v6626_v11 = vmul.f32 %v6594_v41, %v5826_v13  ;;  %v6403_v35 = vmul.f32 %v6371_v56, %v16469_v7  ;;  %v5645_v8 = vadd.f32 %v5644_v51, %v5643_v42  ;;  %v6404_v13 = vmul.f32 %v6372_v62, %v16476_v32 }
 0x448   : > { %6657 = vst.msk [vmem:[#allocation2 + $0x109] sm:$0xff] %vm365_vm1, %v6625_v14  ;;  %v5957_v15 = vand.u32 2147483647, %v16557_v36  ;;  %v5958_v21 = vand.u32 2147483647, %v16561_v26  ;;  %v5674_v43 = vmul.f32 0.0625, %v5642_v9 }
 0x449   : > { %6658 = vst.msk [vmem:[#allocation2 + $0x111] sm:$0xff] %vm365_vm1, %v6626_v11  ;;  %v5646_v12 = vrot.slane %v5645_v8, 4  ;;  %v5452_v57 = vmul.f32 0.0625, %v5436_v3  ;;  %v6457_v7 = vmul.f32 1.442695, %v6403_v35  ;;  %vm5891_vm15 = vcmp.ge.f32.partialorder %v16457_v39, 0.0 }
 0x44a   : > { %v5989_v49 = vmul.f32 0.3275911, %v5957_v15  ;;  %v5990_v29 = vmul.f32 0.3275911, %v5958_v21  ;;  %v5690_v52 = vadd.f32 1e-05, %v5674_v43 }
 0x44b   : > { %v16569_v2 = vpop.eup %12675  ;;  %v5647_v60 = vadd.f32 %v5646_v12, %v5645_v8  ;;  %v6459_v32 = vmul.f32 1.442695, %v6404_v13  ;;  %v16578_v58 = vsub.f32 %v16400_v22, %v5452_v57  ;;  %v16588_v40 = vsub.f32 %v16393_v24, %v5452_v57 }
 0x44c   : > { %v16571_v23 = vpop.eup %12677  ;;  %v6083_v6 = vmul.f32 1.0614054, %v16569_v2  ;;  %v6021_v33 = vadd.f32 1.0, %v5989_v49  ;;  %v6022_v48 = vadd.f32 1.0, %v5990_v29  ;;  %12679 = vrsqrt.f32 %v5690_v52 }
 0x44d   : > { %v6084_v59 = vmul.f32 1.0614054, %v16571_v23  ;;  %v5648_v56 = vrot.slane %v5647_v60, 2  ;;  %v5515_v38 = vmul.f32 %v16578_v58, %v16578_v58  ;;  %v5516_v28 = vmul.f32 %v16588_v40, %v16588_v40 }
 0x44e   : > { %v6115_v31 = vadd.f32 -1.4531521, %v6083_v6  ;;  %12681 = vrcp.f32 %v6021_v33  ;;  %v6373_v24 = vsub.f32 0.0, %v5957_v15  ;;  %v6374_v14 = vsub.f32 0.0, %v5958_v21 }
 0x44f   : > { %v16575_v19 = vld [vmem:[#allocation2 + $0x108] sm:$0xff]  ;;  %v6116_v55 = vadd.f32 -1.4531521, %v6084_v59  ;;  %12683 = vrcp.f32 %v6022_v48  ;;  %v5649_v1 = vadd.f32 %v5648_v56, %v5647_v60  ;;  %v5652_v41 = vsel %vm365_vm1, %v5515_v38, 0.0 }
 0x450   : > { %11973 = vmatprep.mubr.msk.f32.mxu1 %vm365_vm1, %v16575_v19  ;;  %12026 = vmatprep.mubr.msk.f32.mxu0 %vm365_vm1, %v16575_v19  ;;  %v16584_v62 = vld [vmem:[#allocation2 + $0x110] sm:$0xff]  ;;  %v6147_v45 = vmul.f32 %v16569_v2, %v6115_v31  ;;  %12685 = vpow2.f32 %v6457_v7  ;;  %v5653_v42 = vsel %vm365_vm1, %v5516_v28, 0.0  ;;  %v6405_v13 = vmul.f32 %v6373_v24, %v5957_v15 }
 0x451   : > { %11974 = vmatmul.mubr.msk.f32.gmra.mxu1 %vm365_vm1, %v16584_v62  ;;  %12027 = vmatmul.mubr.msk.f32.gmra.mxu0 %vm365_vm1, %v16584_v62  ;;  %v6148_v22 = vmul.f32 %v16571_v23, %v6116_v55  ;;  %12687 = vpow2.f32 %v6459_v32  ;;  %v5650_v63 = vrot.slane %v5649_v1, 1  ;;  %v5654_v11 = vadd.f32 %v5653_v42, %v5652_v41 }
 0x452   : > { %v6179_v54 = vadd.f32 1.4214138, %v6147_v45  ;;  %v6406_v43 = vmul.f32 %v6374_v14, %v5958_v21  ;;  %vm5892_vm2 = vcmp.ge.f32.partialorder %v16460_v50, 0.0  ;;  %v6461_v48 = vmul.f32 1.442695, %v6405_v13 }
 0x453   : > { %v6180_v17 = vadd.f32 1.4214138, %v6148_v22  ;;  %v5651_v0 = vadd.f32 %v5650_v63, %v5649_v1  ;;  %v5655_v35 = vrot.slane %v5654_v11, 4  ;;  %v5924_v39 = vsel %vm5892_vm2, 1.0, %v18399_v30 }
 0x454   : > { %v6211_v34 = vmul.f32 %v16569_v2, %v6179_v54  ;;  %v6463_v31 = vmul.f32 1.442695, %v6406_v43  ;;  %v5828_v43 = vmul.f32 0.5, %v16448_v47  ;;  %vm5893_vm3 = vcmp.ge.f32.partialorder %v16557_v36, 0.0 }
 0x455   : > { %v6212_v53 = vmul.f32 %v16571_v23, %v6180_v17  ;;  %v5675_v51 = vmul.f32 0.0625, %v5651_v0  ;;  %v5656_v29 = vadd.f32 %v5655_v35, %v5654_v11  ;;  %v5827_v35 = vmul.f32 0.5, %v16445_v5 }
 0x456   : > { %v6243_v9 = vadd.f32 -0.28449672, %v6211_v34  ;;  %vm5894_vm4 = vcmp.ge.f32.partialorder %v16561_v26, 0.0 }
 0x457   : > { %v6244_v3 = vadd.f32 -0.28449672, %v6212_v53  ;;  %v5691_v49 = vadd.f32 1e-05, %v5675_v51  ;;  %v5657_v15 = vrot.slane %v5656_v29, 2 }
 0x458   : > { %v6275_v8 = vmul.f32 %v16569_v2, %v6243_v9 }
 0x459   : > { %v6276_v12 = vmul.f32 %v16571_v23, %v6244_v3  ;;  %v12680_v52 = vpop.eup %12679  ;;  %12689 = vrsqrt.f32 %v5691_v49  ;;  %v5658_v54 = vadd.f32 %v5657_v15, %v5656_v29 }
 0x45a   : > { %v6307_v57 = vadd.f32 0.2548296, %v6275_v8  ;;  %v5735_v33 = vmul.f32 %v12680_v52, %v16430_v25  ;;  %v5736_v60 = vmul.f32 %v12680_v52, %v16437_v61  ;;  %v5923_v61 = vsel %vm5891_vm15, 1.0, %v18399_v30 }
 0x45b   : > { %v16607_v6 = vpop.eup %12681  ;;  %v6308_v7 = vadd.f32 0.2548296, %v6276_v12  ;;  %12691 = vpow2.f32 %v6461_v48  ;;  %v5659_v34 = vrot.slane %v5658_v54, 1 }
 0x45c   : > { %v16611_v21 = vpop.eup %12683  ;;  %v6339_v59 = vmul.f32 %v16569_v2, %v6307_v57  ;;  %v6085_v32 = vmul.f32 1.0614054, %v16607_v6  ;;  %v5767_v1 = vmul.f32 %v16515_v46, %v5735_v33  ;;  %v5768_v25 = vmul.f32 %v16521_v44, %v5736_v60 }
 0x45d   : > { %v12686_v56 = vpop.eup %12685  ;;  %v6340_v55 = vmul.f32 %v16571_v23, %v6308_v7  ;;  %v6086_v45 = vmul.f32 1.0614054, %v16611_v21  ;;  %12693 = vpow2.f32 %v6463_v31  ;;  %v5660_v13 = vadd.f32 %v5659_v34, %v5658_v54 }
 0x45e   : > { %v12688_v22 = vpop.eup %12687  ;;  %v6499_v38 = vmul.f32 %v12686_v56, %v6339_v59  ;;  %v6117_v2 = vadd.f32 -1.4531521, %v6085_v32  ;;  %v16623_v17 = vadd.f32 %v16539_v10, %v5767_v1  ;;  %v16626_v23 = vadd.f32 %v16547_v20, %v5768_v25 }
 0x45f   : > { %v6500_v63 = vmul.f32 %v12688_v22, %v6340_v55  ;;  %v6118_v28 = vadd.f32 -1.4531521, %v6086_v45  ;;  %v5676_v48 = vmul.f32 0.0625, %v5660_v13 }
 0x460   : > { %v6531_v24 = vsub.f32 1.0, %v6499_v38  ;;  %v6149_v41 = vmul.f32 %v16607_v6, %v6117_v2  ;;  %v16634_v11 = vmul.f32 0.70710677, %v16623_v17  ;;  %v16637_v9 = vmul.f32 0.70710677, %v16626_v23 }
 0x461   : > { %v6532_v14 = vsub.f32 1.0, %v6500_v63  ;;  %v6150_v0 = vmul.f32 %v16611_v21, %v6118_v28  ;;  %v5692_v2 = vadd.f32 1e-05, %v5676_v48 }
 0x462   : > { %v6563_v42 = vmul.f32 %v6531_v24, %v5923_v61  ;;  %v6181_v53 = vadd.f32 1.4214138, %v6149_v41  ;;  %v5959_v57 = vand.u32 2147483647, %v16634_v11  ;;  %v5960_v7 = vand.u32 2147483647, %v16637_v9 }
 0x463   : > { %v6564_v51 = vmul.f32 %v6532_v14, %v5924_v39  ;;  %v6182_v3 = vadd.f32 1.4214138, %v6150_v0  ;;  %v5925_v14 = vsel %vm5893_vm3, 1.0, %v18399_v30  ;;  %vm5895_vm5 = vcmp.ge.f32.partialorder %v16634_v11, 0.0 }
 0x464   : > { %v6595_v8 = vadd.f32 1.0, %v6563_v42  ;;  %v6213_v50 = vmul.f32 %v16607_v6, %v6181_v53  ;;  %v5991_v59 = vmul.f32 0.3275911, %v5959_v57  ;;  %v5992_v32 = vmul.f32 0.3275911, %v5960_v7 }
 0x465   : > { %v6596_v49 = vadd.f32 1.0, %v6564_v51  ;;  %v6214_v12 = vmul.f32 %v16611_v21, %v6182_v3  ;;  %v6375_v42 = vsub.f32 0.0, %v5959_v57  ;;  %v5926_v51 = vsel %vm5894_vm4, 1.0, %v18399_v30 }
 0x466   : > { %v6627_v29 = vmul.f32 %v6595_v8, %v5827_v35  ;;  %v6245_v52 = vadd.f32 -0.28449672, %v6213_v50  ;;  %v12690_v33 = vpop.eup %12689  ;;  %v6023_v45 = vadd.f32 1.0, %v5991_v59  ;;  %v6024_v1 = vadd.f32 1.0, %v5992_v32 }
 0x467   : > { %v6628_v60 = vmul.f32 %v6596_v49, %v5828_v43  ;;  %v6246_v15 = vadd.f32 -0.28449672, %v6214_v12  ;;  %v5737_v31 = vmul.f32 %v12690_v33, %v16510_v37  ;;  %v5738_v56 = vmul.f32 %v12690_v33, %v16525_v4 }
 0x468   : > { %6659 = vst.msk [vmem:[#allocation2 + $0x121] sm:$0xff] %vm365_vm1, %v6627_v29  ;;  %v6277_v5 = vmul.f32 %v16607_v6, %v6245_v52  ;;  %12695 = vrcp.f32 %v6023_v45  ;;  %v12692_v54 = vpop.eup %12691  ;;  %v6376_v50 = vsub.f32 0.0, %v5960_v7  ;;  %v5829_v43 = vmul.f32 0.5, %v16542_v18 }
 0x469   : > { %6660 = vst.msk [vmem:[#allocation2 + $0x129] sm:$0xff] %vm365_vm1, %v6628_v60  ;;  %v6278_v47 = vmul.f32 %v16611_v21, %v6246_v15  ;;  %v5769_v22 = vmul.f32 %v16515_v46, %v5737_v31  ;;  %v5770_v61 = vmul.f32 %v16521_v44, %v5738_v56  ;;  %12697 = vrcp.f32 %v6024_v1 }
 0x46a   : > { %v6309_v55 = vadd.f32 0.2548296, %v6277_v5  ;;  %v12694_v4 = vpop.eup %12693  ;;  %12699 = vrsqrt.f32 %v5692_v2  ;;  %v5830_v29 = vmul.f32 0.5, %v16550_v27  ;;  %v6407_v33 = vmul.f32 %v6375_v42, %v5959_v57 }
 0x46b   : > { %v6310_v25 = vadd.f32 0.2548296, %v6278_v47  ;;  %v16656_v37 = vadd.f32 %v16539_v10, %v5769_v22  ;;  %v16660_v24 = vadd.f32 %v16547_v20, %v5770_v61  ;;  %v6408_v26 = vmul.f32 %v6376_v50, %v5960_v7  ;;  %v16694_v7 = vld [vmem:[%s18133_s7 + $0x14] sm:$0xf] }
 0x46c   : > { %v6341_v38 = vmul.f32 %v16607_v6, %v6309_v55  ;;  %v6465_v48 = vmul.f32 1.442695, %v6407_v33  ;;  %12191 = vmatprep.subr.msk.mxu0 %vm1966_vm0, %v16694_v7  ;;  %vm5896_vm6 = vcmp.ge.f32.partialorder %v16637_v9, 0.0  ;;  %v5831_v9 = vmul.f32 0.5, %v16623_v17 }
 0x46d   : > { %v6342_v63 = vmul.f32 %v16611_v21, %v6310_v25  ;;  %v16664_v6 = vmul.f32 0.70710677, %v16656_v37  ;;  %v16669_v39 = vmul.f32 0.70710677, %v16660_v24  ;;  %v6467_v56 = vmul.f32 1.442695, %v6408_v26 }
 0x46e   : > { %v6501_v28 = vmul.f32 %v12692_v54, %v6341_v38 }
 0x46f   : > { %v6502_v41 = vmul.f32 %v12694_v4, %v6342_v63  ;;  %v16666_v34 = vld [vmem:[#allocation2 + $0x120] sm:$0xff]  ;;  %v5961_v53 = vand.u32 2147483647, %v16664_v6  ;;  %v5962_v35 = vand.u32 2147483647, %v16669_v39  ;;  %vm5897_vm7 = vcmp.ge.f32.partialorder %v16664_v6, 0.0 }
 0x470   : > { %v6533_v21 = vsub.f32 1.0, %v6501_v28  ;;  %11976 = vmatprep.mubr.msk.f32.mxu1 %vm365_vm1, %v16666_v34  ;;  %12029 = vmatprep.mubr.msk.f32.mxu0 %vm365_vm1, %v16666_v34  ;;  %v16675_v36 = vld [vmem:[#allocation2 + $0x128] sm:$0xff]  ;;  %vm5898_vm8 = vcmp.ge.f32.partialorder %v16669_v39, 0.0 }
 0x471   : > { %v6534_v0 = vsub.f32 1.0, %v6502_v41  ;;  %11977 = vmatmul.mubr.msk.f32.gmra.mxu1 %vm365_vm1, %v16675_v36  ;;  %12030 = vmatmul.mubr.msk.f32.gmra.mxu0 %vm365_vm1, %v16675_v36  ;;  %v5993_v13 = vmul.f32 0.3275911, %v5961_v53  ;;  %v5994_v12 = vmul.f32 0.3275911, %v5962_v35  ;;  %v6377_v55 = vsub.f32 0.0, %v5961_v53 }
 0x472   : > { %v6565_v3 = vmul.f32 %v6533_v21, %v5925_v14  ;;  %v6378_v25 = vsub.f32 0.0, %v5962_v35 }
 0x473   : > { %v6566_v8 = vmul.f32 %v6534_v0, %v5926_v51  ;;  %v6025_v60 = vadd.f32 1.0, %v5993_v13  ;;  %v6026_v5 = vadd.f32 1.0, %v5994_v12  ;;  %v6409_v63 = vmul.f32 %v6377_v55, %v5961_v53 }
 0x474   : > { %v6597_v49 = vadd.f32 1.0, %v6565_v3  ;;  %v6410_v21 = vmul.f32 %v6378_v25, %v5962_v35 }
 0x475   : > { %v6598_v52 = vadd.f32 1.0, %v6566_v8  ;;  %12701 = vrcp.f32 %v6025_v60  ;;  %v12696_v32 = vpop.eup %12695  ;;  %v6469_v53 = vmul.f32 1.442695, %v6409_v63  ;;  %v5928_v63 = vsel %vm5896_vm6, 1.0, %v18399_v30 }
 0x476   : > { %v6629_v15 = vmul.f32 %v6597_v49, %v5829_v43  ;;  %12703 = vrcp.f32 %v6026_v5  ;;  %v12698_v18 = vpop.eup %12697  ;;  %v6087_v47 = vmul.f32 1.0614054, %v12696_v32 }
 0x477   : > { %v6630_v59 = vmul.f32 %v6598_v52, %v5830_v29  ;;  %v6088_v31 = vmul.f32 1.0614054, %v12698_v18  ;;  %v12700_v57 = vpop.eup %12699  ;;  %12705 = vpow2.f32 %v6465_v48 }
 0x478   : > { %6661 = vst.msk [vmem:[#allocation2 + $0x139] sm:$0xff] %vm365_vm1, %v6629_v15  ;;  %v6119_v27 = vadd.f32 -1.4531521, %v6087_v47  ;;  %v5739_v22 = vmul.f32 %v12700_v57, %v16578_v58  ;;  %v5740_v61 = vmul.f32 %v12700_v57, %v16588_v40  ;;  %12707 = vpow2.f32 %v6467_v56 }
 0x479   : > { %6662 = vst.msk [vmem:[#allocation2 + $0x141] sm:$0xff] %vm365_vm1, %v6630_v59  ;;  %v6120_v45 = vadd.f32 -1.4531521, %v6088_v31  ;;  %12709 = vpow2.f32 %v6469_v53 }
 0x47a   : > { %v6151_v1 = vmul.f32 %v12696_v32, %v6119_v27  ;;  %v5771_v4 = vmul.f32 %v16515_v46, %v5739_v22  ;;  %v5772_v28 = vmul.f32 %v16521_v44, %v5740_v61 }
 0x47b   : > { %v6152_v38 = vmul.f32 %v12698_v18, %v6120_v45 }
 0x47c   : > { %v6183_v54 = vadd.f32 1.4214138, %v6151_v1  ;;  %v16715_v46 = vadd.f32 %v16539_v10, %v5771_v4  ;;  %v16718_v44 = vadd.f32 %v16547_v20, %v5772_v28  ;;  %v6471_v10 = vmul.f32 1.442695, %v6410_v21 }
 0x47d   : > { %v6184_v40 = vadd.f32 1.4214138, %v6152_v38 }
 0x47e   : > { %v6215_v41 = vmul.f32 %v12696_v32, %v6183_v54  ;;  %v16721_v51 = vmul.f32 0.70710677, %v16715_v46  ;;  %v16724_v13 = vmul.f32 0.70710677, %v16718_v44  ;;  %12711 = vpow2.f32 %v6471_v10 }
 0x47f   : > { %v16700_v2 = vld [vmem:[#allocation2 + $0x138] sm:$0xff]  ;;  %v6216_v14 = vmul.f32 %v12698_v18, %v6184_v40 }
 0x480   : > { %11979 = vmatprep.mubr.msk.f32.mxu1 %vm365_vm1, %v16700_v2  ;;  %12032 = vmatprep.mubr.msk.f32.mxu0 %vm365_vm1, %v16700_v2  ;;  %v16708_v58 = vld [vmem:[#allocation2 + $0x140] sm:$0xff]  ;;  %v6247_v42 = vadd.f32 -0.28449672, %v6215_v41  ;;  %v5963_v49 = vand.u32 2147483647, %v16721_v51  ;;  %vm5899_vm9 = vcmp.ge.f32.partialorder %v16721_v51, 0.0 }
 0x481   : > { %11980 = vmatmul.mubr.msk.f32.gmra.mxu1 %vm365_vm1, %v16708_v58  ;;  %12033 = vmatmul.mubr.msk.f32.gmra.mxu0 %vm365_vm1, %v16708_v58  ;;  %v6248_v8 = vadd.f32 -0.28449672, %v6216_v14  ;;  %v5964_v15 = vand.u32 2147483647, %v16724_v13  ;;  %v5832_v14 = vmul.f32 0.5, %v16626_v23  ;;  %vm5900_vm10 = vcmp.ge.f32.partialorder %v16724_v13, 0.0 }
 0x482   : > { %v12702_v0 = vpop.eup %12701  ;;  %v6279_v35 = vmul.f32 %v12696_v32, %v6247_v42  ;;  %v5995_v5 = vmul.f32 0.3275911, %v5963_v49  ;;  %v16784_v13 = vld [vmem:[#allocation2 + $0x31] sm:$0xff] }
 0x483   : > { %v12704_v3 = vpop.eup %12703  ;;  %v6089_v50 = vmul.f32 1.0614054, %v12702_v0  ;;  %v6280_v20 = vmul.f32 %v12698_v18, %v6248_v8  ;;  %v5996_v56 = vmul.f32 0.3275911, %v5964_v15  ;;  %v6379_v8 = vsub.f32 0.0, %v5963_v49 }
 0x484   : > { %v6090_v43 = vmul.f32 1.0614054, %v12704_v3  ;;  %v6311_v29 = vadd.f32 0.2548296, %v6279_v35  ;;  %v12706_v59 = vpop.eup %12705  ;;  %v6027_v27 = vadd.f32 1.0, %v5995_v5 }
 0x485   : > { %v6121_v12 = vadd.f32 -1.4531521, %v6089_v50  ;;  %v6312_v33 = vadd.f32 0.2548296, %v6280_v20  ;;  %v12708_v55 = vpop.eup %12707  ;;  %v6028_v22 = vadd.f32 1.0, %v5996_v56 }
 0x486   : > { %v6122_v52 = vadd.f32 -1.4531521, %v6090_v43  ;;  %v6343_v26 = vmul.f32 %v12696_v32, %v6311_v29  ;;  %12713 = vrcp.f32 %v6027_v27  ;;  %v5927_v32 = vsel %vm5895_vm5, 1.0, %v18399_v30  ;;  %v12710_v10 = vpop.eup %12709 }
 0x487   : > { %v6153_v60 = vmul.f32 %v12702_v0, %v6121_v12  ;;  %v6344_v47 = vmul.f32 %v12698_v18, %v6312_v33  ;;  %12715 = vrcp.f32 %v6028_v22  ;;  %v6380_v43 = vsub.f32 0.0, %v5964_v15 }
 0x488   : > { %v6154_v48 = vmul.f32 %v12704_v3, %v6122_v52  ;;  %v6503_v57 = vmul.f32 %v12706_v59, %v6343_v26  ;;  %v6411_v33 = vmul.f32 %v6379_v8, %v5963_v49  ;;  %v5929_v26 = vsel %vm5897_vm7, 1.0, %v18399_v30  ;;  %v7775_v8 = vld [vmem:[#allocation2 + $0x9] sm:$0xff] }
 0x489   : > { %v6185_v31 = vadd.f32 1.4214138, %v6153_v60  ;;  %v6504_v1 = vmul.f32 %v12708_v55, %v6344_v47  ;;  %v6412_v60 = vmul.f32 %v6380_v43, %v5964_v15  ;;  %v5833_v27 = vmul.f32 0.5, %v16656_v37 }
 0x48a   : > { %v6186_v45 = vadd.f32 1.4214138, %v6154_v48  ;;  %v6535_v61 = vsub.f32 1.0, %v6503_v57  ;;  %v5834_v15 = vmul.f32 0.5, %v16660_v24 }
 0x48b   : > { %v6217_v25 = vmul.f32 %v12702_v0, %v6185_v31  ;;  %v6536_v54 = vsub.f32 1.0, %v6504_v1  ;;  %v12712_v52 = vpop.eup %12711  ;;  %v6473_v31 = vmul.f32 1.442695, %v6411_v33  ;;  %v6475_v55 = vmul.f32 1.442695, %v6412_v60  ;;  %v16779_v33 = vld [vmem:[#allocation2 + $0x21] sm:$0xff] }
 0x48c   : > { %v6218_v38 = vmul.f32 %v12704_v3, %v6186_v45  ;;  %v6567_v4 = vmul.f32 %v6535_v61, %v5927_v32  ;;  %v5835_v60 = vmul.f32 0.5, %v16715_v46  ;;  %v16800_v46 = vld [vmem:[#allocation2 + $0x51] sm:$0xff] }
 0x48d   : > { %v6249_v18 = vadd.f32 -0.28449672, %v6217_v25  ;;  %v6568_v11 = vmul.f32 %v6536_v54, %v5928_v63  ;;  %12717 = vpow2.f32 %v6473_v31 }
 0x48e   : > { %v6250_v28 = vadd.f32 -0.28449672, %v6218_v38  ;;  %v6599_v41 = vadd.f32 1.0, %v6567_v4  ;;  %12719 = vpow2.f32 %v6475_v55  ;;  %v16831_v55 = vld [vmem:[#allocation2 + $0x81] sm:$0xff] }
 0x48f   : > { %v6281_v40 = vmul.f32 %v12702_v0, %v6249_v18  ;;  %v6600_v42 = vadd.f32 1.0, %v6568_v11 }
 0x490   : > { %v6282_v21 = vmul.f32 %v12704_v3, %v6250_v28  ;;  %v6631_v50 = vmul.f32 %v6599_v41, %v5831_v9  ;;  %v7774_v9 = vld [vmem:[#allocation2 + $0x1] sm:$0xff] }
 0x491   : > { %v6313_v53 = vadd.f32 0.2548296, %v6281_v40  ;;  %v6632_v20 = vmul.f32 %v6600_v42, %v5832_v14 }
 0x492   : > { %v6314_v35 = vadd.f32 0.2548296, %v6282_v21  ;;  %6663 = vst.msk [vmem:[#allocation2 + $0x151] sm:$0xff] %vm365_vm1, %v6631_v50 }
 0x493   : > { %v6345_v12 = vmul.f32 %v12702_v0, %v6313_v53  ;;  %6664 = vst.msk [vmem:[#allocation2 + $0x159] sm:$0xff] %vm365_vm1, %v6632_v20  ;;  %v12714_v59 = vpop.eup %12713  ;;  %v5930_v0 = vsel %vm5898_vm8, 1.0, %v18399_v30  ;;  %v16771_v20 = vld [vmem:[#allocation2 + $0x19] sm:$0xff] }
 0x494   : > { %v6346_v29 = vmul.f32 %v12704_v3, %v6314_v35  ;;  %v6091_v3 = vmul.f32 1.0614054, %v12714_v59  ;;  %v12716_v56 = vpop.eup %12715 }
 0x495   : > { %v6505_v17 = vmul.f32 %v12710_v10, %v6345_v12  ;;  %v6092_v57 = vmul.f32 1.0614054, %v12716_v56 }
 0x496   : > { %v6506_v23 = vmul.f32 %v12712_v52, %v6346_v29  ;;  %v6123_v39 = vadd.f32 -1.4531521, %v6091_v3  ;;  %v5931_v52 = vsel %vm5899_vm9, 1.0, %v18399_v30  ;;  %v16808_v3 = vld [vmem:[#allocation2 + $0x69] sm:$0xff] }
 0x497   : > { %v6537_v5 = vsub.f32 1.0, %v6505_v17  ;;  %v6124_v37 = vadd.f32 -1.4531521, %v6092_v57  ;;  %v16836_v57 = vld [vmem:[#allocation2 + $0x91] sm:$0xff] }
 0x498   : > { %v6538_v48 = vsub.f32 1.0, %v6506_v23  ;;  %v6155_v61 = vmul.f32 %v12714_v59, %v6123_v39  ;;  %v5932_v23 = vsel %vm5900_vm10, 1.0, %v18399_v30  ;;  %v16794_v30 = vld [vmem:[#allocation2 + $0x49] sm:$0xff] }
 0x499   : > { %v6569_v47 = vmul.f32 %v6537_v5, %v5929_v26  ;;  %v16741_v45 = vld [vmem:[#allocation2 + $0x150] sm:$0xff]  ;;  %v6156_v38 = vmul.f32 %v12716_v56, %v6124_v37  ;;  %v12746_v37 = vld [vmem:[#allocation2 + $0x48] sm:$0xff] }
 0x49a   : > { %v6570_v6 = vmul.f32 %v6538_v48, %v5930_v0  ;;  %11982 = vmatprep.mubr.msk.f32.mxu1 %vm365_vm1, %v16741_v45  ;;  %12035 = vmatprep.mubr.msk.f32.mxu0 %vm365_vm1, %v16741_v45  ;;  %v16748_v25 = vld [vmem:[#allocation2 + $0x158] sm:$0xff]  ;;  %v6187_v32 = vadd.f32 1.4214138, %v6155_v61  ;;  %v12718_v50 = vpop.eup %12717 }
 0x49b   : > { %v6601_v49 = vadd.f32 1.0, %v6569_v47  ;;  %11983 = vmatmul.mubr.msk.f32.gmra.mxu1 %vm365_vm1, %v16748_v25  ;;  %12036 = vmatmul.mubr.msk.f32.gmra.mxu0 %vm365_vm1, %v16748_v25  ;;  %v6188_v54 = vadd.f32 1.4214138, %v6156_v38  ;;  %v12720_v10 = vpop.eup %12719  ;;  %v16790_v0 = vld [vmem:[#allocation2 + $0x39] sm:$0xff] }
 0x49c   : > { %v6602_v1 = vadd.f32 1.0, %v6570_v6  ;;  %v6219_v18 = vmul.f32 %v12714_v59, %v6187_v32  ;;  %v16851_v61 = vld [vmem:[#allocation2 + $0x99] sm:$0xff] }
 0x49d   : > { %v6633_v22 = vmul.f32 %v6601_v49, %v5833_v27  ;;  %v6220_v63 = vmul.f32 %v12716_v56, %v6188_v54  ;;  %v16819_v27 = vld [vmem:[%s18133_s7 + $0x1c] sm:$0xf]  ;;  %v12744_v49 = vld [vmem:[#allocation2 + $0x30] sm:$0xff] }
 0x49e   : > { %v6634_v24 = vmul.f32 %v6602_v1, %v5834_v15  ;;  %v6251_v4 = vadd.f32 -0.28449672, %v6219_v18  ;;  %v16843_v15 = vld [vmem:[%s18133_s7 + $0x18] sm:$0xf]  ;;  %v12747_v54 = vld [vmem:[#allocation2 + $0x50] sm:$0xff]  ;;  %v12748_v18 = vld [vmem:[#allocation2 + $0x60] sm:$0xff] }
 0x49f   : > { %6665 = vst.msk [vmem:[#allocation2 + $0x169] sm:$0xff] %vm365_vm1, %v6633_v22  ;;  %v6252_v28 = vadd.f32 -0.28449672, %v6220_v63  ;;  %v12745_v1 = vld [vmem:[#allocation2 + $0x38] sm:$0xff] }
 0x4a0   : > { %6666 = vst.msk [vmem:[#allocation2 + $0x171] sm:$0xff] %vm365_vm1, %v6634_v24  ;;  %v6283_v11 = vmul.f32 %v12714_v59, %v6251_v4  ;;  %v16855_v24 = vld [vmem:[#allocation2 + $0xa9] sm:$0xff]  ;;  %v16865_v63 = vld [vmem:[#allocation2 + $0xb1] sm:$0xff] }
 0x4a1   : > { %v6284_v41 = vmul.f32 %v12716_v56, %v6252_v28 }
 0x4a2   : > { %v6315_v21 = vadd.f32 0.2548296, %v6283_v11  ;;  %v16873_v11 = vld [vmem:[#allocation2 + $0xc1] sm:$0xff] }
 0x4a3   : > { %v6316_v42 = vadd.f32 0.2548296, %v6284_v41 }
 0x4a4   : > { %v6347_v53 = vmul.f32 %v12714_v59, %v6315_v21  ;;  %v12749_v21 = vld [vmem:[#allocation2 + $0x68] sm:$0xff] }
 0x4a5   : > { %v6348_v35 = vmul.f32 %v12716_v56, %v6316_v42  ;;  %v16814_v56 = vld [vmem:[#allocation2 + $0x79] sm:$0xff] }
 0x4a6   : > { %v16756_v40 = vld [vmem:[#allocation2 + $0x168] sm:$0xff]  ;;  %v6507_v43 = vmul.f32 %v12718_v50, %v6347_v53  ;;  %v12750_v53 = vld [vmem:[#allocation2 + $0x78] sm:$0xff] }
 0x4a7   : > { %11985 = vmatprep.mubr.msk.f32.mxu1 %vm365_vm1, %v16756_v40  ;;  %12038 = vmatprep.mubr.msk.f32.mxu0 %vm365_vm1, %v16756_v40  ;;  %v16762_v14 = vld [vmem:[#allocation2 + $0x170] sm:$0xff]  ;;  %v6508_v12 = vmul.f32 %v12720_v10, %v6348_v35 }
 0x4a8   : > { %11986 = vmatmul.mubr.msk.f32.gmra.mxu1 %vm365_vm1, %v16762_v14  ;;  %12039 = vmatmul.mubr.msk.f32.gmra.mxu0 %vm365_vm1, %v16762_v14  ;;  %v6539_v29 = vsub.f32 1.0, %v6507_v43  ;;  %v16889_v43 = vld [vmem:[#allocation2 + $0xd9] sm:$0xff] }
 0x4a9   : > { %12093 = vmatprep.mubr.msk.f32.mxu0 %vm365_vm1, %v7774_v9  ;;  %v6540_v51 = vsub.f32 1.0, %v6508_v12 }
 0x4aa   : > { %v6571_v17 = vmul.f32 %v6539_v29, %v5931_v52  ;;  %v12751_v29 = vld [vmem:[#allocation2 + $0x80] sm:$0xff] }
 0x4ab   : > { %v6572_v5 = vmul.f32 %v6540_v51, %v5932_v23  ;;  %v12752_v51 = vld [vmem:[#allocation2 + $0x90] sm:$0xff] }
 0x4ac   : > { %12094 = vmatmul.mubr.msk.f32.vlgmr.msra.gmra.mxu0 %vm365_vm1, %v7775_v8  ;;  %v6603_v59 = vadd.f32 1.0, %v6571_v17  ;;  %v16881_v8 = vld [vmem:[#allocation2 + $0xc9] sm:$0xff]  ;;  %v16897_v17 = vld [vmem:[#allocation2 + $0xe1] sm:$0xff] }
 0x4ad   : > { %12096 = vmatprep.mubr.msk.f32.mxu0 %vm365_vm1, %v16771_v20  ;;  %12192 = vmatpush3.msk.msra.mxu0 %vm1966_vm0, %v16694_v7  ;;  %v5836_v7 = vmul.f32 0.5, %v16718_v44  ;;  %v6604_v26 = vadd.f32 1.0, %v6572_v5  ;;  %v16804_v44 = vld [vmem:[#allocation2 + $0x61] sm:$0xff]  ;;  %v16905_v5 = vld [vmem:[#allocation2 + $0xf1] sm:$0xff] }
 0x4ae   : > { %v6635_v48 = vmul.f32 %v6603_v59, %v5835_v60  ;;  %12291 = vmatprep.subr.msk.mxu0 %vm1966_vm0, %v16819_v27 }
 0x4af   : > { %v6636_v47 = vmul.f32 %v6604_v26, %v5836_v7  ;;  %v12753_v7 = vld [vmem:[#allocation2 + $0x98] sm:$0xff] }
 0x4b0   : > { %12097 = vmatmul.mubr.msk.f32.gmra.mxu0 %vm365_vm1, %v16779_v33  ;;  %6667 = vst.msk [vmem:[#allocation2 + $0x181] sm:$0xff] %vm365_vm1, %v6635_v48 }
 0x4b1   : > { %12099 = vmatprep.mubr.msk.f32.mxu0 %vm365_vm1, %v16784_v13  ;;  %6668 = vst.msk [vmem:[#allocation2 + $0x189] sm:$0xff] %vm365_vm1, %v6636_v47  ;;  %v12754_v47 = vld [vmem:[#allocation2 + $0xa8] sm:$0xff] }
 0x4b4   : > { %12100 = vmatmul.mubr.msk.f32.gmra.mxu0 %vm365_vm1, %v16790_v0 }
 0x4b5   : > { %12102 = vmatprep.mubr.msk.f32.mxu0 %vm365_vm1, %v16794_v30 }
 0x4b7   : > { %v16810_v31 = vld [vmem:[#allocation2 + $0x180] sm:$0xff] }
 0x4b8   : > { %12103 = vmatmul.mubr.msk.f32.gmra.mxu0 %vm365_vm1, %v16800_v46  ;;  %11988 = vmatprep.mubr.msk.f32.mxu1 %vm365_vm1, %v16810_v31  ;;  %v16825_v6 = vld [vmem:[#allocation2 + $0x188] sm:$0xff] }
 0x4b9   : > { %12105 = vmatprep.mubr.msk.f32.mxu0 %vm365_vm1, %v16804_v44  ;;  %11989 = vmatmul.mubr.msk.f32.gmra.mxu1 %vm365_vm1, %v16825_v6 }
 0x4ba   : > { %12043 = vmatprep.mubr.msk.f32.mxu1 %vm365_vm1, %v12744_v49  ;;  %v16913_v49 = vld [vmem:[#allocation2 + $0xf9] sm:$0xff] }
 0x4bc   : > { %12106 = vmatmul.mubr.msk.f32.gmra.mxu0 %vm365_vm1, %v16808_v3 }
 0x4bd   : > { %12108 = vmatprep.mubr.msk.f32.mxu0 %vm365_vm1, %v16814_v56  ;;  %12044 = vmatmul.mubr.msk.f32.vlgmr.msra.gmra.mxu1 %vm365_vm1, %v12745_v1  ;;  %v16919_v1 = vld [vmem:[#allocation2 + $0x109] sm:$0xff] }
 0x4be   : > { %v11995_v39 = vpop.f32.mrf.mxu0  ;;  %12142 = vmatpush3.msk.msra.mxu1 %vm1966_vm0, %v16530_v16  ;;  %12046 = vmatprep.mubr.msk.f32.mxu1 %vm365_vm1, %v12746_v37 }
 0x4bf   : > { %12241 = vmatprep.subr.msk.mxu1 %vm1966_vm0, %v16843_v15 }
 0x4c0   : > { %12109 = vmatmul.mubr.msk.f32.gmra.mxu0 %vm365_vm1, %v16831_v55  ;;  %v16846_v22 = vpop.f32.mrf.mxu0 }
 0x4c1   : > { %12111 = vmatprep.mubr.msk.f32.mxu0 %vm365_vm1, %v16836_v57  ;;  %12047 = vmatmul.mubr.msk.f32.gmra.mxu1 %vm365_vm1, %v12747_v54 }
 0x4c2   : > { %12049 = vmatprep.mubr.msk.f32.mxu1 %vm365_vm1, %v12748_v18 }
 0x4c3   : > { %v11945_v38 = vpop.f32.mrf.mxu1  ;;  %v11998_v32 = vpop.f32.mrf.mxu0 }
 0x4c4   : > { %12112 = vmatmul.mubr.msk.f32.gmra.mxu0 %vm365_vm1, %v16851_v61  ;;  %v16862_v16 = vadd.f32 %v11995_v39, %v11945_v38 }
 0x4c5   : > { %12114 = vmatprep.mubr.msk.f32.mxu0 %vm365_vm1, %v16855_v24  ;;  %v16867_v4 = vpop.f32.mrf.mxu1  ;;  %v16869_v28 = vpop.f32.mrf.mxu0  ;;  %12050 = vmatmul.mubr.msk.f32.gmra.mxu1 %vm365_vm1, %v12749_v21 }
 0x4c6   : > { %12052 = vmatprep.mubr.msk.f32.mxu1 %vm365_vm1, %v12750_v53  ;;  %v16935_v53 = vld [vmem:[#allocation2 + $0x121] sm:$0xff] }
 0x4c7   : > { %v11948_v9 = vpop.f32.mrf.mxu1  ;;  %v12001_v41 = vpop.f32.mrf.mxu0 }
 0x4c8   : > { %12115 = vmatmul.mubr.msk.f32.gmra.mxu0 %vm365_vm1, %v16865_v63  ;;  %v16878_v42 = vadd.f32 %v11998_v32, %v11948_v9  ;;  %v12755_v32 = vld [vmem:[#allocation2 + $0xb0] sm:$0xff]  ;;  %v12756_v9 = vld [vmem:[#allocation2 + $0xc0] sm:$0xff] }
 0x4c9   : > { %12117 = vmatprep.mubr.msk.f32.mxu0 %vm365_vm1, %v16873_v11  ;;  %v16883_v50 = vpop.f32.mrf.mxu1  ;;  %v16885_v35 = vpop.f32.mrf.mxu0  ;;  %12053 = vmatmul.mubr.msk.f32.gmra.mxu1 %vm365_vm1, %v12751_v29  ;;  %v12757_v29 = vld [vmem:[#allocation2 + $0xc8] sm:$0xff] }
 0x4ca   : > { %12055 = vmatprep.mubr.msk.f32.mxu1 %vm365_vm1, %v12752_v51 }
 0x4cc   : > { %12118 = vmatmul.mubr.msk.f32.gmra.mxu0 %vm365_vm1, %v16881_v8 }
 0x4cd   : > { %12120 = vmatprep.mubr.msk.f32.mxu0 %vm365_vm1, %v16889_v43  ;;  %v11951_v10 = vpop.f32.mrf.mxu1  ;;  %v12004_v12 = vpop.f32.mrf.mxu0  ;;  %12056 = vmatmul.mubr.msk.f32.gmra.mxu1 %vm365_vm1, %v12753_v7  ;;  %v12758_v7 = vld [vmem:[#allocation2 + $0xd8] sm:$0xff] }
 0x4ce   : > { %v16894_v52 = vadd.f32 %v12001_v41, %v11951_v10  ;;  %12058 = vmatprep.mubr.msk.f32.mxu1 %vm365_vm1, %v12754_v47  ;;  %v16929_v41 = vld [vmem:[#allocation2 + $0x111] sm:$0xff] }
 0x4cf   : > { %v16899_v23 = vpop.f32.mrf.mxu1  ;;  %v16901_v60 = vpop.f32.mrf.mxu0 }
 0x4d0   : > { %12121 = vmatmul.mubr.msk.f32.gmra.mxu0 %vm365_vm1, %v16897_v17 }
 0x4d1   : > { %12123 = vmatprep.mubr.msk.f32.mxu0 %vm365_vm1, %v16905_v5  ;;  %v11954_v59 = vpop.f32.mrf.mxu1  ;;  %12059 = vmatmul.mubr.msk.f32.gmra.mxu1 %vm365_vm1, %v12755_v32 }
 0x4d2   : > { %v16910_v26 = vadd.f32 %v12004_v12, %v11954_v59  ;;  %v12007_v48 = vpop.f32.mrf.mxu0  ;;  %12061 = vmatprep.mubr.msk.f32.mxu1 %vm365_vm1, %v12756_v9  ;;  %v12759_v9 = vld [vmem:[#allocation2 + $0xe0] sm:$0xff] }
 0x4d3   : > { %v16915_v39 = vpop.f32.mrf.mxu1 }
 0x4d4   : > { %12124 = vmatmul.mubr.msk.f32.gmra.mxu0 %vm365_vm1, %v16913_v49  ;;  %v16921_v37 = vpop.f32.mrf.mxu0 }
 0x4d5   : > { %12126 = vmatprep.mubr.msk.f32.mxu0 %vm365_vm1, %v16919_v1  ;;  %v11957_v38 = vpop.f32.mrf.mxu1  ;;  %12062 = vmatmul.mubr.msk.f32.gmra.mxu1 %vm365_vm1, %v12757_v29 }
 0x4d6   : > { %v16926_v54 = vadd.f32 %v12007_v48, %v11957_v38  ;;  %v12010_v18 = vpop.f32.mrf.mxu0  ;;  %12064 = vmatprep.mubr.msk.f32.mxu1 %vm365_vm1, %v12758_v7  ;;  %v16945_v48 = vld [vmem:[#allocation2 + $0x129] sm:$0xff]  ;;  %v16951_v38 = vld [vmem:[#allocation2 + $0x139] sm:$0xff] }
 0x4d7   : > { %v16931_v21 = vpop.f32.mrf.mxu1  ;;  %v12760_v7 = vld [vmem:[#allocation2 + $0xf0] sm:$0xff] }
 0x4d8   : > { %12127 = vmatmul.mubr.msk.f32.gmra.mxu0 %vm365_vm1, %v16929_v41  ;;  %v16937_v10 = vpop.f32.mrf.mxu0 }
 0x4d9   : > { %18418 = vst [vmem:[#allocation21_spill] sm:$0xff] %v16937_v10  ;;  %12129 = vmatprep.mubr.msk.f32.mxu0 %vm365_vm1, %v16935_v53  ;;  %v11960_v12 = vpop.f32.mrf.mxu1  ;;  %12065 = vmatmul.mubr.msk.f32.gmra.mxu1 %vm365_vm1, %v12759_v9  ;;  %v12761_v9 = vld [vmem:[#allocation2 + $0xf8] sm:$0xff] }
 0x4da   : > { %v16942_v51 = vadd.f32 %v12010_v18, %v11960_v12  ;;  %v12013_v59 = vpop.f32.mrf.mxu0  ;;  %12067 = vmatprep.mubr.msk.f32.mxu1 %vm365_vm1, %v12760_v7  ;;  %v16978_v7 = vld [vmem:[#allocation2 + $0x159] sm:$0xff] }
 0x4db   : > { %v16947_v47 = vpop.f32.mrf.mxu1 }
 0x4dc   : > { %18419 = vst [vmem:[#allocation24_spill] sm:$0xff] %v16942_v51  ;;  %18420 = vst [vmem:[#allocation23_spill] sm:$0xff] %v16947_v47  ;;  %12130 = vmatmul.mubr.msk.f32.gmra.mxu0 %vm365_vm1, %v16945_v48  ;;  %v16953_v32 = vpop.f32.mrf.mxu0  ;;  %v16961_v51 = vld [vmem:[#allocation2 + $0x141] sm:$0xff] }
 0x4dd   : > { %18421 = vst [vmem:[#allocation26_spill] sm:$0xff] %v16953_v32  ;;  %12132 = vmatprep.mubr.msk.f32.mxu0 %vm365_vm1, %v16951_v38  ;;  %v11963_v18 = vpop.f32.mrf.mxu1  ;;  %v16967_v32 = vld [vmem:[#allocation2 + $0x151] sm:$0xff]  ;;  %12068 = vmatmul.mubr.msk.f32.gmra.mxu1 %vm365_vm1, %v12761_v9 }
 0x4de   : > { %v16958_v12 = vadd.f32 %v12013_v59, %v11963_v18  ;;  %v12016_v29 = vpop.f32.mrf.mxu0  ;;  %12070 = vmatprep.mubr.msk.f32.mxu1 %vm365_vm1, %v16575_v19  ;;  %v16992_v19 = vld [vmem:[#allocation2 + $0x171] sm:$0xff] }
 0x4df   : > { %v16963_v10 = vpop.f32.mrf.mxu1 }
 0x4e0   : > { %18422 = vst [vmem:[#allocation25_spill] sm:$0xff] %v16958_v12  ;;  %18423 = vst [vmem:[#allocation28_spill] sm:$0xff] %v16963_v10  ;;  %12133 = vmatmul.mubr.msk.f32.gmra.mxu0 %vm365_vm1, %v16961_v51  ;;  %v16972_v59 = vpop.f32.mrf.mxu0  ;;  %v16984_v10 = vld [vmem:[#allocation2 + $0x169] sm:$0xff] }
 0x4e1   : > { %12135 = vmatprep.mubr.msk.f32.mxu0 %vm365_vm1, %v16967_v32  ;;  %12071 = vmatmul.mubr.msk.f32.gmra.mxu1 %vm365_vm1, %v16584_v62  ;;  %v7414_v62 = vld [vmem:[#allocation2 + $0x198] sm:$0xff] }
 0x4e2   : > { %v11966_v47 = vpop.f32.mrf.mxu1  ;;  %12073 = vmatprep.mubr.msk.f32.mxu1 %vm365_vm1, %v16666_v34 }
 0x4e3   : > { %v16974_v18 = vadd.f32 %v12016_v29, %v11966_v47  ;;  %v12019_v47 = vpop.f32.mrf.mxu0 }
 0x4e4   : > { %v16980_v12 = vpop.f32.mrf.mxu1  ;;  %12136 = vmatmul.mubr.msk.f32.gmra.mxu0 %vm365_vm1, %v16978_v7 }
 0x4e5   : > { %12138 = vmatprep.mubr.msk.f32.mxu0 %vm365_vm1, %v16984_v10  ;;  %12074 = vmatmul.mubr.msk.f32.gmra.mxu1 %vm365_vm1, %v16675_v36  ;;  %v17034_v34 = vpop.f32.mrf.mxu0 }
 0x4e6   : > { %12076 = vmatprep.mubr.msk.f32.mxu1 %vm365_vm1, %v16700_v2  ;;  %v7415_v2 = vld [vmem:[#allocation2 + $0x1a0] sm:$0xff] }
 0x4e8   : > { %12139 = vmatmul.mubr.msk.f32.gmra.mxu0 %vm365_vm1, %v16992_v19 }
 0x4e9   : > { %v11969_v29 = vpop.f32.mrf.mxu1  ;;  %12193 = vmatprep.mubr.msk.f32.mxu0 %vm365_vm1, %v16784_v13  ;;  %12077 = vmatmul.mubr.msk.f32.gmra.mxu1 %vm365_vm1, %v16708_v58  ;;  %v12022_v58 = vpop.f32.mrf.mxu0 }
 0x4ea   : > { %v16994_v9 = vadd.f32 %v12019_v47, %v11969_v29  ;;  %12079 = vmatprep.mubr.msk.f32.mxu1 %vm365_vm1, %v16741_v45  ;;  %v17226_v47 = vld [vmem:[#allocation2 + $0xb2] sm:$0xff]  ;;  %v17230_v29 = vld [vmem:[#allocation2 + $0xc2] sm:$0xff] }
 0x4eb   : > { %v17036_v36 = vpop.f32.mrf.mxu1 }
 0x4ec   : > { %12194 = vmatmul.mubr.msk.f32.vlgmr.msra.gmra.mxu0 %vm365_vm1, %v16790_v0 }
 0x4ed   : > { %12196 = vmatprep.mubr.msk.f32.mxu0 %vm365_vm1, %v16794_v30  ;;  %12292 = vmatpush3.msk.msra.mxu0 %vm1966_vm0, %v16819_v27 }
 0x4ee   : > { %12080 = vmatmul.mubr.msk.f32.gmra.mxu1 %vm365_vm1, %v16748_v25 }
 0x4ef   : > { %12082 = vmatprep.mubr.msk.f32.mxu1 %vm365_vm1, %v16756_v40  ;;  %v17057_v40 = vld [vmem:[%s18133_s7 + $0x20] sm:$0xf] }
 0x4f0   : > { %12197 = vmatmul.mubr.msk.f32.gmra.mxu0 %vm365_vm1, %v16800_v46 }
 0x4f1   : > { %12199 = vmatprep.mubr.msk.f32.mxu0 %vm365_vm1, %v16804_v44 }
 0x4f2   : > { %12083 = vmatmul.mubr.msk.f32.gmra.mxu1 %vm365_vm1, %v16762_v14  ;;  %v17079_v14 = vpop.f32.mrf.mxu0 }
 0x4f3   : > { %12085 = vmatprep.mubr.msk.f32.mxu1 %vm365_vm1, %v16810_v31  ;;  %v9334_v31 = vld [vmem:[#allocation2 + $0x1a] sm:$0xff] }
 0x4f4   : > { %12200 = vmatmul.mubr.msk.f32.gmra.mxu0 %vm365_vm1, %v16808_v3 }
 0x4f5   : > { %12202 = vmatprep.mubr.msk.f32.mxu0 %vm365_vm1, %v16814_v56 }
 0x4f6   : > { %12086 = vmatmul.mubr.msk.f32.gmra.mxu1 %vm365_vm1, %v16825_v6  ;;  %v9335_v6 = vld [vmem:[#allocation2 + $0x22] sm:$0xff] }
 0x4f7   : > { %12088 = vmatprep.mubr.msk.f32.mxu1 %vm365_vm1, %v7414_v62  ;;  %v17241_v62 = vld [vmem:[#allocation2 + $0xda] sm:$0xff] }
 0x4f8   : > { %12203 = vmatmul.mubr.msk.f32.gmra.mxu0 %vm365_vm1, %v16831_v55 }
 0x4f9   : > { %12205 = vmatprep.mubr.msk.f32.mxu0 %vm365_vm1, %v16836_v57 }
 0x4fa   : > { %12089 = vmatmul.mubr.msk.f32.gmra.mxu1 %vm365_vm1, %v7415_v2  ;;  %v17249_v2 = vld [vmem:[#allocation2 + $0xe2] sm:$0xff] }
 0x4fb   : > { %12143 = vmatprep.mubr.msk.f32.mxu1 %vm365_vm1, %v16771_v20 }
 0x4fc   : > { %12206 = vmatmul.mubr.msk.f32.gmra.mxu0 %vm365_vm1, %v16851_v61 }
 0x4fd   : > { %12208 = vmatprep.mubr.msk.f32.mxu0 %vm365_vm1, %v16855_v24 }
 0x4fe   : > { %12144 = vmatmul.mubr.msk.f32.vlgmr.msra.gmra.mxu1 %vm365_vm1, %v16779_v33 }
 0x4ff   : > { %12242 = vmatpush3.msk.msra.mxu1 %vm1966_vm0, %v16843_v15  ;;  %12146 = vmatprep.mubr.msk.f32.mxu1 %vm365_vm1, %v16784_v13 }
 0x500   : > { %12209 = vmatmul.mubr.msk.f32.gmra.mxu0 %vm365_vm1, %v16865_v63  ;;  %12341 = vmatprep.subr.msk.mxu1 %vm1966_vm0, %v17057_v40 }
 0x501   : > { %v11972_v45 = vpop.f32.mrf.mxu1  ;;  %12211 = vmatprep.mubr.msk.f32.mxu0 %vm365_vm1, %v16873_v11  ;;  %v12025_v33 = vpop.f32.mrf.mxu0 }
 0x502   : > { %v17046_v25 = vadd.f32 %v12022_v58, %v11972_v45  ;;  %12147 = vmatmul.mubr.msk.f32.gmra.mxu1 %vm365_vm1, %v16790_v0  ;;  %v17253_v58 = vld [vmem:[#allocation2 + $0xf2] sm:$0xff]  ;;  %v17261_v45 = vld [vmem:[#allocation2 + $0xfa] sm:$0xff] }
 0x503   : > { %12149 = vmatprep.mubr.msk.f32.mxu1 %vm365_vm1, %v16794_v30  ;;  %v17081_v20 = vpop.f32.mrf.mxu1  ;;  %v8582_v30 = vld [vmem:[#allocation2 + $0x181] sm:$0xff] }
 0x504   : > { %18424 = vst [vmem:[#allocation27_spill] sm:$0xff] %v17046_v25  ;;  %12212 = vmatmul.mubr.msk.f32.gmra.mxu0 %vm365_vm1, %v16881_v8  ;;  %v7226_v25 = vadd.f32 %v16846_v22, %v16867_v4  ;;  %v7236_v22 = vadd.f32 %v16869_v28, %v16883_v50  ;;  %v7246_v28 = vadd.f32 %v16885_v35, %v16899_v23 }
 0x505   : > { %12214 = vmatprep.mubr.msk.f32.mxu0 %vm365_vm1, %v16889_v43  ;;  %v7256_v35 = vadd.f32 %v16901_v60, %v16915_v39  ;;  %v7266_v60 = vadd.f32 %v16921_v37, %v16931_v21  ;;  %v18449_v37 = vld [vmem:[#allocation23_spill] sm:$0xff]  ;;  %v18450_v21 = vld [vmem:[#allocation21_spill] sm:$0xff] }
 0x506   : > { %12150 = vmatmul.mubr.msk.f32.gmra.mxu1 %vm365_vm1, %v16800_v46  ;;  %v8584_v46 = vld [vmem:[#allocation2 + $0x199] sm:$0xff] }
 0x507   : > { %12152 = vmatprep.mubr.msk.f32.mxu1 %vm365_vm1, %v16804_v44  ;;  %v8583_v44 = vld [vmem:[#allocation2 + $0x189] sm:$0xff] }
 0x508   : > { %12215 = vmatmul.mubr.msk.f32.gmra.mxu0 %vm365_vm1, %v16897_v17 }
 0x509   : > { %12217 = vmatprep.mubr.msk.f32.mxu0 %vm365_vm1, %v16905_v5 }
 0x50a   : > { %12153 = vmatmul.mubr.msk.f32.gmra.mxu1 %vm365_vm1, %v16808_v3  ;;  %v8585_v3 = vld [vmem:[#allocation2 + $0x1a1] sm:$0xff] }
 0x50b   : > { %12155 = vmatprep.mubr.msk.f32.mxu1 %vm365_vm1, %v16814_v56  ;;  %v17146_v56 = vpop.f32.mrf.mxu0 }
 0x50c   : > { %12218 = vmatmul.mubr.msk.f32.gmra.mxu0 %vm365_vm1, %v16913_v49  ;;  %18426 = vst [vmem:[#allocation29_spill] sm:$0xff] %v17146_v56 }
 0x50d   : > { %12220 = vmatprep.mubr.msk.f32.mxu0 %vm365_vm1, %v16919_v1 }
 0x50e   : > { %12156 = vmatmul.mubr.msk.f32.gmra.mxu1 %vm365_vm1, %v16831_v55  ;;  %v17153_v55 = vld [vmem:[#allocation2 + $0x32] sm:$0xff] }
 0x50f   : > { %12158 = vmatprep.mubr.msk.f32.mxu1 %vm365_vm1, %v16836_v57 }
 0x510   : > { %12221 = vmatmul.mubr.msk.f32.gmra.mxu0 %vm365_vm1, %v16929_v41 }
 0x511   : > { %v11975_v13 = vpop.f32.mrf.mxu1  ;;  %12223 = vmatprep.mubr.msk.f32.mxu0 %vm365_vm1, %v16935_v53  ;;  %v12028_v57 = vpop.f32.mrf.mxu0 }
 0x512   : > { %v17093_v0 = vadd.f32 %v12025_v33, %v11975_v13  ;;  %12159 = vmatmul.mubr.msk.f32.gmra.mxu1 %vm365_vm1, %v16851_v61  ;;  %v17161_v61 = vld [vmem:[#allocation2 + $0x3a] sm:$0xff]  ;;  %v17273_v33 = vld [vmem:[#allocation2 + $0x112] sm:$0xff] }
 0x513   : > { %12161 = vmatprep.mubr.msk.f32.mxu1 %vm365_vm1, %v16855_v24  ;;  %v17148_v27 = vpop.f32.mrf.mxu1 }
 0x514   : > { %18425 = vst [vmem:[#allocation38_spill] sm:$0xff] %v17093_v0  ;;  %12224 = vmatmul.mubr.msk.f32.gmra.mxu0 %vm365_vm1, %v16945_v48  ;;  %18427 = vst [vmem:[#allocation40_spill] sm:$0xff] %v17148_v27 }
 0x515   : > { %12226 = vmatprep.mubr.msk.f32.mxu0 %vm365_vm1, %v16951_v38 }
 0x516   : > { %12162 = vmatmul.mubr.msk.f32.gmra.mxu1 %vm365_vm1, %v16865_v63  ;;  %v17167_v63 = vld [vmem:[#allocation2 + $0x4a] sm:$0xff] }
 0x517   : > { %12164 = vmatprep.mubr.msk.f32.mxu1 %vm365_vm1, %v16873_v11  ;;  %v17175_v11 = vld [vmem:[#allocation2 + $0x52] sm:$0xff] }
 0x518   : > { %12227 = vmatmul.mubr.msk.f32.gmra.mxu0 %vm365_vm1, %v16961_v51 }
 0x519   : > { %12229 = vmatprep.mubr.msk.f32.mxu0 %vm365_vm1, %v16967_v32 }
 0x51a   : > { %12165 = vmatmul.mubr.msk.f32.gmra.mxu1 %vm365_vm1, %v16881_v8  ;;  %v17179_v8 = vld [vmem:[#allocation2 + $0x62] sm:$0xff] }
 0x51b   : > { %12167 = vmatprep.mubr.msk.f32.mxu1 %vm365_vm1, %v16889_v43  ;;  %v17187_v43 = vld [vmem:[#allocation2 + $0x6a] sm:$0xff] }
 0x51c   : > { %12230 = vmatmul.mubr.msk.f32.gmra.mxu0 %vm365_vm1, %v16978_v7 }
 0x51d   : > { %12232 = vmatprep.mubr.msk.f32.mxu0 %vm365_vm1, %v16984_v10 }
 0x51e   : > { %12168 = vmatmul.mubr.msk.f32.gmra.mxu1 %vm365_vm1, %v16897_v17  ;;  %v17191_v17 = vld [vmem:[#allocation2 + $0x7a] sm:$0xff] }
 0x51f   : > { %12170 = vmatprep.mubr.msk.f32.mxu1 %vm365_vm1, %v16905_v5  ;;  %v17197_v5 = vpop.f32.mrf.mxu0 }
 0x520   : > { %12233 = vmatmul.mubr.msk.f32.gmra.mxu0 %vm365_vm1, %v16992_v19  ;;  %18429 = vst [vmem:[#allocation31_spill] sm:$0xff] %v17197_v5 }
 0x521   : > { %12235 = vmatprep.mubr.msk.f32.mxu0 %vm365_vm1, %v8582_v30 }
 0x522   : > { %12171 = vmatmul.mubr.msk.f32.gmra.mxu1 %vm365_vm1, %v16913_v49 }
 0x523   : > { %12173 = vmatprep.mubr.msk.f32.mxu1 %vm365_vm1, %v16919_v1  ;;  %v17202_v1 = vld [vmem:[#allocation2 + $0x82] sm:$0xff] }
 0x524   : > { %12236 = vmatmul.mubr.msk.f32.gmra.mxu0 %vm365_vm1, %v8583_v44 }
 0x525   : > { %12238 = vmatprep.mubr.msk.f32.mxu0 %vm365_vm1, %v8584_v46  ;;  %v17287_v46 = vld [vmem:[#allocation2 + $0x12a] sm:$0xff] }
 0x526   : > { %12174 = vmatmul.mubr.msk.f32.gmra.mxu1 %vm365_vm1, %v16929_v41  ;;  %v8944_v41 = vld [vmem:[#allocation2 + $0x2] sm:$0xff]  ;;  %18434 = vst [vmem:[#allocation36_spill] sm:$0xff] %v17287_v46 }
 0x527   : > { %12176 = vmatprep.mubr.msk.f32.mxu1 %vm365_vm1, %v16935_v53  ;;  %v17206_v53 = vld [vmem:[#allocation2 + $0x92] sm:$0xff] }
 0x528   : > { %12239 = vmatmul.mubr.msk.f32.gmra.mxu0 %vm365_vm1, %v8585_v3  ;;  %v17291_v3 = vld [vmem:[#allocation2 + $0x13a] sm:$0xff] }
 0x529   : > { %12293 = vmatprep.mubr.msk.f32.mxu0 %vm365_vm1, %v9334_v31  ;;  %18435 = vst [vmem:[#allocation37_spill] sm:$0xff] %v17291_v3 }
 0x52a   : > { %12177 = vmatmul.mubr.msk.f32.gmra.mxu1 %vm365_vm1, %v16945_v48  ;;  %v8945_v48 = vld [vmem:[#allocation2 + $0xa] sm:$0xff] }
 0x52b   : > { %12179 = vmatprep.mubr.msk.f32.mxu1 %vm365_vm1, %v16951_v38  ;;  %v17212_v38 = vld [vmem:[#allocation2 + $0x9a] sm:$0xff] }
 0x52c   : > { %12294 = vmatmul.mubr.msk.f32.vlgmr.msra.gmra.mxu0 %vm365_vm1, %v9335_v6 }
 0x52d   : > { %12296 = vmatprep.mubr.msk.f32.mxu0 %vm365_vm1, %v17153_v55 }
 0x52e   : > { %12180 = vmatmul.mubr.msk.f32.gmra.mxu1 %vm365_vm1, %v16961_v51 }
 0x52f   : > { %12182 = vmatprep.mubr.msk.f32.mxu1 %vm365_vm1, %v16967_v32 }
 0x530   : > { %12297 = vmatmul.mubr.msk.f32.gmra.mxu0 %vm365_vm1, %v17161_v61 }
 0x531   : > { %v11978_v15 = vpop.f32.mrf.mxu1  ;;  %12299 = vmatprep.mubr.msk.f32.mxu0 %vm365_vm1, %v17167_v63 }
 0x532   : > { %v17163_v24 = vadd.f32 %v12028_v57, %v11978_v15  ;;  %12183 = vmatmul.mubr.msk.f32.gmra.mxu1 %vm365_vm1, %v16978_v7  ;;  %v17218_v7 = vld [vmem:[#allocation2 + $0xaa] sm:$0xff]  ;;  %v17305_v15 = vld [vmem:[#allocation2 + $0x152] sm:$0xff] }
 0x533   : > { %12185 = vmatprep.mubr.msk.f32.mxu1 %vm365_vm1, %v16984_v10  ;;  %v17199_v49 = vpop.f32.mrf.mxu1  ;;  %v12031_v10 = vpop.f32.mrf.mxu0  ;;  %18438 = vst [vmem:[#allocation43_spill] sm:$0xff] %v17305_v15 }
 0x534   : > { %18428 = vst [vmem:[#allocation30_spill] sm:$0xff] %v17163_v24  ;;  %12300 = vmatmul.mubr.msk.f32.gmra.mxu0 %vm365_vm1, %v17175_v11  ;;  %18430 = vst [vmem:[#allocation32_spill] sm:$0xff] %v17199_v49 }
 0x535   : > { %12302 = vmatprep.mubr.msk.f32.mxu0 %vm365_vm1, %v17179_v8  ;;  %v17275_v13 = vpop.f32.mrf.mxu0 }
 0x536   : > { %12186 = vmatmul.mubr.msk.f32.gmra.mxu1 %vm365_vm1, %v16992_v19  ;;  %v17237_v19 = vld [vmem:[#allocation2 + $0xca] sm:$0xff]  ;;  %18432 = vst [vmem:[#allocation34_spill] sm:$0xff] %v17275_v13 }
 0x537   : > { %12188 = vmatprep.mubr.msk.f32.mxu1 %vm365_vm1, %v8582_v30  ;;  %v17279_v30 = vld [vmem:[#allocation2 + $0x122] sm:$0xff] }
 0x538   : > { %12303 = vmatmul.mubr.msk.f32.gmra.mxu0 %vm365_vm1, %v17187_v43  ;;  %18433 = vst [vmem:[#allocation35_spill] sm:$0xff] %v17279_v30 }
 0x539   : > { %12305 = vmatprep.mubr.msk.f32.mxu0 %vm365_vm1, %v17191_v17 }
 0x53a   : > { %12189 = vmatmul.mubr.msk.f32.gmra.mxu1 %vm365_vm1, %v8583_v44 }
 0x53b   : > { %12243 = vmatprep.mubr.msk.f32.mxu1 %vm365_vm1, %v8944_v41 }
 0x53c   : > { %12306 = vmatmul.mubr.msk.f32.gmra.mxu0 %vm365_vm1, %v17202_v1 }
 0x53d   : > { %12308 = vmatprep.mubr.msk.f32.mxu0 %vm365_vm1, %v17206_v53 }
 0x53e   : > { %12244 = vmatmul.mubr.msk.f32.vlgmr.msra.gmra.mxu1 %vm365_vm1, %v8945_v48  ;;  %v17315_v48 = vld [vmem:[#allocation2 + $0x15a] sm:$0xff] }
 0x53f   : > { %12342 = vmatpush3.msk.msra.mxu1 %vm1966_vm0, %v17057_v40  ;;  %12246 = vmatprep.mubr.msk.f32.mxu1 %vm365_vm1, %v9334_v31  ;;  %v17265_v40 = vld [vmem:[#allocation2 + $0x10a] sm:$0xff]  ;;  %18440 = vst [vmem:[#allocation42_spill] sm:$0xff] %v17315_v48 }
 0x540   : > { %12309 = vmatmul.mubr.msk.f32.gmra.mxu0 %vm365_vm1, %v17212_v38 }
 0x541   : > { %v11981_v51 = vpop.f32.mrf.mxu1  ;;  %12311 = vmatprep.mubr.msk.f32.mxu0 %vm365_vm1, %v17218_v7  ;;  %v12034_v44 = vpop.f32.mrf.mxu0 }
 0x542   : > { %v17214_v32 = vadd.f32 %v12031_v10, %v11981_v51  ;;  %12247 = vmatmul.mubr.msk.f32.gmra.mxu1 %vm365_vm1, %v9335_v6  ;;  %v17301_v6 = vld [vmem:[#allocation2 + $0x142] sm:$0xff] }
 0x543   : > { %12249 = vmatprep.mubr.msk.f32.mxu1 %vm365_vm1, %v17153_v55  ;;  %v17293_v31 = vpop.f32.mrf.mxu1  ;;  %18437 = vst [vmem:[#allocation41_spill] sm:$0xff] %v17301_v6  ;;  %v7355_v57 = vpop.f32.mrf.mxu0 }
 0x544   : > { %18431 = vst [vmem:[#allocation33_spill] sm:$0xff] %v17214_v32  ;;  %12312 = vmatmul.mubr.msk.f32.gmra.mxu0 %vm365_vm1, %v17226_v47  ;;  %18436 = vst [vmem:[#allocation39_spill] sm:$0xff] %v17293_v31  ;;  %v17321_v31 = vld [vmem:[#allocation2 + $0x16a] sm:$0xff] }
 0x545   : > { %12314 = vmatprep.mubr.msk.f32.mxu0 %vm365_vm1, %v17230_v29  ;;  %18442 = vst [vmem:[#allocation44_spill] sm:$0xff] %v17321_v31 }
 0x546   : > { %12250 = vmatmul.mubr.msk.f32.gmra.mxu1 %vm365_vm1, %v17161_v61 }
 0x547   : > { %12252 = vmatprep.mubr.msk.f32.mxu1 %vm365_vm1, %v17167_v63 }
 0x548   : > { %12315 = vmatmul.mubr.msk.f32.gmra.mxu0 %vm365_vm1, %v17237_v19 }
 0x549   : > { %12317 = vmatprep.mubr.msk.f32.mxu0 %vm365_vm1, %v17241_v62 }
 0x54a   : > { %12253 = vmatmul.mubr.msk.f32.gmra.mxu1 %vm365_vm1, %v17175_v11 }
 0x54b   : > { %12255 = vmatprep.mubr.msk.f32.mxu1 %vm365_vm1, %v17179_v8 }
 0x54c   : > { %12318 = vmatmul.mubr.msk.f32.gmra.mxu0 %vm365_vm1, %v17249_v2 }
 0x54d   : > { %12320 = vmatprep.mubr.msk.f32.mxu0 %vm365_vm1, %v17253_v58 }
 0x54e   : > { %12256 = vmatmul.mubr.msk.f32.gmra.mxu1 %vm365_vm1, %v17187_v43 }
 0x54f   : > { %12258 = vmatprep.mubr.msk.f32.mxu1 %vm365_vm1, %v17191_v17 }
 0x550   : > { %12321 = vmatmul.mubr.msk.f32.gmra.mxu0 %vm365_vm1, %v17261_v45 }
 0x551   : > { %12323 = vmatprep.mubr.msk.f32.mxu0 %vm365_vm1, %v17265_v40 }
 0x552   : > { %12259 = vmatmul.mubr.msk.f32.gmra.mxu1 %vm365_vm1, %v17202_v1 }
 0x553   : > { %12261 = vmatprep.mubr.msk.f32.mxu1 %vm365_vm1, %v17206_v53 }
 0x554   : > { %12324 = vmatmul.mubr.msk.f32.gmra.mxu0 %vm365_vm1, %v17273_v33 }
 0x555   : > { %12326 = vmatprep.mubr.msk.f32.mxu0 %vm365_vm1, %v17279_v30 }
 0x556   : > { %12262 = vmatmul.mubr.msk.f32.gmra.mxu1 %vm365_vm1, %v17212_v38 }
 0x557   : > { %12264 = vmatprep.mubr.msk.f32.mxu1 %vm365_vm1, %v17218_v7 }
 0x558   : > { %12327 = vmatmul.mubr.msk.f32.gmra.mxu0 %vm365_vm1, %v17287_v46 }
 0x559   : > { %12329 = vmatprep.mubr.msk.f32.mxu0 %vm365_vm1, %v17291_v3 }
 0x55a   : > { %12265 = vmatmul.mubr.msk.f32.gmra.mxu1 %vm365_vm1, %v17226_v47 }
 0x55b   : > { %v11984_v41 = vpop.f32.mrf.mxu1  ;;  %12267 = vmatprep.mubr.msk.f32.mxu1 %vm365_vm1, %v17230_v29  ;;  %v12037_v32 = vpop.f32.mrf.mxu0 }
 0x55c   : > { %12330 = vmatmul.mubr.msk.f32.gmra.mxu0 %vm365_vm1, %v17301_v6  ;;  %v17309_v10 = vadd.f32 %v12034_v44, %v11984_v41  ;;  %v17329_v44 = vld [vmem:[#allocation2 + $0x172] sm:$0xff] }
 0x55d   : > { %12332 = vmatprep.mubr.msk.f32.mxu0 %vm365_vm1, %v17305_v15  ;;  %v7031_v51 = vpop.f32.mrf.mxu1  ;;  %v7365_v41 = vpop.f32.mrf.mxu0 }
 0x55e   : > { %18439 = vst [vmem:[#allocation56_spill] sm:$0xff] %v17309_v10  ;;  %v17317_v13 = vadd.f32 %v7355_v57, %v7031_v51  ;;  %12268 = vmatmul.mubr.msk.f32.gmra.mxu1 %vm365_vm1, %v17237_v19  ;;  %v17333_v57 = vld [vmem:[#allocation2 + $0x182] sm:$0xff]  ;;  %v17341_v10 = vld [vmem:[#allocation2 + $0x18a] sm:$0xff] }
 0x55f   : > { %12270 = vmatprep.mubr.msk.f32.mxu1 %vm365_vm1, %v17241_v62  ;;  %18443 = vst [vmem:[#allocation45_spill] sm:$0xff] %v17333_v57  ;;  %18444 = vst [vmem:[#allocation46_spill] sm:$0xff] %v17341_v10 }
 0x560   : > { %18441 = vst [vmem:[#allocation52_spill] sm:$0xff] %v17317_v13  ;;  %12333 = vmatmul.mubr.msk.f32.gmra.mxu0 %vm365_vm1, %v17315_v48 }
 0x561   : > { %12335 = vmatprep.mubr.msk.f32.mxu0 %vm365_vm1, %v17321_v31 }
 0x562   : > { %12271 = vmatmul.mubr.msk.f32.gmra.mxu1 %vm365_vm1, %v17249_v2 }
 0x563   : > { %12273 = vmatprep.mubr.msk.f32.mxu1 %vm365_vm1, %v17253_v58 }
 0x564   : > { %12336 = vmatmul.mubr.msk.f32.gmra.mxu0 %vm365_vm1, %v17329_v44 }
 0x565   : > { %12338 = vmatprep.mubr.msk.f32.mxu0 %vm365_vm1, %v17333_v57 }
 0x566   : > { %12274 = vmatmul.mubr.msk.f32.gmra.mxu1 %vm365_vm1, %v17261_v45 }
 0x567   : > { %12276 = vmatprep.mubr.msk.f32.mxu1 %vm365_vm1, %v17265_v40 }
 0x568   : > { %v11987_v51 = vpop.f32.mrf.mxu1  ;;  %v12040_v13 = vpop.f32.mrf.mxu0  ;;  %12339 = vmatmul.mubr.msk.f32.gmra.mxu0 %vm365_vm1, %v17341_v10 }
 0x569   : > { %v17343_v24 = vadd.f32 %v12037_v32, %v11987_v51 }
 0x56a   : > { %v7041_v5 = vpop.f32.mrf.mxu1  ;;  %v7375_v49 = vpop.f32.mrf.mxu0  ;;  %12277 = vmatmul.mubr.msk.f32.gmra.mxu1 %vm365_vm1, %v17273_v33 }
 0x56b   : > { %18445 = vst [vmem:[#allocation47_spill] sm:$0xff] %v17343_v24  ;;  %v17349_v57 = vadd.f32 %v7365_v41, %v7041_v5  ;;  %12279 = vmatprep.mubr.msk.f32.mxu1 %vm365_vm1, %v17279_v30 }
 0x56c   : > { %v12095_v0 = vpop.f32.mrf.mxu0 }
 0x56d   : > { %18446 = vst [vmem:[#allocation48_spill] sm:$0xff] %v17349_v57 }
 0x56e   : > { %v7973_v56 = vpop.f32.mrf.mxu0  ;;  %12280 = vmatmul.mubr.msk.f32.gmra.mxu1 %vm365_vm1, %v17287_v46 }
 0x56f   : > { %12282 = vmatprep.mubr.msk.f32.mxu1 %vm365_vm1, %v17291_v3 }
 0x570   : > { %v12098_v32 = vpop.f32.mrf.mxu0 }
 0x572   : > { %v7983_v51 = vpop.f32.mrf.mxu0  ;;  %12283 = vmatmul.mubr.msk.f32.gmra.mxu1 %vm365_vm1, %v17301_v6 }
 0x573   : > { %12285 = vmatprep.mubr.msk.f32.mxu1 %vm365_vm1, %v17305_v15 }
 0x574   : > { %v12101_v5 = vpop.f32.mrf.mxu0 }
 0x576   : > { %v7993_v41 = vpop.f32.mrf.mxu0  ;;  %12286 = vmatmul.mubr.msk.f32.gmra.mxu1 %vm365_vm1, %v17315_v48 }
 0x577   : > { %12288 = vmatprep.mubr.msk.f32.mxu1 %vm365_vm1, %v17321_v31 }
 0x578   : > { %v12104_v57 = vpop.f32.mrf.mxu0 }
 0x579   : > { %v11990_v3 = vpop.f32.mrf.mxu1 }
 0x57a   : > { %v8003_v24 = vpop.f32.mrf.mxu0  ;;  %12289 = vmatmul.mubr.msk.f32.gmra.mxu1 %vm365_vm1, %v17329_v44  ;;  %v17373_v46 = vadd.f32 %v12040_v13, %v11990_v3 }
 0x57b   : > { %12343 = vmatprep.mubr.msk.f32.mxu1 %vm365_vm1, %v17153_v55  ;;  %v7051_v6 = vpop.f32.mrf.mxu1 }
 0x57c   : > { %v12107_v10 = vpop.f32.mrf.mxu0  ;;  %18447 = vst [vmem:[#allocation49_spill] sm:$0xff] %v17373_v46  ;;  %v17379_v30 = vadd.f32 %v7375_v49, %v7051_v6 }
 0x57d   : > { %v12045_v31 = vpop.f32.mrf.mxu1 }
 0x57e   : > { %v17369_v27 = vpop.f32.mrf.mxu0  ;;  %18448 = vst [vmem:[#allocation58_spill] sm:$0xff] %v17379_v30  ;;  %12344 = vmatmul.mubr.msk.f32.vlgmr.msra.gmra.mxu1 %vm365_vm1, %v17161_v61  ;;  %v7743_v13 = vadd.f32 %v12045_v31, %v16862_v16 }
 0x57f   : > { %12346 = vmatprep.mubr.msk.f32.mxu1 %vm365_vm1, %v17167_v63  ;;  %v7583_v55 = vpop.f32.mrf.mxu1 }
 0x580   : > { %v17377_v15 = vpop.f32.mrf.mxu0  ;;  %v7742_v46 = vadd.f32 %v7583_v55, %v7226_v25  ;;  %v17392_v49 = vadd.f32 %v12095_v0, %v7743_v13 }
 0x581   : > { %v12048_v6 = vpop.f32.mrf.mxu1 }
 0x582   : > { %v17381_v48 = vpop.f32.mrf.mxu0  ;;  %12347 = vmatmul.mubr.msk.f32.gmra.mxu1 %vm365_vm1, %v17175_v11  ;;  %v7745_v16 = vadd.f32 %v12048_v6, %v16878_v42  ;;  %v17403_v4 = vadd.f32 %v7973_v56, %v7742_v46 }
 0x583   : > { %12349 = vmatprep.mubr.msk.f32.mxu1 %vm365_vm1, %v17179_v8  ;;  %v7593_v61 = vpop.f32.mrf.mxu1 }
 0x584   : > { %v17390_v3 = vpop.f32.mrf.mxu0  ;;  %v7744_v0 = vadd.f32 %v7593_v61, %v7236_v22  ;;  %v17407_v63 = vadd.f32 %v12098_v32, %v7745_v16  ;;  %v18451_v61 = vld [vmem:[#allocation24_spill] sm:$0xff] }
 0x585   : > { %v12051_v31 = vpop.f32.mrf.mxu1 }
 0x586   : > { %v17396_v30 = vpop.f32.mrf.mxu0  ;;  %12350 = vmatmul.mubr.msk.f32.gmra.mxu1 %vm365_vm1, %v17187_v43  ;;  %v7747_v42 = vadd.f32 %v12051_v31, %v16894_v52  ;;  %v17418_v50 = vadd.f32 %v7983_v51, %v7744_v0 }
 0x587   : > { %12352 = vmatprep.mubr.msk.f32.mxu1 %vm365_vm1, %v17191_v17  ;;  %v7603_v56 = vpop.f32.mrf.mxu1 }
 0x588   : > { %v17405_v25 = vpop.f32.mrf.mxu0  ;;  %v7746_v46 = vadd.f32 %v7603_v56, %v7246_v28  ;;  %v17422_v32 = vadd.f32 %v12101_v5, %v7747_v42  ;;  %v18452_v56 = vld [vmem:[#allocation28_spill] sm:$0xff] }
 0x589   : > { %v12054_v13 = vpop.f32.mrf.mxu1 }
 0x58a   : > { %v17411_v11 = vpop.f32.mrf.mxu0  ;;  %12353 = vmatmul.mubr.msk.f32.gmra.mxu1 %vm365_vm1, %v17202_v1  ;;  %v7749_v52 = vadd.f32 %v12054_v13, %v16910_v26  ;;  %v17433_v23 = vadd.f32 %v7993_v41, %v7746_v46  ;;  %v18453_v46 = vld [vmem:[#allocation26_spill] sm:$0xff] }
 0x58b   : > { %12355 = vmatprep.mubr.msk.f32.mxu1 %vm365_vm1, %v17206_v53  ;;  %v7613_v17 = vpop.f32.mrf.mxu1  ;;  %v7286_v13 = vadd.f32 %v18453_v46, %v18452_v56  ;;  %v18460_v56 = vld [vmem:[#allocation38_spill] sm:$0xff] }
 0x58c   : > { %v17420_v8 = vpop.f32.mrf.mxu0  ;;  %v7748_v5 = vadd.f32 %v7613_v17, %v7256_v35  ;;  %v17437_v55 = vadd.f32 %v12104_v57, %v7749_v52 }
 0x58d   : > { %v12057_v6 = vpop.f32.mrf.mxu1 }
 0x58e   : > { %v17426_v43 = vpop.f32.mrf.mxu0  ;;  %12356 = vmatmul.mubr.msk.f32.gmra.mxu1 %vm365_vm1, %v17212_v38  ;;  %v7751_v26 = vadd.f32 %v12057_v6, %v16926_v54  ;;  %v17448_v39 = vadd.f32 %v8003_v24, %v7748_v5  ;;  %v7276_v54 = vadd.f32 %v18450_v21, %v18449_v37 }
 0x58f   : > { %12358 = vmatprep.mubr.msk.f32.mxu1 %vm365_vm1, %v17218_v7  ;;  %v7623_v53 = vpop.f32.mrf.mxu1 }
 0x590   : > { %v17435_v51 = vpop.f32.mrf.mxu0  ;;  %v7750_v57 = vadd.f32 %v7623_v53, %v7266_v60  ;;  %v17452_v22 = vadd.f32 %v12107_v10, %v7751_v26  ;;  %v7296_v60 = vadd.f32 %v16972_v59, %v16980_v12  ;;  %v7306_v59 = vadd.f32 %v17034_v34, %v17036_v36  ;;  %v18455_v36 = vld [vmem:[#allocation27_spill] sm:$0xff] }
 0x591   : > { %v12060_v16 = vpop.f32.mrf.mxu1 }
 0x592   : > { %v17441_v1 = vpop.f32.mrf.mxu0  ;;  %12359 = vmatmul.mubr.msk.f32.gmra.mxu1 %vm365_vm1, %v17226_v47  ;;  %v7753_v0 = vadd.f32 %v12060_v16, %v18451_v61  ;;  %v17464_v24 = vadd.f32 %v17369_v27, %v7750_v57 }
 0x593   : > { %12361 = vmatprep.mubr.msk.f32.mxu1 %vm365_vm1, %v17230_v29  ;;  %v7633_v7 = vpop.f32.mrf.mxu1  ;;  %v18454_v29 = vld [vmem:[#allocation25_spill] sm:$0xff] }
 0x594   : > { %v17450_v41 = vpop.f32.mrf.mxu0  ;;  %v7752_v31 = vadd.f32 %v7633_v7, %v7276_v54  ;;  %v17469_v28 = vadd.f32 %v17377_v15, %v7753_v0  ;;  %v18457_v7 = vld [vmem:[#allocation36_spill] sm:$0xff] }
 0x595   : > { %v12063_v47 = vpop.f32.mrf.mxu1 }
 0x596   : > { %v17456_v38 = vpop.f32.mrf.mxu0  ;;  %12362 = vmatmul.mubr.msk.f32.gmra.mxu1 %vm365_vm1, %v17237_v19  ;;  %v7755_v35 = vadd.f32 %v12063_v47, %v18454_v29  ;;  %v17481_v27 = vadd.f32 %v17381_v48, %v7752_v31  ;;  %v18459_v31 = vld [vmem:[#allocation29_spill] sm:$0xff] }
 0x597   : > { %12364 = vmatprep.mubr.msk.f32.mxu1 %vm365_vm1, %v17241_v62  ;;  %v7643_v52 = vpop.f32.mrf.mxu1 }
 0x598   : > { %v17466_v10 = vpop.f32.mrf.mxu0  ;;  %v7754_v17 = vadd.f32 %v7643_v52, %v7286_v13  ;;  %v17486_v5 = vadd.f32 %v17390_v3, %v7755_v35 }
 0x599   : > { %v12066_v19 = vpop.f32.mrf.mxu1 }
 0x59a   : > { %v17473_v42 = vpop.f32.mrf.mxu0  ;;  %12365 = vmatmul.mubr.msk.f32.gmra.mxu1 %vm365_vm1, %v17249_v2  ;;  %v7757_v62 = vadd.f32 %v12066_v19, %v16974_v18  ;;  %v17498_v48 = vadd.f32 %v17396_v30, %v7754_v17  ;;  %v18462_v19 = vld [vmem:[#allocation41_spill] sm:$0xff] }
 0x59b   : > { %12367 = vmatprep.mubr.msk.f32.mxu1 %vm365_vm1, %v17253_v58  ;;  %v7653_v26 = vpop.f32.mrf.mxu1 }
 0x59c   : > { %v17483_v15 = vpop.f32.mrf.mxu0  ;;  %v7756_v53 = vadd.f32 %v7653_v26, %v7296_v60  ;;  %v17503_v57 = vadd.f32 %v17405_v25, %v7757_v62  ;;  %v18463_v62 = vld [vmem:[#allocation32_spill] sm:$0xff]  ;;  %v18464_v26 = vld [vmem:[#allocation31_spill] sm:$0xff] }
 0x59d   : > { %v12069_v2 = vpop.f32.mrf.mxu1 }
 0x59e   : > { %v17490_v6 = vpop.f32.mrf.mxu0  ;;  %12368 = vmatmul.mubr.msk.f32.gmra.mxu1 %vm365_vm1, %v17261_v45  ;;  %v7759_v18 = vadd.f32 %v12069_v2, %v16994_v9  ;;  %v17515_v58 = vadd.f32 %v17411_v11, %v7756_v53  ;;  %v7316_v9 = vadd.f32 %v17079_v14, %v17081_v20  ;;  %v18456_v11 = vld [vmem:[#allocation35_spill] sm:$0xff]  ;;  %v18458_v20 = vld [vmem:[#allocation40_spill] sm:$0xff]  ;;  %v7336_v53 = vadd.f32 %v18464_v26, %v18463_v62  ;;  %v18465_v2 = vld [vmem:[#allocation30_spill] sm:$0xff] }
 0x59f   : > { %12370 = vmatprep.mubr.msk.f32.mxu1 %vm365_vm1, %v17265_v40  ;;  %v7663_v30 = vpop.f32.mrf.mxu1  ;;  %v7326_v47 = vadd.f32 %v18459_v31, %v18458_v20  ;;  %v9754_v62 = vld [vmem:[#allocation2 + $0x19a] sm:$0xff] }
 0x5a0   : > { %v17500_v3 = vpop.f32.mrf.mxu0  ;;  %v7758_v16 = vadd.f32 %v7663_v30, %v7306_v59  ;;  %v17520_v37 = vadd.f32 %v17420_v8, %v7759_v18 }
 0x5a1   : > { %v12072_v45 = vpop.f32.mrf.mxu1 }
 0x5a2   : > { %v17507_v12 = vpop.f32.mrf.mxu0  ;;  %12371 = vmatmul.mubr.msk.f32.gmra.mxu1 %vm365_vm1, %v17273_v33  ;;  %v7761_v40 = vadd.f32 %v12072_v45, %v18455_v36  ;;  %v17532_v21 = vadd.f32 %v17426_v43, %v7758_v16  ;;  %v18461_v43 = vld [vmem:[#allocation37_spill] sm:$0xff]  ;;  %v18467_v36 = vld [vmem:[#allocation42_spill] sm:$0xff] }
 0x5a3   : > { %12373 = vmatprep.mubr.msk.f32.mxu1 %vm365_vm1, %v18456_v11  ;;  %v7673_v54 = vpop.f32.mrf.mxu1  ;;  %v18468_v11 = vld [vmem:[#allocation39_spill] sm:$0xff] }
 0x5a4   : > { %v17517_v25 = vpop.f32.mrf.mxu0  ;;  %v7760_v61 = vadd.f32 %v7673_v54, %v7316_v9  ;;  %v17537_v0 = vadd.f32 %v17435_v51, %v7761_v40  ;;  %v18469_v54 = vld [vmem:[#allocation34_spill] sm:$0xff] }
 0x5a5   : > { %v12075_v33 = vpop.f32.mrf.mxu1 }
 0x5a6   : > { %v17524_v34 = vpop.f32.mrf.mxu0  ;;  %12374 = vmatmul.mubr.msk.f32.gmra.mxu1 %vm365_vm1, %v18457_v7  ;;  %v7763_v46 = vadd.f32 %v12075_v33, %v18460_v56  ;;  %v17549_v13 = vadd.f32 %v17441_v1, %v7760_v61  ;;  %v18466_v1 = vld [vmem:[#allocation43_spill] sm:$0xff]  ;;  %v7346_v61 = vadd.f32 %v18469_v54, %v18468_v11  ;;  %v18470_v33 = vld [vmem:[#allocation33_spill] sm:$0xff]  ;;  %v18477_v54 = vld [vmem:[#allocation48_spill] sm:$0xff] }
 0x5a7   : > { %12376 = vmatprep.mubr.msk.f32.mxu1 %vm365_vm1, %v18461_v43  ;;  %v7683_v29 = vpop.f32.mrf.mxu1 }
 0x5a8   : > { %v17534_v8 = vpop.f32.mrf.mxu0  ;;  %v7762_v35 = vadd.f32 %v7683_v29, %v7326_v47  ;;  %v17554_v52 = vadd.f32 %v17450_v41, %v7763_v46  ;;  %v18472_v29 = vld [vmem:[#allocation56_spill] sm:$0xff] }
 0x5a9   : > { %v12078_v17 = vpop.f32.mrf.mxu1 }
 0x5aa   : > { %v17541_v14 = vpop.f32.mrf.mxu0  ;;  %12377 = vmatmul.mubr.msk.f32.gmra.mxu1 %vm365_vm1, %v18462_v19  ;;  %v7765_v59 = vadd.f32 %v12078_v17, %v18465_v2  ;;  %v17566_v18 = vadd.f32 %v17456_v38, %v7762_v35  ;;  %v18471_v38 = vld [vmem:[#allocation44_spill] sm:$0xff]  ;;  %v18473_v17 = vld [vmem:[#allocation45_spill] sm:$0xff] }
 0x5ab   : > { %12379 = vmatprep.mubr.msk.f32.mxu1 %vm365_vm1, %v18466_v1  ;;  %v7693_v30 = vpop.f32.mrf.mxu1 }
 0x5ac   : > { %v17551_v51 = vpop.f32.mrf.mxu0  ;;  %v7764_v16 = vadd.f32 %v7693_v30, %v7336_v53  ;;  %v17571_v45 = vadd.f32 %v17466_v10, %v7765_v59  ;;  %v18475_v59 = vld [vmem:[#allocation46_spill] sm:$0xff]  ;;  %v18476_v30 = vld [vmem:[#allocation47_spill] sm:$0xff] }
 0x5ae   : > { %v17558_v60 = vpop.f32.mrf.mxu0  ;;  %v12081_v9 = vpop.f32.mrf.mxu1  ;;  %12380 = vmatmul.mubr.msk.f32.gmra.mxu1 %vm365_vm1, %v18467_v36  ;;  %v17583_v20 = vadd.f32 %v17473_v42, %v7764_v16 }
 0x5af   : > { %v7767_v7 = vadd.f32 %v12081_v9, %v18470_v33  ;;  %12382 = vmatprep.mubr.msk.f32.mxu1 %vm365_vm1, %v18471_v38  ;;  %v18478_v38 = vld [vmem:[#allocation49_spill] sm:$0xff] }
 0x5b0   : > { %v17568_v41 = vpop.f32.mrf.mxu0  ;;  %v7703_v31 = vpop.f32.mrf.mxu1 }
 0x5b1   : > { %v7766_v47 = vadd.f32 %v7703_v31, %v7346_v61  ;;  %v17588_v56 = vadd.f32 %v17483_v15, %v7767_v7  ;;  %v18474_v15 = vld [vmem:[#allocation52_spill] sm:$0xff] }
 0x5b2   : > { %v17575_v40 = vpop.f32.mrf.mxu0  ;;  %v12084_v46 = vpop.f32.mrf.mxu1  ;;  %12383 = vmatmul.mubr.msk.f32.gmra.mxu1 %vm365_vm1, %v17329_v44 }
 0x5b3   : > { %v7769_v35 = vadd.f32 %v12084_v46, %v18472_v29  ;;  %12385 = vmatprep.mubr.msk.f32.mxu1 %vm365_vm1, %v18473_v17  ;;  %v17598_v42 = vadd.f32 %v17490_v6, %v7766_v47  ;;  %v9755_v6 = vld [vmem:[#allocation2 + $0x1a2] sm:$0xff] }
 0x5b4   : > { %v17585_v10 = vpop.f32.mrf.mxu0  ;;  %v7713_v19 = vpop.f32.mrf.mxu1  ;;  %v18479_v29 = vld [vmem:[#allocation58_spill] sm:$0xff] }
 0x5b5   : > { %v7768_v53 = vadd.f32 %v7713_v19, %v18474_v15  ;;  %v17604_v2 = vadd.f32 %v17500_v3, %v7769_v35 }
 0x5b6   : > { %v17592_v43 = vpop.f32.mrf.mxu0  ;;  %v12087_v44 = vpop.f32.mrf.mxu1  ;;  %12386 = vmatmul.mubr.msk.f32.gmra.mxu1 %vm365_vm1, %v18475_v59 }
 0x5b7   : > { %v7771_v16 = vadd.f32 %v12087_v44, %v18476_v30  ;;  %12388 = vmatprep.mubr.msk.f32.mxu1 %vm365_vm1, %v9754_v62  ;;  %v17613_v9 = vadd.f32 %v17507_v12, %v7768_v53 }
 0x5b8   : > { %v17600_v26 = vpop.f32.mrf.mxu0  ;;  %v7723_v36 = vpop.f32.mrf.mxu1 }
 0x5b9   : > { %v7770_v3 = vadd.f32 %v7723_v36, %v18477_v54  ;;  %v17619_v61 = vadd.f32 %v17517_v25, %v7771_v16 }
 0x5ba   : > { %v17608_v1 = vpop.f32.mrf.mxu0  ;;  %v12090_v33 = vpop.f32.mrf.mxu1  ;;  %12389 = vmatmul.mubr.msk.f32.gmra.mxu1 %vm365_vm1, %v9755_v6 }
 0x5bb   : > { %v7773_v31 = vadd.f32 %v12090_v33, %v18478_v38  ;;  %v17626_v47 = vadd.f32 %v17524_v34, %v7770_v3 }
 0x5bc   : > { %v17615_v11 = vpop.f32.mrf.mxu0  ;;  %v7733_v12 = vpop.f32.mrf.mxu1 }
 0x5bd   : > { %v7772_v35 = vadd.f32 %v7733_v12, %v18479_v29  ;;  %v17632_v17 = vadd.f32 %v17534_v8, %v7773_v31 }
 0x5be   : > { %v17622_v7 = vpop.f32.mrf.mxu0  ;;  %v12145_v25 = vpop.f32.mrf.mxu1 }
 0x5bf   : > { %v17637_v62 = vadd.f32 %v12145_v25, %v17392_v49  ;;  %v17640_v15 = vadd.f32 %v17541_v14, %v7772_v35 }
 0x5c0   : > { %v17628_v46 = vpop.f32.mrf.mxu0  ;;  %v8363_v53 = vpop.f32.mrf.mxu1 }
 0x5c1   : > { %v17645_v44 = vadd.f32 %v8363_v53, %v17403_v4 }
 0x5c2   : > { %v17634_v19 = vpop.f32.mrf.mxu0  ;;  %v12148_v59 = vpop.f32.mrf.mxu1 }
 0x5c3   : > { %v17650_v8 = vadd.f32 %v12148_v59, %v17407_v63 }
 0x5c4   : > { %v17642_v34 = vpop.f32.mrf.mxu0  ;;  %v8373_v16 = vpop.f32.mrf.mxu1 }
 0x5c5   : > { %v17655_v49 = vadd.f32 %v8373_v16, %v17418_v50 }
 0x5c6   : > { %v17647_v30 = vpop.f32.mrf.mxu0  ;;  %v12151_v14 = vpop.f32.mrf.mxu1 }
 0x5c7   : > { %v17660_v54 = vadd.f32 %v12151_v14, %v17422_v32 }
 0x5c8   : > { %v17652_v6 = vpop.f32.mrf.mxu0  ;;  %v8383_v4 = vpop.f32.mrf.mxu1 }
 0x5c9   : > { %18480 = vst [vmem:[#allocation59_spill] sm:$0xff] %v17652_v6  ;;  %v17665_v33 = vadd.f32 %v8383_v4, %v17433_v23 }
 0x5ca   : > { %v17657_v36 = vpop.f32.mrf.mxu0  ;;  %v12154_v63 = vpop.f32.mrf.mxu1 }
 0x5cb   : > { %18481 = vst [vmem:[#allocation50_spill] sm:$0xff] %v17657_v36  ;;  %v17670_v31 = vadd.f32 %v12154_v63, %v17437_v55 }
 0x5cc   : > { %v17662_v3 = vpop.f32.mrf.mxu0  ;;  %v8393_v50 = vpop.f32.mrf.mxu1 }
 0x5cd   : > { %18482 = vst [vmem:[#allocation61_spill] sm:$0xff] %v17662_v3  ;;  %v17675_v29 = vadd.f32 %v8393_v50, %v17448_v39 }
 0x5ce   : > { %v17667_v38 = vpop.f32.mrf.mxu0  ;;  %v12157_v32 = vpop.f32.mrf.mxu1 }
 0x5cf   : > { %18483 = vst [vmem:[#allocation71_spill] sm:$0xff] %v17667_v38  ;;  %v17680_v25 = vadd.f32 %v12157_v32, %v17452_v22 }
 0x5d0   : > { %v17672_v12 = vpop.f32.mrf.mxu0  ;;  %v8403_v23 = vpop.f32.mrf.mxu1 }
 0x5d1   : > { %18484 = vst [vmem:[#allocation70_spill] sm:$0xff] %v17672_v12  ;;  %v17685_v59 = vadd.f32 %v8403_v23, %v17464_v24 }
 0x5d2   : > { %v17677_v35 = vpop.f32.mrf.mxu0  ;;  %v12160_v55 = vpop.f32.mrf.mxu1 }
 0x5d3   : > { %18485 = vst [vmem:[#allocation51_spill] sm:$0xff] %v17677_v35  ;;  %v17690_v14 = vadd.f32 %v12160_v55, %v17469_v28 }
 0x5d4   : > { %v17682_v53 = vpop.f32.mrf.mxu0  ;;  %v8413_v39 = vpop.f32.mrf.mxu1 }
 0x5d5   : > { %18486 = vst [vmem:[#allocation62_spill] sm:$0xff] %v17682_v53  ;;  %v17693_v4 = vadd.f32 %v8413_v39, %v17481_v27 }
 0x5d6   : > { %v17687_v16 = vpop.f32.mrf.mxu0  ;;  %v12163_v63 = vpop.f32.mrf.mxu1 }
 0x5d7   : > { %18487 = vst [vmem:[#allocation64_spill] sm:$0xff] %v17687_v16  ;;  %v17698_v22 = vadd.f32 %v12163_v63, %v17486_v5 }
 0x5d8   : > { %v17695_v50 = vpop.f32.mrf.mxu0  ;;  %v8423_v32 = vpop.f32.mrf.mxu1 }
 0x5d9   : > { %18488 = vst [vmem:[#allocation65_spill] sm:$0xff] %v17695_v50  ;;  %v17701_v24 = vadd.f32 %v8423_v32, %v17498_v48 }
 0x5da   : > { %v12166_v23 = vpop.f32.mrf.mxu1  ;;  %v17703_v53 = vpop.f32.mrf.mxu0 }
 0x5db   : > { %18489 = vst [vmem:[#allocation67_spill] sm:$0xff] %v17703_v53  ;;  %v17706_v28 = vadd.f32 %v12166_v23, %v17503_v57 }
 0x5dc   : > { %v8433_v55 = vpop.f32.mrf.mxu1  ;;  %v17711_v16 = vpop.f32.mrf.mxu0 }
 0x5dd   : > { %18490 = vst [vmem:[#allocation74_spill] sm:$0xff] %v17706_v28  ;;  %v17709_v27 = vadd.f32 %v8433_v55, %v17515_v58  ;;  %18492 = vst [vmem:[#allocation53_spill] sm:$0xff] %v17711_v16 }
 0x5de   : > { %v12169_v39 = vpop.f32.mrf.mxu1  ;;  %v17719_v50 = vpop.f32.mrf.mxu0 }
 0x5df   : > { %18491 = vst [vmem:[#allocation72_spill] sm:$0xff] %v17709_v27  ;;  %v17714_v5 = vadd.f32 %v12169_v39, %v17520_v37  ;;  %18495 = vst [vmem:[#allocation75_spill] sm:$0xff] %v17719_v50 }
 0x5e0   : > { %v8443_v63 = vpop.f32.mrf.mxu1  ;;  %v17727_v53 = vpop.f32.mrf.mxu0 }
 0x5e1   : > { %18493 = vst [vmem:[#allocation54_spill] sm:$0xff] %v17714_v5  ;;  %v17717_v48 = vadd.f32 %v8443_v63, %v17532_v21  ;;  %18498 = vst [vmem:[#allocation57_spill] sm:$0xff] %v17727_v53 }
 0x5e2   : > { %v12172_v32 = vpop.f32.mrf.mxu1  ;;  %v17735_v16 = vpop.f32.mrf.mxu0 }
 0x5e3   : > { %18494 = vst [vmem:[#allocation68_spill] sm:$0xff] %v17717_v48  ;;  %v17722_v57 = vadd.f32 %v12172_v32, %v17537_v0  ;;  %18501 = vst [vmem:[#allocation78_spill] sm:$0xff] %v17735_v16 }
 0x5e4   : > { %v8453_v23 = vpop.f32.mrf.mxu1  ;;  %v17743_v50 = vpop.f32.mrf.mxu0 }
 0x5e5   : > { %18496 = vst [vmem:[#allocation55_spill] sm:$0xff] %v17722_v57  ;;  %v17725_v58 = vadd.f32 %v8453_v23, %v17549_v13  ;;  %18504 = vst [vmem:[#allocation69_spill] sm:$0xff] %v17743_v50 }
 0x5e6   : > { %v12175_v55 = vpop.f32.mrf.mxu1  ;;  %v17751_v53 = vpop.f32.mrf.mxu0 }
 0x5e7   : > { %18497 = vst [vmem:[#allocation77_spill] sm:$0xff] %v17725_v58  ;;  %v17730_v37 = vadd.f32 %v12175_v55, %v17554_v52  ;;  %18507 = vst [vmem:[#allocation86_spill] sm:$0xff] %v17751_v53 }
 0x5e8   : > { %v8463_v39 = vpop.f32.mrf.mxu1  ;;  %v17759_v16 = vpop.f32.mrf.mxu0 }
 0x5e9   : > { %18499 = vst [vmem:[#allocation60_spill] sm:$0xff] %v17730_v37  ;;  %v17733_v21 = vadd.f32 %v8463_v39, %v17566_v18  ;;  %18510 = vst [vmem:[#allocation89_spill] sm:$0xff] %v17759_v16 }
 0x5ea   : > { %v12178_v63 = vpop.f32.mrf.mxu1 }
 0x5eb   : > { %18500 = vst [vmem:[#allocation63_spill] sm:$0xff] %v17733_v21  ;;  %v17738_v0 = vadd.f32 %v12178_v63, %v17571_v45 }
 0x5ec   : > { %v8473_v32 = vpop.f32.mrf.mxu1 }
 0x5ed   : > { %18502 = vst [vmem:[#allocation66_spill] sm:$0xff] %v17738_v0  ;;  %v17741_v13 = vadd.f32 %v8473_v32, %v17583_v20 }
 0x5ee   : > { %v12181_v23 = vpop.f32.mrf.mxu1 }
 0x5ef   : > { %18503 = vst [vmem:[#allocation80_spill] sm:$0xff] %v17741_v13  ;;  %v17746_v52 = vadd.f32 %v12181_v23, %v17588_v56 }
 0x5f0   : > { %v8483_v55 = vpop.f32.mrf.mxu1 }
 0x5f1   : > { %18505 = vst [vmem:[#allocation73_spill] sm:$0xff] %v17746_v52  ;;  %v17749_v18 = vadd.f32 %v8483_v55, %v17598_v42  ;;  %v17767_v55 = vpop.f32.mrf.mxu0 }
 0x5f2   : > { %v12184_v39 = vpop.f32.mrf.mxu1  ;;  %18513 = vst [vmem:[#allocation79_spill] sm:$0xff] %v17767_v55 }
 0x5f3   : > { %18506 = vst [vmem:[#allocation83_spill] sm:$0xff] %v17749_v18  ;;  %v17754_v45 = vadd.f32 %v12184_v39, %v17604_v2 }
 0x5f4   : > { %v8493_v63 = vpop.f32.mrf.mxu1 }
 0x5f5   : > { %18508 = vst [vmem:[#allocation81_spill] sm:$0xff] %v17754_v45  ;;  %v17757_v20 = vadd.f32 %v8493_v63, %v17613_v9  ;;  %v12295_v63 = vpop.f32.mrf.mxu0 }
 0x5f6   : > { %v12187_v32 = vpop.f32.mrf.mxu1 }
 0x5f7   : > { %18509 = vst [vmem:[#allocation76_spill] sm:$0xff] %v17757_v20  ;;  %v17762_v56 = vadd.f32 %v12187_v32, %v17619_v61  ;;  %v9533_v20 = vpop.f32.mrf.mxu0 }
 0x5f8   : > { %v8503_v23 = vpop.f32.mrf.mxu1 }
 0x5f9   : > { %18511 = vst [vmem:[#allocation92_spill] sm:$0xff] %v17762_v56  ;;  %v17765_v42 = vadd.f32 %v8503_v23, %v17626_v47  ;;  %v12298_v56 = vpop.f32.mrf.mxu0 }
 0x5fa   : > { %v12190_v53 = vpop.f32.mrf.mxu1 }
 0x5fb   : > { %18512 = vst [vmem:[#allocation84_spill] sm:$0xff] %v17765_v42  ;;  %v17770_v2 = vadd.f32 %v12190_v53, %v17632_v17  ;;  %v17775_v23 = vpop.f32.mrf.mxu0 }
 0x5fc   : > { %v8513_v39 = vpop.f32.mrf.mxu1 }
 0x5fd   : > { %18514 = vst [vmem:[#allocation95_spill] sm:$0xff] %v17770_v2  ;;  %v17773_v9 = vadd.f32 %v8513_v39, %v17640_v15  ;;  %v17781_v17 = vpop.f32.mrf.mxu0 }
 0x5fe   : > { %v12245_v50 = vpop.f32.mrf.mxu1 }
 0x5ff   : > { %18515 = vst [vmem:[#allocation87_spill] sm:$0xff] %v17773_v9  ;;  %v17787_v39 = vpop.f32.mrf.mxu0 }
 0x600   : > { %v9143_v16 = vpop.f32.mrf.mxu1 }
 0x601   : > { %v17793_v18 = vpop.f32.mrf.mxu0 }
 0x602   : > { %v12248_v61 = vpop.f32.mrf.mxu1 }
 0x603   : > { %v17799_v0 = vpop.f32.mrf.mxu0 }
 0x604   : > { %v9153_v32 = vpop.f32.mrf.mxu1 }
 0x605   : > { %v17805_v35 = vpop.f32.mrf.mxu0 }
 0x606   : > { %v12251_v45 = vpop.f32.mrf.mxu1 }
 0x607   : > { %v17811_v57 = vpop.f32.mrf.mxu0 }
 0x608   : > { %v9163_v47 = vpop.f32.mrf.mxu1 }
 0x609   : > { %v17817_v3 = vpop.f32.mrf.mxu0 }
 0x60a   : > { %v17777_v55 = vpop.f32.mrf.mxu1 }
 0x60c   : > { %v17779_v42 = vpop.f32.mrf.mxu1 }
 0x60e   : > { %v17783_v53 = vpop.f32.mrf.mxu1 }
 0x610   : > { %v17785_v15 = vpop.f32.mrf.mxu1 }
 0x612   : > { %v17789_v9 = vpop.f32.mrf.mxu1 }
 0x614   : > { %v17791_v2 = vpop.f32.mrf.mxu1 }
 0x616   : > { %v17795_v52 = vpop.f32.mrf.mxu1 }
 0x618   : > { %v17797_v13 = vpop.f32.mrf.mxu1 }
 0x61a   : > { %v17801_v21 = vpop.f32.mrf.mxu1 }
 0x61b   : > { %18516 = vst [vmem:[#allocation98_spill] sm:$0xff] %v17801_v21  ;;  %v17823_v21 = vpop.f32.mrf.mxu0 }
 0x61c   : > { %v17803_v37 = vpop.f32.mrf.mxu1 }
 0x61d   : > { %18517 = vst [vmem:[#allocation82_spill] sm:$0xff] %v17803_v37 }
 0x61e   : > { %v17807_v58 = vpop.f32.mrf.mxu1 }
 0x61f   : > { %18518 = vst [vmem:[#allocation11_spill] sm:$0xff] %v17807_v58  ;;  %v17829_v58 = vpop.f32.mrf.mxu0 }
 0x620   : > { %v17809_v12 = vpop.f32.mrf.mxu1  ;;  %18526 = vst [vmem:[#allocation99_spill] sm:$0xff] %v17829_v58 }
 0x621   : > { %18519 = vst [vmem:[#allocation90_spill] sm:$0xff] %v17809_v12 }
 0x622   : > { %v17813_v38 = vpop.f32.mrf.mxu1 }
 0x623   : > { %18520 = vst [vmem:[#allocation85_spill] sm:$0xff] %v17813_v38  ;;  %v17835_v38 = vpop.f32.mrf.mxu0 }
 0x624   : > { %v17815_v48 = vpop.f32.mrf.mxu1  ;;  %18529 = vst [vmem:[#allocation5_spill] sm:$0xff] %v17835_v38 }
 0x625   : > { %18521 = vst [vmem:[#allocation93_spill] sm:$0xff] %v17815_v48 }
 0x626   : > { %v17819_v5 = vpop.f32.mrf.mxu1 }
 0x627   : > { %18522 = vst [vmem:[#allocation88_spill] sm:$0xff] %v17819_v5  ;;  %v17841_v5 = vpop.f32.mrf.mxu0 }
 0x628   : > { %v17821_v36 = vpop.f32.mrf.mxu1  ;;  %18532 = vst [vmem:[#allocation6_spill] sm:$0xff] %v17841_v5 }
 0x629   : > { %18523 = vst [vmem:[#allocation91_spill] sm:$0xff] %v17821_v36 }
 0x62a   : > { %v17825_v37 = vpop.f32.mrf.mxu1 }
 0x62b   : > { %18524 = vst [vmem:[#allocation96_spill] sm:$0xff] %v17825_v37  ;;  %v8913_v37 = vadd.f32 %v17551_v51, %v17637_v62  ;;  %v8914_v51 = vadd.f32 %v17575_v40, %v17655_v49  ;;  %v8916_v40 = vadd.f32 %v17592_v43, %v17665_v33  ;;  %v12762_v33 = vld [vmem:[%s12938_s20 + $0x8] sm:$0xff] }
 0x62c   : > { %v17827_v27 = vpop.f32.mrf.mxu1 }
 0x62d   : > { %18525 = vst [vmem:[#allocation94_spill] sm:$0xff] %v17827_v27  ;;  %v9303_v58 = vadd.f32 %v12245_v50, %v8913_v37  ;;  %v8917_v50 = vadd.f32 %v17585_v10, %v17660_v54  ;;  %v9306_v37 = vadd.f32 %v9163_v47, %v8916_v40  ;;  %v12763_v47 = vld [vmem:[%s12938_s20] sm:$0xff] }
 0x62e   : > { %v17831_v12 = vpop.f32.mrf.mxu1 }
 0x62f   : > { %18527 = vst [vmem:[#allocation3_spill] sm:$0xff] %v17831_v12  ;;  %v8912_v12 = vadd.f32 %v17558_v60, %v17645_v44  ;;  %v9693_v62 = vadd.f32 %v12295_v63, %v9303_v58  ;;  %v8919_v63 = vadd.f32 %v17600_v26, %v17670_v31  ;;  %v8918_v26 = vadd.f32 %v17608_v1, %v17675_v29 }
 0x630   : > { %v17833_v6 = vpop.f32.mrf.mxu1  ;;  %v9696_v29 = vadd.f32 %v17787_v39, %v9306_v37  ;;  %v12765_v39 = vld [vmem:[%s12938_s20 + $0x10] sm:$0xff] }
 0x631   : > { %18528 = vst [vmem:[#allocation97_spill] sm:$0xff] %v17833_v6  ;;  %v17851_v6 = vpop.f32.mrf.mxu0 }
 0x632   : > { %v17837_v48 = vpop.f32.mrf.mxu1 }
 0x633   : > { %18530 = vst [vmem:[#allocation19_spill] sm:$0xff] %v17837_v48  ;;  %v9302_v48 = vadd.f32 %v9143_v16, %v8912_v12  ;;  %v17863_v60 = vpop.f32.mrf.mxu0  ;;  %v17868_v12 = vld [vmem:[%s18134_s8] ss:$0 sm:$0xff] }
 0x634   : > { %v17839_v28 = vpop.f32.mrf.mxu1 }
 0x635   : > { %18531 = vst [vmem:[#allocation7_spill] sm:$0xff] %v17839_v28  ;;  %v8915_v28 = vadd.f32 %v17568_v41, %v17650_v8  ;;  %v9304_v41 = vadd.f32 %v9153_v32, %v8914_v51  ;;  %v9692_v16 = vadd.f32 %v9533_v20, %v9302_v48  ;;  %v9309_v32 = vadd.f32 %v17777_v55, %v8919_v63  ;;  %v12764_v55 = vld [vmem:[%s12938_s20 + $0x18] sm:$0xff] }
 0x636   : > { %v17843_v36 = vpop.f32.mrf.mxu1 }
 0x637   : > { %18533 = vst [vmem:[#allocation22_spill] sm:$0xff] %v17843_v36  ;;  %v9305_v36 = vadd.f32 %v12248_v61, %v8915_v28  ;;  %v9307_v28 = vadd.f32 %v12251_v45, %v8917_v50  ;;  %v17875_v61 = vpop.f32.mrf.mxu0  ;;  %v9694_v20 = vadd.f32 %v17775_v23, %v9304_v41  ;;  %v8921_v23 = vadd.f32 %v17615_v11, %v17680_v25 }
 0x638   : > { %v17847_v27 = vpop.f32.mrf.mxu1  ;;  %v8920_v11 = vadd.f32 %v17622_v7, %v17685_v59  ;;  %v12766_v59 = vld [vmem:[%s12938_s20 + $0x28] sm:$0xff] }
 0x639   : > { %v9695_v58 = vadd.f32 %v12298_v56, %v9305_v36  ;;  %v9697_v56 = vadd.f32 %v17781_v17, %v9307_v28  ;;  %v9308_v17 = vadd.f32 %v17779_v42, %v8918_v26  ;;  %v9311_v28 = vadd.f32 %v17783_v53, %v8921_v23 }
 0x63a   : > { %v17853_v38 = vpop.f32.mrf.mxu1  ;;  %v8923_v53 = vadd.f32 %v17628_v46, %v17690_v14 }
 0x63b   : > { %v9701_v46 = vadd.f32 %v17805_v35, %v9311_v28  ;;  %v18537_v28 = vld [vmem:[#allocation50_spill] sm:$0xff] }
 0x63c   : > { %v17857_v5 = vpop.f32.mrf.mxu1  ;;  %v9313_v14 = vadd.f32 %v17789_v9, %v8923_v53  ;;  %v12768_v9 = vld [vmem:[%s12938_s20 + $0x38] sm:$0xff] }
 0x63e   : > { %v12345_v44 = vpop.f32.mrf.mxu1 }
 0x63f   : > { %v10083_v8 = vadd.f32 %v12345_v44, %v9693_v62  ;;  %v17897_v44 = vpop.f32.mrf.mxu0 }
 0x640   : > { %v9923_v49 = vpop.f32.mrf.mxu1 }
 0x641   : > { %v10122_v10 = vadd.f32 %v17868_v12, %v10083_v8  ;;  %v10082_v54 = vadd.f32 %v9923_v49, %v9692_v16 }
 0x642   : > { %v12348_v43 = vpop.f32.mrf.mxu1 }
 0x643   : > { %v10154_v48 = vadd.f32 %v12762_v33, %v10122_v10  ;;  %v10121_v45 = vadd.f32 %v17868_v12, %v10082_v54  ;;  %v10085_v36 = vadd.f32 %v12348_v43, %v9695_v58  ;;  %v9699_v10 = vadd.f32 %v17793_v18, %v9309_v32  ;;  %v17916_v58 = vpop.f32.mrf.mxu0 }
 0x644   : > { %v9933_v31 = vpop.f32.mrf.mxu1  ;;  %v9310_v54 = vadd.f32 %v17785_v15, %v8920_v11  ;;  %v9698_v33 = vadd.f32 %v17799_v0, %v9308_v17  ;;  %v8922_v18 = vadd.f32 %v17634_v19, %v17693_v4  ;;  %v8925_v0 = vadd.f32 %v17642_v34, %v17698_v22 }
 0x645   : > { %10186 = vst.msk [vmem:[%s17882_s26 + $0x8] sm:$0xff] %vm365_vm1, %v10154_v48  ;;  %v10153_v51 = vadd.f32 %v12763_v47, %v10121_v45  ;;  %v10124_v62 = vadd.f32 %v17868_v12, %v10085_v36  ;;  %v10084_v50 = vadd.f32 %v9933_v31, %v9694_v20  ;;  %v12767_v48 = vld [vmem:[%s12938_s20 + $0x20] sm:$0xff]  ;;  %v17933_v26 = vpop.f32.mrf.mxu0  ;;  %v8924_v34 = vadd.f32 %v17647_v30, %v17701_v24  ;;  %v12770_v24 = vld [vmem:[%s12938_s20 + $0x48] sm:$0xff] }
 0x646   : > { %v12351_v1 = vpop.f32.mrf.mxu1  ;;  %v9700_v4 = vadd.f32 %v17811_v57, %v9310_v54  ;;  %v9312_v35 = vadd.f32 %v17791_v2, %v8922_v18  ;;  %v9315_v47 = vadd.f32 %v17795_v52, %v8925_v0  ;;  %v12769_v57 = vld [vmem:[%s12938_s20 + $0x30] sm:$0xff]  ;;  %v18543_v18 = vld [vmem:[#allocation82_spill] sm:$0xff]  ;;  %v18545_v0 = vld [vmem:[#allocation68_spill] sm:$0xff] }
 0x647   : > { %10185 = vst.msk [vmem:[%s17882_s26] sm:$0xff] %vm365_vm1, %v10153_v51  ;;  %v10156_v41 = vadd.f32 %v12764_v55, %v10124_v62  ;;  %v10123_v8 = vadd.f32 %v17868_v12, %v10084_v50  ;;  %v10087_v16 = vadd.f32 %v12351_v1, %v9697_v56  ;;  %v9703_v50 = vadd.f32 %v17817_v3, %v9313_v14  ;;  %v18534_v1 = vld [vmem:[#allocation74_spill] sm:$0xff]  ;;  %v17952_v17 = vpop.f32.mrf.mxu0  ;;  %v18536_v3 = vld [vmem:[#allocation72_spill] sm:$0xff] }
 0x648   : > { %v9943_v25 = vpop.f32.mrf.mxu1  ;;  %v9314_v23 = vadd.f32 %v17797_v13, %v8924_v34  ;;  %v8926_v13 = vadd.f32 %v18537_v28, %v18536_v3  ;;  %v18553_v28 = vld [vmem:[#allocation85_spill] sm:$0xff] }
 0x649   : > { %10188 = vst.msk [vmem:[%s17882_s26 + $0x18] sm:$0xff] %vm365_vm1, %v10156_v41  ;;  %v10155_v40 = vadd.f32 %v12765_v39, %v10123_v8  ;;  %v10126_v42 = vadd.f32 %v17868_v12, %v10087_v16  ;;  %v10086_v49 = vadd.f32 %v9943_v25, %v9696_v29  ;;  %v18535_v29 = vld [vmem:[#allocation59_spill] sm:$0xff]  ;;  %v9702_v16 = vadd.f32 %v17823_v21, %v9312_v35  ;;  %v18541_v21 = vld [vmem:[#allocation61_spill] sm:$0xff] }
 0x64a   : > { %v12354_v7 = vpop.f32.mrf.mxu1  ;;  %v8927_v52 = vadd.f32 %v18535_v29, %v18534_v1  ;;  %v18538_v25 = vld [vmem:[#allocation99_spill] sm:$0xff]  ;;  %v12774_v1 = vld [vmem:[%s12938_s20 + $0x68] sm:$0xff] }
 0x64b   : > { %10187 = vst.msk [vmem:[%s17882_s26 + $0x10] sm:$0xff] %vm365_vm1, %v10155_v40  ;;  %v10158_v37 = vadd.f32 %v12766_v59, %v10126_v42  ;;  %v10125_v63 = vadd.f32 %v17868_v12, %v10086_v49  ;;  %v10089_v43 = vadd.f32 %v12354_v7, %v9699_v10  ;;  %v9705_v39 = vadd.f32 %v18538_v25, %v9315_v47  ;;  %v18539_v40 = vld [vmem:[#allocation98_spill] sm:$0xff]  ;;  %v12771_v49 = vld [vmem:[%s12938_s20 + $0x40] sm:$0xff] }
 0x64c   : > { %v9953_v15 = vpop.f32.mrf.mxu1  ;;  %v9317_v42 = vadd.f32 %v18539_v40, %v8927_v52  ;;  %v18540_v7 = vld [vmem:[#allocation54_spill] sm:$0xff] }
 0x64d   : > { %10190 = vst.msk [vmem:[%s17882_s26 + $0x28] sm:$0xff] %vm365_vm1, %v10158_v37  ;;  %v10157_v45 = vadd.f32 %v12767_v48, %v10125_v63  ;;  %v10128_v36 = vadd.f32 %v17868_v12, %v10089_v43  ;;  %v10088_v20 = vadd.f32 %v9953_v15, %v9698_v33  ;;  %v8929_v59 = vadd.f32 %v18541_v21, %v18540_v7  ;;  %v17969_v37 = vpop.f32.mrf.mxu0  ;;  %v18542_v43 = vld [vmem:[#allocation5_spill] sm:$0xff]  ;;  %v18547_v47 = vld [vmem:[#allocation6_spill] sm:$0xff]  ;;  %v12776_v21 = vld [vmem:[%s12938_s20 + $0x78] sm:$0xff] }
 0x64e   : > { %v12357_v19 = vpop.f32.mrf.mxu1  ;;  %v9704_v33 = vadd.f32 %v18542_v43, %v9314_v23  ;;  %v9316_v15 = vadd.f32 %v18543_v18, %v8926_v13  ;;  %v9707_v34 = vadd.f32 %v18547_v47, %v9317_v42  ;;  %v18554_v42 = vld [vmem:[#allocation60_spill] sm:$0xff]  ;;  %v12778_v47 = vld [vmem:[%s12938_s20 + $0x88] sm:$0xff] }
 0x64f   : > { %10189 = vst.msk [vmem:[%s17882_s26 + $0x20] sm:$0xff] %vm365_vm1, %v10157_v45  ;;  %v10160_v31 = vadd.f32 %v12768_v9, %v10128_v36  ;;  %v10127_v56 = vadd.f32 %v17868_v12, %v10088_v20  ;;  %v10091_v32 = vadd.f32 %v12357_v19, %v9701_v46  ;;  %v12772_v46 = vld [vmem:[%s12938_s20 + $0x58] sm:$0xff]  ;;  %v18544_v36 = vld [vmem:[#allocation11_spill] sm:$0xff] }
 0x650   : > { %v9963_v22 = vpop.f32.mrf.mxu1  ;;  %v9319_v20 = vadd.f32 %v18544_v36, %v8929_v59  ;;  %v18546_v19 = vld [vmem:[#allocation71_spill] sm:$0xff] }
 0x651   : > { %10192 = vst.msk [vmem:[%s17882_s26 + $0x38] sm:$0xff] %vm365_vm1, %v10160_v31  ;;  %v10159_v51 = vadd.f32 %v12769_v57, %v10127_v56  ;;  %v10130_v2 = vadd.f32 %v17868_v12, %v10091_v32  ;;  %v10090_v62 = vadd.f32 %v9963_v22, %v9700_v4  ;;  %v8928_v4 = vadd.f32 %v18546_v19, %v18545_v0  ;;  %v12773_v9 = vld [vmem:[%s12938_s20 + $0x50] sm:$0xff]  ;;  %v18548_v22 = vld [vmem:[#allocation90_spill] sm:$0xff] }
 0x652   : > { %v12360_v30 = vpop.f32.mrf.mxu1  ;;  %v9709_v3 = vadd.f32 %v17863_v60, %v9319_v20  ;;  %v18556_v60 = vld [vmem:[#allocation93_spill] sm:$0xff]  ;;  %v18560_v19 = vld [vmem:[#allocation91_spill] sm:$0xff] }
 0x653   : > { %10191 = vst.msk [vmem:[%s17882_s26 + $0x30] sm:$0xff] %vm365_vm1, %v10159_v51  ;;  %v10162_v55 = vadd.f32 %v12770_v24, %v10130_v2  ;;  %v10129_v41 = vadd.f32 %v17868_v12, %v10090_v62  ;;  %v10093_v8 = vadd.f32 %v12360_v30, %v9703_v50  ;;  %v9318_v57 = vadd.f32 %v18548_v22, %v8928_v4  ;;  %v18549_v51 = vld [vmem:[#allocation55_spill] sm:$0xff]  ;;  %v18550_v2 = vld [vmem:[#allocation70_spill] sm:$0xff]  ;;  %v17988_v50 = vpop.f32.mrf.mxu0 }
 0x654   : > { %v9973_v11 = vpop.f32.mrf.mxu1  ;;  %v8931_v62 = vadd.f32 %v18550_v2, %v18549_v51  ;;  %v9706_v24 = vadd.f32 %v17851_v6, %v9316_v15  ;;  %v18555_v6 = vld [vmem:[#allocation62_spill] sm:$0xff]  ;;  %v18558_v15 = vld [vmem:[#allocation63_spill] sm:$0xff]  ;;  %v18563_v2 = vld [vmem:[#allocation80_spill] sm:$0xff] }
 0x655   : > { %10194 = vst.msk [vmem:[%s17882_s26 + $0x48] sm:$0xff] %vm365_vm1, %v10162_v55  ;;  %v10161_v10 = vadd.f32 %v12771_v49, %v10129_v41  ;;  %v10132_v54 = vadd.f32 %v17868_v12, %v10093_v8  ;;  %v10092_v53 = vadd.f32 %v9973_v11, %v9702_v16  ;;  %v18551_v55 = vld [vmem:[#allocation77_spill] sm:$0xff]  ;;  %v18552_v41 = vld [vmem:[#allocation51_spill] sm:$0xff]  ;;  %v8933_v49 = vadd.f32 %v18555_v6, %v18554_v42 }
 0x656   : > { %v12363_v63 = vpop.f32.mrf.mxu1  ;;  %v8930_v8 = vadd.f32 %v18552_v41, %v18551_v55  ;;  %v9321_v13 = vadd.f32 %v18553_v28, %v8931_v62  ;;  %v12775_v11 = vld [vmem:[%s12938_s20 + $0x60] sm:$0xff]  ;;  %v18569_v6 = vld [vmem:[#allocation3_spill] sm:$0xff] }
 0x657   : > { %10193 = vst.msk [vmem:[%s17882_s26 + $0x40] sm:$0xff] %vm365_vm1, %v10161_v10  ;;  %v10164_v14 = vadd.f32 %v12772_v46, %v10132_v54  ;;  %v10131_v48 = vadd.f32 %v17868_v12, %v10092_v53  ;;  %v10095_v45 = vadd.f32 %v12363_v63, %v9705_v39  ;;  %v18005_v10 = vpop.f32.mrf.mxu0  ;;  %v9708_v53 = vadd.f32 %v17875_v61, %v9318_v57  ;;  %v18559_v46 = vld [vmem:[#allocation64_spill] sm:$0xff]  ;;  %v12777_v61 = vld [vmem:[%s12938_s20 + $0x70] sm:$0xff] }
 0x658   : > { %v9983_v35 = vpop.f32.mrf.mxu1  ;;  %v9320_v7 = vadd.f32 %v18556_v60, %v8930_v8  ;;  %v9711_v0 = vadd.f32 %v17897_v44, %v9321_v13  ;;  %v18564_v44 = vld [vmem:[#allocation67_spill] sm:$0xff]  ;;  %v18566_v8 = vld [vmem:[#allocation73_spill] sm:$0xff] }
 0x659   : > { %10196 = vst.msk [vmem:[%s17882_s26 + $0x58] sm:$0xff] %vm365_vm1, %v10164_v14  ;;  %v10163_v31 = vadd.f32 %v12773_v9, %v10131_v48  ;;  %v10134_v56 = vadd.f32 %v17868_v12, %v10095_v45  ;;  %v10094_v32 = vadd.f32 %v9983_v35, %v9704_v33  ;;  %v18557_v33 = vld [vmem:[#allocation88_spill] sm:$0xff]  ;;  %v8932_v14 = vadd.f32 %v18559_v46, %v18558_v15  ;;  %v18561_v35 = vld [vmem:[#allocation66_spill] sm:$0xff]  ;;  %v18562_v9 = vld [vmem:[#allocation65_spill] sm:$0xff] }
 0x65a   : > { %v12366_v23 = vpop.f32.mrf.mxu1  ;;  %v9323_v18 = vadd.f32 %v18557_v33, %v8933_v49  ;;  %v9710_v51 = vadd.f32 %v17916_v58, %v9320_v7  ;;  %v8934_v62 = vadd.f32 %v18564_v44, %v18563_v2  ;;  %v18567_v58 = vld [vmem:[#allocation53_spill] sm:$0xff] }
 0x65b   : > { %10195 = vst.msk [vmem:[%s17882_s26 + $0x50] sm:$0xff] %vm365_vm1, %v10163_v31  ;;  %v10166_v29 = vadd.f32 %v12774_v1, %v10134_v56  ;;  %v10133_v52 = vadd.f32 %v17868_v12, %v10094_v32  ;;  %v10097_v30 = vadd.f32 %v12366_v23, %v9707_v34  ;;  %v9322_v4 = vadd.f32 %v18560_v19, %v8932_v14  ;;  %v9653_v56 = vpop.f32.mrf.mxu0  ;;  %v18572_v33 = vld [vmem:[#allocation97_spill] sm:$0xff] }
 0x65c   : > { %v9993_v16 = vpop.f32.mrf.mxu1  ;;  %v8935_v31 = vadd.f32 %v18562_v9, %v18561_v35  ;;  %v9713_v1 = vadd.f32 %v17933_v26, %v9323_v18  ;;  %v18573_v46 = vld [vmem:[#allocation81_spill] sm:$0xff] }
 0x65d   : > { %10198 = vst.msk [vmem:[%s17882_s26 + $0x68] sm:$0xff] %vm365_vm1, %v10166_v29  ;;  %v10165_v25 = vadd.f32 %v12775_v11, %v10133_v52  ;;  %v10136_v39 = vadd.f32 %v17868_v12, %v10097_v30  ;;  %v10096_v40 = vadd.f32 %v9993_v16, %v9706_v24  ;;  %v18565_v29 = vld [vmem:[#allocation96_spill] sm:$0xff]  ;;  %v12779_v30 = vld [vmem:[%s12938_s20 + $0x80] sm:$0xff]  ;;  %v8937_v16 = vadd.f32 %v18567_v58, %v18566_v8  ;;  %v18568_v11 = vld [vmem:[#allocation94_spill] sm:$0xff] }
 0x65e   : > { %v12369_v54 = vpop.f32.mrf.mxu1  ;;  %v9325_v52 = vadd.f32 %v18565_v29, %v8935_v31  ;;  %v9712_v13 = vadd.f32 %v17952_v17, %v9322_v4  ;;  %v9324_v26 = vadd.f32 %v18568_v11, %v8934_v62  ;;  %v12781_v17 = vld [vmem:[%s12938_s20 + $0x90] sm:$0xff]  ;;  %v18574_v14 = vld [vmem:[#allocation57_spill] sm:$0xff]  ;;  %v18575_v4 = vld [vmem:[#allocation76_spill] sm:$0xff] }
 0x65f   : > { %10197 = vst.msk [vmem:[%s17882_s26 + $0x60] sm:$0xff] %vm365_vm1, %v10165_v25  ;;  %v10168_v59 = vadd.f32 %v12776_v21, %v10136_v39  ;;  %v10135_v63 = vadd.f32 %v17868_v12, %v10096_v40  ;;  %v10099_v43 = vadd.f32 %v12369_v54, %v9709_v3  ;;  %v12334_v3 = vpop.f32.mrf.mxu0  ;;  %v12780_v25 = vld [vmem:[%s12938_s20 + $0x98] sm:$0xff]  ;;  %v9327_v49 = vadd.f32 %v18569_v6, %v8937_v16  ;;  %v18570_v54 = vld [vmem:[#allocation83_spill] sm:$0xff]  ;;  %v18579_v44 = vld [vmem:[#allocation69_spill] sm:$0xff] }
 0x660   : > { %v10003_v48 = vpop.f32.mrf.mxu1  ;;  %v9714_v19 = vadd.f32 %v17988_v50, %v9324_v26  ;;  %v18578_v50 = vld [vmem:[#allocation92_spill] sm:$0xff]  ;;  %v18580_v29 = vld [vmem:[#allocation7_spill] sm:$0xff]  ;;  %v18583_v16 = vld [vmem:[#allocation86_spill] sm:$0xff] }
 0x661   : > { %10200 = vst.msk [vmem:[%s17882_s26 + $0x78] sm:$0xff] %vm365_vm1, %v10168_v59  ;;  %v10167_v45 = vadd.f32 %v12777_v61, %v10135_v63  ;;  %v10138_v36 = vadd.f32 %v17868_v12, %v10099_v43  ;;  %v10098_v20 = vadd.f32 %v10003_v48, %v9708_v53  ;;  %v18571_v53 = vld [vmem:[#allocation75_spill] sm:$0xff]  ;;  %v9715_v43 = vadd.f32 %v17969_v37, %v9325_v52  ;;  %v9663_v15 = vpop.f32.mrf.mxu0  ;;  %v18576_v37 = vld [vmem:[#allocation78_spill] sm:$0xff]  ;;  %v18582_v58 = vld [vmem:[#allocation84_spill] sm:$0xff] }
 0x662   : > { %v12372_v32 = vpop.f32.mrf.mxu1  ;;  %v8936_v60 = vadd.f32 %v18571_v53, %v18570_v54  ;;  %v8939_v48 = vadd.f32 %v18574_v14, %v18573_v46  ;;  %v8938_v35 = vadd.f32 %v18576_v37, %v18575_v4  ;;  %v9717_v31 = vadd.f32 %v18005_v10, %v9327_v49  ;;  %v12784_v10 = vld [vmem:[%s12938_s20 + $0xb8] sm:$0xff]  ;;  %v18584_v6 = vld [vmem:[#allocation95_spill] sm:$0xff]  ;;  %v18585_v49 = vld [vmem:[#allocation89_spill] sm:$0xff] }
 0x663   : > { %10199 = vst.msk [vmem:[%s17882_s26 + $0x70] sm:$0xff] %vm365_vm1, %v10167_v45  ;;  %v10170_v34 = vadd.f32 %v12778_v47, %v10138_v36  ;;  %v10137_v22 = vadd.f32 %v17868_v12, %v10098_v20  ;;  %v10101_v57 = vadd.f32 %v12372_v32, %v9711_v0  ;;  %v12782_v45 = vld [vmem:[%s12938_s20 + $0xa8] sm:$0xff]  ;;  %v18577_v32 = vld [vmem:[#allocation19_spill] sm:$0xff]  ;;  %v12337_v2 = vpop.f32.mrf.mxu0  ;;  %v8941_v62 = vadd.f32 %v18579_v44, %v18578_v50  ;;  %v12787_v46 = vld [vmem:[%s12938_s20 + $0xc0] sm:$0xff] }
 0x664   : > { %v10013_v23 = vpop.f32.mrf.mxu1  ;;  %v9326_v18 = vadd.f32 %v18572_v33, %v8936_v60  ;;  %v9329_v47 = vadd.f32 %v18577_v32, %v8939_v48  ;;  %v9328_v52 = vadd.f32 %v18580_v29, %v8938_v35  ;;  %v8943_v54 = vadd.f32 %v18585_v49, %v18584_v6  ;;  %v12786_v60 = vld [vmem:[%s12938_s20 + $0xc8] sm:$0xff]  ;;  %v12789_v35 = vld [vmem:[%s12938_s20 + $0xd0] sm:$0xff] }
 0x665   : > { %10202 = vst.msk [vmem:[%s17882_s26 + $0x88] sm:$0xff] %vm365_vm1, %v10170_v34  ;;  %v10169_v24 = vadd.f32 %v12779_v30, %v10137_v22  ;;  %v10140_v55 = vadd.f32 %v17868_v12, %v10101_v57  ;;  %v10100_v41 = vadd.f32 %v10013_v23, %v9710_v51  ;;  %v12783_v34 = vld [vmem:[%s12938_s20 + $0xa0] sm:$0xff] }
 0x666   : > { %v12375_v28 = vpop.f32.mrf.mxu1 }
 0x667   : > { %10201 = vst.msk [vmem:[%s17882_s26 + $0x80] sm:$0xff] %vm365_vm1, %v10169_v24  ;;  %v10172_v39 = vadd.f32 %v12780_v25, %v10140_v55  ;;  %v10139_v40 = vadd.f32 %v17868_v12, %v10100_v41  ;;  %v10103_v42 = vadd.f32 %v12375_v28, %v9713_v1  ;;  %v9716_v1 = vadd.f32 %v9653_v56, %v9326_v18  ;;  %v18581_v41 = vld [vmem:[#allocation22_spill] sm:$0xff]  ;;  %v12785_v56 = vld [vmem:[%s12938_s20 + $0xb0] sm:$0xff] }
 0x668   : > { %v10023_v7 = vpop.f32.mrf.mxu1  ;;  %v9331_v8 = vadd.f32 %v18581_v41, %v8941_v62  ;;  %v8940_v28 = vadd.f32 %v18583_v16, %v18582_v58  ;;  %v12791_v62 = vld [vmem:[%s12938_s20 + $0xe0] sm:$0xff] }
 0x669   : > { %10204 = vst.msk [vmem:[%s17882_s26 + $0x98] sm:$0xff] %vm365_vm1, %v10172_v39  ;;  %v10171_v21 = vadd.f32 %v12781_v17, %v10139_v40  ;;  %v10142_v59 = vadd.f32 %v17868_v12, %v10103_v42  ;;  %v10102_v63 = vadd.f32 %v10023_v7, %v9712_v13  ;;  %v9719_v39 = vadd.f32 %v12334_v3, %v9329_v47  ;;  %v9673_v40 = vpop.f32.mrf.mxu0  ;;  %v18587_v3 = vld [vmem:[#allocation79_spill] sm:$0xff] }
 0x66a   : > { %v12378_v61 = vpop.f32.mrf.mxu1  ;;  %v9330_v42 = vadd.f32 %v17847_v27, %v8940_v28  ;;  %v9721_v18 = vadd.f32 %v12337_v2, %v9331_v8  ;;  %v9333_v27 = vadd.f32 %v17853_v38, %v8943_v54 }
 0x66b   : > { %10203 = vst.msk [vmem:[%s17882_s26 + $0x90] sm:$0xff] %vm365_vm1, %v10171_v21  ;;  %v10174_v36 = vadd.f32 %v12782_v45, %v10142_v59  ;;  %v10141_v20 = vadd.f32 %v17868_v12, %v10102_v63  ;;  %v10105_v0 = vadd.f32 %v12378_v61, %v9715_v43  ;;  %v9718_v59 = vadd.f32 %v9663_v15, %v9328_v52  ;;  %v18586_v63 = vld [vmem:[#allocation87_spill] sm:$0xff]  ;;  %v12340_v45 = vpop.f32.mrf.mxu0  ;;  %v12792_v52 = vld [vmem:[%s12938_s20 + $0xf8] sm:$0xff] }
 0x66c   : > { %v10033_v9 = vpop.f32.mrf.mxu1  ;;  %v8942_v43 = vadd.f32 %v18587_v3, %v18586_v63 }
 0x66d   : > { %10206 = vst.msk [vmem:[%s17882_s26 + $0xa8] sm:$0xff] %vm365_vm1, %v10174_v36  ;;  %v10173_v22 = vadd.f32 %v12783_v34, %v10141_v20  ;;  %v10144_v57 = vadd.f32 %v17868_v12, %v10105_v0  ;;  %v10104_v51 = vadd.f32 %v10033_v9, %v9714_v19  ;;  %v9720_v20 = vadd.f32 %v9673_v40, %v9330_v42  ;;  %v12788_v0 = vld [vmem:[%s12938_s20 + $0xd8] sm:$0xff]  ;;  %v9683_v47 = vpop.f32.mrf.mxu0 }
 0x66e   : > { %v12381_v23 = vpop.f32.mrf.mxu1  ;;  %v9332_v15 = vadd.f32 %v17857_v5, %v8942_v43  ;;  %v9723_v5 = vadd.f32 %v12340_v45, %v9333_v27 }
 0x66f   : > { %10205 = vst.msk [vmem:[%s17882_s26 + $0xa0] sm:$0xff] %vm365_vm1, %v10173_v22  ;;  %v10176_v30 = vadd.f32 %v12784_v10, %v10144_v57  ;;  %v10143_v24 = vadd.f32 %v17868_v12, %v10104_v51  ;;  %v10107_v55 = vadd.f32 %v12381_v23, %v9717_v31  ;;  %v12790_v22 = vld [vmem:[%s12938_s20 + $0xe8] sm:$0xff] }
 0x670   : > { %v10043_v13 = vpop.f32.mrf.mxu1  ;;  %v9722_v50 = vadd.f32 %v9683_v47, %v9332_v15 }
 0x671   : > { %10208 = vst.msk [vmem:[%s17882_s26 + $0xb8] sm:$0xff] %vm365_vm1, %v10176_v30  ;;  %v10175_v11 = vadd.f32 %v12785_v56, %v10143_v24  ;;  %v10146_v26 = vadd.f32 %v17868_v12, %v10107_v55  ;;  %v10106_v25 = vadd.f32 %v10043_v13, %v9716_v1  ;;  %v12793_v24 = vld [vmem:[%s12938_s20 + $0xf0] sm:$0xff] }
 0x672   : > { %v12384_v53 = vpop.f32.mrf.mxu1 }
 0x673   : > { %10207 = vst.msk [vmem:[%s17882_s26 + $0xb0] sm:$0xff] %vm365_vm1, %v10175_v11  ;;  %v10178_v7 = vadd.f32 %v12786_v60, %v10146_v26  ;;  %v10145_v17 = vadd.f32 %v17868_v12, %v10106_v25  ;;  %v10109_v21 = vadd.f32 %v12384_v53, %v9719_v39 }
 0x674   : > { %v10053_v33 = vpop.f32.mrf.mxu1 }
 0x675   : > { %10210 = vst.msk [vmem:[%s17882_s26 + $0xc8] sm:$0xff] %vm365_vm1, %v10178_v7  ;;  %v10177_v14 = vadd.f32 %v12787_v46, %v10145_v17  ;;  %v10148_v48 = vadd.f32 %v17868_v12, %v10109_v21  ;;  %v10108_v61 = vadd.f32 %v10053_v33, %v9718_v59 }
 0x676   : > { %v12387_v36 = vpop.f32.mrf.mxu1 }
 0x677   : > { %10209 = vst.msk [vmem:[%s17882_s26 + $0xc0] sm:$0xff] %vm365_vm1, %v10177_v14  ;;  %v10180_v38 = vadd.f32 %v12788_v0, %v10148_v48  ;;  %v10147_v19 = vadd.f32 %v17868_v12, %v10108_v61  ;;  %v10111_v4 = vadd.f32 %v12387_v36, %v9721_v18 }
 0x678   : > { %v10063_v37 = vpop.f32.mrf.mxu1 }
 0x679   : > { %10212 = vst.msk [vmem:[%s17882_s26 + $0xd8] sm:$0xff] %vm365_vm1, %v10180_v38  ;;  %v10179_v9 = vadd.f32 %v12789_v35, %v10147_v19  ;;  %v10150_v31 = vadd.f32 %v17868_v12, %v10111_v4  ;;  %v10110_v32 = vadd.f32 %v10063_v37, %v9720_v20 }
 0x67a   : > { %v12390_v34 = vpop.f32.mrf.mxu1 }
 0x67b   : > { %10211 = vst.msk [vmem:[%s17882_s26 + $0xd0] sm:$0xff] %vm365_vm1, %v10179_v9  ;;  %v10182_v57 = vadd.f32 %v12790_v22, %v10150_v31  ;;  %v10149_v51 = vadd.f32 %v17868_v12, %v10110_v32  ;;  %v10113_v2 = vadd.f32 %v12390_v34, %v9723_v5 }
 0x67c   : > { %v10073_v44 = vpop.f32.mrf.mxu1 }
 0x67d   : > { %10214 = vst.msk [vmem:[%s17882_s26 + $0xe8] sm:$0xff] %vm365_vm1, %v10182_v57  ;;  %v10181_v23 = vadd.f32 %v12791_v62, %v10149_v51  ;;  %v10152_v1 = vadd.f32 %v17868_v12, %v10113_v2  ;;  %v10112_v29 = vadd.f32 %v10073_v44, %v9722_v50 }
 0x67f   : > { %10213 = vst.msk [vmem:[%s17882_s26 + $0xe0] sm:$0xff] %vm365_vm1, %v10181_v23  ;;  %v10184_v10 = vadd.f32 %v12792_v52, %v10152_v1  ;;  %v10151_v30 = vadd.f32 %v17868_v12, %v10112_v29 }
 0x681   : > { %10216 = vst.msk [vmem:[%s17882_s26 + $0xf8] sm:$0xff] %vm365_vm1, %v10184_v10  ;;  %v10183_v55 = vadd.f32 %v12793_v24, %v10151_v30 }
 0x683   : > { %10215 = vst.msk [vmem:[%s17882_s26 + $0xf0] sm:$0xff] %vm365_vm1, %v10183_v55 }
 0x684 PF: > { %s19_s30 = sadd.s32 1, %s12800_s30  }
 0x685   : > { %p16_p4 = scmp.ge.s32.totalorder %s19_s30, 4  }
 0x687   :  { %18 = sbr.rel (!%p16_p4) target bundleno = 1 (0x1), region = 104 }

</bundles_post_ra>
